<compile_context>
chip_gen: v5e
topology: v5e:2x2
jax: 0.10.0
libtpu: 0.0.40
codegen_flags: <defaults>
</compile_context>

<pallas_src>
import functools

import jax
import jax.numpy as jnp
from jax.experimental import pallas as pl
from jax.experimental.pallas import tpu as pltpu


# ----------------------------------------------------------------------------
# helpers
# ----------------------------------------------------------------------------

def _round_up(x, m):
    return (x + m - 1) // m * m


def _pick_tile(padded_dim, cap, floor):
    """Largest power-of-two tile <= cap (>= floor) that divides padded_dim."""
    t = cap
    while t > floor and padded_dim % t != 0:
        t //= 2
    return t


# ----------------------------------------------------------------------------
# Tiled matmul kernel:  o = act( x @ w + bias [+ residual] )
#   x:[M,K] bf16   w:[K,N] bf16 (BN scale pre-folded)   bias:[1,N] f32
# ----------------------------------------------------------------------------

def _mm_kernel(x_ref, w_ref, b_ref, o_ref, acc_ref, *, relu):
    k = pl.program_id(2)

    @pl.when(k == 0)
    def _():
        acc_ref[...] = jnp.zeros_like(acc_ref)

    acc_ref[...] += jnp.dot(x_ref[...], w_ref[...],
                            preferred_element_type=jnp.float32)

    @pl.when(k == pl.num_programs(2) - 1)
    def _():
        y = acc_ref[...] + b_ref[...]
        if relu:
            y = jnp.maximum(y, 0.0)
        o_ref[...] = y.astype(o_ref.dtype)


def _mm_res_kernel(x_ref, w_ref, b_ref, r_ref, o_ref, acc_ref, *, relu):
    k = pl.program_id(2)

    @pl.when(k == 0)
    def _():
        acc_ref[...] = jnp.zeros_like(acc_ref)

    acc_ref[...] += jnp.dot(x_ref[...], w_ref[...],
                            preferred_element_type=jnp.float32)

    @pl.when(k == pl.num_programs(2) - 1)
    def _():
        y = acc_ref[...] + b_ref[...] + r_ref[...].astype(jnp.float32)
        if relu:
            y = jnp.maximum(y, 0.0)
        o_ref[...] = y.astype(o_ref.dtype)


def matmul_bias_act(x, w, bias, *, relu, residual=None, out_dtype=jnp.bfloat16):
    M, K = x.shape
    K2, N = w.shape
    assert K == K2
    Mp = _round_up(M, 8)
    Kp = _round_up(K, 128)
    Np = _round_up(N, 128)
    TM = _pick_tile(Mp, 256, 8)
    TN = _pick_tile(Np, 256, 128)
    TK = _pick_tile(Kp, 512, 128)

    xp = jnp.pad(x.astype(jnp.bfloat16), ((0, Mp - M), (0, Kp - K)))
    wp = jnp.pad(w.astype(jnp.bfloat16), ((0, Kp - K), (0, Np - N)))
    bp = jnp.pad(bias.reshape(1, N).astype(jnp.float32), ((0, 0), (0, Np - N)))

    grid = (Mp // TM, Np // TN, Kp // TK)
    x_spec = pl.BlockSpec((TM, TK), lambda i, j, k: (i, k))
    w_spec = pl.BlockSpec((TK, TN), lambda i, j, k: (k, j))
    b_spec = pl.BlockSpec((1, TN), lambda i, j, k: (0, j))
    o_spec = pl.BlockSpec((TM, TN), lambda i, j, k: (i, j))

    if residual is not None:
        rp = jnp.pad(residual.astype(jnp.bfloat16), ((0, Mp - M), (0, Np - N)))
        kernel = functools.partial(_mm_res_kernel, relu=relu)
        in_specs = [x_spec, w_spec, b_spec,
                    pl.BlockSpec((TM, TN), lambda i, j, k: (i, j))]
        args = (xp, wp, bp, rp)
    else:
        kernel = functools.partial(_mm_kernel, relu=relu)
        in_specs = [x_spec, w_spec, b_spec]
        args = (xp, wp, bp)

    out = pl.pallas_call(
        kernel,
        out_shape=jax.ShapeDtypeStruct((Mp, Np), out_dtype),
        grid=grid,
        in_specs=in_specs,
        out_specs=o_spec,
        scratch_shapes=[pltpu.VMEM((TM, TN), jnp.float32)],
        compiler_params=pltpu.CompilerParams(
            dimension_semantics=("parallel", "parallel", "arbitrary")),
    )(*args)
    return out[:M, :N]


# ----------------------------------------------------------------------------
# 3x3 stride-2 max-pool (tiled over rows)
# ----------------------------------------------------------------------------

def _window_max_kernel(x_ref, o_ref):
    # x:[KK, TM, C] -> o:[TM, C]
    o_ref[...] = jnp.max(x_ref[...], axis=0)


def max_pool_3x3_s2(x_nhwc):
    N, H, W, C = x_nhwc.shape
    ksz, s, pad = 3, 2, 1
    Ho = (H + 2 * pad - ksz) // s + 1
    Wo = (W + 2 * pad - ksz) // s + 1
    neg = jnp.asarray(-jnp.inf, x_nhwc.dtype)
    xp = jnp.pad(x_nhwc, ((0, 0), (pad, pad), (pad, pad), (0, 0)),
                 constant_values=neg)
    wins = [xp[:, kh:kh + s * Ho:s, kw:kw + s * Wo:s, :].reshape(N * Ho * Wo, C)
            for kh in range(ksz) for kw in range(ksz)]
    stacked = jnp.stack(wins, axis=0)                       # [9, M, C]
    M = N * Ho * Wo
    Mp = _round_up(M, 8)
    TM = _pick_tile(Mp, 512, 8)
    stacked = jnp.pad(stacked, ((0, 0), (0, Mp - M), (0, 0)))
    out = pl.pallas_call(
        _window_max_kernel,
        out_shape=jax.ShapeDtypeStruct((Mp, C), x_nhwc.dtype),
        grid=(Mp // TM,),
        in_specs=[pl.BlockSpec((ksz * ksz, TM, C), lambda i: (0, i, 0))],
        out_specs=pl.BlockSpec((TM, C), lambda i: (i, 0)),
        compiler_params=pltpu.CompilerParams(
            dimension_semantics=("parallel",)),
    )(stacked)
    return out[:M].reshape(N, Ho, Wo, C)


# ----------------------------------------------------------------------------
# Fused head: global-avg-pool -> Linear -> ReLU -> Linear (single pallas_call)
# ----------------------------------------------------------------------------

def _head_kernel(x_ref, w1_ref, b1_ref, w2_ref, b2_ref, o_ref, *, inv_hw):
    feats = jnp.sum(x_ref[...].astype(jnp.float32), axis=1) * inv_hw   # [N, C]
    h = jnp.dot(feats.astype(jnp.bfloat16), w1_ref[...],
                preferred_element_type=jnp.float32) + b1_ref[...]
    h = jnp.maximum(h, 0.0)
    out = jnp.dot(h.astype(jnp.bfloat16), w2_ref[...],
                  preferred_element_type=jnp.float32) + b2_ref[...]
    o_ref[...] = out.astype(o_ref.dtype)


def head_forward(x_nhwc, w1, b1, w2, b2):
    N, H, W, C = x_nhwc.shape
    HW = H * W
    out_dim = w2.shape[1]
    Np = _round_up(max(N, 8), 8)
    xr = jnp.pad(x_nhwc.reshape(N, HW, C).astype(jnp.bfloat16),
                 ((0, Np - N), (0, 0), (0, 0)))
    out = pl.pallas_call(
        functools.partial(_head_kernel, inv_hw=1.0 / HW),
        out_shape=jax.ShapeDtypeStruct((Np, out_dim), jnp.float32),
        grid=(1,),
        in_specs=[
            pl.BlockSpec((Np, HW, C), lambda i: (0, 0, 0)),
            pl.BlockSpec((C, C), lambda i: (0, 0)),
            pl.BlockSpec((1, C), lambda i: (0, 0)),
            pl.BlockSpec((C, out_dim), lambda i: (0, 0)),
            pl.BlockSpec((1, out_dim), lambda i: (0, 0)),
        ],
        out_specs=pl.BlockSpec((Np, out_dim), lambda i: (0, 0)),
    )(xr, w1.astype(jnp.bfloat16), b1.reshape(1, C).astype(jnp.float32),
      w2.astype(jnp.bfloat16), b2.reshape(1, out_dim).astype(jnp.float32))
    return out[:N]


# ----------------------------------------------------------------------------
# Conv + folded BN (+ReLU, + optional fused residual) via im2col + tiled matmul
# ----------------------------------------------------------------------------

def bn_fold(bn, eps=1e-5):
    scale = bn["gamma"] / jnp.sqrt(bn["var"] + eps)
    bias = bn["beta"] - bn["mean"] * scale
    return scale, bias


def conv_bn(x_nhwc, w_oihw, bn, *, stride, padding, relu, residual=None):
    N, H, W, Cin = x_nhwc.shape
    Cout, Cin2, KH, KW = w_oihw.shape
    assert Cin == Cin2
    Ho = (H + 2 * padding - KH) // stride + 1
    Wo = (W + 2 * padding - KW) // stride + 1
    scale, bias = bn_fold(bn)
    # Fold BN scale into weight columns; epilogue keeps only the bias add.
    wm = (jnp.transpose(w_oihw, (2, 3, 1, 0)).reshape(KH * KW * Cin, Cout)
          * scale[None, :])
    xb = x_nhwc.astype(jnp.bfloat16)
    xp = jnp.pad(xb, ((0, 0), (padding, padding), (padding, padding), (0, 0)))
    cols = [xp[:, kh:kh + stride * Ho:stride, kw:kw + stride * Wo:stride, :]
            for kh in range(KH) for kw in range(KW)]
    patches = jnp.concatenate(cols, axis=-1).reshape(N * Ho * Wo, KH * KW * Cin)
    res2d = None
    if residual is not None:
        res2d = residual.reshape(N * Ho * Wo, Cout)
    y = matmul_bias_act(patches, wm, bias, relu=relu, residual=res2d)
    return y.reshape(N, Ho, Wo, Cout)


# ----------------------------------------------------------------------------
# Deterministic parameter construction (resnet18 shapes, out_dim head)
# ----------------------------------------------------------------------------

class ParamGen:
    def __init__(self, seed):
        self.key = jax.random.PRNGKey(seed)
        self.i = 0

    def _k(self):
        self.i += 1
        return jax.random.fold_in(self.key, self.i)

    def normal(self, shape, scale):
        return scale * jax.random.normal(self._k(), shape, jnp.float32)

    def uniform(self, shape, lo, hi):
        return jax.random.uniform(self._k(), shape, jnp.float32, lo, hi)


def make_conv(pg, cout, cin, kh, kw):
    fan_in = cin * kh * kw
    return pg.normal((cout, cin, kh, kw), (2.0 / fan_in) ** 0.5)


def make_bn(pg, c):
    return dict(gamma=pg.uniform((c,), 0.8, 1.2),
                beta=pg.normal((c,), 0.01),
                mean=pg.normal((c,), 0.01),
                var=pg.uniform((c,), 0.8, 1.2))


def make_block(pg, cin, cout, stride):
    p = dict(conv1=make_conv(pg, cout, cin, 3, 3), bn1=make_bn(pg, cout),
             conv2=make_conv(pg, cout, cout, 3, 3), bn2=make_bn(pg, cout),
             stride=stride)
    if stride != 1 or cin != cout:
        p["down_conv"] = make_conv(pg, cout, cin, 1, 1)
        p["down_bn"] = make_bn(pg, cout)
    return p


def make_params(out_dim=128):
    pg = ParamGen(1234)
    p = dict(conv1=make_conv(pg, 64, 3, 7, 7), bn1=make_bn(pg, 64))
    cfgs = [("layer1", 64, 64, 1), ("layer2", 64, 128, 2),
            ("layer3", 128, 256, 2), ("layer4", 256, 512, 2)]
    for name, cin, cout, stride in cfgs:
        p[name] = [make_block(pg, cin, cout, stride),
                   make_block(pg, cout, cout, 1)]
    d_feats = 512  # resnet18: backbone.fc.in_features
    p["head_w1"] = pg.normal((d_feats, d_feats), (1.0 / d_feats) ** 0.5)
    p["head_b1"] = pg.normal((d_feats,), 0.01)
    p["head_w2"] = pg.normal((d_feats, out_dim), (1.0 / d_feats) ** 0.5)
    p["head_b2"] = pg.normal((out_dim,), 0.01)
    return p


# ----------------------------------------------------------------------------
# Forward pass (ResNetSimCLR.forward semantics, resnet18 backbone, fc=Identity)
# ----------------------------------------------------------------------------

def basic_block_forward(x, p):
    out = conv_bn(x, p["conv1"], p["bn1"], stride=p["stride"], padding=1,
                  relu=True)
    if "down_conv" in p:
        identity = conv_bn(x, p["down_conv"], p["down_bn"],
                           stride=p["stride"], padding=0, relu=False)
    else:
        identity = x
    # conv2 + bn2 + residual add + ReLU fused into one matmul epilogue.
    out = conv_bn(out, p["conv2"], p["bn2"], stride=1, padding=1,
                  relu=True, residual=identity)
    return out


def resnet_simclr_forward(x_nchw, params):
    # PyTorch NCHW -> NHWC (channels on the 128-lane axis)
    x = jnp.transpose(x_nchw, (0, 2, 3, 1))
    x = conv_bn(x, params["conv1"], params["bn1"], stride=2, padding=3,
                relu=True)
    x = max_pool_3x3_s2(x)
    for layer in ("layer1", "layer2", "layer3", "layer4"):
        for blk in params[layer]:
            x = basic_block_forward(x, blk)
    # backbone.fc = Identity; avgpool + Linear -> ReLU -> Linear fused.
    return head_forward(x, params["head_w1"], params["head_b1"],
                        params["head_w2"], params["head_b2"])


if __name__ == "__main__":
    OUT_DIM = 128
    key = jax.random.PRNGKey(0)
    x = jax.random.normal(key, (2, 3, 32, 32), jnp.float32)   # NCHW, like PyTorch
    params = make_params(out_dim=OUT_DIM)

    fwd = jax.jit(lambda inp: resnet_simclr_forward(inp, params))
    out = jax.block_until_ready(fwd(x))

    assert out.shape == (2, OUT_DIM), out.shape
    assert bool(jnp.all(jnp.isfinite(out)))
    print("KERNEL_OK")
</pallas_src>

<mosaic_0001>
module attributes {stable_mosaic.version = 11 : i64} {
  func.func @_mm_kernel(%arg0: i32, %arg1: i32, %arg2: i32, %arg3: memref<256x256xbf16, #tpu.memory_space<vmem>>, %arg4: memref<256x128xbf16, #tpu.memory_space<vmem>>, %arg5: memref<1x128xf32, #tpu.memory_space<vmem>>, %arg6: memref<256x128xbf16, #tpu.memory_space<vmem>>, %arg7: memref<256x128xf32, #tpu.memory_space<vmem>>) attributes {dimension_semantics = [#tpu.dimension_semantics<parallel>, #tpu.dimension_semantics<parallel>, #tpu.dimension_semantics<arbitrary>], iteration_bounds = array<i64: 2, 1, 1>, scalar_prefetch = 0 : i64, scratch_operands = 1 : i64, tpu.core_type = #tpu.core_type<tc>, window_params = [{transform_indices = @transform_0, window_bounds = array<i64: 256, 256>}, {transform_indices = @transform_1, window_bounds = array<i64: 256, 128>}, {transform_indices = @transform_2, window_bounds = array<i64: 1, 128>}, {transform_indices = @transform_3, window_bounds = array<i64: 256, 128>}]} {
    %c0_i32 = arith.constant 0 : i32
    %0 = arith.cmpi eq, %arg2, %c0_i32 : i32
    %1 = arith.extui %0 : i1 to i32
    %c0_i32_0 = arith.constant 0 : i32
    %2 = arith.cmpi ne, %1, %c0_i32_0 : i32
    scf.if %2 {
      %cst_10 = arith.constant 0.000000e+00 : f32
      %12 = vector.broadcast %cst_10 : f32 to vector<256x128xf32>
      %c0_11 = arith.constant 0 : index
      %c0_12 = arith.constant 0 : index
      %13 = vector.load %arg7[%c0_11, %c0_12] : memref<256x128xf32, #tpu.memory_space<vmem>>, vector<256x128xf32>
      tpu.vector_store %arg7[%c0_11, %c0_12], %12 {strides = array<i32>} : memref<256x128xf32, #tpu.memory_space<vmem>>, vector<256x128xf32>,
    } else {
    }
    %c0 = arith.constant 0 : index
    %c0_1 = arith.constant 0 : index
    %3 = vector.load %arg7[%c0, %c0_1] : memref<256x128xf32, #tpu.memory_space<vmem>>, vector<256x128xf32>
    %c0_2 = arith.constant 0 : index
    %c0_3 = arith.constant 0 : index
    %4 = vector.load %arg3[%c0_2, %c0_3] : memref<256x256xbf16, #tpu.memory_space<vmem>>, vector<256x256xbf16>
    %c0_4 = arith.constant 0 : index
    %c0_5 = arith.constant 0 : index
    %5 = vector.load %arg4[%c0_4, %c0_5] : memref<256x128xbf16, #tpu.memory_space<vmem>>, vector<256x128xbf16>
    %cst = arith.constant dense<0.000000e+00> : vector<256x128xf32>
    %6 = tpu.matmul %4, %5, %cst {dimension_numbers = #tpu.dot_dimension_numbers<[1], [0], [0], [1], [0, 0, 1, 1], [], []>} : vector<256x256xbf16>, vector<256x128xbf16>, vector<256x128xf32> -> vector<256x128xf32>
    %7 = arith.addf %3, %6 : vector<256x128xf32>
    %c0_6 = arith.constant 0 : index
    %c0_7 = arith.constant 0 : index
    %8 = vector.load %arg7[%c0_6, %c0_7] : memref<256x128xf32, #tpu.memory_space<vmem>>, vector<256x128xf32>
    tpu.vector_store %arg7[%c0_6, %c0_7], %7 {strides = array<i32>} : memref<256x128xf32, #tpu.memory_space<vmem>>, vector<256x128xf32>,
    %c0_i32_8 = arith.constant 0 : i32
    %9 = arith.cmpi eq, %arg2, %c0_i32_8 : i32
    %10 = arith.extui %9 : i1 to i32
    %c0_i32_9 = arith.constant 0 : i32
    %11 = arith.cmpi ne, %10, %c0_i32_9 : i32
    scf.if %11 {
      %c0_10 = arith.constant 0 : index
      %c0_11 = arith.constant 0 : index
      %12 = vector.load %arg7[%c0_10, %c0_11] : memref<256x128xf32, #tpu.memory_space<vmem>>, vector<256x128xf32>
      %c0_12 = arith.constant 0 : index
      %c0_13 = arith.constant 0 : index
      %13 = vector.load %arg5[%c0_12, %c0_13] : memref<1x128xf32, #tpu.memory_space<vmem>>, vector<1x128xf32>
      %14 = vector.broadcast %13 : vector<1x128xf32> to vector<256x128xf32>
      %15 = arith.addf %12, %14 : vector<256x128xf32>
      %cst_14 = arith.constant 0.000000e+00 : f32
      %16 = vector.broadcast %cst_14 : f32 to vector<256x128xf32>
      %17 = arith.maximumf %15, %16 : vector<256x128xf32>
      %18 = arith.truncf %17 : vector<256x128xf32> to vector<256x128xbf16>
      %c0_15 = arith.constant 0 : index
      %c0_16 = arith.constant 0 : index
      %19 = vector.load %arg6[%c0_15, %c0_16] : memref<256x128xbf16, #tpu.memory_space<vmem>>, vector<256x128xbf16>
      tpu.vector_store %arg6[%c0_15, %c0_16], %18 {strides = array<i32>} : memref<256x128xbf16, #tpu.memory_space<vmem>>, vector<256x128xbf16>,
    } else {
    }
    return
  }
  func.func @transform_0(%arg0: i32, %arg1: i32, %arg2: i32) -> (i32, i32) {
    %c0_i32 = arith.constant 0 : i32
    return %arg0, %arg2 : i32, i32
  }
  func.func @transform_1(%arg0: i32, %arg1: i32, %arg2: i32) -> (i32, i32) {
    %c0_i32 = arith.constant 0 : i32
    return %arg2, %arg1 : i32, i32
  }
  func.func @transform_2(%arg0: i32, %arg1: i32, %arg2: i32) -> (i32, i32) {
    %c0_i32 = arith.constant 0 : i32
    %c0_i32_0 = arith.constant 0 : i32
    return %c0_i32, %arg1 : i32, i32
  }
  func.func @transform_3(%arg0: i32, %arg1: i32, %arg2: i32) -> (i32, i32) {
    %c0_i32 = arith.constant 0 : i32
    return %arg0, %arg1 : i32, i32
  }
}

module attributes {stable_mosaic.version = 11 : i64} {
  func.func @_window_max_kernel(%arg0: i32, %arg1: memref<9x128x64xbf16, #tpu.memory_space<vmem>>, %arg2: memref<128x64xbf16, #tpu.memory_space<vmem>>) attributes {dimension_semantics = [#tpu.dimension_semantics<parallel>], iteration_bounds = array<i64: 1>, scalar_prefetch = 0 : i64, scratch_operands = 0 : i64, tpu.core_type = #tpu.core_type<tc>, window_params = [{transform_indices = @transform_0, window_bounds = array<i64: 9, 128, 64>}, {transform_indices = @transform_1, window_bounds = array<i64: 128, 64>}]} {
    %c0 = arith.constant 0 : index
    %c0_0 = arith.constant 0 : index
    %c0_1 = arith.constant 0 : index
    %0 = vector.load %arg1[%c0, %c0_0, %c0_1] : memref<9x128x64xbf16, #tpu.memory_space<vmem>>, vector<9x128x64xbf16>
    %cst = arith.constant dense<0xFF80> : vector<128x64xbf16>
    %1 = vector.multi_reduction <maximumf>, %0, %cst [0] : vector<9x128x64xbf16> to vector<128x64xbf16>
    %c0_2 = arith.constant 0 : index
    %c0_3 = arith.constant 0 : index
    %2 = vector.load %arg2[%c0_2, %c0_3] : memref<128x64xbf16, #tpu.memory_space<vmem>>, vector<128x64xbf16>
    tpu.vector_store %arg2[%c0_2, %c0_3], %1 {strides = array<i32>} : memref<128x64xbf16, #tpu.memory_space<vmem>>, vector<128x64xbf16>,
    return
  }
  func.func @transform_0(%arg0: i32) -> (i32, i32, i32) {
    %c0_i32 = arith.constant 0 : i32
    %c0_i32_0 = arith.constant 0 : i32
    %c0_i32_1 = arith.constant 0 : i32
    return %c0_i32, %arg0, %c0_i32_0 : i32, i32, i32
  }
  func.func @transform_1(%arg0: i32) -> (i32, i32) {
    %c0_i32 = arith.constant 0 : i32
    %c0_i32_0 = arith.constant 0 : i32
    return %arg0, %c0_i32 : i32, i32
  }
}

module attributes {stable_mosaic.version = 11 : i64} {
  func.func @_mm_kernel(%arg0: i32, %arg1: i32, %arg2: i32, %arg3: memref<128x128xbf16, #tpu.memory_space<vmem>>, %arg4: memref<128x128xbf16, #tpu.memory_space<vmem>>, %arg5: memref<1x128xf32, #tpu.memory_space<vmem>>, %arg6: memref<128x128xbf16, #tpu.memory_space<vmem>>, %arg7: memref<128x128xf32, #tpu.memory_space<vmem>>) attributes {dimension_semantics = [#tpu.dimension_semantics<parallel>, #tpu.dimension_semantics<parallel>, #tpu.dimension_semantics<arbitrary>], iteration_bounds = array<i64: 1, 1, 5>, scalar_prefetch = 0 : i64, scratch_operands = 1 : i64, tpu.core_type = #tpu.core_type<tc>, window_params = [{transform_indices = @transform_0, window_bounds = array<i64: 128, 128>}, {transform_indices = @transform_1, window_bounds = array<i64: 128, 128>}, {transform_indices = @transform_2, window_bounds = array<i64: 1, 128>}, {transform_indices = @transform_3, window_bounds = array<i64: 128, 128>}]} {
    %c0_i32 = arith.constant 0 : i32
    %0 = arith.cmpi eq, %arg2, %c0_i32 : i32
    %1 = arith.extui %0 : i1 to i32
    %c0_i32_0 = arith.constant 0 : i32
    %2 = arith.cmpi ne, %1, %c0_i32_0 : i32
    scf.if %2 {
      %cst_9 = arith.constant 0.000000e+00 : f32
      %12 = vector.broadcast %cst_9 : f32 to vector<128x128xf32>
      %c0_10 = arith.constant 0 : index
      %c0_11 = arith.constant 0 : index
      %13 = vector.load %arg7[%c0_10, %c0_11] : memref<128x128xf32, #tpu.memory_space<vmem>>, vector<128x128xf32>
      tpu.vector_store %arg7[%c0_10, %c0_11], %12 {strides = array<i32>} : memref<128x128xf32, #tpu.memory_space<vmem>>, vector<128x128xf32>,
    } else {
    }
    %c0 = arith.constant 0 : index
    %c0_1 = arith.constant 0 : index
    %3 = vector.load %arg7[%c0, %c0_1] : memref<128x128xf32, #tpu.memory_space<vmem>>, vector<128x128xf32>
    %c0_2 = arith.constant 0 : index
    %c0_3 = arith.constant 0 : index
    %4 = vector.load %arg3[%c0_2, %c0_3] : memref<128x128xbf16, #tpu.memory_space<vmem>>, vector<128x128xbf16>
    %c0_4 = arith.constant 0 : index
    %c0_5 = arith.constant 0 : index
    %5 = vector.load %arg4[%c0_4, %c0_5] : memref<128x128xbf16, #tpu.memory_space<vmem>>, vector<128x128xbf16>
    %cst = arith.constant dense<0.000000e+00> : vector<128x128xf32>
    %6 = tpu.matmul %4, %5, %cst {dimension_numbers = #tpu.dot_dimension_numbers<[1], [0], [0], [1], [0, 0, 1, 1], [], []>} : vector<128x128xbf16>, vector<128x128xbf16>, vector<128x128xf32> -> vector<128x128xf32>
    %7 = arith.addf %3, %6 : vector<128x128xf32>
    %c0_6 = arith.constant 0 : index
    %c0_7 = arith.constant 0 : index
    %8 = vector.load %arg7[%c0_6, %c0_7] : memref<128x128xf32, #tpu.memory_space<vmem>>, vector<128x128xf32>
    tpu.vector_store %arg7[%c0_6, %c0_7], %7 {strides = array<i32>} : memref<128x128xf32, #tpu.memory_space<vmem>>, vector<128x128xf32>,
    %c4_i32 = arith.constant 4 : i32
    %9 = arith.cmpi eq, %arg2, %c4_i32 : i32
    %10 = arith.extui %9 : i1 to i32
    %c0_i32_8 = arith.constant 0 : i32
    %11 = arith.cmpi ne, %10, %c0_i32_8 : i32
    scf.if %11 {
      %c0_9 = arith.constant 0 : index
      %c0_10 = arith.constant 0 : index
      %12 = vector.load %arg7[%c0_9, %c0_10] : memref<128x128xf32, #tpu.memory_space<vmem>>, vector<128x128xf32>
      %c0_11 = arith.constant 0 : index
      %c0_12 = arith.constant 0 : index
      %13 = vector.load %arg5[%c0_11, %c0_12] : memref<1x128xf32, #tpu.memory_space<vmem>>, vector<1x128xf32>
      %14 = vector.broadcast %13 : vector<1x128xf32> to vector<128x128xf32>
      %15 = arith.addf %12, %14 : vector<128x128xf32>
      %cst_13 = arith.constant 0.000000e+00 : f32
      %16 = vector.broadcast %cst_13 : f32 to vector<128x128xf32>
      %17 = arith.maximumf %15, %16 : vector<128x128xf32>
      %18 = arith.truncf %17 : vector<128x128xf32> to vector<128x128xbf16>
      %c0_14 = arith.constant 0 : index
      %c0_15 = arith.constant 0 : index
      %19 = vector.load %arg6[%c0_14, %c0_15] : memref<128x128xbf16, #tpu.memory_space<vmem>>, vector<128x128xbf16>
      tpu.vector_store %arg6[%c0_14, %c0_15], %18 {strides = array<i32>} : memref<128x128xbf16, #tpu.memory_space<vmem>>, vector<128x128xbf16>,
    } else {
    }
    return
  }
  func.func @transform_0(%arg0: i32, %arg1: i32, %arg2: i32) -> (i32, i32) {
    %c0_i32 = arith.constant 0 : i32
    return %arg0, %arg2 : i32, i32
  }
  func.func @transform_1(%arg0: i32, %arg1: i32, %arg2: i32) -> (i32, i32) {
    %c0_i32 = arith.constant 0 : i32
    return %arg2, %arg1 : i32, i32
  }
  func.func @transform_2(%arg0: i32, %arg1: i32, %arg2: i32) -> (i32, i32) {
    %c0_i32 = arith.constant 0 : i32
    %c0_i32_0 = arith.constant 0 : i32
    return %c0_i32, %arg1 : i32, i32
  }
  func.func @transform_3(%arg0: i32, %arg1: i32, %arg2: i32) -> (i32, i32) {
    %c0_i32 = arith.constant 0 : i32
    return %arg0, %arg1 : i32, i32
  }
}

module attributes {stable_mosaic.version = 11 : i64} {
  func.func @_mm_res_kernel(%arg0: i32, %arg1: i32, %arg2: i32, %arg3: memref<128x128xbf16, #tpu.memory_space<vmem>>, %arg4: memref<128x128xbf16, #tpu.memory_space<vmem>>, %arg5: memref<1x128xf32, #tpu.memory_space<vmem>>, %arg6: memref<128x128xbf16, #tpu.memory_space<vmem>>, %arg7: memref<128x128xbf16, #tpu.memory_space<vmem>>, %arg8: memref<128x128xf32, #tpu.memory_space<vmem>>) attributes {dimension_semantics = [#tpu.dimension_semantics<parallel>, #tpu.dimension_semantics<parallel>, #tpu.dimension_semantics<arbitrary>], iteration_bounds = array<i64: 1, 1, 5>, scalar_prefetch = 0 : i64, scratch_operands = 1 : i64, tpu.core_type = #tpu.core_type<tc>, window_params = [{transform_indices = @transform_0, window_bounds = array<i64: 128, 128>}, {transform_indices = @transform_1, window_bounds = array<i64: 128, 128>}, {transform_indices = @transform_2, window_bounds = array<i64: 1, 128>}, {transform_indices = @transform_3, window_bounds = array<i64: 128, 128>}, {transform_indices = @transform_4, window_bounds = array<i64: 128, 128>}]} {
    %c0_i32 = arith.constant 0 : i32
    %0 = arith.cmpi eq, %arg2, %c0_i32 : i32
    %1 = arith.extui %0 : i1 to i32
    %c0_i32_0 = arith.constant 0 : i32
    %2 = arith.cmpi ne, %1, %c0_i32_0 : i32
    scf.if %2 {
      %cst_9 = arith.constant 0.000000e+00 : f32
      %12 = vector.broadcast %cst_9 : f32 to vector<128x128xf32>
      %c0_10 = arith.constant 0 : index
      %c0_11 = arith.constant 0 : index
      %13 = vector.load %arg8[%c0_10, %c0_11] : memref<128x128xf32, #tpu.memory_space<vmem>>, vector<128x128xf32>
      tpu.vector_store %arg8[%c0_10, %c0_11], %12 {strides = array<i32>} : memref<128x128xf32, #tpu.memory_space<vmem>>, vector<128x128xf32>,
    } else {
    }
    %c0 = arith.constant 0 : index
    %c0_1 = arith.constant 0 : index
    %3 = vector.load %arg8[%c0, %c0_1] : memref<128x128xf32, #tpu.memory_space<vmem>>, vector<128x128xf32>
    %c0_2 = arith.constant 0 : index
    %c0_3 = arith.constant 0 : index
    %4 = vector.load %arg3[%c0_2, %c0_3] : memref<128x128xbf16, #tpu.memory_space<vmem>>, vector<128x128xbf16>
    %c0_4 = arith.constant 0 : index
    %c0_5 = arith.constant 0 : index
    %5 = vector.load %arg4[%c0_4, %c0_5] : memref<128x128xbf16, #tpu.memory_space<vmem>>, vector<128x128xbf16>
    %cst = arith.constant dense<0.000000e+00> : vector<128x128xf32>
    %6 = tpu.matmul %4, %5, %cst {dimension_numbers = #tpu.dot_dimension_numbers<[1], [0], [0], [1], [0, 0, 1, 1], [], []>} : vector<128x128xbf16>, vector<128x128xbf16>, vector<128x128xf32> -> vector<128x128xf32>
    %7 = arith.addf %3, %6 : vector<128x128xf32>
    %c0_6 = arith.constant 0 : index
    %c0_7 = arith.constant 0 : index
    %8 = vector.load %arg8[%c0_6, %c0_7] : memref<128x128xf32, #tpu.memory_space<vmem>>, vector<128x128xf32>
    tpu.vector_store %arg8[%c0_6, %c0_7], %7 {strides = array<i32>} : memref<128x128xf32, #tpu.memory_space<vmem>>, vector<128x128xf32>,
    %c4_i32 = arith.constant 4 : i32
    %9 = arith.cmpi eq, %arg2, %c4_i32 : i32
    %10 = arith.extui %9 : i1 to i32
    %c0_i32_8 = arith.constant 0 : i32
    %11 = arith.cmpi ne, %10, %c0_i32_8 : i32
    scf.if %11 {
      %c0_9 = arith.constant 0 : index
      %c0_10 = arith.constant 0 : index
      %12 = vector.load %arg8[%c0_9, %c0_10] : memref<128x128xf32, #tpu.memory_space<vmem>>, vector<128x128xf32>
      %c0_11 = arith.constant 0 : index
      %c0_12 = arith.constant 0 : index
      %13 = vector.load %arg5[%c0_11, %c0_12] : memref<1x128xf32, #tpu.memory_space<vmem>>, vector<1x128xf32>
      %14 = vector.broadcast %13 : vector<1x128xf32> to vector<128x128xf32>
      %15 = arith.addf %12, %14 : vector<128x128xf32>
      %c0_13 = arith.constant 0 : index
      %c0_14 = arith.constant 0 : index
      %16 = vector.load %arg6[%c0_13, %c0_14] : memref<128x128xbf16, #tpu.memory_space<vmem>>, vector<128x128xbf16>
      %17 = arith.extf %16 : vector<128x128xbf16> to vector<128x128xf32>
      %18 = arith.addf %15, %17 : vector<128x128xf32>
      %cst_15 = arith.constant 0.000000e+00 : f32
      %19 = vector.broadcast %cst_15 : f32 to vector<128x128xf32>
      %20 = arith.maximumf %18, %19 : vector<128x128xf32>
      %21 = arith.truncf %20 : vector<128x128xf32> to vector<128x128xbf16>
      %c0_16 = arith.constant 0 : index
      %c0_17 = arith.constant 0 : index
      %22 = vector.load %arg7[%c0_16, %c0_17] : memref<128x128xbf16, #tpu.memory_space<vmem>>, vector<128x128xbf16>
      tpu.vector_store %arg7[%c0_16, %c0_17], %21 {strides = array<i32>} : memref<128x128xbf16, #tpu.memory_space<vmem>>, vector<128x128xbf16>,
    } else {
    }
    return
  }
  func.func @transform_0(%arg0: i32, %arg1: i32, %arg2: i32) -> (i32, i32) {
    %c0_i32 = arith.constant 0 : i32
    return %arg0, %arg2 : i32, i32
  }
  func.func @transform_1(%arg0: i32, %arg1: i32, %arg2: i32) -> (i32, i32) {
    %c0_i32 = arith.constant 0 : i32
    return %arg2, %arg1 : i32, i32
  }
  func.func @transform_2(%arg0: i32, %arg1: i32, %arg2: i32) -> (i32, i32) {
    %c0_i32 = arith.constant 0 : i32
    %c0_i32_0 = arith.constant 0 : i32
    return %c0_i32, %arg1 : i32, i32
  }
  func.func @transform_3(%arg0: i32, %arg1: i32, %arg2: i32) -> (i32, i32) {
    %c0_i32 = arith.constant 0 : i32
    return %arg0, %arg1 : i32, i32
  }
  func.func @transform_4(%arg0: i32, %arg1: i32, %arg2: i32) -> (i32, i32) {
    %c0_i32 = arith.constant 0 : i32
    return %arg0, %arg1 : i32, i32
  }
}

module attributes {stable_mosaic.version = 11 : i64} {
  func.func @_mm_kernel(%arg0: i32, %arg1: i32, %arg2: i32, %arg3: memref<128x128xbf16, #tpu.memory_space<vmem>>, %arg4: memref<128x128xbf16, #tpu.memory_space<vmem>>, %arg5: memref<1x128xf32, #tpu.memory_space<vmem>>, %arg6: memref<128x128xbf16, #tpu.memory_space<vmem>>, %arg7: memref<128x128xf32, #tpu.memory_space<vmem>>) attributes {dimension_semantics = [#tpu.dimension_semantics<parallel>, #tpu.dimension_semantics<parallel>, #tpu.dimension_semantics<arbitrary>], iteration_bounds = array<i64: 1, 1, 5>, scalar_prefetch = 0 : i64, scratch_operands = 1 : i64, tpu.core_type = #tpu.core_type<tc>, window_params = [{transform_indices = @transform_0, window_bounds = array<i64: 128, 128>}, {transform_indices = @transform_1, window_bounds = array<i64: 128, 128>}, {transform_indices = @transform_2, window_bounds = array<i64: 1, 128>}, {transform_indices = @transform_3, window_bounds = array<i64: 128, 128>}]} {
    %c0_i32 = arith.constant 0 : i32
    %0 = arith.cmpi eq, %arg2, %c0_i32 : i32
    %1 = arith.extui %0 : i1 to i32
    %c0_i32_0 = arith.constant 0 : i32
    %2 = arith.cmpi ne, %1, %c0_i32_0 : i32
    scf.if %2 {
      %cst_9 = arith.constant 0.000000e+00 : f32
      %12 = vector.broadcast %cst_9 : f32 to vector<128x128xf32>
      %c0_10 = arith.constant 0 : index
      %c0_11 = arith.constant 0 : index
      %13 = vector.load %arg7[%c0_10, %c0_11] : memref<128x128xf32, #tpu.memory_space<vmem>>, vector<128x128xf32>
      tpu.vector_store %arg7[%c0_10, %c0_11], %12 {strides = array<i32>} : memref<128x128xf32, #tpu.memory_space<vmem>>, vector<128x128xf32>,
    } else {
    }
    %c0 = arith.constant 0 : index
    %c0_1 = arith.constant 0 : index
    %3 = vector.load %arg7[%c0, %c0_1] : memref<128x128xf32, #tpu.memory_space<vmem>>, vector<128x128xf32>
    %c0_2 = arith.constant 0 : index
    %c0_3 = arith.constant 0 : index
    %4 = vector.load %arg3[%c0_2, %c0_3] : memref<128x128xbf16, #tpu.memory_space<vmem>>, vector<128x128xbf16>
    %c0_4 = arith.constant 0 : index
    %c0_5 = arith.constant 0 : index
    %5 = vector.load %arg4[%c0_4, %c0_5] : memref<128x128xbf16, #tpu.memory_space<vmem>>, vector<128x128xbf16>
    %cst = arith.constant dense<0.000000e+00> : vector<128x128xf32>
    %6 = tpu.matmul %4, %5, %cst {dimension_numbers = #tpu.dot_dimension_numbers<[1], [0], [0], [1], [0, 0, 1, 1], [], []>} : vector<128x128xbf16>, vector<128x128xbf16>, vector<128x128xf32> -> vector<128x128xf32>
    %7 = arith.addf %3, %6 : vector<128x128xf32>
    %c0_6 = arith.constant 0 : index
    %c0_7 = arith.constant 0 : index
    %8 = vector.load %arg7[%c0_6, %c0_7] : memref<128x128xf32, #tpu.memory_space<vmem>>, vector<128x128xf32>
    tpu.vector_store %arg7[%c0_6, %c0_7], %7 {strides = array<i32>} : memref<128x128xf32, #tpu.memory_space<vmem>>, vector<128x128xf32>,
    %c4_i32 = arith.constant 4 : i32
    %9 = arith.cmpi eq, %arg2, %c4_i32 : i32
    %10 = arith.extui %9 : i1 to i32
    %c0_i32_8 = arith.constant 0 : i32
    %11 = arith.cmpi ne, %10, %c0_i32_8 : i32
    scf.if %11 {
      %c0_9 = arith.constant 0 : index
      %c0_10 = arith.constant 0 : index
      %12 = vector.load %arg7[%c0_9, %c0_10] : memref<128x128xf32, #tpu.memory_space<vmem>>, vector<128x128xf32>
      %c0_11 = arith.constant 0 : index
      %c0_12 = arith.constant 0 : index
      %13 = vector.load %arg5[%c0_11, %c0_12] : memref<1x128xf32, #tpu.memory_space<vmem>>, vector<1x128xf32>
      %14 = vector.broadcast %13 : vector<1x128xf32> to vector<128x128xf32>
      %15 = arith.addf %12, %14 : vector<128x128xf32>
      %cst_13 = arith.constant 0.000000e+00 : f32
      %16 = vector.broadcast %cst_13 : f32 to vector<128x128xf32>
      %17 = arith.maximumf %15, %16 : vector<128x128xf32>
      %18 = arith.truncf %17 : vector<128x128xf32> to vector<128x128xbf16>
      %c0_14 = arith.constant 0 : index
      %c0_15 = arith.constant 0 : index
      %19 = vector.load %arg6[%c0_14, %c0_15] : memref<128x128xbf16, #tpu.memory_space<vmem>>, vector<128x128xbf16>
      tpu.vector_store %arg6[%c0_14, %c0_15], %18 {strides = array<i32>} : memref<128x128xbf16, #tpu.memory_space<vmem>>, vector<128x128xbf16>,
    } else {
    }
    return
  }
  func.func @transform_0(%arg0: i32, %arg1: i32, %arg2: i32) -> (i32, i32) {
    %c0_i32 = arith.constant 0 : i32
    return %arg0, %arg2 : i32, i32
  }
  func.func @transform_1(%arg0: i32, %arg1: i32, %arg2: i32) -> (i32, i32) {
    %c0_i32 = arith.constant 0 : i32
    return %arg2, %arg1 : i32, i32
  }
  func.func @transform_2(%arg0: i32, %arg1: i32, %arg2: i32) -> (i32, i32) {
    %c0_i32 = arith.constant 0 : i32
    %c0_i32_0 = arith.constant 0 : i32
    return %c0_i32, %arg1 : i32, i32
  }
  func.func @transform_3(%arg0: i32, %arg1: i32, %arg2: i32) -> (i32, i32) {
    %c0_i32 = arith.constant 0 : i32
    return %arg0, %arg1 : i32, i32
  }
}

module attributes {stable_mosaic.version = 11 : i64} {
  func.func @_mm_res_kernel(%arg0: i32, %arg1: i32, %arg2: i32, %arg3: memref<128x128xbf16, #tpu.memory_space<vmem>>, %arg4: memref<128x128xbf16, #tpu.memory_space<vmem>>, %arg5: memref<1x128xf32, #tpu.memory_space<vmem>>, %arg6: memref<128x128xbf16, #tpu.memory_space<vmem>>, %arg7: memref<128x128xbf16, #tpu.memory_space<vmem>>, %arg8: memref<128x128xf32, #tpu.memory_space<vmem>>) attributes {dimension_semantics = [#tpu.dimension_semantics<parallel>, #tpu.dimension_semantics<parallel>, #tpu.dimension_semantics<arbitrary>], iteration_bounds = array<i64: 1, 1, 5>, scalar_prefetch = 0 : i64, scratch_operands = 1 : i64, tpu.core_type = #tpu.core_type<tc>, window_params = [{transform_indices = @transform_0, window_bounds = array<i64: 128, 128>}, {transform_indices = @transform_1, window_bounds = array<i64: 128, 128>}, {transform_indices = @transform_2, window_bounds = array<i64: 1, 128>}, {transform_indices = @transform_3, window_bounds = array<i64: 128, 128>}, {transform_indices = @transform_4, window_bounds = array<i64: 128, 128>}]} {
    %c0_i32 = arith.constant 0 : i32
    %0 = arith.cmpi eq, %arg2, %c0_i32 : i32
    %1 = arith.extui %0 : i1 to i32
    %c0_i32_0 = arith.constant 0 : i32
    %2 = arith.cmpi ne, %1, %c0_i32_0 : i32
    scf.if %2 {
      %cst_9 = arith.constant 0.000000e+00 : f32
      %12 = vector.broadcast %cst_9 : f32 to vector<128x128xf32>
      %c0_10 = arith.constant 0 : index
      %c0_11 = arith.constant 0 : index
      %13 = vector.load %arg8[%c0_10, %c0_11] : memref<128x128xf32, #tpu.memory_space<vmem>>, vector<128x128xf32>
      tpu.vector_store %arg8[%c0_10, %c0_11], %12 {strides = array<i32>} : memref<128x128xf32, #tpu.memory_space<vmem>>, vector<128x128xf32>,
    } else {
    }
    %c0 = arith.constant 0 : index
    %c0_1 = arith.constant 0 : index
    %3 = vector.load %arg8[%c0, %c0_1] : memref<128x128xf32, #tpu.memory_space<vmem>>, vector<128x128xf32>
    %c0_2 = arith.constant 0 : index
    %c0_3 = arith.constant 0 : index
    %4 = vector.load %arg3[%c0_2, %c0_3] : memref<128x128xbf16, #tpu.memory_space<vmem>>, vector<128x128xbf16>
    %c0_4 = arith.constant 0 : index
    %c0_5 = arith.constant 0 : index
    %5 = vector.load %arg4[%c0_4, %c0_5] : memref<128x128xbf16, #tpu.memory_space<vmem>>, vector<128x128xbf16>
    %cst = arith.constant dense<0.000000e+00> : vector<128x128xf32>
    %6 = tpu.matmul %4, %5, %cst {dimension_numbers = #tpu.dot_dimension_numbers<[1], [0], [0], [1], [0, 0, 1, 1], [], []>} : vector<128x128xbf16>, vector<128x128xbf16>, vector<128x128xf32> -> vector<128x128xf32>
    %7 = arith.addf %3, %6 : vector<128x128xf32>
    %c0_6 = arith.constant 0 : index
    %c0_7 = arith.constant 0 : index
    %8 = vector.load %arg8[%c0_6, %c0_7] : memref<128x128xf32, #tpu.memory_space<vmem>>, vector<128x128xf32>
    tpu.vector_store %arg8[%c0_6, %c0_7], %7 {strides = array<i32>} : memref<128x128xf32, #tpu.memory_space<vmem>>, vector<128x128xf32>,
    %c4_i32 = arith.constant 4 : i32
    %9 = arith.cmpi eq, %arg2, %c4_i32 : i32
    %10 = arith.extui %9 : i1 to i32
    %c0_i32_8 = arith.constant 0 : i32
    %11 = arith.cmpi ne, %10, %c0_i32_8 : i32
    scf.if %11 {
      %c0_9 = arith.constant 0 : index
      %c0_10 = arith.constant 0 : index
      %12 = vector.load %arg8[%c0_9, %c0_10] : memref<128x128xf32, #tpu.memory_space<vmem>>, vector<128x128xf32>
      %c0_11 = arith.constant 0 : index
      %c0_12 = arith.constant 0 : index
      %13 = vector.load %arg5[%c0_11, %c0_12] : memref<1x128xf32, #tpu.memory_space<vmem>>, vector<1x128xf32>
      %14 = vector.broadcast %13 : vector<1x128xf32> to vector<128x128xf32>
      %15 = arith.addf %12, %14 : vector<128x128xf32>
      %c0_13 = arith.constant 0 : index
      %c0_14 = arith.constant 0 : index
      %16 = vector.load %arg6[%c0_13, %c0_14] : memref<128x128xbf16, #tpu.memory_space<vmem>>, vector<128x128xbf16>
      %17 = arith.extf %16 : vector<128x128xbf16> to vector<128x128xf32>
      %18 = arith.addf %15, %17 : vector<128x128xf32>
      %cst_15 = arith.constant 0.000000e+00 : f32
      %19 = vector.broadcast %cst_15 : f32 to vector<128x128xf32>
      %20 = arith.maximumf %18, %19 : vector<128x128xf32>
      %21 = arith.truncf %20 : vector<128x128xf32> to vector<128x128xbf16>
      %c0_16 = arith.constant 0 : index
      %c0_17 = arith.constant 0 : index
      %22 = vector.load %arg7[%c0_16, %c0_17] : memref<128x128xbf16, #tpu.memory_space<vmem>>, vector<128x128xbf16>
      tpu.vector_store %arg7[%c0_16, %c0_17], %21 {strides = array<i32>} : memref<128x128xbf16, #tpu.memory_space<vmem>>, vector<128x128xbf16>,
    } else {
    }
    return
  }
  func.func @transform_0(%arg0: i32, %arg1: i32, %arg2: i32) -> (i32, i32) {
    %c0_i32 = arith.constant 0 : i32
    return %arg0, %arg2 : i32, i32
  }
  func.func @transform_1(%arg0: i32, %arg1: i32, %arg2: i32) -> (i32, i32) {
    %c0_i32 = arith.constant 0 : i32
    return %arg2, %arg1 : i32, i32
  }
  func.func @transform_2(%arg0: i32, %arg1: i32, %arg2: i32) -> (i32, i32) {
    %c0_i32 = arith.constant 0 : i32
    %c0_i32_0 = arith.constant 0 : i32
    return %c0_i32, %arg1 : i32, i32
  }
  func.func @transform_3(%arg0: i32, %arg1: i32, %arg2: i32) -> (i32, i32) {
    %c0_i32 = arith.constant 0 : i32
    return %arg0, %arg1 : i32, i32
  }
  func.func @transform_4(%arg0: i32, %arg1: i32, %arg2: i32) -> (i32, i32) {
    %c0_i32 = arith.constant 0 : i32
    return %arg0, %arg1 : i32, i32
  }
}

module attributes {stable_mosaic.version = 11 : i64} {
  func.func @_mm_kernel(%arg0: i32, %arg1: i32, %arg2: i32, %arg3: memref<32x128xbf16, #tpu.memory_space<vmem>>, %arg4: memref<128x128xbf16, #tpu.memory_space<vmem>>, %arg5: memref<1x128xf32, #tpu.memory_space<vmem>>, %arg6: memref<32x128xbf16, #tpu.memory_space<vmem>>, %arg7: memref<32x128xf32, #tpu.memory_space<vmem>>) attributes {dimension_semantics = [#tpu.dimension_semantics<parallel>, #tpu.dimension_semantics<parallel>, #tpu.dimension_semantics<arbitrary>], iteration_bounds = array<i64: 1, 1, 5>, scalar_prefetch = 0 : i64, scratch_operands = 1 : i64, tpu.core_type = #tpu.core_type<tc>, window_params = [{transform_indices = @transform_0, window_bounds = array<i64: 32, 128>}, {transform_indices = @transform_1, window_bounds = array<i64: 128, 128>}, {transform_indices = @transform_2, window_bounds = array<i64: 1, 128>}, {transform_indices = @transform_3, window_bounds = array<i64: 32, 128>}]} {
    %c0_i32 = arith.constant 0 : i32
    %0 = arith.cmpi eq, %arg2, %c0_i32 : i32
    %1 = arith.extui %0 : i1 to i32
    %c0_i32_0 = arith.constant 0 : i32
    %2 = arith.cmpi ne, %1, %c0_i32_0 : i32
    scf.if %2 {
      %cst_9 = arith.constant 0.000000e+00 : f32
      %12 = vector.broadcast %cst_9 : f32 to vector<32x128xf32>
      %c0_10 = arith.constant 0 : index
      %c0_11 = arith.constant 0 : index
      %13 = vector.load %arg7[%c0_10, %c0_11] : memref<32x128xf32, #tpu.memory_space<vmem>>, vector<32x128xf32>
      tpu.vector_store %arg7[%c0_10, %c0_11], %12 {strides = array<i32>} : memref<32x128xf32, #tpu.memory_space<vmem>>, vector<32x128xf32>,
    } else {
    }
    %c0 = arith.constant 0 : index
    %c0_1 = arith.constant 0 : index
    %3 = vector.load %arg7[%c0, %c0_1] : memref<32x128xf32, #tpu.memory_space<vmem>>, vector<32x128xf32>
    %c0_2 = arith.constant 0 : index
    %c0_3 = arith.constant 0 : index
    %4 = vector.load %arg3[%c0_2, %c0_3] : memref<32x128xbf16, #tpu.memory_space<vmem>>, vector<32x128xbf16>
    %c0_4 = arith.constant 0 : index
    %c0_5 = arith.constant 0 : index
    %5 = vector.load %arg4[%c0_4, %c0_5] : memref<128x128xbf16, #tpu.memory_space<vmem>>, vector<128x128xbf16>
    %cst = arith.constant dense<0.000000e+00> : vector<32x128xf32>
    %6 = tpu.matmul %4, %5, %cst {dimension_numbers = #tpu.dot_dimension_numbers<[1], [0], [0], [1], [0, 0, 1, 1], [], []>} : vector<32x128xbf16>, vector<128x128xbf16>, vector<32x128xf32> -> vector<32x128xf32>
    %7 = arith.addf %3, %6 : vector<32x128xf32>
    %c0_6 = arith.constant 0 : index
    %c0_7 = arith.constant 0 : index
    %8 = vector.load %arg7[%c0_6, %c0_7] : memref<32x128xf32, #tpu.memory_space<vmem>>, vector<32x128xf32>
    tpu.vector_store %arg7[%c0_6, %c0_7], %7 {strides = array<i32>} : memref<32x128xf32, #tpu.memory_space<vmem>>, vector<32x128xf32>,
    %c4_i32 = arith.constant 4 : i32
    %9 = arith.cmpi eq, %arg2, %c4_i32 : i32
    %10 = arith.extui %9 : i1 to i32
    %c0_i32_8 = arith.constant 0 : i32
    %11 = arith.cmpi ne, %10, %c0_i32_8 : i32
    scf.if %11 {
      %c0_9 = arith.constant 0 : index
      %c0_10 = arith.constant 0 : index
      %12 = vector.load %arg7[%c0_9, %c0_10] : memref<32x128xf32, #tpu.memory_space<vmem>>, vector<32x128xf32>
      %c0_11 = arith.constant 0 : index
      %c0_12 = arith.constant 0 : index
      %13 = vector.load %arg5[%c0_11, %c0_12] : memref<1x128xf32, #tpu.memory_space<vmem>>, vector<1x128xf32>
      %14 = vector.broadcast %13 : vector<1x128xf32> to vector<32x128xf32>
      %15 = arith.addf %12, %14 : vector<32x128xf32>
      %cst_13 = arith.constant 0.000000e+00 : f32
      %16 = vector.broadcast %cst_13 : f32 to vector<32x128xf32>
      %17 = arith.maximumf %15, %16 : vector<32x128xf32>
      %18 = arith.truncf %17 : vector<32x128xf32> to vector<32x128xbf16>
      %c0_14 = arith.constant 0 : index
      %c0_15 = arith.constant 0 : index
      %19 = vector.load %arg6[%c0_14, %c0_15] : memref<32x128xbf16, #tpu.memory_space<vmem>>, vector<32x128xbf16>
      tpu.vector_store %arg6[%c0_14, %c0_15], %18 {strides = array<i32>} : memref<32x128xbf16, #tpu.memory_space<vmem>>, vector<32x128xbf16>,
    } else {
    }
    return
  }
  func.func @transform_0(%arg0: i32, %arg1: i32, %arg2: i32) -> (i32, i32) {
    %c0_i32 = arith.constant 0 : i32
    return %arg0, %arg2 : i32, i32
  }
  func.func @transform_1(%arg0: i32, %arg1: i32, %arg2: i32) -> (i32, i32) {
    %c0_i32 = arith.constant 0 : i32
    return %arg2, %arg1 : i32, i32
  }
  func.func @transform_2(%arg0: i32, %arg1: i32, %arg2: i32) -> (i32, i32) {
    %c0_i32 = arith.constant 0 : i32
    %c0_i32_0 = arith.constant 0 : i32
    return %c0_i32, %arg1 : i32, i32
  }
  func.func @transform_3(%arg0: i32, %arg1: i32, %arg2: i32) -> (i32, i32) {
    %c0_i32 = arith.constant 0 : i32
    return %arg0, %arg1 : i32, i32
  }
}

module attributes {stable_mosaic.version = 11 : i64} {
  func.func @_mm_kernel(%arg0: i32, %arg1: i32, %arg2: i32, %arg3: memref<32x128xbf16, #tpu.memory_space<vmem>>, %arg4: memref<128x128xbf16, #tpu.memory_space<vmem>>, %arg5: memref<1x128xf32, #tpu.memory_space<vmem>>, %arg6: memref<32x128xbf16, #tpu.memory_space<vmem>>, %arg7: memref<32x128xf32, #tpu.memory_space<vmem>>) attributes {dimension_semantics = [#tpu.dimension_semantics<parallel>, #tpu.dimension_semantics<parallel>, #tpu.dimension_semantics<arbitrary>], iteration_bounds = array<i64: 1, 1, 1>, scalar_prefetch = 0 : i64, scratch_operands = 1 : i64, tpu.core_type = #tpu.core_type<tc>, window_params = [{transform_indices = @transform_0, window_bounds = array<i64: 32, 128>}, {transform_indices = @transform_1, window_bounds = array<i64: 128, 128>}, {transform_indices = @transform_2, window_bounds = array<i64: 1, 128>}, {transform_indices = @transform_3, window_bounds = array<i64: 32, 128>}]} {
    %c0_i32 = arith.constant 0 : i32
    %0 = arith.cmpi eq, %arg2, %c0_i32 : i32
    %1 = arith.extui %0 : i1 to i32
    %c0_i32_0 = arith.constant 0 : i32
    %2 = arith.cmpi ne, %1, %c0_i32_0 : i32
    scf.if %2 {
      %cst_10 = arith.constant 0.000000e+00 : f32
      %12 = vector.broadcast %cst_10 : f32 to vector<32x128xf32>
      %c0_11 = arith.constant 0 : index
      %c0_12 = arith.constant 0 : index
      %13 = vector.load %arg7[%c0_11, %c0_12] : memref<32x128xf32, #tpu.memory_space<vmem>>, vector<32x128xf32>
      tpu.vector_store %arg7[%c0_11, %c0_12], %12 {strides = array<i32>} : memref<32x128xf32, #tpu.memory_space<vmem>>, vector<32x128xf32>,
    } else {
    }
    %c0 = arith.constant 0 : index
    %c0_1 = arith.constant 0 : index
    %3 = vector.load %arg7[%c0, %c0_1] : memref<32x128xf32, #tpu.memory_space<vmem>>, vector<32x128xf32>
    %c0_2 = arith.constant 0 : index
    %c0_3 = arith.constant 0 : index
    %4 = vector.load %arg3[%c0_2, %c0_3] : memref<32x128xbf16, #tpu.memory_space<vmem>>, vector<32x128xbf16>
    %c0_4 = arith.constant 0 : index
    %c0_5 = arith.constant 0 : index
    %5 = vector.load %arg4[%c0_4, %c0_5] : memref<128x128xbf16, #tpu.memory_space<vmem>>, vector<128x128xbf16>
    %cst = arith.constant dense<0.000000e+00> : vector<32x128xf32>
    %6 = tpu.matmul %4, %5, %cst {dimension_numbers = #tpu.dot_dimension_numbers<[1], [0], [0], [1], [0, 0, 1, 1], [], []>} : vector<32x128xbf16>, vector<128x128xbf16>, vector<32x128xf32> -> vector<32x128xf32>
    %7 = arith.addf %3, %6 : vector<32x128xf32>
    %c0_6 = arith.constant 0 : index
    %c0_7 = arith.constant 0 : index
    %8 = vector.load %arg7[%c0_6, %c0_7] : memref<32x128xf32, #tpu.memory_space<vmem>>, vector<32x128xf32>
    tpu.vector_store %arg7[%c0_6, %c0_7], %7 {strides = array<i32>} : memref<32x128xf32, #tpu.memory_space<vmem>>, vector<32x128xf32>,
    %c0_i32_8 = arith.constant 0 : i32
    %9 = arith.cmpi eq, %arg2, %c0_i32_8 : i32
    %10 = arith.extui %9 : i1 to i32
    %c0_i32_9 = arith.constant 0 : i32
    %11 = arith.cmpi ne, %10, %c0_i32_9 : i32
    scf.if %11 {
      %c0_10 = arith.constant 0 : index
      %c0_11 = arith.constant 0 : index
      %12 = vector.load %arg7[%c0_10, %c0_11] : memref<32x128xf32, #tpu.memory_space<vmem>>, vector<32x128xf32>
      %c0_12 = arith.constant 0 : index
      %c0_13 = arith.constant 0 : index
      %13 = vector.load %arg5[%c0_12, %c0_13] : memref<1x128xf32, #tpu.memory_space<vmem>>, vector<1x128xf32>
      %14 = vector.broadcast %13 : vector<1x128xf32> to vector<32x128xf32>
      %15 = arith.addf %12, %14 : vector<32x128xf32>
      %16 = arith.truncf %15 : vector<32x128xf32> to vector<32x128xbf16>
      %c0_14 = arith.constant 0 : index
      %c0_15 = arith.constant 0 : index
      %17 = vector.load %arg6[%c0_14, %c0_15] : memref<32x128xbf16, #tpu.memory_space<vmem>>, vector<32x128xbf16>
      tpu.vector_store %arg6[%c0_14, %c0_15], %16 {strides = array<i32>} : memref<32x128xbf16, #tpu.memory_space<vmem>>, vector<32x128xbf16>,
    } else {
    }
    return
  }
  func.func @transform_0(%arg0: i32, %arg1: i32, %arg2: i32) -> (i32, i32) {
    %c0_i32 = arith.constant 0 : i32
    return %arg0, %arg2 : i32, i32
  }
  func.func @transform_1(%arg0: i32, %arg1: i32, %arg2: i32) -> (i32, i32) {
    %c0_i32 = arith.constant 0 : i32
    return %arg2, %arg1 : i32, i32
  }
  func.func @transform_2(%arg0: i32, %arg1: i32, %arg2: i32) -> (i32, i32) {
    %c0_i32 = arith.constant 0 : i32
    %c0_i32_0 = arith.constant 0 : i32
    return %c0_i32, %arg1 : i32, i32
  }
  func.func @transform_3(%arg0: i32, %arg1: i32, %arg2: i32) -> (i32, i32) {
    %c0_i32 = arith.constant 0 : i32
    return %arg0, %arg1 : i32, i32
  }
}

module attributes {stable_mosaic.version = 11 : i64} {
  func.func @_mm_res_kernel(%arg0: i32, %arg1: i32, %arg2: i32, %arg3: memref<32x128xbf16, #tpu.memory_space<vmem>>, %arg4: memref<128x128xbf16, #tpu.memory_space<vmem>>, %arg5: memref<1x128xf32, #tpu.memory_space<vmem>>, %arg6: memref<32x128xbf16, #tpu.memory_space<vmem>>, %arg7: memref<32x128xbf16, #tpu.memory_space<vmem>>, %arg8: memref<32x128xf32, #tpu.memory_space<vmem>>) attributes {dimension_semantics = [#tpu.dimension_semantics<parallel>, #tpu.dimension_semantics<parallel>, #tpu.dimension_semantics<arbitrary>], iteration_bounds = array<i64: 1, 1, 9>, scalar_prefetch = 0 : i64, scratch_operands = 1 : i64, tpu.core_type = #tpu.core_type<tc>, window_params = [{transform_indices = @transform_0, window_bounds = array<i64: 32, 128>}, {transform_indices = @transform_1, window_bounds = array<i64: 128, 128>}, {transform_indices = @transform_2, window_bounds = array<i64: 1, 128>}, {transform_indices = @transform_3, window_bounds = array<i64: 32, 128>}, {transform_indices = @transform_4, window_bounds = array<i64: 32, 128>}]} {
    %c0_i32 = arith.constant 0 : i32
    %0 = arith.cmpi eq, %arg2, %c0_i32 : i32
    %1 = arith.extui %0 : i1 to i32
    %c0_i32_0 = arith.constant 0 : i32
    %2 = arith.cmpi ne, %1, %c0_i32_0 : i32
    scf.if %2 {
      %cst_9 = arith.constant 0.000000e+00 : f32
      %12 = vector.broadcast %cst_9 : f32 to vector<32x128xf32>
      %c0_10 = arith.constant 0 : index
      %c0_11 = arith.constant 0 : index
      %13 = vector.load %arg8[%c0_10, %c0_11] : memref<32x128xf32, #tpu.memory_space<vmem>>, vector<32x128xf32>
      tpu.vector_store %arg8[%c0_10, %c0_11], %12 {strides = array<i32>} : memref<32x128xf32, #tpu.memory_space<vmem>>, vector<32x128xf32>,
    } else {
    }
    %c0 = arith.constant 0 : index
    %c0_1 = arith.constant 0 : index
    %3 = vector.load %arg8[%c0, %c0_1] : memref<32x128xf32, #tpu.memory_space<vmem>>, vector<32x128xf32>
    %c0_2 = arith.constant 0 : index
    %c0_3 = arith.constant 0 : index
    %4 = vector.load %arg3[%c0_2, %c0_3] : memref<32x128xbf16, #tpu.memory_space<vmem>>, vector<32x128xbf16>
    %c0_4 = arith.constant 0 : index
    %c0_5 = arith.constant 0 : index
    %5 = vector.load %arg4[%c0_4, %c0_5] : memref<128x128xbf16, #tpu.memory_space<vmem>>, vector<128x128xbf16>
    %cst = arith.constant dense<0.000000e+00> : vector<32x128xf32>
    %6 = tpu.matmul %4, %5, %cst {dimension_numbers = #tpu.dot_dimension_numbers<[1], [0], [0], [1], [0, 0, 1, 1], [], []>} : vector<32x128xbf16>, vector<128x128xbf16>, vector<32x128xf32> -> vector<32x128xf32>
    %7 = arith.addf %3, %6 : vector<32x128xf32>
    %c0_6 = arith.constant 0 : index
    %c0_7 = arith.constant 0 : index
    %8 = vector.load %arg8[%c0_6, %c0_7] : memref<32x128xf32, #tpu.memory_space<vmem>>, vector<32x128xf32>
    tpu.vector_store %arg8[%c0_6, %c0_7], %7 {strides = array<i32>} : memref<32x128xf32, #tpu.memory_space<vmem>>, vector<32x128xf32>,
    %c8_i32 = arith.constant 8 : i32
    %9 = arith.cmpi eq, %arg2, %c8_i32 : i32
    %10 = arith.extui %9 : i1 to i32
    %c0_i32_8 = arith.constant 0 : i32
    %11 = arith.cmpi ne, %10, %c0_i32_8 : i32
    scf.if %11 {
      %c0_9 = arith.constant 0 : index
      %c0_10 = arith.constant 0 : index
      %12 = vector.load %arg8[%c0_9, %c0_10] : memref<32x128xf32, #tpu.memory_space<vmem>>, vector<32x128xf32>
      %c0_11 = arith.constant 0 : index
      %c0_12 = arith.constant 0 : index
      %13 = vector.load %arg5[%c0_11, %c0_12] : memref<1x128xf32, #tpu.memory_space<vmem>>, vector<1x128xf32>
      %14 = vector.broadcast %13 : vector<1x128xf32> to vector<32x128xf32>
      %15 = arith.addf %12, %14 : vector<32x128xf32>
      %c0_13 = arith.constant 0 : index
      %c0_14 = arith.constant 0 : index
      %16 = vector.load %arg6[%c0_13, %c0_14] : memref<32x128xbf16, #tpu.memory_space<vmem>>, vector<32x128xbf16>
      %17 = arith.extf %16 : vector<32x128xbf16> to vector<32x128xf32>
      %18 = arith.addf %15, %17 : vector<32x128xf32>
      %cst_15 = arith.constant 0.000000e+00 : f32
      %19 = vector.broadcast %cst_15 : f32 to vector<32x128xf32>
      %20 = arith.maximumf %18, %19 : vector<32x128xf32>
      %21 = arith.truncf %20 : vector<32x128xf32> to vector<32x128xbf16>
      %c0_16 = arith.constant 0 : index
      %c0_17 = arith.constant 0 : index
      %22 = vector.load %arg7[%c0_16, %c0_17] : memref<32x128xbf16, #tpu.memory_space<vmem>>, vector<32x128xbf16>
      tpu.vector_store %arg7[%c0_16, %c0_17], %21 {strides = array<i32>} : memref<32x128xbf16, #tpu.memory_space<vmem>>, vector<32x128xbf16>,
    } else {
    }
    return
  }
  func.func @transform_0(%arg0: i32, %arg1: i32, %arg2: i32) -> (i32, i32) {
    %c0_i32 = arith.constant 0 : i32
    return %arg0, %arg2 : i32, i32
  }
  func.func @transform_1(%arg0: i32, %arg1: i32, %arg2: i32) -> (i32, i32) {
    %c0_i32 = arith.constant 0 : i32
    return %arg2, %arg1 : i32, i32
  }
  func.func @transform_2(%arg0: i32, %arg1: i32, %arg2: i32) -> (i32, i32) {
    %c0_i32 = arith.constant 0 : i32
    %c0_i32_0 = arith.constant 0 : i32
    return %c0_i32, %arg1 : i32, i32
  }
  func.func @transform_3(%arg0: i32, %arg1: i32, %arg2: i32) -> (i32, i32) {
    %c0_i32 = arith.constant 0 : i32
    return %arg0, %arg1 : i32, i32
  }
  func.func @transform_4(%arg0: i32, %arg1: i32, %arg2: i32) -> (i32, i32) {
    %c0_i32 = arith.constant 0 : i32
    return %arg0, %arg1 : i32, i32
  }
}

module attributes {stable_mosaic.version = 11 : i64} {
  func.func @_mm_kernel(%arg0: i32, %arg1: i32, %arg2: i32, %arg3: memref<32x128xbf16, #tpu.memory_space<vmem>>, %arg4: memref<128x128xbf16, #tpu.memory_space<vmem>>, %arg5: memref<1x128xf32, #tpu.memory_space<vmem>>, %arg6: memref<32x128xbf16, #tpu.memory_space<vmem>>, %arg7: memref<32x128xf32, #tpu.memory_space<vmem>>) attributes {dimension_semantics = [#tpu.dimension_semantics<parallel>, #tpu.dimension_semantics<parallel>, #tpu.dimension_semantics<arbitrary>], iteration_bounds = array<i64: 1, 1, 9>, scalar_prefetch = 0 : i64, scratch_operands = 1 : i64, tpu.core_type = #tpu.core_type<tc>, window_params = [{transform_indices = @transform_0, window_bounds = array<i64: 32, 128>}, {transform_indices = @transform_1, window_bounds = array<i64: 128, 128>}, {transform_indices = @transform_2, window_bounds = array<i64: 1, 128>}, {transform_indices = @transform_3, window_bounds = array<i64: 32, 128>}]} {
    %c0_i32 = arith.constant 0 : i32
    %0 = arith.cmpi eq, %arg2, %c0_i32 : i32
    %1 = arith.extui %0 : i1 to i32
    %c0_i32_0 = arith.constant 0 : i32
    %2 = arith.cmpi ne, %1, %c0_i32_0 : i32
    scf.if %2 {
      %cst_9 = arith.constant 0.000000e+00 : f32
      %12 = vector.broadcast %cst_9 : f32 to vector<32x128xf32>
      %c0_10 = arith.constant 0 : index
      %c0_11 = arith.constant 0 : index
      %13 = vector.load %arg7[%c0_10, %c0_11] : memref<32x128xf32, #tpu.memory_space<vmem>>, vector<32x128xf32>
      tpu.vector_store %arg7[%c0_10, %c0_11], %12 {strides = array<i32>} : memref<32x128xf32, #tpu.memory_space<vmem>>, vector<32x128xf32>,
    } else {
    }
    %c0 = arith.constant 0 : index
    %c0_1 = arith.constant 0 : index
    %3 = vector.load %arg7[%c0, %c0_1] : memref<32x128xf32, #tpu.memory_space<vmem>>, vector<32x128xf32>
    %c0_2 = arith.constant 0 : index
    %c0_3 = arith.constant 0 : index
    %4 = vector.load %arg3[%c0_2, %c0_3] : memref<32x128xbf16, #tpu.memory_space<vmem>>, vector<32x128xbf16>
    %c0_4 = arith.constant 0 : index
    %c0_5 = arith.constant 0 : index
    %5 = vector.load %arg4[%c0_4, %c0_5] : memref<128x128xbf16, #tpu.memory_space<vmem>>, vector<128x128xbf16>
    %cst = arith.constant dense<0.000000e+00> : vector<32x128xf32>
    %6 = tpu.matmul %4, %5, %cst {dimension_numbers = #tpu.dot_dimension_numbers<[1], [0], [0], [1], [0, 0, 1, 1], [], []>} : vector<32x128xbf16>, vector<128x128xbf16>, vector<32x128xf32> -> vector<32x128xf32>
    %7 = arith.addf %3, %6 : vector<32x128xf32>
    %c0_6 = arith.constant 0 : index
    %c0_7 = arith.constant 0 : index
    %8 = vector.load %arg7[%c0_6, %c0_7] : memref<32x128xf32, #tpu.memory_space<vmem>>, vector<32x128xf32>
    tpu.vector_store %arg7[%c0_6, %c0_7], %7 {strides = array<i32>} : memref<32x128xf32, #tpu.memory_space<vmem>>, vector<32x128xf32>,
    %c8_i32 = arith.constant 8 : i32
    %9 = arith.cmpi eq, %arg2, %c8_i32 : i32
    %10 = arith.extui %9 : i1 to i32
    %c0_i32_8 = arith.constant 0 : i32
    %11 = arith.cmpi ne, %10, %c0_i32_8 : i32
    scf.if %11 {
      %c0_9 = arith.constant 0 : index
      %c0_10 = arith.constant 0 : index
      %12 = vector.load %arg7[%c0_9, %c0_10] : memref<32x128xf32, #tpu.memory_space<vmem>>, vector<32x128xf32>
      %c0_11 = arith.constant 0 : index
      %c0_12 = arith.constant 0 : index
      %13 = vector.load %arg5[%c0_11, %c0_12] : memref<1x128xf32, #tpu.memory_space<vmem>>, vector<1x128xf32>
      %14 = vector.broadcast %13 : vector<1x128xf32> to vector<32x128xf32>
      %15 = arith.addf %12, %14 : vector<32x128xf32>
      %cst_13 = arith.constant 0.000000e+00 : f32
      %16 = vector.broadcast %cst_13 : f32 to vector<32x128xf32>
      %17 = arith.maximumf %15, %16 : vector<32x128xf32>
      %18 = arith.truncf %17 : vector<32x128xf32> to vector<32x128xbf16>
      %c0_14 = arith.constant 0 : index
      %c0_15 = arith.constant 0 : index
      %19 = vector.load %arg6[%c0_14, %c0_15] : memref<32x128xbf16, #tpu.memory_space<vmem>>, vector<32x128xbf16>
      tpu.vector_store %arg6[%c0_14, %c0_15], %18 {strides = array<i32>} : memref<32x128xbf16, #tpu.memory_space<vmem>>, vector<32x128xbf16>,
    } else {
    }
    return
  }
  func.func @transform_0(%arg0: i32, %arg1: i32, %arg2: i32) -> (i32, i32) {
    %c0_i32 = arith.constant 0 : i32
    return %arg0, %arg2 : i32, i32
  }
  func.func @transform_1(%arg0: i32, %arg1: i32, %arg2: i32) -> (i32, i32) {
    %c0_i32 = arith.constant 0 : i32
    return %arg2, %arg1 : i32, i32
  }
  func.func @transform_2(%arg0: i32, %arg1: i32, %arg2: i32) -> (i32, i32) {
    %c0_i32 = arith.constant 0 : i32
    %c0_i32_0 = arith.constant 0 : i32
    return %c0_i32, %arg1 : i32, i32
  }
  func.func @transform_3(%arg0: i32, %arg1: i32, %arg2: i32) -> (i32, i32) {
    %c0_i32 = arith.constant 0 : i32
    return %arg0, %arg1 : i32, i32
  }
}

module attributes {stable_mosaic.version = 11 : i64} {
  func.func @_mm_res_kernel(%arg0: i32, %arg1: i32, %arg2: i32, %arg3: memref<32x128xbf16, #tpu.memory_space<vmem>>, %arg4: memref<128x128xbf16, #tpu.memory_space<vmem>>, %arg5: memref<1x128xf32, #tpu.memory_space<vmem>>, %arg6: memref<32x128xbf16, #tpu.memory_space<vmem>>, %arg7: memref<32x128xbf16, #tpu.memory_space<vmem>>, %arg8: memref<32x128xf32, #tpu.memory_space<vmem>>) attributes {dimension_semantics = [#tpu.dimension_semantics<parallel>, #tpu.dimension_semantics<parallel>, #tpu.dimension_semantics<arbitrary>], iteration_bounds = array<i64: 1, 1, 9>, scalar_prefetch = 0 : i64, scratch_operands = 1 : i64, tpu.core_type = #tpu.core_type<tc>, window_params = [{transform_indices = @transform_0, window_bounds = array<i64: 32, 128>}, {transform_indices = @transform_1, window_bounds = array<i64: 128, 128>}, {transform_indices = @transform_2, window_bounds = array<i64: 1, 128>}, {transform_indices = @transform_3, window_bounds = array<i64: 32, 128>}, {transform_indices = @transform_4, window_bounds = array<i64: 32, 128>}]} {
    %c0_i32 = arith.constant 0 : i32
    %0 = arith.cmpi eq, %arg2, %c0_i32 : i32
    %1 = arith.extui %0 : i1 to i32
    %c0_i32_0 = arith.constant 0 : i32
    %2 = arith.cmpi ne, %1, %c0_i32_0 : i32
    scf.if %2 {
      %cst_9 = arith.constant 0.000000e+00 : f32
      %12 = vector.broadcast %cst_9 : f32 to vector<32x128xf32>
      %c0_10 = arith.constant 0 : index
      %c0_11 = arith.constant 0 : index
      %13 = vector.load %arg8[%c0_10, %c0_11] : memref<32x128xf32, #tpu.memory_space<vmem>>, vector<32x128xf32>
      tpu.vector_store %arg8[%c0_10, %c0_11], %12 {strides = array<i32>} : memref<32x128xf32, #tpu.memory_space<vmem>>, vector<32x128xf32>,
    } else {
    }
    %c0 = arith.constant 0 : index
    %c0_1 = arith.constant 0 : index
    %3 = vector.load %arg8[%c0, %c0_1] : memref<32x128xf32, #tpu.memory_space<vmem>>, vector<32x128xf32>
    %c0_2 = arith.constant 0 : index
    %c0_3 = arith.constant 0 : index
    %4 = vector.load %arg3[%c0_2, %c0_3] : memref<32x128xbf16, #tpu.memory_space<vmem>>, vector<32x128xbf16>
    %c0_4 = arith.constant 0 : index
    %c0_5 = arith.constant 0 : index
    %5 = vector.load %arg4[%c0_4, %c0_5] : memref<128x128xbf16, #tpu.memory_space<vmem>>, vector<128x128xbf16>
    %cst = arith.constant dense<0.000000e+00> : vector<32x128xf32>
    %6 = tpu.matmul %4, %5, %cst {dimension_numbers = #tpu.dot_dimension_numbers<[1], [0], [0], [1], [0, 0, 1, 1], [], []>} : vector<32x128xbf16>, vector<128x128xbf16>, vector<32x128xf32> -> vector<32x128xf32>
    %7 = arith.addf %3, %6 : vector<32x128xf32>
    %c0_6 = arith.constant 0 : index
    %c0_7 = arith.constant 0 : index
    %8 = vector.load %arg8[%c0_6, %c0_7] : memref<32x128xf32, #tpu.memory_space<vmem>>, vector<32x128xf32>
    tpu.vector_store %arg8[%c0_6, %c0_7], %7 {strides = array<i32>} : memref<32x128xf32, #tpu.memory_space<vmem>>, vector<32x128xf32>,
    %c8_i32 = arith.constant 8 : i32
    %9 = arith.cmpi eq, %arg2, %c8_i32 : i32
    %10 = arith.extui %9 : i1 to i32
    %c0_i32_8 = arith.constant 0 : i32
    %11 = arith.cmpi ne, %10, %c0_i32_8 : i32
    scf.if %11 {
      %c0_9 = arith.constant 0 : index
      %c0_10 = arith.constant 0 : index
      %12 = vector.load %arg8[%c0_9, %c0_10] : memref<32x128xf32, #tpu.memory_space<vmem>>, vector<32x128xf32>
      %c0_11 = arith.constant 0 : index
      %c0_12 = arith.constant 0 : index
      %13 = vector.load %arg5[%c0_11, %c0_12] : memref<1x128xf32, #tpu.memory_space<vmem>>, vector<1x128xf32>
      %14 = vector.broadcast %13 : vector<1x128xf32> to vector<32x128xf32>
      %15 = arith.addf %12, %14 : vector<32x128xf32>
      %c0_13 = arith.constant 0 : index
      %c0_14 = arith.constant 0 : index
      %16 = vector.load %arg6[%c0_13, %c0_14] : memref<32x128xbf16, #tpu.memory_space<vmem>>, vector<32x128xbf16>
      %17 = arith.extf %16 : vector<32x128xbf16> to vector<32x128xf32>
      %18 = arith.addf %15, %17 : vector<32x128xf32>
      %cst_15 = arith.constant 0.000000e+00 : f32
      %19 = vector.broadcast %cst_15 : f32 to vector<32x128xf32>
      %20 = arith.maximumf %18, %19 : vector<32x128xf32>
      %21 = arith.truncf %20 : vector<32x128xf32> to vector<32x128xbf16>
      %c0_16 = arith.constant 0 : index
      %c0_17 = arith.constant 0 : index
      %22 = vector.load %arg7[%c0_16, %c0_17] : memref<32x128xbf16, #tpu.memory_space<vmem>>, vector<32x128xbf16>
      tpu.vector_store %arg7[%c0_16, %c0_17], %21 {strides = array<i32>} : memref<32x128xbf16, #tpu.memory_space<vmem>>, vector<32x128xbf16>,
    } else {
    }
    return
  }
  func.func @transform_0(%arg0: i32, %arg1: i32, %arg2: i32) -> (i32, i32) {
    %c0_i32 = arith.constant 0 : i32
    return %arg0, %arg2 : i32, i32
  }
  func.func @transform_1(%arg0: i32, %arg1: i32, %arg2: i32) -> (i32, i32) {
    %c0_i32 = arith.constant 0 : i32
    return %arg2, %arg1 : i32, i32
  }
  func.func @transform_2(%arg0: i32, %arg1: i32, %arg2: i32) -> (i32, i32) {
    %c0_i32 = arith.constant 0 : i32
    %c0_i32_0 = arith.constant 0 : i32
    return %c0_i32, %arg1 : i32, i32
  }
  func.func @transform_3(%arg0: i32, %arg1: i32, %arg2: i32) -> (i32, i32) {
    %c0_i32 = arith.constant 0 : i32
    return %arg0, %arg1 : i32, i32
  }
  func.func @transform_4(%arg0: i32, %arg1: i32, %arg2: i32) -> (i32, i32) {
    %c0_i32 = arith.constant 0 : i32
    return %arg0, %arg1 : i32, i32
  }
}

module attributes {stable_mosaic.version = 11 : i64} {
  func.func @_mm_kernel(%arg0: i32, %arg1: i32, %arg2: i32, %arg3: memref<8x128xbf16, #tpu.memory_space<vmem>>, %arg4: memref<128x256xbf16, #tpu.memory_space<vmem>>, %arg5: memref<1x256xf32, #tpu.memory_space<vmem>>, %arg6: memref<8x256xbf16, #tpu.memory_space<vmem>>, %arg7: memref<8x256xf32, #tpu.memory_space<vmem>>) attributes {dimension_semantics = [#tpu.dimension_semantics<parallel>, #tpu.dimension_semantics<parallel>, #tpu.dimension_semantics<arbitrary>], iteration_bounds = array<i64: 1, 1, 9>, scalar_prefetch = 0 : i64, scratch_operands = 1 : i64, tpu.core_type = #tpu.core_type<tc>, window_params = [{transform_indices = @transform_0, window_bounds = array<i64: 8, 128>}, {transform_indices = @transform_1, window_bounds = array<i64: 128, 256>}, {transform_indices = @transform_2, window_bounds = array<i64: 1, 256>}, {transform_indices = @transform_3, window_bounds = array<i64: 8, 256>}]} {
    %c0_i32 = arith.constant 0 : i32
    %0 = arith.cmpi eq, %arg2, %c0_i32 : i32
    %1 = arith.extui %0 : i1 to i32
    %c0_i32_0 = arith.constant 0 : i32
    %2 = arith.cmpi ne, %1, %c0_i32_0 : i32
    scf.if %2 {
      %cst_9 = arith.constant 0.000000e+00 : f32
      %12 = vector.broadcast %cst_9 : f32 to vector<8x256xf32>
      %c0_10 = arith.constant 0 : index
      %c0_11 = arith.constant 0 : index
      %13 = vector.load %arg7[%c0_10, %c0_11] : memref<8x256xf32, #tpu.memory_space<vmem>>, vector<8x256xf32>
      tpu.vector_store %arg7[%c0_10, %c0_11], %12 {strides = array<i32>} : memref<8x256xf32, #tpu.memory_space<vmem>>, vector<8x256xf32>,
    } else {
    }
    %c0 = arith.constant 0 : index
    %c0_1 = arith.constant 0 : index
    %3 = vector.load %arg7[%c0, %c0_1] : memref<8x256xf32, #tpu.memory_space<vmem>>, vector<8x256xf32>
    %c0_2 = arith.constant 0 : index
    %c0_3 = arith.constant 0 : index
    %4 = vector.load %arg3[%c0_2, %c0_3] : memref<8x128xbf16, #tpu.memory_space<vmem>>, vector<8x128xbf16>
    %c0_4 = arith.constant 0 : index
    %c0_5 = arith.constant 0 : index
    %5 = vector.load %arg4[%c0_4, %c0_5] : memref<128x256xbf16, #tpu.memory_space<vmem>>, vector<128x256xbf16>
    %cst = arith.constant dense<0.000000e+00> : vector<8x256xf32>
    %6 = tpu.matmul %4, %5, %cst {dimension_numbers = #tpu.dot_dimension_numbers<[1], [0], [0], [1], [0, 0, 1, 1], [], []>} : vector<8x128xbf16>, vector<128x256xbf16>, vector<8x256xf32> -> vector<8x256xf32>
    %7 = arith.addf %3, %6 : vector<8x256xf32>
    %c0_6 = arith.constant 0 : index
    %c0_7 = arith.constant 0 : index
    %8 = vector.load %arg7[%c0_6, %c0_7] : memref<8x256xf32, #tpu.memory_space<vmem>>, vector<8x256xf32>
    tpu.vector_store %arg7[%c0_6, %c0_7], %7 {strides = array<i32>} : memref<8x256xf32, #tpu.memory_space<vmem>>, vector<8x256xf32>,
    %c8_i32 = arith.constant 8 : i32
    %9 = arith.cmpi eq, %arg2, %c8_i32 : i32
    %10 = arith.extui %9 : i1 to i32
    %c0_i32_8 = arith.constant 0 : i32
    %11 = arith.cmpi ne, %10, %c0_i32_8 : i32
    scf.if %11 {
      %c0_9 = arith.constant 0 : index
      %c0_10 = arith.constant 0 : index
      %12 = vector.load %arg7[%c0_9, %c0_10] : memref<8x256xf32, #tpu.memory_space<vmem>>, vector<8x256xf32>
      %c0_11 = arith.constant 0 : index
      %c0_12 = arith.constant 0 : index
      %13 = vector.load %arg5[%c0_11, %c0_12] : memref<1x256xf32, #tpu.memory_space<vmem>>, vector<1x256xf32>
      %14 = vector.broadcast %13 : vector<1x256xf32> to vector<8x256xf32>
      %15 = arith.addf %12, %14 : vector<8x256xf32>
      %cst_13 = arith.constant 0.000000e+00 : f32
      %16 = vector.broadcast %cst_13 : f32 to vector<8x256xf32>
      %17 = arith.maximumf %15, %16 : vector<8x256xf32>
      %18 = arith.truncf %17 : vector<8x256xf32> to vector<8x256xbf16>
      %c0_14 = arith.constant 0 : index
      %c0_15 = arith.constant 0 : index
      %19 = vector.load %arg6[%c0_14, %c0_15] : memref<8x256xbf16, #tpu.memory_space<vmem>>, vector<8x256xbf16>
      tpu.vector_store %arg6[%c0_14, %c0_15], %18 {strides = array<i32>} : memref<8x256xbf16, #tpu.memory_space<vmem>>, vector<8x256xbf16>,
    } else {
    }
    return
  }
  func.func @transform_0(%arg0: i32, %arg1: i32, %arg2: i32) -> (i32, i32) {
    %c0_i32 = arith.constant 0 : i32
    return %arg0, %arg2 : i32, i32
  }
  func.func @transform_1(%arg0: i32, %arg1: i32, %arg2: i32) -> (i32, i32) {
    %c0_i32 = arith.constant 0 : i32
    return %arg2, %arg1 : i32, i32
  }
  func.func @transform_2(%arg0: i32, %arg1: i32, %arg2: i32) -> (i32, i32) {
    %c0_i32 = arith.constant 0 : i32
    %c0_i32_0 = arith.constant 0 : i32
    return %c0_i32, %arg1 : i32, i32
  }
  func.func @transform_3(%arg0: i32, %arg1: i32, %arg2: i32) -> (i32, i32) {
    %c0_i32 = arith.constant 0 : i32
    return %arg0, %arg1 : i32, i32
  }
}

module attributes {stable_mosaic.version = 11 : i64} {
  func.func @_mm_kernel(%arg0: i32, %arg1: i32, %arg2: i32, %arg3: memref<8x128xbf16, #tpu.memory_space<vmem>>, %arg4: memref<128x256xbf16, #tpu.memory_space<vmem>>, %arg5: memref<1x256xf32, #tpu.memory_space<vmem>>, %arg6: memref<8x256xbf16, #tpu.memory_space<vmem>>, %arg7: memref<8x256xf32, #tpu.memory_space<vmem>>) attributes {dimension_semantics = [#tpu.dimension_semantics<parallel>, #tpu.dimension_semantics<parallel>, #tpu.dimension_semantics<arbitrary>], iteration_bounds = array<i64: 1, 1, 1>, scalar_prefetch = 0 : i64, scratch_operands = 1 : i64, tpu.core_type = #tpu.core_type<tc>, window_params = [{transform_indices = @transform_0, window_bounds = array<i64: 8, 128>}, {transform_indices = @transform_1, window_bounds = array<i64: 128, 256>}, {transform_indices = @transform_2, window_bounds = array<i64: 1, 256>}, {transform_indices = @transform_3, window_bounds = array<i64: 8, 256>}]} {
    %c0_i32 = arith.constant 0 : i32
    %0 = arith.cmpi eq, %arg2, %c0_i32 : i32
    %1 = arith.extui %0 : i1 to i32
    %c0_i32_0 = arith.constant 0 : i32
    %2 = arith.cmpi ne, %1, %c0_i32_0 : i32
    scf.if %2 {
      %cst_10 = arith.constant 0.000000e+00 : f32
      %12 = vector.broadcast %cst_10 : f32 to vector<8x256xf32>
      %c0_11 = arith.constant 0 : index
      %c0_12 = arith.constant 0 : index
      %13 = vector.load %arg7[%c0_11, %c0_12] : memref<8x256xf32, #tpu.memory_space<vmem>>, vector<8x256xf32>
      tpu.vector_store %arg7[%c0_11, %c0_12], %12 {strides = array<i32>} : memref<8x256xf32, #tpu.memory_space<vmem>>, vector<8x256xf32>,
    } else {
    }
    %c0 = arith.constant 0 : index
    %c0_1 = arith.constant 0 : index
    %3 = vector.load %arg7[%c0, %c0_1] : memref<8x256xf32, #tpu.memory_space<vmem>>, vector<8x256xf32>
    %c0_2 = arith.constant 0 : index
    %c0_3 = arith.constant 0 : index
    %4 = vector.load %arg3[%c0_2, %c0_3] : memref<8x128xbf16, #tpu.memory_space<vmem>>, vector<8x128xbf16>
    %c0_4 = arith.constant 0 : index
    %c0_5 = arith.constant 0 : index
    %5 = vector.load %arg4[%c0_4, %c0_5] : memref<128x256xbf16, #tpu.memory_space<vmem>>, vector<128x256xbf16>
    %cst = arith.constant dense<0.000000e+00> : vector<8x256xf32>
    %6 = tpu.matmul %4, %5, %cst {dimension_numbers = #tpu.dot_dimension_numbers<[1], [0], [0], [1], [0, 0, 1, 1], [], []>} : vector<8x128xbf16>, vector<128x256xbf16>, vector<8x256xf32> -> vector<8x256xf32>
    %7 = arith.addf %3, %6 : vector<8x256xf32>
    %c0_6 = arith.constant 0 : index
    %c0_7 = arith.constant 0 : index
    %8 = vector.load %arg7[%c0_6, %c0_7] : memref<8x256xf32, #tpu.memory_space<vmem>>, vector<8x256xf32>
    tpu.vector_store %arg7[%c0_6, %c0_7], %7 {strides = array<i32>} : memref<8x256xf32, #tpu.memory_space<vmem>>, vector<8x256xf32>,
    %c0_i32_8 = arith.constant 0 : i32
    %9 = arith.cmpi eq, %arg2, %c0_i32_8 : i32
    %10 = arith.extui %9 : i1 to i32
    %c0_i32_9 = arith.constant 0 : i32
    %11 = arith.cmpi ne, %10, %c0_i32_9 : i32
    scf.if %11 {
      %c0_10 = arith.constant 0 : index
      %c0_11 = arith.constant 0 : index
      %12 = vector.load %arg7[%c0_10, %c0_11] : memref<8x256xf32, #tpu.memory_space<vmem>>, vector<8x256xf32>
      %c0_12 = arith.constant 0 : index
      %c0_13 = arith.constant 0 : index
      %13 = vector.load %arg5[%c0_12, %c0_13] : memref<1x256xf32, #tpu.memory_space<vmem>>, vector<1x256xf32>
      %14 = vector.broadcast %13 : vector<1x256xf32> to vector<8x256xf32>
      %15 = arith.addf %12, %14 : vector<8x256xf32>
      %16 = arith.truncf %15 : vector<8x256xf32> to vector<8x256xbf16>
      %c0_14 = arith.constant 0 : index
      %c0_15 = arith.constant 0 : index
      %17 = vector.load %arg6[%c0_14, %c0_15] : memref<8x256xbf16, #tpu.memory_space<vmem>>, vector<8x256xbf16>
      tpu.vector_store %arg6[%c0_14, %c0_15], %16 {strides = array<i32>} : memref<8x256xbf16, #tpu.memory_space<vmem>>, vector<8x256xbf16>,
    } else {
    }
    return
  }
  func.func @transform_0(%arg0: i32, %arg1: i32, %arg2: i32) -> (i32, i32) {
    %c0_i32 = arith.constant 0 : i32
    return %arg0, %arg2 : i32, i32
  }
  func.func @transform_1(%arg0: i32, %arg1: i32, %arg2: i32) -> (i32, i32) {
    %c0_i32 = arith.constant 0 : i32
    return %arg2, %arg1 : i32, i32
  }
  func.func @transform_2(%arg0: i32, %arg1: i32, %arg2: i32) -> (i32, i32) {
    %c0_i32 = arith.constant 0 : i32
    %c0_i32_0 = arith.constant 0 : i32
    return %c0_i32, %arg1 : i32, i32
  }
  func.func @transform_3(%arg0: i32, %arg1: i32, %arg2: i32) -> (i32, i32) {
    %c0_i32 = arith.constant 0 : i32
    return %arg0, %arg1 : i32, i32
  }
}

module attributes {stable_mosaic.version = 11 : i64} {
  func.func @_mm_kernel(%arg0: i32, %arg1: i32, %arg2: i32, %arg3: memref<8x256xbf16, #tpu.memory_space<vmem>>, %arg4: memref<256x256xbf16, #tpu.memory_space<vmem>>, %arg5: memref<1x256xf32, #tpu.memory_space<vmem>>, %arg6: memref<8x256xbf16, #tpu.memory_space<vmem>>, %arg7: memref<8x256xf32, #tpu.memory_space<vmem>>) attributes {dimension_semantics = [#tpu.dimension_semantics<parallel>, #tpu.dimension_semantics<parallel>, #tpu.dimension_semantics<arbitrary>], iteration_bounds = array<i64: 1, 1, 9>, scalar_prefetch = 0 : i64, scratch_operands = 1 : i64, tpu.core_type = #tpu.core_type<tc>, window_params = [{transform_indices = @transform_0, window_bounds = array<i64: 8, 256>}, {transform_indices = @transform_1, window_bounds = array<i64: 256, 256>}, {transform_indices = @transform_2, window_bounds = array<i64: 1, 256>}, {transform_indices = @transform_3, window_bounds = array<i64: 8, 256>}]} {
    %c0_i32 = arith.constant 0 : i32
    %0 = arith.cmpi eq, %arg2, %c0_i32 : i32
    %1 = arith.extui %0 : i1 to i32
    %c0_i32_0 = arith.constant 0 : i32
    %2 = arith.cmpi ne, %1, %c0_i32_0 : i32
    scf.if %2 {
      %cst_9 = arith.constant 0.000000e+00 : f32
      %12 = vector.broadcast %cst_9 : f32 to vector<8x256xf32>
      %c0_10 = arith.constant 0 : index
      %c0_11 = arith.constant 0 : index
      %13 = vector.load %arg7[%c0_10, %c0_11] : memref<8x256xf32, #tpu.memory_space<vmem>>, vector<8x256xf32>
      tpu.vector_store %arg7[%c0_10, %c0_11], %12 {strides = array<i32>} : memref<8x256xf32, #tpu.memory_space<vmem>>, vector<8x256xf32>,
    } else {
    }
    %c0 = arith.constant 0 : index
    %c0_1 = arith.constant 0 : index
    %3 = vector.load %arg7[%c0, %c0_1] : memref<8x256xf32, #tpu.memory_space<vmem>>, vector<8x256xf32>
    %c0_2 = arith.constant 0 : index
    %c0_3 = arith.constant 0 : index
    %4 = vector.load %arg3[%c0_2, %c0_3] : memref<8x256xbf16, #tpu.memory_space<vmem>>, vector<8x256xbf16>
    %c0_4 = arith.constant 0 : index
    %c0_5 = arith.constant 0 : index
    %5 = vector.load %arg4[%c0_4, %c0_5] : memref<256x256xbf16, #tpu.memory_space<vmem>>, vector<256x256xbf16>
    %cst = arith.constant dense<0.000000e+00> : vector<8x256xf32>
    %6 = tpu.matmul %4, %5, %cst {dimension_numbers = #tpu.dot_dimension_numbers<[1], [0], [0], [1], [0, 0, 1, 1], [], []>} : vector<8x256xbf16>, vector<256x256xbf16>, vector<8x256xf32> -> vector<8x256xf32>
    %7 = arith.addf %3, %6 : vector<8x256xf32>
    %c0_6 = arith.constant 0 : index
    %c0_7 = arith.constant 0 : index
    %8 = vector.load %arg7[%c0_6, %c0_7] : memref<8x256xf32, #tpu.memory_space<vmem>>, vector<8x256xf32>
    tpu.vector_store %arg7[%c0_6, %c0_7], %7 {strides = array<i32>} : memref<8x256xf32, #tpu.memory_space<vmem>>, vector<8x256xf32>,
    %c8_i32 = arith.constant 8 : i32
    %9 = arith.cmpi eq, %arg2, %c8_i32 : i32
    %10 = arith.extui %9 : i1 to i32
    %c0_i32_8 = arith.constant 0 : i32
    %11 = arith.cmpi ne, %10, %c0_i32_8 : i32
    scf.if %11 {
      %c0_9 = arith.constant 0 : index
      %c0_10 = arith.constant 0 : index
      %12 = vector.load %arg7[%c0_9, %c0_10] : memref<8x256xf32, #tpu.memory_space<vmem>>, vector<8x256xf32>
      %c0_11 = arith.constant 0 : index
      %c0_12 = arith.constant 0 : index
      %13 = vector.load %arg5[%c0_11, %c0_12] : memref<1x256xf32, #tpu.memory_space<vmem>>, vector<1x256xf32>
      %14 = vector.broadcast %13 : vector<1x256xf32> to vector<8x256xf32>
      %15 = arith.addf %12, %14 : vector<8x256xf32>
      %cst_13 = arith.constant 0.000000e+00 : f32
      %16 = vector.broadcast %cst_13 : f32 to vector<8x256xf32>
      %17 = arith.maximumf %15, %16 : vector<8x256xf32>
      %18 = arith.truncf %17 : vector<8x256xf32> to vector<8x256xbf16>
      %c0_14 = arith.constant 0 : index
      %c0_15 = arith.constant 0 : index
      %19 = vector.load %arg6[%c0_14, %c0_15] : memref<8x256xbf16, #tpu.memory_space<vmem>>, vector<8x256xbf16>
      tpu.vector_store %arg6[%c0_14, %c0_15], %18 {strides = array<i32>} : memref<8x256xbf16, #tpu.memory_space<vmem>>, vector<8x256xbf16>,
    } else {
    }
    return
  }
  func.func @transform_0(%arg0: i32, %arg1: i32, %arg2: i32) -> (i32, i32) {
    %c0_i32 = arith.constant 0 : i32
    return %arg0, %arg2 : i32, i32
  }
  func.func @transform_1(%arg0: i32, %arg1: i32, %arg2: i32) -> (i32, i32) {
    %c0_i32 = arith.constant 0 : i32
    return %arg2, %arg1 : i32, i32
  }
  func.func @transform_2(%arg0: i32, %arg1: i32, %arg2: i32) -> (i32, i32) {
    %c0_i32 = arith.constant 0 : i32
    %c0_i32_0 = arith.constant 0 : i32
    return %c0_i32, %arg1 : i32, i32
  }
  func.func @transform_3(%arg0: i32, %arg1: i32, %arg2: i32) -> (i32, i32) {
    %c0_i32 = arith.constant 0 : i32
    return %arg0, %arg1 : i32, i32
  }
}

module attributes {stable_mosaic.version = 11 : i64} {
  func.func @_mm_res_kernel(%arg0: i32, %arg1: i32, %arg2: i32, %arg3: memref<8x256xbf16, #tpu.memory_space<vmem>>, %arg4: memref<256x256xbf16, #tpu.memory_space<vmem>>, %arg5: memref<1x256xf32, #tpu.memory_space<vmem>>, %arg6: memref<8x256xbf16, #tpu.memory_space<vmem>>, %arg7: memref<8x256xbf16, #tpu.memory_space<vmem>>, %arg8: memref<8x256xf32, #tpu.memory_space<vmem>>) attributes {dimension_semantics = [#tpu.dimension_semantics<parallel>, #tpu.dimension_semantics<parallel>, #tpu.dimension_semantics<arbitrary>], iteration_bounds = array<i64: 1, 1, 9>, scalar_prefetch = 0 : i64, scratch_operands = 1 : i64, tpu.core_type = #tpu.core_type<tc>, window_params = [{transform_indices = @transform_0, window_bounds = array<i64: 8, 256>}, {transform_indices = @transform_1, window_bounds = array<i64: 256, 256>}, {transform_indices = @transform_2, window_bounds = array<i64: 1, 256>}, {transform_indices = @transform_3, window_bounds = array<i64: 8, 256>}, {transform_indices = @transform_4, window_bounds = array<i64: 8, 256>}]} {
    %c0_i32 = arith.constant 0 : i32
    %0 = arith.cmpi eq, %arg2, %c0_i32 : i32
    %1 = arith.extui %0 : i1 to i32
    %c0_i32_0 = arith.constant 0 : i32
    %2 = arith.cmpi ne, %1, %c0_i32_0 : i32
    scf.if %2 {
      %cst_9 = arith.constant 0.000000e+00 : f32
      %12 = vector.broadcast %cst_9 : f32 to vector<8x256xf32>
      %c0_10 = arith.constant 0 : index
      %c0_11 = arith.constant 0 : index
      %13 = vector.load %arg8[%c0_10, %c0_11] : memref<8x256xf32, #tpu.memory_space<vmem>>, vector<8x256xf32>
      tpu.vector_store %arg8[%c0_10, %c0_11], %12 {strides = array<i32>} : memref<8x256xf32, #tpu.memory_space<vmem>>, vector<8x256xf32>,
    } else {
    }
    %c0 = arith.constant 0 : index
    %c0_1 = arith.constant 0 : index
    %3 = vector.load %arg8[%c0, %c0_1] : memref<8x256xf32, #tpu.memory_space<vmem>>, vector<8x256xf32>
    %c0_2 = arith.constant 0 : index
    %c0_3 = arith.constant 0 : index
    %4 = vector.load %arg3[%c0_2, %c0_3] : memref<8x256xbf16, #tpu.memory_space<vmem>>, vector<8x256xbf16>
    %c0_4 = arith.constant 0 : index
    %c0_5 = arith.constant 0 : index
    %5 = vector.load %arg4[%c0_4, %c0_5] : memref<256x256xbf16, #tpu.memory_space<vmem>>, vector<256x256xbf16>
    %cst = arith.constant dense<0.000000e+00> : vector<8x256xf32>
    %6 = tpu.matmul %4, %5, %cst {dimension_numbers = #tpu.dot_dimension_numbers<[1], [0], [0], [1], [0, 0, 1, 1], [], []>} : vector<8x256xbf16>, vector<256x256xbf16>, vector<8x256xf32> -> vector<8x256xf32>
    %7 = arith.addf %3, %6 : vector<8x256xf32>
    %c0_6 = arith.constant 0 : index
    %c0_7 = arith.constant 0 : index
    %8 = vector.load %arg8[%c0_6, %c0_7] : memref<8x256xf32, #tpu.memory_space<vmem>>, vector<8x256xf32>
    tpu.vector_store %arg8[%c0_6, %c0_7], %7 {strides = array<i32>} : memref<8x256xf32, #tpu.memory_space<vmem>>, vector<8x256xf32>,
    %c8_i32 = arith.constant 8 : i32
    %9 = arith.cmpi eq, %arg2, %c8_i32 : i32
    %10 = arith.extui %9 : i1 to i32
    %c0_i32_8 = arith.constant 0 : i32
    %11 = arith.cmpi ne, %10, %c0_i32_8 : i32
    scf.if %11 {
      %c0_9 = arith.constant 0 : index
      %c0_10 = arith.constant 0 : index
      %12 = vector.load %arg8[%c0_9, %c0_10] : memref<8x256xf32, #tpu.memory_space<vmem>>, vector<8x256xf32>
      %c0_11 = arith.constant 0 : index
      %c0_12 = arith.constant 0 : index
      %13 = vector.load %arg5[%c0_11, %c0_12] : memref<1x256xf32, #tpu.memory_space<vmem>>, vector<1x256xf32>
      %14 = vector.broadcast %13 : vector<1x256xf32> to vector<8x256xf32>
      %15 = arith.addf %12, %14 : vector<8x256xf32>
      %c0_13 = arith.constant 0 : index
      %c0_14 = arith.constant 0 : index
      %16 = vector.load %arg6[%c0_13, %c0_14] : memref<8x256xbf16, #tpu.memory_space<vmem>>, vector<8x256xbf16>
      %17 = arith.extf %16 : vector<8x256xbf16> to vector<8x256xf32>
      %18 = arith.addf %15, %17 : vector<8x256xf32>
      %cst_15 = arith.constant 0.000000e+00 : f32
      %19 = vector.broadcast %cst_15 : f32 to vector<8x256xf32>
      %20 = arith.maximumf %18, %19 : vector<8x256xf32>
      %21 = arith.truncf %20 : vector<8x256xf32> to vector<8x256xbf16>
      %c0_16 = arith.constant 0 : index
      %c0_17 = arith.constant 0 : index
      %22 = vector.load %arg7[%c0_16, %c0_17] : memref<8x256xbf16, #tpu.memory_space<vmem>>, vector<8x256xbf16>
      tpu.vector_store %arg7[%c0_16, %c0_17], %21 {strides = array<i32>} : memref<8x256xbf16, #tpu.memory_space<vmem>>, vector<8x256xbf16>,
    } else {
    }
    return
  }
  func.func @transform_0(%arg0: i32, %arg1: i32, %arg2: i32) -> (i32, i32) {
    %c0_i32 = arith.constant 0 : i32
    return %arg0, %arg2 : i32, i32
  }
  func.func @transform_1(%arg0: i32, %arg1: i32, %arg2: i32) -> (i32, i32) {
    %c0_i32 = arith.constant 0 : i32
    return %arg2, %arg1 : i32, i32
  }
  func.func @transform_2(%arg0: i32, %arg1: i32, %arg2: i32) -> (i32, i32) {
    %c0_i32 = arith.constant 0 : i32
    %c0_i32_0 = arith.constant 0 : i32
    return %c0_i32, %arg1 : i32, i32
  }
  func.func @transform_3(%arg0: i32, %arg1: i32, %arg2: i32) -> (i32, i32) {
    %c0_i32 = arith.constant 0 : i32
    return %arg0, %arg1 : i32, i32
  }
  func.func @transform_4(%arg0: i32, %arg1: i32, %arg2: i32) -> (i32, i32) {
    %c0_i32 = arith.constant 0 : i32
    return %arg0, %arg1 : i32, i32
  }
}

module attributes {stable_mosaic.version = 11 : i64} {
  func.func @_mm_kernel(%arg0: i32, %arg1: i32, %arg2: i32, %arg3: memref<8x256xbf16, #tpu.memory_space<vmem>>, %arg4: memref<256x256xbf16, #tpu.memory_space<vmem>>, %arg5: memref<1x256xf32, #tpu.memory_space<vmem>>, %arg6: memref<8x256xbf16, #tpu.memory_space<vmem>>, %arg7: memref<8x256xf32, #tpu.memory_space<vmem>>) attributes {dimension_semantics = [#tpu.dimension_semantics<parallel>, #tpu.dimension_semantics<parallel>, #tpu.dimension_semantics<arbitrary>], iteration_bounds = array<i64: 1, 2, 9>, scalar_prefetch = 0 : i64, scratch_operands = 1 : i64, tpu.core_type = #tpu.core_type<tc>, window_params = [{transform_indices = @transform_0, window_bounds = array<i64: 8, 256>}, {transform_indices = @transform_1, window_bounds = array<i64: 256, 256>}, {transform_indices = @transform_2, window_bounds = array<i64: 1, 256>}, {transform_indices = @transform_3, window_bounds = array<i64: 8, 256>}]} {
    %c0_i32 = arith.constant 0 : i32
    %0 = arith.cmpi eq, %arg2, %c0_i32 : i32
    %1 = arith.extui %0 : i1 to i32
    %c0_i32_0 = arith.constant 0 : i32
    %2 = arith.cmpi ne, %1, %c0_i32_0 : i32
    scf.if %2 {
      %cst_9 = arith.constant 0.000000e+00 : f32
      %12 = vector.broadcast %cst_9 : f32 to vector<8x256xf32>
      %c0_10 = arith.constant 0 : index
      %c0_11 = arith.constant 0 : index
      %13 = vector.load %arg7[%c0_10, %c0_11] : memref<8x256xf32, #tpu.memory_space<vmem>>, vector<8x256xf32>
      tpu.vector_store %arg7[%c0_10, %c0_11], %12 {strides = array<i32>} : memref<8x256xf32, #tpu.memory_space<vmem>>, vector<8x256xf32>,
    } else {
    }
    %c0 = arith.constant 0 : index
    %c0_1 = arith.constant 0 : index
    %3 = vector.load %arg7[%c0, %c0_1] : memref<8x256xf32, #tpu.memory_space<vmem>>, vector<8x256xf32>
    %c0_2 = arith.constant 0 : index
    %c0_3 = arith.constant 0 : index
    %4 = vector.load %arg3[%c0_2, %c0_3] : memref<8x256xbf16, #tpu.memory_space<vmem>>, vector<8x256xbf16>
    %c0_4 = arith.constant 0 : index
    %c0_5 = arith.constant 0 : index
    %5 = vector.load %arg4[%c0_4, %c0_5] : memref<256x256xbf16, #tpu.memory_space<vmem>>, vector<256x256xbf16>
    %cst = arith.constant dense<0.000000e+00> : vector<8x256xf32>
    %6 = tpu.matmul %4, %5, %cst {dimension_numbers = #tpu.dot_dimension_numbers<[1], [0], [0], [1], [0, 0, 1, 1], [], []>} : vector<8x256xbf16>, vector<256x256xbf16>, vector<8x256xf32> -> vector<8x256xf32>
    %7 = arith.addf %3, %6 : vector<8x256xf32>
    %c0_6 = arith.constant 0 : index
    %c0_7 = arith.constant 0 : index
    %8 = vector.load %arg7[%c0_6, %c0_7] : memref<8x256xf32, #tpu.memory_space<vmem>>, vector<8x256xf32>
    tpu.vector_store %arg7[%c0_6, %c0_7], %7 {strides = array<i32>} : memref<8x256xf32, #tpu.memory_space<vmem>>, vector<8x256xf32>,
    %c8_i32 = arith.constant 8 : i32
    %9 = arith.cmpi eq, %arg2, %c8_i32 : i32
    %10 = arith.extui %9 : i1 to i32
    %c0_i32_8 = arith.constant 0 : i32
    %11 = arith.cmpi ne, %10, %c0_i32_8 : i32
    scf.if %11 {
      %c0_9 = arith.constant 0 : index
      %c0_10 = arith.constant 0 : index
      %12 = vector.load %arg7[%c0_9, %c0_10] : memref<8x256xf32, #tpu.memory_space<vmem>>, vector<8x256xf32>
      %c0_11 = arith.constant 0 : index
      %c0_12 = arith.constant 0 : index
      %13 = vector.load %arg5[%c0_11, %c0_12] : memref<1x256xf32, #tpu.memory_space<vmem>>, vector<1x256xf32>
      %14 = vector.broadcast %13 : vector<1x256xf32> to vector<8x256xf32>
      %15 = arith.addf %12, %14 : vector<8x256xf32>
      %cst_13 = arith.constant 0.000000e+00 : f32
      %16 = vector.broadcast %cst_13 : f32 to vector<8x256xf32>
      %17 = arith.maximumf %15, %16 : vector<8x256xf32>
      %18 = arith.truncf %17 : vector<8x256xf32> to vector<8x256xbf16>
      %c0_14 = arith.constant 0 : index
      %c0_15 = arith.constant 0 : index
      %19 = vector.load %arg6[%c0_14, %c0_15] : memref<8x256xbf16, #tpu.memory_space<vmem>>, vector<8x256xbf16>
      tpu.vector_store %arg6[%c0_14, %c0_15], %18 {strides = array<i32>} : memref<8x256xbf16, #tpu.memory_space<vmem>>, vector<8x256xbf16>,
    } else {
    }
    return
  }
  func.func @transform_0(%arg0: i32, %arg1: i32, %arg2: i32) -> (i32, i32) {
    %c0_i32 = arith.constant 0 : i32
    return %arg0, %arg2 : i32, i32
  }
  func.func @transform_1(%arg0: i32, %arg1: i32, %arg2: i32) -> (i32, i32) {
    %c0_i32 = arith.constant 0 : i32
    return %arg2, %arg1 : i32, i32
  }
  func.func @transform_2(%arg0: i32, %arg1: i32, %arg2: i32) -> (i32, i32) {
    %c0_i32 = arith.constant 0 : i32
    %c0_i32_0 = arith.constant 0 : i32
    return %c0_i32, %arg1 : i32, i32
  }
  func.func @transform_3(%arg0: i32, %arg1: i32, %arg2: i32) -> (i32, i32) {
    %c0_i32 = arith.constant 0 : i32
    return %arg0, %arg1 : i32, i32
  }
}

module attributes {stable_mosaic.version = 11 : i64} {
  func.func @_mm_kernel(%arg0: i32, %arg1: i32, %arg2: i32, %arg3: memref<8x256xbf16, #tpu.memory_space<vmem>>, %arg4: memref<256x256xbf16, #tpu.memory_space<vmem>>, %arg5: memref<1x256xf32, #tpu.memory_space<vmem>>, %arg6: memref<8x256xbf16, #tpu.memory_space<vmem>>, %arg7: memref<8x256xf32, #tpu.memory_space<vmem>>) attributes {dimension_semantics = [#tpu.dimension_semantics<parallel>, #tpu.dimension_semantics<parallel>, #tpu.dimension_semantics<arbitrary>], iteration_bounds = array<i64: 1, 2, 1>, scalar_prefetch = 0 : i64, scratch_operands = 1 : i64, tpu.core_type = #tpu.core_type<tc>, window_params = [{transform_indices = @transform_0, window_bounds = array<i64: 8, 256>}, {transform_indices = @transform_1, window_bounds = array<i64: 256, 256>}, {transform_indices = @transform_2, window_bounds = array<i64: 1, 256>}, {transform_indices = @transform_3, window_bounds = array<i64: 8, 256>}]} {
    %c0_i32 = arith.constant 0 : i32
    %0 = arith.cmpi eq, %arg2, %c0_i32 : i32
    %1 = arith.extui %0 : i1 to i32
    %c0_i32_0 = arith.constant 0 : i32
    %2 = arith.cmpi ne, %1, %c0_i32_0 : i32
    scf.if %2 {
      %cst_10 = arith.constant 0.000000e+00 : f32
      %12 = vector.broadcast %cst_10 : f32 to vector<8x256xf32>
      %c0_11 = arith.constant 0 : index
      %c0_12 = arith.constant 0 : index
      %13 = vector.load %arg7[%c0_11, %c0_12] : memref<8x256xf32, #tpu.memory_space<vmem>>, vector<8x256xf32>
      tpu.vector_store %arg7[%c0_11, %c0_12], %12 {strides = array<i32>} : memref<8x256xf32, #tpu.memory_space<vmem>>, vector<8x256xf32>,
    } else {
    }
    %c0 = arith.constant 0 : index
    %c0_1 = arith.constant 0 : index
    %3 = vector.load %arg7[%c0, %c0_1] : memref<8x256xf32, #tpu.memory_space<vmem>>, vector<8x256xf32>
    %c0_2 = arith.constant 0 : index
    %c0_3 = arith.constant 0 : index
    %4 = vector.load %arg3[%c0_2, %c0_3] : memref<8x256xbf16, #tpu.memory_space<vmem>>, vector<8x256xbf16>
    %c0_4 = arith.constant 0 : index
    %c0_5 = arith.constant 0 : index
    %5 = vector.load %arg4[%c0_4, %c0_5] : memref<256x256xbf16, #tpu.memory_space<vmem>>, vector<256x256xbf16>
    %cst = arith.constant dense<0.000000e+00> : vector<8x256xf32>
    %6 = tpu.matmul %4, %5, %cst {dimension_numbers = #tpu.dot_dimension_numbers<[1], [0], [0], [1], [0, 0, 1, 1], [], []>} : vector<8x256xbf16>, vector<256x256xbf16>, vector<8x256xf32> -> vector<8x256xf32>
    %7 = arith.addf %3, %6 : vector<8x256xf32>
    %c0_6 = arith.constant 0 : index
    %c0_7 = arith.constant 0 : index
    %8 = vector.load %arg7[%c0_6, %c0_7] : memref<8x256xf32, #tpu.memory_space<vmem>>, vector<8x256xf32>
    tpu.vector_store %arg7[%c0_6, %c0_7], %7 {strides = array<i32>} : memref<8x256xf32, #tpu.memory_space<vmem>>, vector<8x256xf32>,
    %c0_i32_8 = arith.constant 0 : i32
    %9 = arith.cmpi eq, %arg2, %c0_i32_8 : i32
    %10 = arith.extui %9 : i1 to i32
    %c0_i32_9 = arith.constant 0 : i32
    %11 = arith.cmpi ne, %10, %c0_i32_9 : i32
    scf.if %11 {
      %c0_10 = arith.constant 0 : index
      %c0_11 = arith.constant 0 : index
      %12 = vector.load %arg7[%c0_10, %c0_11] : memref<8x256xf32, #tpu.memory_space<vmem>>, vector<8x256xf32>
      %c0_12 = arith.constant 0 : index
      %c0_13 = arith.constant 0 : index
      %13 = vector.load %arg5[%c0_12, %c0_13] : memref<1x256xf32, #tpu.memory_space<vmem>>, vector<1x256xf32>
      %14 = vector.broadcast %13 : vector<1x256xf32> to vector<8x256xf32>
      %15 = arith.addf %12, %14 : vector<8x256xf32>
      %16 = arith.truncf %15 : vector<8x256xf32> to vector<8x256xbf16>
      %c0_14 = arith.constant 0 : index
      %c0_15 = arith.constant 0 : index
      %17 = vector.load %arg6[%c0_14, %c0_15] : memref<8x256xbf16, #tpu.memory_space<vmem>>, vector<8x256xbf16>
      tpu.vector_store %arg6[%c0_14, %c0_15], %16 {strides = array<i32>} : memref<8x256xbf16, #tpu.memory_space<vmem>>, vector<8x256xbf16>,
    } else {
    }
    return
  }
  func.func @transform_0(%arg0: i32, %arg1: i32, %arg2: i32) -> (i32, i32) {
    %c0_i32 = arith.constant 0 : i32
    return %arg0, %arg2 : i32, i32
  }
  func.func @transform_1(%arg0: i32, %arg1: i32, %arg2: i32) -> (i32, i32) {
    %c0_i32 = arith.constant 0 : i32
    return %arg2, %arg1 : i32, i32
  }
  func.func @transform_2(%arg0: i32, %arg1: i32, %arg2: i32) -> (i32, i32) {
    %c0_i32 = arith.constant 0 : i32
    %c0_i32_0 = arith.constant 0 : i32
    return %c0_i32, %arg1 : i32, i32
  }
  func.func @transform_3(%arg0: i32, %arg1: i32, %arg2: i32) -> (i32, i32) {
    %c0_i32 = arith.constant 0 : i32
    return %arg0, %arg1 : i32, i32
  }
}

module attributes {stable_mosaic.version = 11 : i64} {
  func.func @_mm_res_kernel(%arg0: i32, %arg1: i32, %arg2: i32, %arg3: memref<8x512xbf16, #tpu.memory_space<vmem>>, %arg4: memref<512x256xbf16, #tpu.memory_space<vmem>>, %arg5: memref<1x256xf32, #tpu.memory_space<vmem>>, %arg6: memref<8x256xbf16, #tpu.memory_space<vmem>>, %arg7: memref<8x256xbf16, #tpu.memory_space<vmem>>, %arg8: memref<8x256xf32, #tpu.memory_space<vmem>>) attributes {dimension_semantics = [#tpu.dimension_semantics<parallel>, #tpu.dimension_semantics<parallel>, #tpu.dimension_semantics<arbitrary>], iteration_bounds = array<i64: 1, 2, 9>, scalar_prefetch = 0 : i64, scratch_operands = 1 : i64, tpu.core_type = #tpu.core_type<tc>, window_params = [{transform_indices = @transform_0, window_bounds = array<i64: 8, 512>}, {transform_indices = @transform_1, window_bounds = array<i64: 512, 256>}, {transform_indices = @transform_2, window_bounds = array<i64: 1, 256>}, {transform_indices = @transform_3, window_bounds = array<i64: 8, 256>}, {transform_indices = @transform_4, window_bounds = array<i64: 8, 256>}]} {
    %c0_i32 = arith.constant 0 : i32
    %0 = arith.cmpi eq, %arg2, %c0_i32 : i32
    %1 = arith.extui %0 : i1 to i32
    %c0_i32_0 = arith.constant 0 : i32
    %2 = arith.cmpi ne, %1, %c0_i32_0 : i32
    scf.if %2 {
      %cst_9 = arith.constant 0.000000e+00 : f32
      %12 = vector.broadcast %cst_9 : f32 to vector<8x256xf32>
      %c0_10 = arith.constant 0 : index
      %c0_11 = arith.constant 0 : index
      %13 = vector.load %arg8[%c0_10, %c0_11] : memref<8x256xf32, #tpu.memory_space<vmem>>, vector<8x256xf32>
      tpu.vector_store %arg8[%c0_10, %c0_11], %12 {strides = array<i32>} : memref<8x256xf32, #tpu.memory_space<vmem>>, vector<8x256xf32>,
    } else {
    }
    %c0 = arith.constant 0 : index
    %c0_1 = arith.constant 0 : index
    %3 = vector.load %arg8[%c0, %c0_1] : memref<8x256xf32, #tpu.memory_space<vmem>>, vector<8x256xf32>
    %c0_2 = arith.constant 0 : index
    %c0_3 = arith.constant 0 : index
    %4 = vector.load %arg3[%c0_2, %c0_3] : memref<8x512xbf16, #tpu.memory_space<vmem>>, vector<8x512xbf16>
    %c0_4 = arith.constant 0 : index
    %c0_5 = arith.constant 0 : index
    %5 = vector.load %arg4[%c0_4, %c0_5] : memref<512x256xbf16, #tpu.memory_space<vmem>>, vector<512x256xbf16>
    %cst = arith.constant dense<0.000000e+00> : vector<8x256xf32>
    %6 = tpu.matmul %4, %5, %cst {dimension_numbers = #tpu.dot_dimension_numbers<[1], [0], [0], [1], [0, 0, 1, 1], [], []>} : vector<8x512xbf16>, vector<512x256xbf16>, vector<8x256xf32> -> vector<8x256xf32>
    %7 = arith.addf %3, %6 : vector<8x256xf32>
    %c0_6 = arith.constant 0 : index
    %c0_7 = arith.constant 0 : index
    %8 = vector.load %arg8[%c0_6, %c0_7] : memref<8x256xf32, #tpu.memory_space<vmem>>, vector<8x256xf32>
    tpu.vector_store %arg8[%c0_6, %c0_7], %7 {strides = array<i32>} : memref<8x256xf32, #tpu.memory_space<vmem>>, vector<8x256xf32>,
    %c8_i32 = arith.constant 8 : i32
    %9 = arith.cmpi eq, %arg2, %c8_i32 : i32
    %10 = arith.extui %9 : i1 to i32
    %c0_i32_8 = arith.constant 0 : i32
    %11 = arith.cmpi ne, %10, %c0_i32_8 : i32
    scf.if %11 {
      %c0_9 = arith.constant 0 : index
      %c0_10 = arith.constant 0 : index
      %12 = vector.load %arg8[%c0_9, %c0_10] : memref<8x256xf32, #tpu.memory_space<vmem>>, vector<8x256xf32>
      %c0_11 = arith.constant 0 : index
      %c0_12 = arith.constant 0 : index
      %13 = vector.load %arg5[%c0_11, %c0_12] : memref<1x256xf32, #tpu.memory_space<vmem>>, vector<1x256xf32>
      %14 = vector.broadcast %13 : vector<1x256xf32> to vector<8x256xf32>
      %15 = arith.addf %12, %14 : vector<8x256xf32>
      %c0_13 = arith.constant 0 : index
      %c0_14 = arith.constant 0 : index
      %16 = vector.load %arg6[%c0_13, %c0_14] : memref<8x256xbf16, #tpu.memory_space<vmem>>, vector<8x256xbf16>
      %17 = arith.extf %16 : vector<8x256xbf16> to vector<8x256xf32>
      %18 = arith.addf %15, %17 : vector<8x256xf32>
      %cst_15 = arith.constant 0.000000e+00 : f32
      %19 = vector.broadcast %cst_15 : f32 to vector<8x256xf32>
      %20 = arith.maximumf %18, %19 : vector<8x256xf32>
      %21 = arith.truncf %20 : vector<8x256xf32> to vector<8x256xbf16>
      %c0_16 = arith.constant 0 : index
      %c0_17 = arith.constant 0 : index
      %22 = vector.load %arg7[%c0_16, %c0_17] : memref<8x256xbf16, #tpu.memory_space<vmem>>, vector<8x256xbf16>
      tpu.vector_store %arg7[%c0_16, %c0_17], %21 {strides = array<i32>} : memref<8x256xbf16, #tpu.memory_space<vmem>>, vector<8x256xbf16>,
    } else {
    }
    return
  }
  func.func @transform_0(%arg0: i32, %arg1: i32, %arg2: i32) -> (i32, i32) {
    %c0_i32 = arith.constant 0 : i32
    return %arg0, %arg2 : i32, i32
  }
  func.func @transform_1(%arg0: i32, %arg1: i32, %arg2: i32) -> (i32, i32) {
    %c0_i32 = arith.constant 0 : i32
    return %arg2, %arg1 : i32, i32
  }
  func.func @transform_2(%arg0: i32, %arg1: i32, %arg2: i32) -> (i32, i32) {
    %c0_i32 = arith.constant 0 : i32
    %c0_i32_0 = arith.constant 0 : i32
    return %c0_i32, %arg1 : i32, i32
  }
  func.func @transform_3(%arg0: i32, %arg1: i32, %arg2: i32) -> (i32, i32) {
    %c0_i32 = arith.constant 0 : i32
    return %arg0, %arg1 : i32, i32
  }
  func.func @transform_4(%arg0: i32, %arg1: i32, %arg2: i32) -> (i32, i32) {
    %c0_i32 = arith.constant 0 : i32
    return %arg0, %arg1 : i32, i32
  }
}

module attributes {stable_mosaic.version = 11 : i64} {
  func.func @_mm_kernel(%arg0: i32, %arg1: i32, %arg2: i32, %arg3: memref<8x512xbf16, #tpu.memory_space<vmem>>, %arg4: memref<512x256xbf16, #tpu.memory_space<vmem>>, %arg5: memref<1x256xf32, #tpu.memory_space<vmem>>, %arg6: memref<8x256xbf16, #tpu.memory_space<vmem>>, %arg7: memref<8x256xf32, #tpu.memory_space<vmem>>) attributes {dimension_semantics = [#tpu.dimension_semantics<parallel>, #tpu.dimension_semantics<parallel>, #tpu.dimension_semantics<arbitrary>], iteration_bounds = array<i64: 1, 2, 9>, scalar_prefetch = 0 : i64, scratch_operands = 1 : i64, tpu.core_type = #tpu.core_type<tc>, window_params = [{transform_indices = @transform_0, window_bounds = array<i64: 8, 512>}, {transform_indices = @transform_1, window_bounds = array<i64: 512, 256>}, {transform_indices = @transform_2, window_bounds = array<i64: 1, 256>}, {transform_indices = @transform_3, window_bounds = array<i64: 8, 256>}]} {
    %c0_i32 = arith.constant 0 : i32
    %0 = arith.cmpi eq, %arg2, %c0_i32 : i32
    %1 = arith.extui %0 : i1 to i32
    %c0_i32_0 = arith.constant 0 : i32
    %2 = arith.cmpi ne, %1, %c0_i32_0 : i32
    scf.if %2 {
      %cst_9 = arith.constant 0.000000e+00 : f32
      %12 = vector.broadcast %cst_9 : f32 to vector<8x256xf32>
      %c0_10 = arith.constant 0 : index
      %c0_11 = arith.constant 0 : index
      %13 = vector.load %arg7[%c0_10, %c0_11] : memref<8x256xf32, #tpu.memory_space<vmem>>, vector<8x256xf32>
      tpu.vector_store %arg7[%c0_10, %c0_11], %12 {strides = array<i32>} : memref<8x256xf32, #tpu.memory_space<vmem>>, vector<8x256xf32>,
    } else {
    }
    %c0 = arith.constant 0 : index
    %c0_1 = arith.constant 0 : index
    %3 = vector.load %arg7[%c0, %c0_1] : memref<8x256xf32, #tpu.memory_space<vmem>>, vector<8x256xf32>
    %c0_2 = arith.constant 0 : index
    %c0_3 = arith.constant 0 : index
    %4 = vector.load %arg3[%c0_2, %c0_3] : memref<8x512xbf16, #tpu.memory_space<vmem>>, vector<8x512xbf16>
    %c0_4 = arith.constant 0 : index
    %c0_5 = arith.constant 0 : index
    %5 = vector.load %arg4[%c0_4, %c0_5] : memref<512x256xbf16, #tpu.memory_space<vmem>>, vector<512x256xbf16>
    %cst = arith.constant dense<0.000000e+00> : vector<8x256xf32>
    %6 = tpu.matmul %4, %5, %cst {dimension_numbers = #tpu.dot_dimension_numbers<[1], [0], [0], [1], [0, 0, 1, 1], [], []>} : vector<8x512xbf16>, vector<512x256xbf16>, vector<8x256xf32> -> vector<8x256xf32>
    %7 = arith.addf %3, %6 : vector<8x256xf32>
    %c0_6 = arith.constant 0 : index
    %c0_7 = arith.constant 0 : index
    %8 = vector.load %arg7[%c0_6, %c0_7] : memref<8x256xf32, #tpu.memory_space<vmem>>, vector<8x256xf32>
    tpu.vector_store %arg7[%c0_6, %c0_7], %7 {strides = array<i32>} : memref<8x256xf32, #tpu.memory_space<vmem>>, vector<8x256xf32>,
    %c8_i32 = arith.constant 8 : i32
    %9 = arith.cmpi eq, %arg2, %c8_i32 : i32
    %10 = arith.extui %9 : i1 to i32
    %c0_i32_8 = arith.constant 0 : i32
    %11 = arith.cmpi ne, %10, %c0_i32_8 : i32
    scf.if %11 {
      %c0_9 = arith.constant 0 : index
      %c0_10 = arith.constant 0 : index
      %12 = vector.load %arg7[%c0_9, %c0_10] : memref<8x256xf32, #tpu.memory_space<vmem>>, vector<8x256xf32>
      %c0_11 = arith.constant 0 : index
      %c0_12 = arith.constant 0 : index
      %13 = vector.load %arg5[%c0_11, %c0_12] : memref<1x256xf32, #tpu.memory_space<vmem>>, vector<1x256xf32>
      %14 = vector.broadcast %13 : vector<1x256xf32> to vector<8x256xf32>
      %15 = arith.addf %12, %14 : vector<8x256xf32>
      %cst_13 = arith.constant 0.000000e+00 : f32
      %16 = vector.broadcast %cst_13 : f32 to vector<8x256xf32>
      %17 = arith.maximumf %15, %16 : vector<8x256xf32>
      %18 = arith.truncf %17 : vector<8x256xf32> to vector<8x256xbf16>
      %c0_14 = arith.constant 0 : index
      %c0_15 = arith.constant 0 : index
      %19 = vector.load %arg6[%c0_14, %c0_15] : memref<8x256xbf16, #tpu.memory_space<vmem>>, vector<8x256xbf16>
      tpu.vector_store %arg6[%c0_14, %c0_15], %18 {strides = array<i32>} : memref<8x256xbf16, #tpu.memory_space<vmem>>, vector<8x256xbf16>,
    } else {
    }
    return
  }
  func.func @transform_0(%arg0: i32, %arg1: i32, %arg2: i32) -> (i32, i32) {
    %c0_i32 = arith.constant 0 : i32
    return %arg0, %arg2 : i32, i32
  }
  func.func @transform_1(%arg0: i32, %arg1: i32, %arg2: i32) -> (i32, i32) {
    %c0_i32 = arith.constant 0 : i32
    return %arg2, %arg1 : i32, i32
  }
  func.func @transform_2(%arg0: i32, %arg1: i32, %arg2: i32) -> (i32, i32) {
    %c0_i32 = arith.constant 0 : i32
    %c0_i32_0 = arith.constant 0 : i32
    return %c0_i32, %arg1 : i32, i32
  }
  func.func @transform_3(%arg0: i32, %arg1: i32, %arg2: i32) -> (i32, i32) {
    %c0_i32 = arith.constant 0 : i32
    return %arg0, %arg1 : i32, i32
  }
}

module attributes {stable_mosaic.version = 11 : i64} {
  func.func @_head_kernel(%arg0: i32, %arg1: memref<8x1x512xbf16, #tpu.memory_space<vmem>>, %arg2: memref<512x512xbf16, #tpu.memory_space<vmem>>, %arg3: memref<1x512xf32, #tpu.memory_space<vmem>>, %arg4: memref<512x128xbf16, #tpu.memory_space<vmem>>, %arg5: memref<1x128xf32, #tpu.memory_space<vmem>>, %arg6: memref<8x128xf32, #tpu.memory_space<vmem>>) attributes {dimension_semantics = [#tpu.dimension_semantics<arbitrary>], iteration_bounds = array<i64: 1>, scalar_prefetch = 0 : i64, scratch_operands = 0 : i64, tpu.core_type = #tpu.core_type<tc>, window_params = [{pipeline_mode = #tpu.pipeline_mode<synchronous>, transform_indices = @transform_0, window_bounds = array<i64: 8, 1, 512>}, {pipeline_mode = #tpu.pipeline_mode<synchronous>, transform_indices = @transform_1, window_bounds = array<i64: 512, 512>}, {pipeline_mode = #tpu.pipeline_mode<synchronous>, transform_indices = @transform_2, window_bounds = array<i64: 1, 512>}, {pipeline_mode = #tpu.pipeline_mode<synchronous>, transform_indices = @transform_3, window_bounds = array<i64: 512, 128>}, {pipeline_mode = #tpu.pipeline_mode<synchronous>, transform_indices = @transform_4, window_bounds = array<i64: 1, 128>}, {pipeline_mode = #tpu.pipeline_mode<synchronous>, transform_indices = @transform_5, window_bounds = array<i64: 8, 128>}]} {
    %c0 = arith.constant 0 : index
    %c0_0 = arith.constant 0 : index
    %c0_1 = arith.constant 0 : index
    %0 = vector.load %arg1[%c0, %c0_0, %c0_1] : memref<8x1x512xbf16, #tpu.memory_space<vmem>>, vector<8x1x512xbf16>
    %1 = arith.extf %0 : vector<8x1x512xbf16> to vector<8x1x512xf32>
    %cst = arith.constant dense<0.000000e+00> : vector<8x512xf32>
    %2 = vector.multi_reduction <add>, %1, %cst [1] : vector<8x1x512xf32> to vector<8x512xf32>
    %cst_2 = arith.constant 1.000000e+00 : f32
    %3 = vector.broadcast %cst_2 : f32 to vector<8x512xf32>
    %4 = arith.mulf %2, %3 : vector<8x512xf32>
    %5 = arith.truncf %4 : vector<8x512xf32> to vector<8x512xbf16>
    %c0_3 = arith.constant 0 : index
    %c0_4 = arith.constant 0 : index
    %6 = vector.load %arg2[%c0_3, %c0_4] : memref<512x512xbf16, #tpu.memory_space<vmem>>, vector<512x512xbf16>
    %cst_5 = arith.constant dense<0.000000e+00> : vector<8x512xf32>
    %7 = tpu.matmul %5, %6, %cst_5 {dimension_numbers = #tpu.dot_dimension_numbers<[1], [0], [0], [1], [0, 0, 1, 1], [], []>} : vector<8x512xbf16>, vector<512x512xbf16>, vector<8x512xf32> -> vector<8x512xf32>
    %c0_6 = arith.constant 0 : index
    %c0_7 = arith.constant 0 : index
    %8 = vector.load %arg3[%c0_6, %c0_7] : memref<1x512xf32, #tpu.memory_space<vmem>>, vector<1x512xf32>
    %9 = vector.broadcast %8 : vector<1x512xf32> to vector<8x512xf32>
    %10 = arith.addf %7, %9 : vector<8x512xf32>
    %cst_8 = arith.constant 0.000000e+00 : f32
    %11 = vector.broadcast %cst_8 : f32 to vector<8x512xf32>
    %12 = arith.maximumf %10, %11 : vector<8x512xf32>
    %13 = arith.truncf %12 : vector<8x512xf32> to vector<8x512xbf16>
    %c0_9 = arith.constant 0 : index
    %c0_10 = arith.constant 0 : index
    %14 = vector.load %arg4[%c0_9, %c0_10] : memref<512x128xbf16, #tpu.memory_space<vmem>>, vector<512x128xbf16>
    %cst_11 = arith.constant dense<0.000000e+00> : vector<8x128xf32>
    %15 = tpu.matmul %13, %14, %cst_11 {dimension_numbers = #tpu.dot_dimension_numbers<[1], [0], [0], [1], [0, 0, 1, 1], [], []>} : vector<8x512xbf16>, vector<512x128xbf16>, vector<8x128xf32> -> vector<8x128xf32>
    %c0_12 = arith.constant 0 : index
    %c0_13 = arith.constant 0 : index
    %16 = vector.load %arg5[%c0_12, %c0_13] : memref<1x128xf32, #tpu.memory_space<vmem>>, vector<1x128xf32>
    %17 = vector.broadcast %16 : vector<1x128xf32> to vector<8x128xf32>
    %18 = arith.addf %15, %17 : vector<8x128xf32>
    %c0_14 = arith.constant 0 : index
    %c0_15 = arith.constant 0 : index
    %19 = vector.load %arg6[%c0_14, %c0_15] : memref<8x128xf32, #tpu.memory_space<vmem>>, vector<8x128xf32>
    tpu.vector_store %arg6[%c0_14, %c0_15], %18 {strides = array<i32>} : memref<8x128xf32, #tpu.memory_space<vmem>>, vector<8x128xf32>,
    return
  }
  func.func @transform_0(%arg0: i32) -> (i32, i32, i32) {
    %c0_i32 = arith.constant 0 : i32
    %c0_i32_0 = arith.constant 0 : i32
    %c0_i32_1 = arith.constant 0 : i32
    %c0_i32_2 = arith.constant 0 : i32
    return %c0_i32, %c0_i32_0, %c0_i32_1 : i32, i32, i32
  }
  func.func @transform_1(%arg0: i32) -> (i32, i32) {
    %c0_i32 = arith.constant 0 : i32
    %c0_i32_0 = arith.constant 0 : i32
    %c0_i32_1 = arith.constant 0 : i32
    return %c0_i32, %c0_i32_0 : i32, i32
  }
  func.func @transform_2(%arg0: i32) -> (i32, i32) {
    %c0_i32 = arith.constant 0 : i32
    %c0_i32_0 = arith.constant 0 : i32
    %c0_i32_1 = arith.constant 0 : i32
    return %c0_i32, %c0_i32_0 : i32, i32
  }
  func.func @transform_3(%arg0: i32) -> (i32, i32) {
    %c0_i32 = arith.constant 0 : i32
    %c0_i32_0 = arith.constant 0 : i32
    %c0_i32_1 = arith.constant 0 : i32
    return %c0_i32, %c0_i32_0 : i32, i32
  }
  func.func @transform_4(%arg0: i32) -> (i32, i32) {
    %c0_i32 = arith.constant 0 : i32
    %c0_i32_0 = arith.constant 0 : i32
    %c0_i32_1 = arith.constant 0 : i32
    return %c0_i32, %c0_i32_0 : i32, i32
  }
  func.func @transform_5(%arg0: i32) -> (i32, i32) {
    %c0_i32 = arith.constant 0 : i32
    %c0_i32_0 = arith.constant 0 : i32
    %c0_i32_1 = arith.constant 0 : i32
    return %c0_i32, %c0_i32_0 : i32, i32
  }
}

</mosaic_0001>

<bundles_post_ra>
// kernel: _lambda_.22
= control target key start
LH: loop header
LB: loop body
LE: loop exit
PB: predicated region body
PF: predicated region fallthrough
CT: control target
= control target key end

     0   :  { %s1613_s12 = smov 0   ;;  %s1615_s13 = smov 0   ;;  %s1822_s0 = inlined_call_operand.vmem [shape: bf16[512,256], index: 0, kind: input, shape index: {}]   ;;  %s1823_s1 = inlined_call_operand.vmem [shape: bf16[256,128], index: 1, kind: input, shape index: {}]   ;;  %s1824_s2 = inlined_call_operand.vmem [shape: f32[1,128], index: 2, kind: input, shape index: {}]   ;;  %s1825_s3 = inlined_call_operand.vmem [shape: bf16[512,128], index: 3, kind: output, shape index: {}]  }
   0x1   :  { %s1617_s14 = smov 0  }
   0x2 LB: > { %s32_s15 = sadd.s32 1, %s1587_s13  ;;  %p1184_p0 = scmp.ge.s32.totalorder %s1591_s14, 1  ;;  %s1591_s14 = sphi %s1617_s14, %s13_s14   ;;  %s1587_s13 = sphi %s1615_s13, %s1827_s13   ;;  %s1583_s12 = sphi %s1613_s12, %s1826_s12  }
   0x3   : > { %p34_p1 = scmp.ge.s32.totalorder %s32_s15, 2  ;;  %p191_p2 = scmp.lt.s32.totalorder %s1591_s14, 3 }
   0x5   : > { %s1829_s15 = smov (%p34_p1, %s32_s15), 0  ;;  %p192_p3 = pnand %p1184_p0, %p191_p2 }
   0x6   : > { %s1185_s28 = sshll.u32 (!%p192_p3), %s1583_s12, 5 }
   0x7   : > { %195 = sbr.rel (%p192_p3) target bundleno = 306 (0x132), region = 32  ;;  %p236_p4 = scmp.lt.s32.totalorder (!%p192_p3), %s1185_s28, 63 }
   0xc   : > { %v1424_v0 = vld [vmem:[%s1823_s1 + $0x38] sm:$0xff]  ;;  %v1423_v2 = vld [vmem:[%s1823_s1 + $0x30] sm:$0xff]  ;;  %v1422_v4 = vld [vmem:[%s1823_s1 + $0x28] sm:$0xff]  ;;  %s1831_s28 = smov (!%p236_p4, %s1185_s28), 63 }
   0xd   : > { %v1432_v1 = vld [vmem:[%s1823_s1 + $0x78] sm:$0xff]  ;;  %655 = vmatpush.bf16.msra.mxu0 %v1424_v0  ;;  %1528 = vmatpush.bf16.msra.mxu2 %v1424_v0  ;;  %v1431_v3 = vld [vmem:[%s1823_s1 + $0x70] sm:$0xff]  ;;  %v1430_v5 = vld [vmem:[%s1823_s1 + $0x68] sm:$0xff]  ;;  %s1384_s17 = sshll.u32 %s1831_s28, 3  ;;  %s1189_s5 = sshll.u32 %s1831_s28, 2 }
   0xe   : > { %744 = vmatpush.bf16.msra.mxu1 %v1432_v1  ;;  %1536 = vmatpush.bf16.msra.mxu3 %v1432_v1  ;;  %v1421_v6 = vld [vmem:[%s1823_s1 + $0x20] sm:$0xff]  ;;  %v1420_v8 = vld [vmem:[%s1823_s1 + $0x18] sm:$0xff]  ;;  %v1419_v10 = vld [vmem:[%s1823_s1 + $0x10] sm:$0xff]  ;;  %s1679_s22 = scalar_lea.vmem %s1822_s0, %s1384_s17  ;;  %s1765_s8 = scalar_lea.vmem %s1825_s3, %s1189_s5 }
   0xf   : > { %v1429_v7 = vld [vmem:[%s1823_s1 + $0x60] sm:$0xff]  ;;  %v1428_v9 = vld [vmem:[%s1823_s1 + $0x58] sm:$0xff]  ;;  %v1427_v11 = vld [vmem:[%s1823_s1 + $0x50] sm:$0xff] }
  0x10   : > { %v1418_v12 = vld [vmem:[%s1823_s1 + $0x8] sm:$0xff]  ;;  %v1417_v14 = vld [vmem:[%s1823_s1] sm:$0xff]  ;;  %v1200_v28 = vld [vmem:[%s1679_s22 + $0x10] sm:$0xf] }
  0x11   : > { %656 = vmatpush.bf16.msra.mxu0 %v1423_v2  ;;  %1529 = vmatpush.bf16.msra.mxu2 %v1423_v2  ;;  %v1426_v13 = vld [vmem:[%s1823_s1 + $0x48] sm:$0xff]  ;;  %v1425_v15 = vld [vmem:[%s1823_s1 + $0x40] sm:$0xff]  ;;  %v1388_v29 = vld [vmem:[%s1679_s22 + $0x14] sm:$0xf0] }
  0x12   : > { %745 = vmatpush.bf16.msra.mxu1 %v1431_v3  ;;  %1537 = vmatpush.bf16.msra.mxu3 %v1431_v3  ;;  %v1192_v16 = vld [vmem:[%s1679_s22] sm:$0xf]  ;;  %v1386_v17 = vld [vmem:[%s1679_s22 + $0x4] sm:$0xf0]  ;;  %v1385_v20 = vld [vmem:[%s1679_s22 + $0x4] sm:$0xf]  ;;  %v1201_v36 = vor.u32 %v1388_v29, %v1200_v28 }
  0x13   : > { %v1256_v18 = vld [vmem:[%s1679_s22 + $0x80] sm:$0xf]  ;;  %v1402_v19 = vld [vmem:[%s1679_s22 + $0x84] sm:$0xf0]  ;;  %v1194_v21 = vld [vmem:[%s1679_s22 + $0x8] sm:$0xf0]  ;;  %v1193_v24 = vor.u32 %v1386_v17, %v1192_v16 }
  0x14   : > { %v1401_v22 = vld [vmem:[%s1679_s22 + $0x84] sm:$0xf]  ;;  %v1258_v23 = vld [vmem:[%s1679_s22 + $0x88] sm:$0xf0]  ;;  %v1257_v25 = vor.u32 %v1402_v19, %v1256_v18  ;;  %v1197_v26 = vor.u32 %v1385_v20, %v1194_v21  ;;  %v1264_v30 = vld [vmem:[%s1679_s22 + $0x90] sm:$0xf] }
  0x15   : > { %657 = vmatpush.bf16.msra.mxu0 %v1422_v4  ;;  %1530 = vmatpush.bf16.msra.mxu2 %v1422_v4  ;;  %v1261_v27 = vor.u32 %v1401_v22, %v1258_v23  ;;  %v1404_v31 = vld [vmem:[%s1679_s22 + $0x94] sm:$0xf0]  ;;  %v1387_v32 = vld [vmem:[%s1679_s22 + $0x14] sm:$0xf]  ;;  %v1202_v33 = vld [vmem:[%s1679_s22 + $0x18] sm:$0xf0] }
  0x16   : > { %746 = vmatpush.bf16.msra.mxu1 %v1430_v5  ;;  %1538 = vmatpush.bf16.msra.mxu3 %v1430_v5  ;;  %v1403_v34 = vld [vmem:[%s1679_s22 + $0x94] sm:$0xf]  ;;  %v1266_v35 = vld [vmem:[%s1679_s22 + $0x98] sm:$0xf0]  ;;  %v1265_v37 = vor.u32 %v1404_v31, %v1264_v30  ;;  %v1205_v38 = vor.u32 %v1387_v32, %v1202_v33  ;;  %v1208_v40 = vld [vmem:[%s1679_s22 + $0x20] sm:$0xf] }
  0x17   : > { %v1269_v39 = vor.u32 %v1403_v34, %v1266_v35  ;;  %v1390_v41 = vld [vmem:[%s1679_s22 + $0x24] sm:$0xf0]  ;;  %v1272_v42 = vld [vmem:[%s1679_s22 + $0xa0] sm:$0xf]  ;;  %v1389_v44 = vld [vmem:[%s1679_s22 + $0x24] sm:$0xf] }
  0x18   : > { %v1406_v43 = vld [vmem:[%s1679_s22 + $0xa4] sm:$0xf0]  ;;  %v1210_v45 = vld [vmem:[%s1679_s22 + $0x28] sm:$0xf0]  ;;  %v1405_v46 = vld [vmem:[%s1679_s22 + $0xa4] sm:$0xf]  ;;  %v1209_v48 = vor.u32 %v1390_v41, %v1208_v40 }
  0x19   : > { %658 = vmatpush.bf16.msra.mxu0 %v1421_v6  ;;  %1531 = vmatpush.bf16.msra.mxu2 %v1421_v6  ;;  %v1274_v47 = vld [vmem:[%s1679_s22 + $0xa8] sm:$0xf0]  ;;  %v1273_v49 = vor.u32 %v1406_v43, %v1272_v42  ;;  %v1213_v50 = vor.u32 %v1389_v44, %v1210_v45  ;;  %v1216_v52 = vld [vmem:[%s1679_s22 + $0x30] sm:$0xf]  ;;  %v1392_v53 = vld [vmem:[%s1679_s22 + $0x34] sm:$0xf0] }
  0x1a   : > { %747 = vmatpush.bf16.msra.mxu1 %v1429_v7  ;;  %1539 = vmatpush.bf16.msra.mxu3 %v1429_v7  ;;  %v1277_v51 = vor.u32 %v1405_v46, %v1274_v47  ;;  %v1280_v54 = vld [vmem:[%s1679_s22 + $0xb0] sm:$0xf]  ;;  %v1408_v55 = vld [vmem:[%s1679_s22 + $0xb4] sm:$0xf0]  ;;  %v1391_v56 = vld [vmem:[%s1679_s22 + $0x34] sm:$0xf]  ;;  %v1217_v60 = vor.u32 %v1392_v53, %v1216_v52 }
  0x1b   : > { %v1218_v57 = vld [vmem:[%s1679_s22 + $0x38] sm:$0xf0]  ;;  %v1407_v58 = vld [vmem:[%s1679_s22 + $0xb4] sm:$0xf]  ;;  %v1281_v61 = vor.u32 %v1408_v55, %v1280_v54  ;;  %v1224_v0 = vld [vmem:[%s1679_s22 + $0x40] sm:$0xf] }
  0x1c   : > { %v1282_v59 = vld [vmem:[%s1679_s22 + $0xb8] sm:$0xf0]  ;;  %v1221_v62 = vor.u32 %v1391_v56, %v1218_v57  ;;  %v1394_v1 = vld [vmem:[%s1679_s22 + $0x44] sm:$0xf0]  ;;  %v1288_v2 = vld [vmem:[%s1679_s22 + $0xc0] sm:$0xf] }
  0x1d   : > { %659 = vmatpush.bf16.msra.mxu0 %v1420_v8  ;;  %1532 = vmatpush.bf16.msra.mxu2 %v1420_v8  ;;  %v1285_v63 = vor.u32 %v1407_v58, %v1282_v59  ;;  %v1410_v3 = vld [vmem:[%s1679_s22 + $0xc4] sm:$0xf0]  ;;  %v1393_v4 = vld [vmem:[%s1679_s22 + $0x44] sm:$0xf]  ;;  %v1226_v5 = vld [vmem:[%s1679_s22 + $0x48] sm:$0xf0]  ;;  %v1225_v8 = vor.u32 %v1394_v1, %v1224_v0 }
  0x1e   : > { %748 = vmatpush.bf16.msra.mxu1 %v1428_v9  ;;  %1540 = vmatpush.bf16.msra.mxu3 %v1428_v9  ;;  %v1409_v6 = vld [vmem:[%s1679_s22 + $0xc4] sm:$0xf]  ;;  %v1290_v7 = vld [vmem:[%s1679_s22 + $0xc8] sm:$0xf0]  ;;  %v1289_v9 = vor.u32 %v1410_v3, %v1288_v2  ;;  %v1395_v16 = vld [vmem:[%s1679_s22 + $0x54] sm:$0xf] }
  0x1f   : > { %v1234_v17 = vld [vmem:[%s1679_s22 + $0x58] sm:$0xf0]  ;;  %v1411_v18 = vld [vmem:[%s1679_s22 + $0xd4] sm:$0xf]  ;;  %v1397_v28 = vld [vmem:[%s1679_s22 + $0x64] sm:$0xf] }
  0x20   : > { %v1298_v19 = vld [vmem:[%s1679_s22 + $0xd8] sm:$0xf0]  ;;  %v1237_v22 = vor.u32 %v1395_v16, %v1234_v17  ;;  %v1242_v29 = vld [vmem:[%s1679_s22 + $0x68] sm:$0xf0]  ;;  %v1413_v30 = vld [vmem:[%s1679_s22 + $0xe4] sm:$0xf] }
  0x21   : > { %660 = vmatpush.bf16.msra.mxu0 %v1419_v10  ;;  %1533 = vmatpush.bf16.msra.mxu2 %v1419_v10  ;;  %v1229_v10 = vor.u32 %v1393_v4, %v1226_v5  ;;  %v1301_v23 = vor.u32 %v1411_v18, %v1298_v19  ;;  %v1306_v31 = vld [vmem:[%s1679_s22 + $0xe8] sm:$0xf0]  ;;  %v1245_v34 = vor.u32 %v1397_v28, %v1242_v29  ;;  %v1399_v40 = vld [vmem:[%s1679_s22 + $0x74] sm:$0xf]  ;;  %v1250_v41 = vld [vmem:[%s1679_s22 + $0x78] sm:$0xf0] }
  0x22   : > { %749 = vmatpush.bf16.msra.mxu1 %v1427_v11  ;;  %1541 = vmatpush.bf16.msra.mxu3 %v1427_v11  ;;  %v1293_v11 = vor.u32 %v1409_v6, %v1290_v7  ;;  %v1309_v35 = vor.u32 %v1413_v30, %v1306_v31  ;;  %v1415_v42 = vld [vmem:[%s1679_s22 + $0xf4] sm:$0xf]  ;;  %v1314_v43 = vld [vmem:[%s1679_s22 + $0xf8] sm:$0xf0]  ;;  %v1253_v46 = vor.u32 %v1399_v40, %v1250_v41 }
  0x23   : > { %v1317_v47 = vor.u32 %v1415_v42, %v1314_v43 }
  0x25   : > { %661 = vmatpush.bf16.msra.mxu0 %v1418_v12  ;;  %1534 = vmatpush.bf16.msra.mxu2 %v1418_v12  ;;  %v1232_v12 = vld [vmem:[%s1679_s22 + $0x50] sm:$0xf] }
  0x26   : > { %750 = vmatpush.bf16.msra.mxu1 %v1426_v13  ;;  %1542 = vmatpush.bf16.msra.mxu3 %v1426_v13  ;;  %v1396_v13 = vld [vmem:[%s1679_s22 + $0x54] sm:$0xf0] }
  0x27   : > { %v1233_v20 = vor.u32 %v1396_v13, %v1232_v12 }
  0x29   : > { %662 = vmatpush.bf16.msra.mxu0 %v1417_v14  ;;  %1535 = vmatpush.bf16.msra.mxu2 %v1417_v14  ;;  %v1296_v14 = vld [vmem:[%s1679_s22 + $0xd0] sm:$0xf] }
  0x2a   : > { %751 = vmatpush.bf16.msra.mxu1 %v1425_v15  ;;  %1543 = vmatpush.bf16.msra.mxu3 %v1425_v15  ;;  %v1412_v15 = vld [vmem:[%s1679_s22 + $0xd4] sm:$0xf0] }
  0x2b   : > { %v1297_v21 = vor.u32 %v1412_v15, %v1296_v14 }
  0x2c   : > { %663 = vmatmul.bf16.vlgmr.msra.gmra.mxu0 %v1193_v24  ;;  %703 = vmatmul.bf16.vlgmr.msra.gmra.mxu2 %v1257_v25  ;;  %v1240_v24 = vld [vmem:[%s1679_s22 + $0x60] sm:$0xf]  ;;  %v1398_v25 = vld [vmem:[%s1679_s22 + $0x64] sm:$0xf0] }
  0x2d   : > { %752 = vmatmul.bf16.vlgmr.msra.gmra.mxu1 %v1197_v26  ;;  %792 = vmatmul.bf16.vlgmr.msra.gmra.mxu3 %v1261_v27  ;;  %v1304_v26 = vld [vmem:[%s1679_s22 + $0xe0] sm:$0xf]  ;;  %v1414_v27 = vld [vmem:[%s1679_s22 + $0xe4] sm:$0xf0]  ;;  %v1241_v32 = vor.u32 %v1398_v25, %v1240_v24 }
  0x2e   : > { %v1305_v33 = vor.u32 %v1414_v27, %v1304_v26 }
  0x3c   : > { %668 = vmatmul.bf16.gmra.mxu0 %v1201_v36  ;;  %708 = vmatmul.bf16.gmra.mxu2 %v1265_v37  ;;  %v1248_v36 = vld [vmem:[%s1679_s22 + $0x70] sm:$0xf]  ;;  %v1400_v37 = vld [vmem:[%s1679_s22 + $0x74] sm:$0xf0] }
  0x3d   : > { %757 = vmatmul.bf16.gmra.mxu1 %v1205_v38  ;;  %797 = vmatmul.bf16.gmra.mxu3 %v1269_v39  ;;  %v1312_v38 = vld [vmem:[%s1679_s22 + $0xf0] sm:$0xf]  ;;  %v1416_v39 = vld [vmem:[%s1679_s22 + $0xf4] sm:$0xf0]  ;;  %v1249_v44 = vor.u32 %v1400_v37, %v1248_v36 }
  0x3e   : > { %v1313_v45 = vor.u32 %v1416_v39, %v1312_v38 }
  0x4c   : > { %673 = vmatmul.bf16.gmra.mxu0 %v1209_v48  ;;  %713 = vmatmul.bf16.gmra.mxu2 %v1273_v49 }
  0x4d   : > { %762 = vmatmul.bf16.gmra.mxu1 %v1213_v50  ;;  %802 = vmatmul.bf16.gmra.mxu3 %v1277_v51  ;;  %v1757_v51 = vld [vmem:[%s1824_s2] ss:$0 sm:$0xff] }
  0x5c   : > { %678 = vmatmul.bf16.gmra.mxu0 %v1217_v60  ;;  %718 = vmatmul.bf16.gmra.mxu2 %v1281_v61 }
  0x5d   : > { %767 = vmatmul.bf16.gmra.mxu1 %v1221_v62  ;;  %807 = vmatmul.bf16.gmra.mxu3 %v1285_v63 }
  0x6c   : > { %683 = vmatmul.bf16.gmra.mxu0 %v1225_v8  ;;  %723 = vmatmul.bf16.gmra.mxu2 %v1289_v9 }
  0x6d   : > { %772 = vmatmul.bf16.gmra.mxu1 %v1229_v10  ;;  %812 = vmatmul.bf16.gmra.mxu3 %v1293_v11 }
  0x7c   : > { %688 = vmatmul.bf16.gmra.mxu0 %v1233_v20  ;;  %728 = vmatmul.bf16.gmra.mxu2 %v1297_v21 }
  0x7d   : > { %777 = vmatmul.bf16.gmra.mxu1 %v1237_v22  ;;  %817 = vmatmul.bf16.gmra.mxu3 %v1301_v23 }
  0x8c   : > { %693 = vmatmul.bf16.gmra.mxu0 %v1241_v32  ;;  %733 = vmatmul.bf16.gmra.mxu2 %v1305_v33 }
  0x8d   : > { %782 = vmatmul.bf16.gmra.mxu1 %v1245_v34  ;;  %822 = vmatmul.bf16.gmra.mxu3 %v1309_v35 }
  0x9c   : > { %698 = vmatmul.bf16.gmra.mxu0 %v1249_v44  ;;  %738 = vmatmul.bf16.gmra.mxu2 %v1313_v45 }
  0x9d   : > { %787 = vmatmul.bf16.gmra.mxu1 %v1253_v46  ;;  %827 = vmatmul.bf16.gmra.mxu3 %v1317_v47 }
  0xa9   : > { %v664_v48 = vpop.f32.mrf.mxu0 }
  0xaa   : > { %v753_v49 = vpop.f32.mrf.mxu1 }
  0xab   : > { %v754_v50 = vadd.f32 %v753_v49, %v664_v48 }
  0xad   : > { %v936_v56 = vadd.f32 %v1757_v51, %v754_v50 }
  0xaf   : > { %v704_v52 = vpop.f32.mrf.mxu2  ;;  %v968_v60 = vmax.f32 %v936_v56, 0.0 }
  0xb0   : > { %v793_v53 = vpop.f32.mrf.mxu3 }
  0xb1   : > { %v666_v54 = vpop.f32.mrf.mxu0  ;;  %v794_v58 = vadd.f32 %v793_v53, %v704_v52 }
  0xb2   : > { %v755_v55 = vpop.f32.mrf.mxu1 }
  0xb3   : > { %v756_v57 = vadd.f32 %v755_v55, %v666_v54  ;;  %v952_v0 = vadd.f32 %v1757_v51, %v794_v58 }
  0xb5   : > { %v937_v59 = vadd.f32 %v1757_v51, %v756_v57  ;;  %v984_v6 = vmax.f32 %v952_v0, 0.0 }
  0xb7   : > { %v969_v61 = vmax.f32 %v937_v59, 0.0  ;;  %v706_v62 = vpop.f32.mrf.mxu2 }
  0xb8   : > { %v795_v63 = vpop.f32.mrf.mxu3 }
  0xb9   : > { %v1436_v1 = vpack.c.bf16 %v969_v61, %v968_v60  ;;  %v796_v2 = vadd.f32 %v795_v63, %v706_v62  ;;  %v669_v3 = vpop.f32.mrf.mxu0 }
  0xba   : > { %v758_v4 = vpop.f32.mrf.mxu1 }
  0xbb   : > { %1437 = vst [vmem:[%s1765_s8] sm:$0xff] %v1436_v1   ;;  %v953_v5 = vadd.f32 %v1757_v51, %v796_v2  ;;  %v759_v9 = vadd.f32 %v758_v4, %v669_v3 }
  0xbd   : > { %v985_v7 = vmax.f32 %v953_v5, 0.0  ;;  %v938_v14 = vadd.f32 %v1757_v51, %v759_v9 }
  0xbf   : > { %v1476_v8 = vpack.c.bf16 %v985_v7, %v984_v6  ;;  %v709_v10 = vpop.f32.mrf.mxu2  ;;  %v970_v18 = vmax.f32 %v938_v14, 0.0 }
  0xc0   : > { %v798_v11 = vpop.f32.mrf.mxu3 }
  0xc1   : > { %1520 = vst [vmem:[%s1765_s8 + $0x40] sm:$0xff] %v1476_v8   ;;  %v671_v12 = vpop.f32.mrf.mxu0  ;;  %v799_v16 = vadd.f32 %v798_v11, %v709_v10 }
  0xc2   : > { %v760_v13 = vpop.f32.mrf.mxu1 }
  0xc3   : > { %v761_v15 = vadd.f32 %v760_v13, %v671_v12  ;;  %v954_v22 = vadd.f32 %v1757_v51, %v799_v16 }
  0xc5   : > { %v939_v17 = vadd.f32 %v1757_v51, %v761_v15  ;;  %v986_v28 = vmax.f32 %v954_v22, 0.0 }
  0xc7   : > { %v971_v19 = vmax.f32 %v939_v17, 0.0  ;;  %v711_v20 = vpop.f32.mrf.mxu2 }
  0xc8   : > { %v800_v21 = vpop.f32.mrf.mxu3 }
  0xc9   : > { %v1441_v23 = vpack.c.bf16 %v971_v19, %v970_v18  ;;  %v801_v24 = vadd.f32 %v800_v21, %v711_v20  ;;  %v674_v25 = vpop.f32.mrf.mxu0 }
  0xca   : > { %v763_v26 = vpop.f32.mrf.mxu1 }
  0xcb   : > { %1513 = vst [vmem:[%s1765_s8 + $0x8] sm:$0xff] %v1441_v23   ;;  %v955_v27 = vadd.f32 %v1757_v51, %v801_v24  ;;  %v764_v31 = vadd.f32 %v763_v26, %v674_v25 }
  0xcd   : > { %v987_v29 = vmax.f32 %v955_v27, 0.0  ;;  %v940_v36 = vadd.f32 %v1757_v51, %v764_v31 }
  0xcf   : > { %v1481_v30 = vpack.c.bf16 %v987_v29, %v986_v28  ;;  %v714_v32 = vpop.f32.mrf.mxu2  ;;  %v972_v40 = vmax.f32 %v940_v36, 0.0 }
  0xd0   : > { %v803_v33 = vpop.f32.mrf.mxu3 }
  0xd1   : > { %1521 = vst [vmem:[%s1765_s8 + $0x48] sm:$0xff] %v1481_v30   ;;  %v676_v34 = vpop.f32.mrf.mxu0  ;;  %v804_v38 = vadd.f32 %v803_v33, %v714_v32 }
  0xd2   : > { %v765_v35 = vpop.f32.mrf.mxu1 }
  0xd3   : > { %v766_v37 = vadd.f32 %v765_v35, %v676_v34  ;;  %v956_v44 = vadd.f32 %v1757_v51, %v804_v38 }
  0xd5   : > { %v941_v39 = vadd.f32 %v1757_v51, %v766_v37  ;;  %v988_v50 = vmax.f32 %v956_v44, 0.0 }
  0xd7   : > { %v973_v41 = vmax.f32 %v941_v39, 0.0  ;;  %v716_v42 = vpop.f32.mrf.mxu2 }
  0xd8   : > { %v805_v43 = vpop.f32.mrf.mxu3 }
  0xd9   : > { %v1446_v45 = vpack.c.bf16 %v973_v41, %v972_v40  ;;  %v806_v46 = vadd.f32 %v805_v43, %v716_v42  ;;  %v679_v47 = vpop.f32.mrf.mxu0 }
  0xda   : > { %v768_v48 = vpop.f32.mrf.mxu1 }
  0xdb   : > { %1514 = vst [vmem:[%s1765_s8 + $0x10] sm:$0xff] %v1446_v45   ;;  %v957_v49 = vadd.f32 %v1757_v51, %v806_v46  ;;  %v769_v54 = vadd.f32 %v768_v48, %v679_v47 }
  0xdd   : > { %v989_v52 = vmax.f32 %v957_v49, 0.0  ;;  %v942_v59 = vadd.f32 %v1757_v51, %v769_v54 }
  0xdf   : > { %v1486_v53 = vpack.c.bf16 %v989_v52, %v988_v50  ;;  %v719_v55 = vpop.f32.mrf.mxu2  ;;  %v974_v63 = vmax.f32 %v942_v59, 0.0 }
  0xe0   : > { %v808_v56 = vpop.f32.mrf.mxu3 }
  0xe1   : > { %1522 = vst [vmem:[%s1765_s8 + $0x50] sm:$0xff] %v1486_v53   ;;  %v681_v57 = vpop.f32.mrf.mxu0  ;;  %v809_v61 = vadd.f32 %v808_v56, %v719_v55 }
  0xe2   : > { %v770_v58 = vpop.f32.mrf.mxu1 }
  0xe3   : > { %v771_v60 = vadd.f32 %v770_v58, %v681_v57  ;;  %v958_v3 = vadd.f32 %v1757_v51, %v809_v61 }
  0xe5   : > { %v943_v62 = vadd.f32 %v1757_v51, %v771_v60  ;;  %v990_v9 = vmax.f32 %v958_v3, 0.0 }
  0xe7   : > { %v975_v0 = vmax.f32 %v943_v62, 0.0  ;;  %v721_v1 = vpop.f32.mrf.mxu2 }
  0xe8   : > { %v810_v2 = vpop.f32.mrf.mxu3 }
  0xe9   : > { %v1451_v4 = vpack.c.bf16 %v975_v0, %v974_v63  ;;  %v811_v5 = vadd.f32 %v810_v2, %v721_v1  ;;  %v684_v6 = vpop.f32.mrf.mxu0 }
  0xea   : > { %v773_v7 = vpop.f32.mrf.mxu1 }
  0xeb   : > { %1515 = vst [vmem:[%s1765_s8 + $0x18] sm:$0xff] %v1451_v4   ;;  %v959_v8 = vadd.f32 %v1757_v51, %v811_v5  ;;  %v774_v12 = vadd.f32 %v773_v7, %v684_v6 }
  0xed   : > { %v991_v10 = vmax.f32 %v959_v8, 0.0  ;;  %v944_v17 = vadd.f32 %v1757_v51, %v774_v12 }
  0xef   : > { %v1491_v11 = vpack.c.bf16 %v991_v10, %v990_v9  ;;  %v724_v13 = vpop.f32.mrf.mxu2  ;;  %v976_v21 = vmax.f32 %v944_v17, 0.0 }
  0xf0   : > { %v813_v14 = vpop.f32.mrf.mxu3 }
  0xf1   : > { %1523 = vst [vmem:[%s1765_s8 + $0x58] sm:$0xff] %v1491_v11   ;;  %v686_v15 = vpop.f32.mrf.mxu0  ;;  %v814_v19 = vadd.f32 %v813_v14, %v724_v13 }
  0xf2   : > { %v775_v16 = vpop.f32.mrf.mxu1 }
  0xf3   : > { %v776_v18 = vadd.f32 %v775_v16, %v686_v15  ;;  %v960_v25 = vadd.f32 %v1757_v51, %v814_v19 }
  0xf5   : > { %v945_v20 = vadd.f32 %v1757_v51, %v776_v18  ;;  %v992_v31 = vmax.f32 %v960_v25, 0.0 }
  0xf7   : > { %v977_v22 = vmax.f32 %v945_v20, 0.0  ;;  %v726_v23 = vpop.f32.mrf.mxu2 }
  0xf8   : > { %v815_v24 = vpop.f32.mrf.mxu3 }
  0xf9   : > { %v1456_v26 = vpack.c.bf16 %v977_v22, %v976_v21  ;;  %v816_v27 = vadd.f32 %v815_v24, %v726_v23  ;;  %v689_v28 = vpop.f32.mrf.mxu0 }
  0xfa   : > { %v778_v29 = vpop.f32.mrf.mxu1 }
  0xfb   : > { %1516 = vst [vmem:[%s1765_s8 + $0x20] sm:$0xff] %v1456_v26   ;;  %v961_v30 = vadd.f32 %v1757_v51, %v816_v27  ;;  %v779_v34 = vadd.f32 %v778_v29, %v689_v28 }
  0xfd   : > { %v993_v32 = vmax.f32 %v961_v30, 0.0  ;;  %v946_v39 = vadd.f32 %v1757_v51, %v779_v34 }
  0xff   : > { %v1496_v33 = vpack.c.bf16 %v993_v32, %v992_v31  ;;  %v729_v35 = vpop.f32.mrf.mxu2  ;;  %v978_v43 = vmax.f32 %v946_v39, 0.0 }
 0x100   : > { %v818_v36 = vpop.f32.mrf.mxu3 }
 0x101   : > { %1524 = vst [vmem:[%s1765_s8 + $0x60] sm:$0xff] %v1496_v33   ;;  %v691_v37 = vpop.f32.mrf.mxu0  ;;  %v819_v41 = vadd.f32 %v818_v36, %v729_v35 }
 0x102   : > { %v780_v38 = vpop.f32.mrf.mxu1 }
 0x103   : > { %v781_v40 = vadd.f32 %v780_v38, %v691_v37  ;;  %v962_v47 = vadd.f32 %v1757_v51, %v819_v41 }
 0x105   : > { %v947_v42 = vadd.f32 %v1757_v51, %v781_v40  ;;  %v994_v54 = vmax.f32 %v962_v47, 0.0 }
 0x107   : > { %v979_v44 = vmax.f32 %v947_v42, 0.0  ;;  %v731_v45 = vpop.f32.mrf.mxu2 }
 0x108   : > { %v820_v46 = vpop.f32.mrf.mxu3 }
 0x109   : > { %v1461_v48 = vpack.c.bf16 %v979_v44, %v978_v43  ;;  %v821_v49 = vadd.f32 %v820_v46, %v731_v45  ;;  %v694_v50 = vpop.f32.mrf.mxu0 }
 0x10a   : > { %v783_v52 = vpop.f32.mrf.mxu1 }
 0x10b   : > { %1517 = vst [vmem:[%s1765_s8 + $0x28] sm:$0xff] %v1461_v48   ;;  %v963_v53 = vadd.f32 %v1757_v51, %v821_v49  ;;  %v784_v57 = vadd.f32 %v783_v52, %v694_v50 }
 0x10d   : > { %v995_v55 = vmax.f32 %v963_v53, 0.0  ;;  %v948_v62 = vadd.f32 %v1757_v51, %v784_v57 }
 0x10f   : > { %v1501_v56 = vpack.c.bf16 %v995_v55, %v994_v54  ;;  %v734_v58 = vpop.f32.mrf.mxu2  ;;  %v980_v2 = vmax.f32 %v948_v62, 0.0 }
 0x110   : > { %v823_v59 = vpop.f32.mrf.mxu3 }
 0x111   : > { %1525 = vst [vmem:[%s1765_s8 + $0x68] sm:$0xff] %v1501_v56   ;;  %v696_v60 = vpop.f32.mrf.mxu0  ;;  %v824_v0 = vadd.f32 %v823_v59, %v734_v58 }
 0x112   : > { %v785_v61 = vpop.f32.mrf.mxu1 }
 0x113   : > { %v786_v63 = vadd.f32 %v785_v61, %v696_v60  ;;  %v964_v6 = vadd.f32 %v1757_v51, %v824_v0 }
 0x115   : > { %v949_v1 = vadd.f32 %v1757_v51, %v786_v63  ;;  %v996_v12 = vmax.f32 %v964_v6, 0.0 }
 0x117   : > { %v981_v3 = vmax.f32 %v949_v1, 0.0  ;;  %v736_v4 = vpop.f32.mrf.mxu2 }
 0x118   : > { %v825_v5 = vpop.f32.mrf.mxu3 }
 0x119   : > { %v1466_v7 = vpack.c.bf16 %v981_v3, %v980_v2  ;;  %v826_v8 = vadd.f32 %v825_v5, %v736_v4  ;;  %v699_v9 = vpop.f32.mrf.mxu0 }
 0x11a   : > { %v788_v10 = vpop.f32.mrf.mxu1 }
 0x11b   : > { %1518 = vst [vmem:[%s1765_s8 + $0x30] sm:$0xff] %v1466_v7   ;;  %v965_v11 = vadd.f32 %v1757_v51, %v826_v8  ;;  %v789_v15 = vadd.f32 %v788_v10, %v699_v9 }
 0x11d   : > { %v997_v13 = vmax.f32 %v965_v11, 0.0  ;;  %v950_v20 = vadd.f32 %v1757_v51, %v789_v15 }
 0x11f   : > { %v1506_v14 = vpack.c.bf16 %v997_v13, %v996_v12  ;;  %v739_v16 = vpop.f32.mrf.mxu2  ;;  %v982_v24 = vmax.f32 %v950_v20, 0.0 }
 0x120   : > { %v828_v17 = vpop.f32.mrf.mxu3 }
 0x121   : > { %1526 = vst [vmem:[%s1765_s8 + $0x70] sm:$0xff] %v1506_v14   ;;  %v701_v18 = vpop.f32.mrf.mxu0  ;;  %v829_v22 = vadd.f32 %v828_v17, %v739_v16 }
 0x122   : > { %v790_v19 = vpop.f32.mrf.mxu1 }
 0x123   : > { %v791_v21 = vadd.f32 %v790_v19, %v701_v18  ;;  %v966_v28 = vadd.f32 %v1757_v51, %v829_v22 }
 0x125   : > { %v951_v23 = vadd.f32 %v1757_v51, %v791_v21  ;;  %v998_v32 = vmax.f32 %v966_v28, 0.0 }
 0x127   : > { %v983_v25 = vmax.f32 %v951_v23, 0.0  ;;  %v741_v26 = vpop.f32.mrf.mxu2 }
 0x128   : > { %v830_v27 = vpop.f32.mrf.mxu3 }
 0x129   : > { %v1471_v29 = vpack.c.bf16 %v983_v25, %v982_v24  ;;  %v831_v30 = vadd.f32 %v830_v27, %v741_v26 }
 0x12b   : > { %1519 = vst [vmem:[%s1765_s8 + $0x38] sm:$0xff] %v1471_v29   ;;  %v967_v31 = vadd.f32 %v1757_v51, %v831_v30 }
 0x12d   : > { %v999_v33 = vmax.f32 %v967_v31, 0.0 }
 0x12f   : > { %v1511_v34 = vpack.c.bf16 %v999_v33, %v998_v32 }
 0x131   : > { %1527 = vst [vmem:[%s1765_s8 + $0x78] sm:$0xff] %v1511_v34  }
 0x132 PF: > { %s13_s14 = sadd.s32 1, %s1591_s14   ;;  %s1826_s12 = smov %s1587_s13 }
 0x133   : > { %p10_p5 = scmp.ge.s32.totalorder %s13_s14, 4   ;;  %s1827_s13 = smov %s1829_s15 }
 0x135   :  { %12 = sbr.rel (!%p10_p5) target bundleno = 2 (0x2), region = 76 }

// kernel: _lambda_.23
= control target key start
LH: loop header
LB: loop body
LE: loop exit
PB: predicated region body
PF: predicated region fallthrough
CT: control target
= control target key end

     0   :  { %vm296_vm0 = vcmask 523264   ;;  %vm585_vm1 = vcmask 519168   ;;  %s1539_s0 = inlined_call_operand.vmem [shape: bf16[9,128,64], index: 0, kind: input, shape index: {}]   ;;  %s1540_s1 = inlined_call_operand.vmem [shape: bf16[128,64], index: 1, kind: output, shape index: {}]  }
   0x1   :  { %v607_v0 = vld [vmem:[%s1539_s0] sm:$0xff]   ;;  %v1018_v35 = vld [vmem:[%s1539_s0 + $0x8] sm:$0xff]  }
   0x2   :  { %v901_v1 = vld [vmem:[%s1539_s0 + $0x40] sm:$0xff]   ;;  %v608_v3 = vunpack.c.l.bf16 %v607_v0  ;;  %v609_v19 = vunpack.c.h.bf16 %v607_v0  ;;  %v1023_v36 = vld [vmem:[%s1539_s0 + $0x48] sm:$0xff]   ;;  %v612_v49 = vunpack.c.l.bf16 %v1018_v35 }
   0x3   :  { %v909_v2 = vld [vmem:[%s1539_s0 + $0x80] sm:$0xff]   ;;  %v640_v4 = vunpack.c.l.bf16 %v901_v1  ;;  %v641_v20 = vunpack.c.h.bf16 %v901_v1  ;;  %v910_v41 = vld [vmem:[%s1539_s0 + $0x88] sm:$0xff]   ;;  %v644_v50 = vunpack.c.l.bf16 %v1023_v36 }
   0x4   :  { %v672_v5 = vunpack.c.l.bf16 %v909_v2  ;;  %v917_v6 = vld [vmem:[%s1539_s0 + $0xc0] sm:$0xff]   ;;  %v297_v16 = vsel %vm296_vm0, %v608_v3, -inf  ;;  %v673_v25 = vunpack.c.h.bf16 %v909_v2  ;;  %v314_v32 = vsel %vm296_vm0, %v609_v19, -inf  ;;  %v1031_v42 = vld [vmem:[%s1539_s0 + $0xc8] sm:$0xff]  }
   0x5   :  { %v925_v7 = vld [vmem:[%s1539_s0 + $0x100] sm:$0xff]   ;;  %v704_v9 = vunpack.c.l.bf16 %v917_v6  ;;  %v298_v17 = vsel %vm296_vm0, %v640_v4, -inf  ;;  %v705_v26 = vunpack.c.h.bf16 %v917_v6  ;;  %v315_v33 = vsel %vm296_vm0, %v641_v20, -inf  ;;  %v1041_v51 = vld [vmem:[%s1539_s0 + $0x108] sm:$0xff]  }
   0x6   :  { %v933_v8 = vld [vmem:[%s1539_s0 + $0x140] sm:$0xff]   ;;  %v736_v12 = vunpack.c.l.bf16 %v925_v7  ;;  %v300_v18 = vsel %vm296_vm0, %v672_v5, -inf  ;;  %v299_v22 = vmax.f32 %v297_v16, %v298_v17  ;;  %v737_v31 = vunpack.c.h.bf16 %v925_v7  ;;  %v1051_v60 = vld [vmem:[%s1539_s0 + $0x148] sm:$0xff]  }
   0x7   :  { %v941_v10 = vld [vmem:[%s1539_s0 + $0x180] sm:$0xff]   ;;  %v768_v13 = vunpack.c.l.bf16 %v933_v8  ;;  %v302_v24 = vsel %vm296_vm0, %v704_v9, -inf  ;;  %v317_v34 = vsel %vm296_vm0, %v673_v25, -inf  ;;  %v769_v38 = vunpack.c.h.bf16 %v933_v8  ;;  %v1056_v61 = vld [vmem:[%s1539_s0 + $0x188] sm:$0xff]  }
   0x8   :  { %v949_v11 = vld [vmem:[%s1539_s0 + $0x1c0] sm:$0xff]   ;;  %v800_v14 = vunpack.c.l.bf16 %v941_v10  ;;  %v301_v27 = vmax.f32 %v299_v22, %v300_v18  ;;  %v304_v28 = vsel %vm296_vm0, %v736_v12, -inf  ;;  %v801_v39 = vunpack.c.h.bf16 %v941_v10  ;;  %v1061_v62 = vld [vmem:[%s1539_s0 + $0x1c8] sm:$0xff]  }
   0x9   :  { %v1002_v15 = vld [vmem:[%s1539_s0 + $0x200] sm:$0xff]   ;;  %v832_v21 = vunpack.c.l.bf16 %v949_v11  ;;  %v306_v29 = vsel %vm296_vm0, %v768_v13, -inf  ;;  %v316_v40 = vmax.f32 %v314_v32, %v315_v33  ;;  %v833_v45 = vunpack.c.h.bf16 %v949_v11  ;;  %v1074_v10 = vld [vmem:[%s1539_s0 + $0x208] sm:$0xff]   ;;  %v1090_v32 = vld [vmem:[%s1539_s0 + $0x10] sm:$0xff]  }
   0xa   :  { %v864_v23 = vunpack.c.l.bf16 %v1002_v15  ;;  %v308_v30 = vsel %vm296_vm0, %v800_v14, -inf  ;;  %v303_v37 = vmax.f32 %v301_v27, %v302_v24  ;;  %v319_v46 = vsel %vm296_vm0, %v705_v26, -inf }
   0xb   :  { %v310_v43 = vsel %vm296_vm0, %v832_v21, -inf  ;;  %v318_v48 = vmax.f32 %v316_v40, %v317_v34  ;;  %v865_v52 = vunpack.c.h.bf16 %v1002_v15  ;;  %v321_v53 = vsel %vm296_vm0, %v737_v31, -inf }
   0xc   :  { %v312_v44 = vsel %vm296_vm0, %v864_v23, -inf  ;;  %v305_v47 = vmax.f32 %v303_v37, %v304_v28  ;;  %v676_v54 = vunpack.c.l.bf16 %v910_v41  ;;  %v708_v55 = vunpack.c.l.bf16 %v1031_v42  ;;  %v903_v37 = vld [vmem:[%s1539_s0 + $0x50] sm:$0xff]  }
   0xd   :  { %v320_v57 = vmax.f32 %v318_v48, %v319_v46  ;;  %v323_v58 = vsel %vm296_vm0, %v769_v38, -inf  ;;  %v325_v59 = vsel %vm296_vm0, %v801_v39, -inf  ;;  %v740_v63 = vunpack.c.l.bf16 %v1041_v51 }
   0xe   :  { %v307_v56 = vmax.f32 %v305_v47, %v306_v29  ;;  %v331_v0 = vsel %vm296_vm0, %v612_v49, -inf  ;;  %v332_v1 = vsel %vm296_vm0, %v644_v50, -inf  ;;  %v334_v2 = vsel %vm296_vm0, %v676_v54, -inf }
   0xf   :  { %v322_v4 = vmax.f32 %v320_v57, %v321_v53  ;;  %v327_v5 = vsel %vm296_vm0, %v833_v45, -inf  ;;  %v333_v6 = vmax.f32 %v331_v0, %v332_v1  ;;  %v772_v7 = vunpack.c.l.bf16 %v1051_v60  ;;  %v1142_v0 = vld [vmem:[%s1539_s0 + $0x1d0] sm:$0xff]  }
  0x10   :  { %v309_v3 = vmax.f32 %v307_v56, %v308_v30  ;;  %v804_v8 = vunpack.c.l.bf16 %v1056_v61  ;;  %v836_v9 = vunpack.c.l.bf16 %v1061_v62  ;;  %v336_v11 = vsel %vm296_vm0, %v708_v55, -inf }
  0x11   :  { %v324_v13 = vmax.f32 %v322_v4, %v323_v58  ;;  %v329_v14 = vsel %vm296_vm0, %v865_v52, -inf  ;;  %v335_v15 = vmax.f32 %v333_v6, %v334_v2  ;;  %v338_v16 = vsel %vm296_vm0, %v740_v63, -inf  ;;  %v1119_v52 = vld [vmem:[%s1539_s0 + $0x110] sm:$0xff]  }
  0x12   :  { %v311_v12 = vmax.f32 %v309_v3, %v310_v43  ;;  %v613_v17 = vunpack.c.h.bf16 %v1018_v35  ;;  %v645_v18 = vunpack.c.h.bf16 %v1023_v36  ;;  %v677_v19 = vunpack.c.h.bf16 %v910_v41  ;;  %v1110_v43 = vld [vmem:[%s1539_s0 + $0xd0] sm:$0xff]  }
  0x13   :  { %v326_v21 = vmax.f32 %v324_v13, %v325_v59  ;;  %v868_v22 = vunpack.c.l.bf16 %v1074_v10  ;;  %v337_v23 = vmax.f32 %v335_v15, %v336_v11  ;;  %v340_v24 = vsel %vm296_vm0, %v772_v7, -inf  ;;  %v959_v11 = vld [vmem:[%s1539_s0 + $0x210] sm:$0xff]  }
  0x14   :  { %v313_v20 = vmax.f32 %v311_v12, %v312_v44  ;;  %v342_v25 = vsel %vm296_vm0, %v804_v8, -inf  ;;  %v344_v26 = vsel %vm296_vm0, %v836_v9, -inf  ;;  %v709_v27 = vunpack.c.h.bf16 %v1031_v42  ;;  %v911_v42 = vld [vmem:[%s1539_s0 + $0x90] sm:$0xff]  }
  0x15   :  { %v328_v29 = vmax.f32 %v326_v21, %v327_v5  ;;  %v339_v30 = vmax.f32 %v337_v23, %v338_v16  ;;  %v348_v31 = vsel %vm296_vm0, %v613_v17, -inf  ;;  %v741_v33 = vunpack.c.h.bf16 %v1041_v51 }
  0x16   :  { %v569_v28 = vpack.c.bf16 %v313_v20, %v313_v20  ;;  %v773_v34 = vunpack.c.h.bf16 %v1051_v60  ;;  %v349_v35 = vsel %vm296_vm0, %v645_v18, -inf  ;;  %v351_v36 = vsel %vm296_vm0, %v677_v19, -inf }
  0x17   :  { %v330_v38 = vmax.f32 %v328_v29, %v329_v14  ;;  %v341_v39 = vmax.f32 %v339_v30, %v340_v24  ;;  %v805_v40 = vunpack.c.h.bf16 %v1056_v61  ;;  %v350_v41 = vmax.f32 %v348_v31, %v349_v35  ;;  %v935_v61 = vld [vmem:[%s1539_s0 + $0x150] sm:$0xff]  }
  0x18   :  { %586 = vst.msk [vmem:[%s1540_s1] sm:$0xf] %vm585_vm1, %v569_v28  ;;  %v346_v44 = vsel %vm296_vm0, %v868_v22, -inf  ;;  %v837_v45 = vunpack.c.h.bf16 %v1061_v62  ;;  %v353_v46 = vsel %vm296_vm0, %v709_v27, -inf  ;;  %v616_v47 = vunpack.c.l.bf16 %v1090_v32  ;;  %v1136_v62 = vld [vmem:[%s1539_s0 + $0x190] sm:$0xff]  }
  0x19   :  { %v570_v48 = vpack.c.bf16 %v330_v38, %v330_v38  ;;  %v343_v49 = vmax.f32 %v341_v39, %v342_v25  ;;  %v352_v50 = vmax.f32 %v350_v41, %v351_v36  ;;  %v648_v51 = vunpack.c.l.bf16 %v903_v37  ;;  %v912_v39 = vld [vmem:[%s1539_s0 + $0x98] sm:$0xff]  }
  0x1a   :  { %v869_v53 = vunpack.c.h.bf16 %v1074_v10  ;;  %v355_v54 = vsel %vm296_vm0, %v741_v33, -inf  ;;  %v680_v55 = vunpack.c.l.bf16 %v911_v42  ;;  %v712_v56 = vunpack.c.l.bf16 %v1110_v43  ;;  %v896_v33 = vld [vmem:[%s1539_s0 + $0x18] sm:$0xff]  }
  0x1b   :  { %587 = vst.msk [vmem:[%s1540_s1 + $0x4] sm:$0xf] %vm585_vm1, %v570_v48  ;;  %v345_v57 = vmax.f32 %v343_v49, %v344_v26  ;;  %v354_v58 = vmax.f32 %v352_v50, %v353_v46  ;;  %v357_v59 = vsel %vm296_vm0, %v773_v34, -inf  ;;  %v359_v60 = vsel %vm296_vm0, %v805_v40, -inf  ;;  %v904_v34 = vld [vmem:[%s1539_s0 + $0x58] sm:$0xff]  }
  0x1c   :  { %v744_v63 = vunpack.c.l.bf16 %v1119_v52  ;;  %v365_v1 = vsel %vm296_vm0, %v616_v47, -inf  ;;  %v366_v2 = vsel %vm296_vm0, %v648_v51, -inf  ;;  %v368_v3 = vsel %vm296_vm0, %v680_v55, -inf }
  0x1d   :  { %v347_v4 = vmax.f32 %v345_v57, %v346_v44  ;;  %v356_v5 = vmax.f32 %v354_v58, %v355_v54  ;;  %v361_v6 = vsel %vm296_vm0, %v837_v45, -inf  ;;  %v367_v7 = vmax.f32 %v365_v1, %v366_v2  ;;  %v1184_v44 = vld [vmem:[%s1539_s0 + $0xd8] sm:$0xff]  }
  0x1e   :  { %v363_v8 = vsel %vm296_vm0, %v869_v53, -inf  ;;  %v776_v9 = vunpack.c.l.bf16 %v935_v61  ;;  %v808_v10 = vunpack.c.l.bf16 %v1136_v62  ;;  %v370_v12 = vsel %vm296_vm0, %v712_v56, -inf  ;;  %v928_v53 = vld [vmem:[%s1539_s0 + $0x118] sm:$0xff]  }
  0x1f   :  { %v571_v13 = vpack.c.bf16 %v347_v4, %v347_v4  ;;  %v358_v14 = vmax.f32 %v356_v5, %v357_v59  ;;  %v840_v15 = vunpack.c.l.bf16 %v1142_v0  ;;  %v369_v16 = vmax.f32 %v367_v7, %v368_v3  ;;  %v1196_v58 = vld [vmem:[%s1539_s0 + $0x158] sm:$0xff]  }
  0x20   :  { %v372_v17 = vsel %vm296_vm0, %v744_v63, -inf  ;;  %v617_v18 = vunpack.c.h.bf16 %v1090_v32  ;;  %v649_v19 = vunpack.c.h.bf16 %v903_v37  ;;  %v681_v20 = vunpack.c.h.bf16 %v911_v42  ;;  %v1201_v59 = vld [vmem:[%s1539_s0 + $0x198] sm:$0xff]  }
  0x21   :  { %588 = vst.msk [vmem:[%s1540_s1 + $0x8] sm:$0xf] %vm585_vm1, %v571_v13  ;;  %v360_v21 = vmax.f32 %v358_v14, %v359_v60  ;;  %v872_v22 = vunpack.c.l.bf16 %v959_v11  ;;  %v371_v23 = vmax.f32 %v369_v16, %v370_v12  ;;  %v713_v24 = vunpack.c.h.bf16 %v1110_v43  ;;  %v1212_v63 = vld [vmem:[%s1539_s0 + $0x1d8] sm:$0xff]  }
  0x22   :  { %v374_v25 = vsel %vm296_vm0, %v776_v9, -inf  ;;  %v376_v26 = vsel %vm296_vm0, %v808_v10, -inf  ;;  %v745_v27 = vunpack.c.h.bf16 %v1119_v52  ;;  %v382_v28 = vsel %vm296_vm0, %v617_v18, -inf  ;;  %v1224_v12 = vld [vmem:[%s1539_s0 + $0x218] sm:$0xff]  }
  0x23   :  { %v362_v29 = vmax.f32 %v360_v21, %v361_v6  ;;  %v373_v30 = vmax.f32 %v371_v23, %v372_v17  ;;  %v383_v31 = vsel %vm296_vm0, %v649_v19, -inf  ;;  %v385_v32 = vsel %vm296_vm0, %v681_v20, -inf }
  0x24   :  { %v378_v35 = vsel %vm296_vm0, %v840_v15, -inf  ;;  %v777_v36 = vunpack.c.h.bf16 %v935_v61  ;;  %v809_v37 = vunpack.c.h.bf16 %v1136_v62  ;;  %v384_v38 = vmax.f32 %v382_v28, %v383_v31 }
  0x25   :  { %v364_v40 = vmax.f32 %v362_v29, %v363_v8  ;;  %v375_v41 = vmax.f32 %v373_v30, %v374_v25  ;;  %v841_v42 = vunpack.c.h.bf16 %v1142_v0  ;;  %v387_v43 = vsel %vm296_vm0, %v713_v24, -inf }
  0x26   :  { %v873_v45 = vunpack.c.h.bf16 %v959_v11  ;;  %v386_v46 = vmax.f32 %v384_v38, %v385_v32  ;;  %v620_v47 = vunpack.c.l.bf16 %v896_v33  ;;  %v652_v48 = vunpack.c.l.bf16 %v904_v34 }
  0x27   :  { %v572_v49 = vpack.c.bf16 %v364_v40, %v364_v40  ;;  %v377_v50 = vmax.f32 %v375_v41, %v376_v26  ;;  %v389_v51 = vsel %vm296_vm0, %v745_v27, -inf  ;;  %v684_v52 = vunpack.c.l.bf16 %v912_v39  ;;  %v1255_v41 = vld [vmem:[%s1539_s0 + $0xe0] sm:$0xff]  }
  0x28   :  { %v380_v54 = vsel %vm296_vm0, %v872_v22, -inf  ;;  %v388_v55 = vmax.f32 %v386_v46, %v387_v43  ;;  %v391_v56 = vsel %vm296_vm0, %v777_v36, -inf  ;;  %v716_v57 = vunpack.c.l.bf16 %v1184_v44  ;;  %v913_v36 = vld [vmem:[%s1539_s0 + $0xa0] sm:$0xff]  }
  0x29   :  { %589 = vst.msk [vmem:[%s1540_s1 + $0xc] sm:$0xf] %vm585_vm1, %v572_v49  ;;  %v379_v60 = vmax.f32 %v377_v50, %v378_v35  ;;  %v393_v61 = vsel %vm296_vm0, %v809_v37, -inf  ;;  %v395_v62 = vsel %vm296_vm0, %v841_v42, -inf  ;;  %v399_v0 = vsel %vm296_vm0, %v620_v47, -inf  ;;  %v905_v35 = vld [vmem:[%s1539_s0 + $0x60] sm:$0xff]  }
  0x2a   :  { %v390_v1 = vmax.f32 %v388_v55, %v389_v51  ;;  %v748_v2 = vunpack.c.l.bf16 %v928_v53  ;;  %v400_v3 = vsel %vm296_vm0, %v652_v48, -inf  ;;  %v402_v4 = vsel %vm296_vm0, %v684_v52, -inf  ;;  %v1262_v46 = vld [vmem:[%s1539_s0 + $0x120] sm:$0xff]  }
  0x2b   :  { %v381_v5 = vmax.f32 %v379_v60, %v380_v54  ;;  %v397_v6 = vsel %vm296_vm0, %v873_v45, -inf  ;;  %v780_v7 = vunpack.c.l.bf16 %v1196_v58  ;;  %v401_v8 = vmax.f32 %v399_v0, %v400_v3  ;;  %v1269_v55 = vld [vmem:[%s1539_s0 + $0x160] sm:$0xff]  }
  0x2c   :  { %v392_v9 = vmax.f32 %v390_v1, %v391_v56  ;;  %v812_v10 = vunpack.c.l.bf16 %v1201_v59  ;;  %v844_v11 = vunpack.c.l.bf16 %v1212_v63  ;;  %v404_v13 = vsel %vm296_vm0, %v716_v57, -inf  ;;  %v1282_v60 = vld [vmem:[%s1539_s0 + $0x1a0] sm:$0xff]  }
  0x2d   :  { %v573_v14 = vpack.c.bf16 %v381_v5, %v381_v5  ;;  %v403_v15 = vmax.f32 %v401_v8, %v402_v4  ;;  %v621_v16 = vunpack.c.h.bf16 %v896_v33  ;;  %v653_v17 = vunpack.c.h.bf16 %v904_v34  ;;  %v897_v34 = vld [vmem:[%s1539_s0 + $0x20] sm:$0xff]  }
  0x2e   :  { %v394_v18 = vmax.f32 %v392_v9, %v393_v61  ;;  %v406_v19 = vsel %vm296_vm0, %v748_v2, -inf  ;;  %v685_v20 = vunpack.c.h.bf16 %v912_v39  ;;  %v717_v21 = vunpack.c.h.bf16 %v1184_v44  ;;  %v961_v9 = vld [vmem:[%s1539_s0 + $0x220] sm:$0xff]  }
  0x2f   :  { %590 = vst.msk [vmem:[%s1540_s1 + $0x10] sm:$0xf] %vm585_vm1, %v573_v14  ;;  %v876_v22 = vunpack.c.l.bf16 %v1224_v12  ;;  %v405_v23 = vmax.f32 %v403_v15, %v404_v13  ;;  %v408_v24 = vsel %vm296_vm0, %v780_v7, -inf  ;;  %v749_v25 = vunpack.c.h.bf16 %v928_v53 }
  0x30   :  { %v396_v26 = vmax.f32 %v394_v18, %v395_v62  ;;  %v410_v27 = vsel %vm296_vm0, %v812_v10, -inf  ;;  %v416_v28 = vsel %vm296_vm0, %v621_v16, -inf  ;;  %v417_v29 = vsel %vm296_vm0, %v653_v17, -inf }
  0x31   :  { %v407_v30 = vmax.f32 %v405_v23, %v406_v19  ;;  %v412_v31 = vsel %vm296_vm0, %v844_v11, -inf  ;;  %v418_v32 = vmax.f32 %v416_v28, %v417_v29  ;;  %v419_v33 = vsel %vm296_vm0, %v685_v20, -inf }
  0x32   :  { %v398_v37 = vmax.f32 %v396_v26, %v397_v6  ;;  %v781_v38 = vunpack.c.h.bf16 %v1196_v58  ;;  %v813_v39 = vunpack.c.h.bf16 %v1201_v59  ;;  %v421_v40 = vsel %vm296_vm0, %v717_v21, -inf }
  0x33   :  { %v409_v42 = vmax.f32 %v407_v30, %v408_v24  ;;  %v845_v43 = vunpack.c.h.bf16 %v1212_v63  ;;  %v420_v44 = vmax.f32 %v418_v32, %v419_v33  ;;  %v423_v45 = vsel %vm296_vm0, %v749_v25, -inf  ;;  %v1287_v63 = vld [vmem:[%s1539_s0 + $0x1e0] sm:$0xff]  }
  0x34   :  { %v574_v47 = vpack.c.bf16 %v398_v37, %v398_v37  ;;  %v624_v48 = vunpack.c.l.bf16 %v897_v34  ;;  %v656_v49 = vunpack.c.l.bf16 %v905_v35  ;;  %v688_v50 = vunpack.c.l.bf16 %v913_v36  ;;  %v914_v37 = vld [vmem:[%s1539_s0 + $0xa8] sm:$0xff]  }
  0x35   :  { %v411_v51 = vmax.f32 %v409_v42, %v410_v27  ;;  %v414_v52 = vsel %vm296_vm0, %v876_v22, -inf  ;;  %v422_v53 = vmax.f32 %v420_v44, %v421_v40  ;;  %v720_v54 = vunpack.c.l.bf16 %v1255_v41  ;;  %v1330_v42 = vld [vmem:[%s1539_s0 + $0xe8] sm:$0xff]  }
  0x36   :  { %591 = vst.msk [vmem:[%s1540_s1 + $0x14] sm:$0xf] %vm585_vm1, %v574_v47  ;;  %v877_v56 = vunpack.c.h.bf16 %v1224_v12  ;;  %v425_v57 = vsel %vm296_vm0, %v781_v38, -inf  ;;  %v427_v58 = vsel %vm296_vm0, %v813_v39, -inf  ;;  %v752_v59 = vunpack.c.l.bf16 %v1262_v46 }
  0x37   :  { %v413_v61 = vmax.f32 %v411_v51, %v412_v31  ;;  %v424_v62 = vmax.f32 %v422_v53, %v423_v45  ;;  %v433_v0 = vsel %vm296_vm0, %v624_v48, -inf  ;;  %v434_v1 = vsel %vm296_vm0, %v656_v49, -inf  ;;  %v898_v31 = vld [vmem:[%s1539_s0 + $0x28] sm:$0xff]  }
  0x38   :  { %v429_v2 = vsel %vm296_vm0, %v845_v43, -inf  ;;  %v784_v3 = vunpack.c.l.bf16 %v1269_v55  ;;  %v435_v4 = vmax.f32 %v433_v0, %v434_v1  ;;  %v436_v5 = vsel %vm296_vm0, %v688_v50, -inf  ;;  %v930_v51 = vld [vmem:[%s1539_s0 + $0x128] sm:$0xff]  }
  0x39   :  { %v415_v6 = vmax.f32 %v413_v61, %v414_v52  ;;  %v426_v7 = vmax.f32 %v424_v62, %v425_v57  ;;  %v816_v8 = vunpack.c.l.bf16 %v1282_v60  ;;  %v438_v10 = vsel %vm296_vm0, %v720_v54, -inf  ;;  %v1358_v61 = vld [vmem:[%s1539_s0 + $0x1e8] sm:$0xff]  }
  0x3a   :  { %v848_v11 = vunpack.c.l.bf16 %v1287_v63  ;;  %v437_v12 = vmax.f32 %v435_v4, %v436_v5  ;;  %v440_v13 = vsel %vm296_vm0, %v752_v59, -inf  ;;  %v625_v14 = vunpack.c.h.bf16 %v897_v34 }
  0x3b   :  { %v575_v15 = vpack.c.bf16 %v415_v6, %v415_v6  ;;  %v428_v16 = vmax.f32 %v426_v7, %v427_v58  ;;  %v657_v17 = vunpack.c.h.bf16 %v905_v35  ;;  %v689_v18 = vunpack.c.h.bf16 %v913_v36  ;;  %v906_v36 = vld [vmem:[%s1539_s0 + $0x68] sm:$0xff]  }
  0x3c   :  { %v431_v19 = vsel %vm296_vm0, %v877_v56, -inf  ;;  %v880_v20 = vunpack.c.l.bf16 %v961_v9  ;;  %v439_v21 = vmax.f32 %v437_v12, %v438_v10  ;;  %v721_v22 = vunpack.c.h.bf16 %v1255_v41  ;;  %v1346_v56 = vld [vmem:[%s1539_s0 + $0x168] sm:$0xff]  }
  0x3d   :  { %592 = vst.msk [vmem:[%s1540_s1 + $0x18] sm:$0xf] %vm585_vm1, %v575_v15  ;;  %v430_v23 = vmax.f32 %v428_v16, %v429_v2  ;;  %v442_v24 = vsel %vm296_vm0, %v784_v3, -inf  ;;  %v444_v25 = vsel %vm296_vm0, %v816_v8, -inf  ;;  %v753_v26 = vunpack.c.h.bf16 %v1262_v46  ;;  %v1370_v10 = vld [vmem:[%s1539_s0 + $0x228] sm:$0xff]  }
  0x3e   :  { %v441_v27 = vmax.f32 %v439_v21, %v440_v13  ;;  %v450_v28 = vsel %vm296_vm0, %v625_v14, -inf  ;;  %v451_v29 = vsel %vm296_vm0, %v657_v17, -inf  ;;  %v453_v30 = vsel %vm296_vm0, %v689_v18, -inf }
  0x3f   :  { %v432_v32 = vmax.f32 %v430_v23, %v431_v19  ;;  %v446_v33 = vsel %vm296_vm0, %v848_v11, -inf  ;;  %v785_v34 = vunpack.c.h.bf16 %v1269_v55  ;;  %v452_v35 = vmax.f32 %v450_v28, %v451_v29 }
  0x40   :  { %v443_v38 = vmax.f32 %v441_v27, %v442_v24  ;;  %v817_v39 = vunpack.c.h.bf16 %v1282_v60  ;;  %v849_v40 = vunpack.c.h.bf16 %v1287_v63  ;;  %v455_v41 = vsel %vm296_vm0, %v721_v22, -inf  ;;  %v1353_v60 = vld [vmem:[%s1539_s0 + $0x1a8] sm:$0xff]  }
  0x41   :  { %v576_v43 = vpack.c.bf16 %v432_v32, %v432_v32  ;;  %v881_v44 = vunpack.c.h.bf16 %v961_v9  ;;  %v454_v45 = vmax.f32 %v452_v35, %v453_v30  ;;  %v628_v46 = vunpack.c.l.bf16 %v898_v31  ;;  %v899_v32 = vld [vmem:[%s1539_s0 + $0x30] sm:$0xff]  }
  0x42   :  { %v445_v47 = vmax.f32 %v443_v38, %v444_v25  ;;  %v457_v48 = vsel %vm296_vm0, %v753_v26, -inf  ;;  %v660_v49 = vunpack.c.l.bf16 %v906_v36  ;;  %v692_v50 = vunpack.c.l.bf16 %v914_v37 }
  0x43   :  { %593 = vst.msk [vmem:[%s1540_s1 + $0x1c] sm:$0xf] %vm585_vm1, %v576_v43  ;;  %v448_v52 = vsel %vm296_vm0, %v880_v20, -inf  ;;  %v456_v53 = vmax.f32 %v454_v45, %v455_v41  ;;  %v459_v54 = vsel %vm296_vm0, %v785_v34, -inf  ;;  %v724_v55 = vunpack.c.l.bf16 %v1330_v42  ;;  %v915_v34 = vld [vmem:[%s1539_s0 + $0xb0] sm:$0xff]  }
  0x44   :  { %v447_v57 = vmax.f32 %v445_v47, %v446_v33  ;;  %v461_v58 = vsel %vm296_vm0, %v817_v39, -inf  ;;  %v463_v59 = vsel %vm296_vm0, %v849_v40, -inf  ;;  %v467_v62 = vsel %vm296_vm0, %v628_v46, -inf  ;;  %v907_v33 = vld [vmem:[%s1539_s0 + $0x70] sm:$0xff]  }
  0x45   :  { %v458_v63 = vmax.f32 %v456_v53, %v457_v48  ;;  %v756_v0 = vunpack.c.l.bf16 %v930_v51  ;;  %v468_v1 = vsel %vm296_vm0, %v660_v49, -inf  ;;  %v470_v2 = vsel %vm296_vm0, %v692_v50, -inf  ;;  %v1401_v39 = vld [vmem:[%s1539_s0 + $0xf0] sm:$0xff]  }
  0x46   :  { %v449_v3 = vmax.f32 %v447_v57, %v448_v52  ;;  %v465_v4 = vsel %vm296_vm0, %v881_v44, -inf  ;;  %v788_v5 = vunpack.c.l.bf16 %v1346_v56  ;;  %v469_v6 = vmax.f32 %v467_v62, %v468_v1  ;;  %v1408_v44 = vld [vmem:[%s1539_s0 + $0x130] sm:$0xff]  }
  0x47   :  { %v460_v7 = vmax.f32 %v458_v63, %v459_v54  ;;  %v820_v8 = vunpack.c.l.bf16 %v1353_v60  ;;  %v852_v9 = vunpack.c.l.bf16 %v1358_v61  ;;  %v472_v11 = vsel %vm296_vm0, %v724_v55, -inf }
  0x48   :  { %v577_v12 = vpack.c.bf16 %v449_v3, %v449_v3  ;;  %v471_v13 = vmax.f32 %v469_v6, %v470_v2  ;;  %v629_v14 = vunpack.c.h.bf16 %v898_v31  ;;  %v661_v15 = vunpack.c.h.bf16 %v906_v36 }
  0x49   :  { %v462_v16 = vmax.f32 %v460_v7, %v461_v58  ;;  %v474_v17 = vsel %vm296_vm0, %v756_v0, -inf  ;;  %v693_v18 = vunpack.c.h.bf16 %v914_v37  ;;  %v725_v19 = vunpack.c.h.bf16 %v1330_v42 }
  0x4a   :  { %594 = vst.msk [vmem:[%s1540_s1 + $0x20] sm:$0xf] %vm585_vm1, %v577_v12  ;;  %v884_v20 = vunpack.c.l.bf16 %v1370_v10  ;;  %v473_v21 = vmax.f32 %v471_v13, %v472_v11  ;;  %v476_v22 = vsel %vm296_vm0, %v788_v5, -inf  ;;  %v757_v23 = vunpack.c.h.bf16 %v930_v51  ;;  %v1438_v5 = vld [vmem:[%s1539_s0 + $0x1f0] sm:$0xff]  }
  0x4b   :  { %v464_v24 = vmax.f32 %v462_v16, %v463_v59  ;;  %v478_v25 = vsel %vm296_vm0, %v820_v8, -inf  ;;  %v484_v26 = vsel %vm296_vm0, %v629_v14, -inf  ;;  %v485_v27 = vsel %vm296_vm0, %v661_v15, -inf  ;;  %v1427_v59 = vld [vmem:[%s1539_s0 + $0x1b0] sm:$0xff]  }
  0x4c   :  { %v475_v28 = vmax.f32 %v473_v21, %v474_v17  ;;  %v480_v29 = vsel %vm296_vm0, %v852_v9, -inf  ;;  %v486_v30 = vmax.f32 %v484_v26, %v485_v27  ;;  %v487_v31 = vsel %vm296_vm0, %v693_v18, -inf  ;;  %v1448_v17 = vld [vmem:[%s1539_s0 + $0x230] sm:$0xff]   ;;  %v900_v27 = vld [vmem:[%s1539_s0 + $0x38] sm:$0xff]  }
  0x4d   :  { %v466_v35 = vmax.f32 %v464_v24, %v465_v4  ;;  %v789_v36 = vunpack.c.h.bf16 %v1346_v56  ;;  %v821_v37 = vunpack.c.h.bf16 %v1353_v60  ;;  %v489_v38 = vsel %vm296_vm0, %v725_v19, -inf  ;;  %v1422_v56 = vld [vmem:[%s1539_s0 + $0x170] sm:$0xff]  }
  0x4e   :  { %v477_v40 = vmax.f32 %v475_v28, %v476_v22  ;;  %v853_v41 = vunpack.c.h.bf16 %v1358_v61  ;;  %v488_v42 = vmax.f32 %v486_v30, %v487_v31  ;;  %v491_v43 = vsel %vm296_vm0, %v757_v23, -inf }
  0x4f   :  { %v578_v45 = vpack.c.bf16 %v466_v35, %v466_v35  ;;  %v632_v46 = vunpack.c.l.bf16 %v899_v32  ;;  %v664_v47 = vunpack.c.l.bf16 %v907_v33  ;;  %v696_v48 = vunpack.c.l.bf16 %v915_v34 }
  0x50   :  { %v479_v49 = vmax.f32 %v477_v40, %v478_v25  ;;  %v490_v50 = vmax.f32 %v488_v42, %v489_v38  ;;  %v728_v51 = vunpack.c.l.bf16 %v1401_v39  ;;  %v482_v52 = vsel %vm296_vm0, %v884_v20, -inf  ;;  %v924_v38 = vld [vmem:[%s1539_s0 + $0xf8] sm:$0xff]  }
  0x51   :  { %595 = vst.msk [vmem:[%s1540_s1 + $0x24] sm:$0xf] %vm585_vm1, %v578_v45  ;;  %v885_v53 = vunpack.c.h.bf16 %v1370_v10  ;;  %v493_v54 = vsel %vm296_vm0, %v789_v36, -inf  ;;  %v760_v55 = vunpack.c.l.bf16 %v1408_v44  ;;  %v501_v60 = vsel %vm296_vm0, %v632_v46, -inf }
  0x52   :  { %v481_v57 = vmax.f32 %v479_v49, %v480_v29  ;;  %v492_v58 = vmax.f32 %v490_v50, %v491_v43  ;;  %v502_v61 = vsel %vm296_vm0, %v664_v47, -inf  ;;  %v495_v62 = vsel %vm296_vm0, %v821_v37, -inf  ;;  %v932_v47 = vld [vmem:[%s1539_s0 + $0x138] sm:$0xff]  }
  0x53   :  { %v497_v63 = vsel %vm296_vm0, %v853_v41, -inf  ;;  %v503_v0 = vmax.f32 %v501_v60, %v502_v61  ;;  %v504_v1 = vsel %vm296_vm0, %v696_v48, -inf  ;;  %v792_v4 = vunpack.c.l.bf16 %v1422_v56 }
  0x54   :  { %v483_v2 = vmax.f32 %v481_v57, %v482_v52  ;;  %v494_v3 = vmax.f32 %v492_v58, %v493_v54  ;;  %v506_v6 = vsel %vm296_vm0, %v728_v51, -inf  ;;  %v824_v7 = vunpack.c.l.bf16 %v1427_v59  ;;  %v940_v52 = vld [vmem:[%s1539_s0 + $0x178] sm:$0xff]  }
  0x55   :  { %v505_v8 = vmax.f32 %v503_v0, %v504_v1  ;;  %v508_v9 = vsel %vm296_vm0, %v760_v55, -inf  ;;  %v633_v10 = vunpack.c.h.bf16 %v899_v32  ;;  %v665_v13 = vunpack.c.h.bf16 %v907_v33  ;;  %v908_v32 = vld [vmem:[%s1539_s0 + $0x78] sm:$0xff]  }
  0x56   :  { %v579_v11 = vpack.c.bf16 %v483_v2, %v483_v2  ;;  %v496_v12 = vmax.f32 %v494_v3, %v495_v62  ;;  %v697_v14 = vunpack.c.h.bf16 %v915_v34  ;;  %v499_v15 = vsel %vm296_vm0, %v885_v53, -inf  ;;  %v916_v33 = vld [vmem:[%s1539_s0 + $0xb8] sm:$0xff]  }
  0x57   :  { %v856_v16 = vunpack.c.l.bf16 %v1438_v5  ;;  %v507_v18 = vmax.f32 %v505_v8, %v506_v6  ;;  %v729_v19 = vunpack.c.h.bf16 %v1401_v39  ;;  %v510_v21 = vsel %vm296_vm0, %v792_v4, -inf }
  0x58   :  { %596 = vst.msk [vmem:[%s1540_s1 + $0x28] sm:$0xf] %vm585_vm1, %v579_v11  ;;  %v498_v20 = vmax.f32 %v496_v12, %v497_v63  ;;  %v761_v22 = vunpack.c.h.bf16 %v1408_v44  ;;  %v518_v24 = vsel %vm296_vm0, %v633_v10, -inf  ;;  %v519_v25 = vsel %vm296_vm0, %v665_v13, -inf  ;;  %v964_v12 = vld [vmem:[%s1539_s0 + $0x238] sm:$0xff]  }
  0x59   :  { %v509_v23 = vmax.f32 %v507_v18, %v508_v9  ;;  %v521_v26 = vsel %vm296_vm0, %v697_v14, -inf  ;;  %v888_v29 = vunpack.c.l.bf16 %v1448_v17  ;;  %v512_v30 = vsel %vm296_vm0, %v824_v7, -inf }
  0x5a   :  { %v500_v28 = vmax.f32 %v498_v20, %v499_v15  ;;  %v520_v31 = vmax.f32 %v518_v24, %v519_v25  ;;  %v514_v35 = vsel %vm296_vm0, %v856_v16, -inf  ;;  %v793_v36 = vunpack.c.h.bf16 %v1422_v56  ;;  %v948_v56 = vld [vmem:[%s1539_s0 + $0x1b8] sm:$0xff]  }
  0x5b   :  { %v511_v34 = vmax.f32 %v509_v23, %v510_v21  ;;  %v523_v37 = vsel %vm296_vm0, %v729_v19, -inf  ;;  %v825_v40 = vunpack.c.h.bf16 %v1427_v59  ;;  %v636_v42 = vunpack.c.l.bf16 %v900_v27 }
  0x5c   :  { %v580_v39 = vpack.c.bf16 %v500_v28, %v500_v28  ;;  %v522_v41 = vmax.f32 %v520_v31, %v521_v26  ;;  %v525_v44 = vsel %vm296_vm0, %v761_v22, -inf  ;;  %v668_v45 = vunpack.c.l.bf16 %v908_v32 }
  0x5d   :  { %v513_v43 = vmax.f32 %v511_v34, %v512_v30  ;;  %v700_v46 = vunpack.c.l.bf16 %v916_v33  ;;  %v516_v48 = vsel %vm296_vm0, %v888_v29, -inf  ;;  %v857_v49 = vunpack.c.h.bf16 %v1438_v5  ;;  %v956_v5 = vld [vmem:[%s1539_s0 + $0x1f8] sm:$0xff]  }
  0x5e   :  { %597 = vst.msk [vmem:[%s1540_s1 + $0x2c] sm:$0xf] %vm585_vm1, %v580_v39  ;;  %v524_v50 = vmax.f32 %v522_v41, %v523_v37  ;;  %v732_v51 = vunpack.c.l.bf16 %v924_v38  ;;  %v889_v54 = vunpack.c.h.bf16 %v1448_v17  ;;  %v527_v55 = vsel %vm296_vm0, %v793_v36, -inf }
  0x5f   :  { %v515_v53 = vmax.f32 %v513_v43, %v514_v35  ;;  %v535_v57 = vsel %vm296_vm0, %v636_v42, -inf  ;;  %v764_v59 = vunpack.c.l.bf16 %v932_v47  ;;  %v536_v60 = vsel %vm296_vm0, %v668_v45, -inf }
  0x60   :  { %v526_v58 = vmax.f32 %v524_v50, %v525_v44  ;;  %v538_v61 = vsel %vm296_vm0, %v700_v46, -inf  ;;  %v529_v63 = vsel %vm296_vm0, %v825_v40, -inf  ;;  %v796_v0 = vunpack.c.l.bf16 %v940_v52 }
  0x61   :  { %v517_v62 = vmax.f32 %v515_v53, %v516_v48  ;;  %v537_v1 = vmax.f32 %v535_v57, %v536_v60  ;;  %v531_v3 = vsel %vm296_vm0, %v857_v49, -inf  ;;  %v828_v4 = vunpack.c.l.bf16 %v948_v56 }
  0x62   :  { %v528_v2 = vmax.f32 %v526_v58, %v527_v55  ;;  %v540_v6 = vsel %vm296_vm0, %v732_v51, -inf  ;;  %v637_v9 = vunpack.c.h.bf16 %v900_v27  ;;  %v669_v10 = vunpack.c.h.bf16 %v908_v32 }
  0x63   :  { %v581_v7 = vpack.c.bf16 %v517_v62, %v517_v62  ;;  %v539_v8 = vmax.f32 %v537_v1, %v538_v61  ;;  %v542_v13 = vsel %vm296_vm0, %v764_v59, -inf  ;;  %v701_v14 = vunpack.c.h.bf16 %v916_v33 }
  0x64   :  { %v530_v11 = vmax.f32 %v528_v2, %v529_v63  ;;  %v733_v15 = vunpack.c.h.bf16 %v924_v38  ;;  %v533_v16 = vsel %vm296_vm0, %v889_v54, -inf  ;;  %v860_v17 = vunpack.c.l.bf16 %v956_v5 }
  0x65   :  { %598 = vst.msk [vmem:[%s1540_s1 + $0x30] sm:$0xf] %vm585_vm1, %v581_v7  ;;  %v541_v18 = vmax.f32 %v539_v8, %v540_v6  ;;  %v544_v19 = vsel %vm296_vm0, %v796_v0, -inf  ;;  %v765_v21 = vunpack.c.h.bf16 %v932_v47  ;;  %v552_v22 = vsel %vm296_vm0, %v637_v9, -inf }
  0x66   :  { %v532_v20 = vmax.f32 %v530_v11, %v531_v3  ;;  %v553_v23 = vsel %vm296_vm0, %v669_v10, -inf  ;;  %v892_v24 = vunpack.c.l.bf16 %v964_v12  ;;  %v555_v27 = vsel %vm296_vm0, %v701_v14, -inf }
  0x67   :  { %v543_v25 = vmax.f32 %v541_v18, %v542_v13  ;;  %v554_v26 = vmax.f32 %v552_v22, %v553_v23  ;;  %v546_v29 = vsel %vm296_vm0, %v828_v4, -inf  ;;  %v797_v30 = vunpack.c.h.bf16 %v940_v52 }
  0x68   :  { %v534_v28 = vmax.f32 %v532_v20, %v533_v16  ;;  %v557_v31 = vsel %vm296_vm0, %v733_v15, -inf  ;;  %v548_v35 = vsel %vm296_vm0, %v860_v17, -inf  ;;  %v829_v36 = vunpack.c.h.bf16 %v948_v56 }
  0x69   :  { %v545_v32 = vmax.f32 %v543_v25, %v544_v19  ;;  %v556_v33 = vmax.f32 %v554_v26, %v555_v27  ;;  %v559_v37 = vsel %vm296_vm0, %v765_v21, -inf  ;;  %v550_v40 = vsel %vm296_vm0, %v892_v24, -inf }
  0x6a   :  { %v582_v34 = vpack.c.bf16 %v534_v28, %v534_v28  ;;  %v861_v41 = vunpack.c.h.bf16 %v956_v5  ;;  %v561_v42 = vsel %vm296_vm0, %v797_v30, -inf  ;;  %v893_v45 = vunpack.c.h.bf16 %v964_v12 }
  0x6b   :  { %v547_v38 = vmax.f32 %v545_v32, %v546_v29  ;;  %v558_v39 = vmax.f32 %v556_v33, %v557_v31  ;;  %v563_v46 = vsel %vm296_vm0, %v829_v36, -inf }
  0x6c   :  { %599 = vst.msk [vmem:[%s1540_s1 + $0x34] sm:$0xf] %vm585_vm1, %v582_v34  ;;  %v565_v49 = vsel %vm296_vm0, %v861_v41, -inf  ;;  %v567_v52 = vsel %vm296_vm0, %v893_v45, -inf }
  0x6d   :  { %v549_v43 = vmax.f32 %v547_v38, %v548_v35  ;;  %v560_v44 = vmax.f32 %v558_v39, %v559_v37 }
  0x6f   :  { %v551_v47 = vmax.f32 %v549_v43, %v550_v40  ;;  %v562_v48 = vmax.f32 %v560_v44, %v561_v42 }
  0x71   :  { %v583_v50 = vpack.c.bf16 %v551_v47, %v551_v47  ;;  %v564_v51 = vmax.f32 %v562_v48, %v563_v46 }
  0x73   :  { %600 = vst.msk [vmem:[%s1540_s1 + $0x38] sm:$0xf] %vm585_vm1, %v583_v50  ;;  %v566_v53 = vmax.f32 %v564_v51, %v565_v49 }
  0x75   :  { %v568_v54 = vmax.f32 %v566_v53, %v567_v52 }
  0x77   :  { %v584_v55 = vpack.c.bf16 %v568_v54, %v568_v54 }
  0x79   :  { %601 = vst.msk [vmem:[%s1540_s1 + $0x3c] sm:$0xf] %vm585_vm1, %v584_v55 }

// kernel: _lambda_.24
= control target key start
LH: loop header
LB: loop body
LE: loop exit
PB: predicated region body
PF: predicated region fallthrough
CT: control target
= control target key end

     0   :  { %s1068_s12 = smov 0   ;;  %s1070_s13 = smov 0   ;;  %s1200_s0 = inlined_call_operand.vmem [shape: bf16[128,640], index: 0, kind: input, shape index: {}]   ;;  %s1201_s1 = inlined_call_operand.vmem [shape: bf16[640,128], index: 1, kind: input, shape index: {}]   ;;  %s1202_s2 = inlined_call_operand.vmem [shape: f32[1,128], index: 2, kind: input, shape index: {}]   ;;  %s1203_s3 = inlined_call_operand.vmem [shape: bf16[128,128], index: 3, kind: output, shape index: {}]  }
   0x1   :  { %s1072_s14 = smov 0   ;;  %s1074_s15 = smov 0  }
   0x2   :  { %s1076_s16 = smov 0  }
   0x3 LB: > { %s25_s17 = sadd.s32 1, %s1041_s15  ;;  %p48_p1 = scmp.ne.s32.totalorder %s1033_s13, %s1029_s12  ;;  %s1045_s16 = sphi %s1076_s16, %s13_s16   ;;  %s1041_s15 = sphi %s1074_s15, %s1207_s15   ;;  %s1037_s14 = sphi %s1072_s14, %s1206_s14   ;;  %s1033_s13 = sphi %s1070_s13, %s1205_s13   ;;  %s1029_s12 = sphi %s1068_s12, %s1204_s12  }
   0x4   : > { %p26_p0 = scmp.ge.s32.totalorder %s25_s17, 5  ;;  %p49_p2 = scmp.eq.s32.totalorder %s1045_s16, 0 }
   0x5   : > { %s41_s19 = sadd.s32 1, %s1033_s13  ;;  %p801_p5 = scmp.ge.s32.totalorder %s1045_s16, 5 }
   0x6   : > { %s1209_s17 = smov (%p26_p0, %s25_s17), 0  ;;  %p50_p3 = por %p49_p2, %p48_p1 }
   0x7   : > { %s37_s18 = ssub.s32 %s1041_s15, %s1209_s17  ;;  %162 = sbr.rel (%p801_p5) target bundleno = 32 (0x20), region = 20 }
   0x8   : > { %p39_p4 = scmp.eq.s32.totalorder %s37_s18, 0 }
   0xa   : > { %s1103_s20 = scalar_select %p39_p4, %s1033_s13, %s41_s19  }
   0xc   : > { %165 = sbr.rel (!%p50_p3) target bundleno = 32 (0x20), region = 24  ;;  %s167_s21 = sand.u32 (%p50_p3), 1, %s1033_s13  }
   0xd   : > { %s803_s22 = sshll.u32 (%p50_p3), %s1041_s15, 2  ;;  %s802_s23 = sshll.u32 (%p50_p3), %s167_s21, 6 }
   0xe   : > { %s1111_s26 = scalar_lea.vmem (%p50_p3), %s1200_s0, %s803_s22  ;;  %s169_s27 = scalar_lea.vmem (%p50_p3), [#allocation3], %s802_s23 }
   0xf   : > { %v191_v0 = vld [vmem:[%s1111_s26] sm:$0xf] (%p50_p3)  ;;  %v193_v1 = vld [vmem:[%s1111_s26 + $0x14] sm:$0xf] (%p50_p3)  ;;  %v195_v2 = vld [vmem:[%s1111_s26 + $0x28] sm:$0xf] (%p50_p3) }
  0x10   : > { %192 = vst [vmem:[%s169_s27] sm:$0xf] (%p50_p3), %v191_v0  ;;  %v197_v3 = vld [vmem:[%s1111_s26 + $0x3c] sm:$0xf] (%p50_p3)  ;;  %v199_v4 = vld [vmem:[%s1111_s26 + $0x50] sm:$0xf] (%p50_p3) }
  0x11   : > { %194 = vst [vmem:[%s169_s27 + $0x4] sm:$0xf] %v193_v1  ;;  %v201_v5 = vld [vmem:[%s1111_s26 + $0x64] sm:$0xf]  ;;  %v203_v6 = vld [vmem:[%s1111_s26 + $0x78] sm:$0xf] }
  0x12   : > { %196 = vst [vmem:[%s169_s27 + $0x8] sm:$0xf] %v195_v2  ;;  %v205_v7 = vld [vmem:[%s1111_s26 + $0x8c] sm:$0xf]  ;;  %v207_v8 = vld [vmem:[%s1111_s26 + $0xa0] sm:$0xf] }
  0x13   : > { %198 = vst [vmem:[%s169_s27 + $0xc] sm:$0xf] %v197_v3  ;;  %v209_v9 = vld [vmem:[%s1111_s26 + $0xb4] sm:$0xf]  ;;  %v211_v10 = vld [vmem:[%s1111_s26 + $0xc8] sm:$0xf] }
  0x14   : > { %200 = vst [vmem:[%s169_s27 + $0x10] sm:$0xf] %v199_v4  ;;  %v213_v11 = vld [vmem:[%s1111_s26 + $0xdc] sm:$0xf]  ;;  %v215_v12 = vld [vmem:[%s1111_s26 + $0xf0] sm:$0xf] }
  0x15   : > { %202 = vst [vmem:[%s169_s27 + $0x14] sm:$0xf] %v201_v5  ;;  %v217_v13 = vld [vmem:[%s1111_s26 + $0x104] sm:$0xf]  ;;  %v219_v14 = vld [vmem:[%s1111_s26 + $0x118] sm:$0xf] }
  0x16   : > { %204 = vst [vmem:[%s169_s27 + $0x18] sm:$0xf] %v203_v6  ;;  %v221_v15 = vld [vmem:[%s1111_s26 + $0x12c] sm:$0xf] }
  0x17   : > { %206 = vst [vmem:[%s169_s27 + $0x1c] sm:$0xf] %v205_v7 }
  0x18   : > { %208 = vst [vmem:[%s169_s27 + $0x20] sm:$0xf] %v207_v8 }
  0x19   : > { %210 = vst [vmem:[%s169_s27 + $0x24] sm:$0xf] %v209_v9 }
  0x1a   : > { %212 = vst [vmem:[%s169_s27 + $0x28] sm:$0xf] %v211_v10 }
  0x1b   : > { %214 = vst [vmem:[%s169_s27 + $0x2c] sm:$0xf] %v213_v11 }
  0x1c   : > { %216 = vst [vmem:[%s169_s27 + $0x30] sm:$0xf] %v215_v12 }
  0x1d   : > { %218 = vst [vmem:[%s169_s27 + $0x34] sm:$0xf] %v217_v13 }
  0x1e   : > { %220 = vst [vmem:[%s169_s27 + $0x38] sm:$0xf] %v219_v14 }
  0x1f   : > { %222 = vst [vmem:[%s169_s27 + $0x3c] sm:$0xf] %v221_v15 }
  0x20 PF: > { %p804_p6 = scmp.ge.s32.totalorder %s1045_s16, 1  ;;  %p289_p7 = scmp.lt.s32.totalorder %s1045_s16, 6 }
  0x22   : > { %p290_p8 = pnand %p804_p6, %p289_p7 }
  0x23   : > { %s296_s28 = sand.u32 (!%p290_p8), 1, %s1029_s12   ;;  %s806_s29 = sshll.u32 (!%p290_p8), %s1037_s14, 4 }
  0x24   : > { %293 = sbr.rel (%p290_p8) target bundleno = 272 (0x110), region = 69  ;;  %s805_s30 = sshll.u32 (!%p290_p8), %s296_s28, 6 }
  0x25   : > { %p335_p9 = scmp.lt.s32.totalorder (!%p290_p8), %s806_s29, 79  ;;  %s1138_s8 = scalar_lea.vmem (!%p290_p8), [#allocation3], %s805_s30 }
  0x26   : > { %p808_p10 = scmp.ne.s32.totalorder (!%p290_p8), %s1037_s14, 0 }
  0x29   : > { %s1211_s29 = smov (!%p335_p9, %s806_s29), 79  ;;  %358 = sbr.rel (%p808_p10) target bundleno = 63 (0x3f), region = 77 }
  0x2a   : > { %s807_s4 = sshll.u32 %s1211_s29, 2 }
  0x2b   : > { %s1136_s7 = scalar_lea.vmem %s1201_s1, %s807_s4 }
  0x2e   : > { %v1047_v16 = vmov 0.0  }
  0x2f   : > { %359 = vst [vmem:[#allocation2 + $0x30] sm:$0xff] %v1047_v16 }
  0x30   : > { %360 = vst [vmem:[#allocation2] sm:$0xff] %v1047_v16 }
  0x31   : > { %361 = vst [vmem:[#allocation2 + $0x58] sm:$0xff] %v1047_v16 }
  0x32   : > { %362 = vst [vmem:[#allocation2 + $0x18] sm:$0xff] %v1047_v16 }
  0x33   : > { %363 = vst [vmem:[#allocation2 + $0x50] sm:$0xff] %v1047_v16 }
  0x34   : > { %364 = vst [vmem:[#allocation2 + $0x68] sm:$0xff] %v1047_v16 }
  0x35   : > { %365 = vst [vmem:[#allocation2 + $0x8] sm:$0xff] %v1047_v16 }
  0x36   : > { %366 = vst [vmem:[#allocation2 + $0x48] sm:$0xff] %v1047_v16 }
  0x37   : > { %367 = vst [vmem:[#allocation2 + $0x40] sm:$0xff] %v1047_v16 }
  0x38   : > { %368 = vst [vmem:[#allocation2 + $0x20] sm:$0xff] %v1047_v16 }
  0x39   : > { %369 = vst [vmem:[#allocation2 + $0x10] sm:$0xff] %v1047_v16 }
  0x3a   : > { %370 = vst [vmem:[#allocation2 + $0x38] sm:$0xff] %v1047_v16 }
  0x3b   : > { %371 = vst [vmem:[#allocation2 + $0x60] sm:$0xff] %v1047_v16 }
  0x3c   : > { %372 = vst [vmem:[#allocation2 + $0x70] sm:$0xff] %v1047_v16 }
  0x3d   : > { %373 = vst [vmem:[#allocation2 + $0x78] sm:$0xff] %v1047_v16 }
  0x3e   : > { %374 = vst [vmem:[#allocation2 + $0x28] sm:$0xff] %v1047_v16 }
  0x3f PF: > { %v893_v17 = vld [vmem:[%s1136_s7 + $0x38] sm:$0xff]  ;;  %v892_v18 = vld [vmem:[%s1136_s7 + $0x30] sm:$0xff]  ;;  %v891_v19 = vld [vmem:[%s1136_s7 + $0x28] sm:$0xff]  ;;  %p873_p11 = scmp.ne.s32.totalorder %s1037_s14, 4 }
  0x40   : > { %519 = vmatpush.bf16.msra.mxu0 %v893_v17  ;;  %941 = vmatpush.bf16.msra.mxu1 %v893_v17  ;;  %v890_v20 = vld [vmem:[%s1136_s7 + $0x20] sm:$0xff]  ;;  %v889_v21 = vld [vmem:[%s1136_s7 + $0x18] sm:$0xff]  ;;  %v888_v22 = vld [vmem:[%s1136_s7 + $0x10] sm:$0xff] }
  0x41   : > { %942 = vmatpush.bf16.msra.mxu2 %v893_v17  ;;  %943 = vmatpush.bf16.msra.mxu3 %v893_v17  ;;  %v887_v23 = vld [vmem:[%s1136_s7 + $0x8] sm:$0xff]  ;;  %v886_v24 = vld [vmem:[%s1136_s7] sm:$0xff]  ;;  %v880_v26 = vld [vmem:[%s1138_s8 + $0x10] sm:$0xff] }
  0x42   : > { %v878_v25 = vld [vmem:[%s1138_s8] sm:$0xff]  ;;  %v884_v28 = vld [vmem:[%s1138_s8 + $0x30] sm:$0xff]  ;;  %v879_v29 = vld [vmem:[%s1138_s8 + $0x8] sm:$0xff] }
  0x43   : > { %v882_v27 = vld [vmem:[%s1138_s8 + $0x20] sm:$0xff]  ;;  %v881_v30 = vld [vmem:[%s1138_s8 + $0x18] sm:$0xff]  ;;  %v883_v31 = vld [vmem:[%s1138_s8 + $0x28] sm:$0xff] }
  0x44   : > { %520 = vmatpush.bf16.msra.mxu0 %v892_v18  ;;  %944 = vmatpush.bf16.msra.mxu1 %v892_v18  ;;  %v885_v32 = vld [vmem:[%s1138_s8 + $0x38] sm:$0xff]  ;;  %v375_v33 = vld [vmem:[#allocation2 + $0x30] sm:$0xff]  ;;  %v383_v39 = vld [vmem:[#allocation2 + $0x40] sm:$0xff] }
  0x45   : > { %945 = vmatpush.bf16.msra.mxu2 %v892_v18  ;;  %946 = vmatpush.bf16.msra.mxu3 %v892_v18  ;;  %v379_v34 = vld [vmem:[#allocation2 + $0x50] sm:$0xff]  ;;  %v387_v40 = vld [vmem:[#allocation2 + $0x60] sm:$0xff]  ;;  %v380_v42 = vld [vmem:[#allocation2 + $0x68] sm:$0xff] }
  0x46   : > { %v376_v41 = vld [vmem:[#allocation2] sm:$0xff]  ;;  %v388_v52 = vld [vmem:[#allocation2 + $0x70] sm:$0xff]  ;;  %v377_v53 = vld [vmem:[#allocation2 + $0x58] sm:$0xff] }
  0x47   : > { %v384_v51 = vld [vmem:[#allocation2 + $0x20] sm:$0xff]  ;;  %v381_v54 = vld [vmem:[#allocation2 + $0x8] sm:$0xff]  ;;  %v385_v63 = vld [vmem:[#allocation2 + $0x10] sm:$0xff] }
  0x48   : > { %521 = vmatpush.bf16.msra.mxu0 %v891_v19  ;;  %947 = vmatpush.bf16.msra.mxu1 %v891_v19  ;;  %v389_v0 = vld [vmem:[#allocation2 + $0x78] sm:$0xff]  ;;  %v382_v2 = vld [vmem:[#allocation2 + $0x48] sm:$0xff] }
  0x49   : > { %948 = vmatpush.bf16.msra.mxu2 %v891_v19  ;;  %949 = vmatpush.bf16.msra.mxu3 %v891_v19  ;;  %v378_v1 = vld [vmem:[#allocation2 + $0x18] sm:$0xff]  ;;  %v390_v12 = vld [vmem:[#allocation2 + $0x28] sm:$0xff] }
  0x4a   : > { %v386_v11 = vld [vmem:[#allocation2 + $0x38] sm:$0xff] }
  0x4c   : > { %522 = vmatpush.bf16.msra.mxu0 %v890_v20  ;;  %950 = vmatpush.bf16.msra.mxu1 %v890_v20 }
  0x4d   : > { %951 = vmatpush.bf16.msra.mxu2 %v890_v20  ;;  %952 = vmatpush.bf16.msra.mxu3 %v890_v20 }
  0x50   : > { %523 = vmatpush.bf16.msra.mxu0 %v889_v21  ;;  %953 = vmatpush.bf16.msra.mxu1 %v889_v21 }
  0x51   : > { %954 = vmatpush.bf16.msra.mxu2 %v889_v21  ;;  %955 = vmatpush.bf16.msra.mxu3 %v889_v21 }
  0x54   : > { %524 = vmatpush.bf16.msra.mxu0 %v888_v22  ;;  %956 = vmatpush.bf16.msra.mxu1 %v888_v22 }
  0x55   : > { %957 = vmatpush.bf16.msra.mxu2 %v888_v22  ;;  %958 = vmatpush.bf16.msra.mxu3 %v888_v22 }
  0x58   : > { %525 = vmatpush.bf16.msra.mxu0 %v887_v23  ;;  %959 = vmatpush.bf16.msra.mxu1 %v887_v23 }
  0x59   : > { %960 = vmatpush.bf16.msra.mxu2 %v887_v23  ;;  %961 = vmatpush.bf16.msra.mxu3 %v887_v23 }
  0x5c   : > { %526 = vmatpush.bf16.msra.mxu0 %v886_v24  ;;  %962 = vmatpush.bf16.msra.mxu1 %v886_v24 }
  0x5d   : > { %963 = vmatpush.bf16.msra.mxu2 %v886_v24  ;;  %964 = vmatpush.bf16.msra.mxu3 %v886_v24 }
  0x5f   : > { %527 = vmatmul.bf16.vlgmr.msra.gmra.mxu0 %v878_v25  ;;  %537 = vmatmul.bf16.vlgmr.msra.gmra.mxu1 %v880_v26 }
  0x60   : > { %547 = vmatmul.bf16.vlgmr.msra.gmra.mxu2 %v882_v27  ;;  %557 = vmatmul.bf16.vlgmr.msra.gmra.mxu3 %v884_v28 }
  0x6f   : > { %532 = vmatmul.bf16.gmra.mxu0 %v879_v29  ;;  %542 = vmatmul.bf16.gmra.mxu1 %v881_v30 }
  0x70   : > { %552 = vmatmul.bf16.gmra.mxu2 %v883_v31  ;;  %562 = vmatmul.bf16.gmra.mxu3 %v885_v32 }
  0xdc   : > { %v528_v35 = vpop.f32.mrf.mxu0  ;;  %v538_v36 = vpop.f32.mrf.mxu1 }
  0xdd   : > { %v568_v37 = vadd.f32 %v528_v35, %v375_v33  ;;  %v572_v38 = vadd.f32 %v538_v36, %v379_v34 }
  0xdf   : > { %584 = vst [vmem:[#allocation2 + $0x30] sm:$0xff] %v568_v37 }
  0xe0   : > { %588 = vst [vmem:[#allocation2 + $0x50] sm:$0xff] %v572_v38 }
  0xe3   : > { %v548_v43 = vpop.f32.mrf.mxu2  ;;  %v558_v44 = vpop.f32.mrf.mxu3 }
  0xe4   : > { %v576_v45 = vadd.f32 %v548_v43, %v383_v39  ;;  %v580_v46 = vadd.f32 %v558_v44, %v387_v40  ;;  %v530_v47 = vpop.f32.mrf.mxu0  ;;  %v540_v48 = vpop.f32.mrf.mxu1 }
  0xe5   : > { %v569_v49 = vadd.f32 %v530_v47, %v376_v41  ;;  %v573_v50 = vadd.f32 %v540_v48, %v380_v42 }
  0xe6   : > { %592 = vst [vmem:[#allocation2 + $0x40] sm:$0xff] %v576_v45 }
  0xe7   : > { %596 = vst [vmem:[#allocation2 + $0x60] sm:$0xff] %v580_v46 }
  0xe8   : > { %585 = vst [vmem:[#allocation2] sm:$0xff] %v569_v49 }
  0xe9   : > { %589 = vst [vmem:[#allocation2 + $0x68] sm:$0xff] %v573_v50 }
  0xeb   : > { %v550_v55 = vpop.f32.mrf.mxu2  ;;  %v560_v56 = vpop.f32.mrf.mxu3 }
  0xec   : > { %v577_v57 = vadd.f32 %v550_v55, %v384_v51  ;;  %v581_v58 = vadd.f32 %v560_v56, %v388_v52  ;;  %v533_v59 = vpop.f32.mrf.mxu0  ;;  %v543_v60 = vpop.f32.mrf.mxu1 }
  0xed   : > { %v570_v61 = vadd.f32 %v533_v59, %v377_v53  ;;  %v574_v62 = vadd.f32 %v543_v60, %v381_v54 }
  0xee   : > { %593 = vst [vmem:[#allocation2 + $0x20] sm:$0xff] %v577_v57 }
  0xef   : > { %597 = vst [vmem:[#allocation2 + $0x70] sm:$0xff] %v581_v58 }
  0xf0   : > { %586 = vst [vmem:[#allocation2 + $0x58] sm:$0xff] %v570_v61 }
  0xf1   : > { %590 = vst [vmem:[#allocation2 + $0x8] sm:$0xff] %v574_v62 }
  0xf3   : > { %v553_v3 = vpop.f32.mrf.mxu2  ;;  %v563_v4 = vpop.f32.mrf.mxu3 }
  0xf4   : > { %v578_v5 = vadd.f32 %v553_v3, %v385_v63  ;;  %v582_v6 = vadd.f32 %v563_v4, %v389_v0  ;;  %v535_v7 = vpop.f32.mrf.mxu0  ;;  %v545_v8 = vpop.f32.mrf.mxu1 }
  0xf5   : > { %v571_v9 = vadd.f32 %v535_v7, %v378_v1  ;;  %v575_v10 = vadd.f32 %v545_v8, %v382_v2 }
  0xf6   : > { %594 = vst [vmem:[#allocation2 + $0x10] sm:$0xff] %v578_v5 }
  0xf7   : > { %598 = vst [vmem:[#allocation2 + $0x78] sm:$0xff] %v582_v6 }
  0xf8   : > { %587 = vst [vmem:[#allocation2 + $0x18] sm:$0xff] %v571_v9 }
  0xf9   : > { %591 = vst [vmem:[#allocation2 + $0x48] sm:$0xff] %v575_v10 }
  0xfb   : > { %v555_v13 = vpop.f32.mrf.mxu2  ;;  %v565_v14 = vpop.f32.mrf.mxu3  ;;  %603 = sbr.rel (%p873_p11) target bundleno = 272 (0x110), region = 81 }
  0xfc   : > { %v579_v15 = vadd.f32 %v555_v13, %v386_v11  ;;  %v583_v16 = vadd.f32 %v565_v14, %v390_v12 }
  0xfe   : > { %595 = vst [vmem:[#allocation2 + $0x38] sm:$0xff] %v579_v15 }
  0xff   : > { %599 = vst [vmem:[#allocation2 + $0x28] sm:$0xff] %v583_v16 }
 0x100   : > { %v604_v17 = vld [vmem:[#allocation2 + $0x30] sm:$0xff]  ;;  %v605_v18 = vld [vmem:[#allocation2] sm:$0xff]  ;;  %v606_v20 = vld [vmem:[#allocation2 + $0x58] sm:$0xff] }
 0x101   : > { %v1006_v19 = vld [vmem:[%s1202_s2] ss:$0 sm:$0xff]  ;;  %v607_v21 = vld [vmem:[#allocation2 + $0x18] sm:$0xff]  ;;  %v608_v22 = vld [vmem:[#allocation2 + $0x50] sm:$0xff] }
 0x102   : > { %v609_v23 = vld [vmem:[#allocation2 + $0x68] sm:$0xff]  ;;  %v624_v25 = vadd.f32 %v1006_v19, %v604_v17  ;;  %v625_v26 = vadd.f32 %v1006_v19, %v605_v18  ;;  %v626_v27 = vadd.f32 %v1006_v19, %v606_v20  ;;  %v627_v28 = vadd.f32 %v1006_v19, %v607_v21  ;;  %v612_v34 = vld [vmem:[#allocation2 + $0x40] sm:$0xff]  ;;  %v614_v40 = vld [vmem:[#allocation2 + $0x10] sm:$0xff] }
 0x103   : > { %v610_v24 = vld [vmem:[#allocation2 + $0x8] sm:$0xff]  ;;  %v628_v30 = vadd.f32 %v1006_v19, %v608_v22  ;;  %v629_v31 = vadd.f32 %v1006_v19, %v609_v23  ;;  %v613_v35 = vld [vmem:[#allocation2 + $0x20] sm:$0xff]  ;;  %v617_v47 = vld [vmem:[#allocation2 + $0x70] sm:$0xff]  ;;  %v632_v50 = vadd.f32 %v1006_v19, %v612_v34  ;;  %v634_v56 = vadd.f32 %v1006_v19, %v614_v40 }
 0x104   : > { %v611_v29 = vld [vmem:[#allocation2 + $0x48] sm:$0xff]  ;;  %v630_v32 = vadd.f32 %v1006_v19, %v610_v24  ;;  %v640_v36 = vmax.f32 %v624_v25, 0.0  ;;  %v641_v37 = vmax.f32 %v625_v26, 0.0  ;;  %v642_v38 = vmax.f32 %v626_v27, 0.0  ;;  %v616_v46 = vld [vmem:[#allocation2 + $0x60] sm:$0xff]  ;;  %v618_v52 = vld [vmem:[#allocation2 + $0x78] sm:$0xff] }
 0x105   : > { %v631_v33 = vadd.f32 %v1006_v19, %v611_v29  ;;  %v643_v39 = vmax.f32 %v627_v28, 0.0  ;;  %v615_v41 = vld [vmem:[#allocation2 + $0x38] sm:$0xff]  ;;  %v644_v42 = vmax.f32 %v628_v30, 0.0  ;;  %v645_v43 = vmax.f32 %v629_v31, 0.0 }
 0x106   : > { %v646_v44 = vmax.f32 %v630_v32, 0.0  ;;  %v897_v48 = vpack.c.bf16 %v641_v37, %v640_v36  ;;  %v633_v51 = vadd.f32 %v1006_v19, %v613_v35  ;;  %v619_v53 = vld [vmem:[#allocation2 + $0x28] sm:$0xff]  ;;  %v635_v57 = vadd.f32 %v1006_v19, %v615_v41 }
 0x107   : > { %v647_v45 = vmax.f32 %v631_v33, 0.0  ;;  %v902_v49 = vpack.c.bf16 %v643_v39, %v642_v38  ;;  %v907_v54 = vpack.c.bf16 %v645_v43, %v644_v42  ;;  %v648_v58 = vmax.f32 %v632_v50, 0.0 }
 0x108   : > { %898 = vst [vmem:[%s1203_s3] sm:$0xff] %v897_v48   ;;  %v649_v59 = vmax.f32 %v633_v51, 0.0  ;;  %v636_v60 = vadd.f32 %v1006_v19, %v616_v46  ;;  %v637_v61 = vadd.f32 %v1006_v19, %v617_v47  ;;  %v650_v62 = vmax.f32 %v634_v56, 0.0 }
 0x109   : > { %v912_v55 = vpack.c.bf16 %v647_v45, %v646_v44  ;;  %934 = vst [vmem:[%s1203_s3 + $0x8] sm:$0xff] %v902_v49   ;;  %v651_v63 = vmax.f32 %v635_v57, 0.0  ;;  %v638_v0 = vadd.f32 %v1006_v19, %v618_v52  ;;  %v639_v1 = vadd.f32 %v1006_v19, %v619_v53 }
 0x10a   : > { %935 = vst [vmem:[%s1203_s3 + $0x10] sm:$0xff] %v907_v54   ;;  %v917_v2 = vpack.c.bf16 %v649_v59, %v648_v58  ;;  %v652_v3 = vmax.f32 %v636_v60, 0.0  ;;  %v653_v4 = vmax.f32 %v637_v61, 0.0 }
 0x10b   : > { %936 = vst [vmem:[%s1203_s3 + $0x18] sm:$0xff] %v912_v55   ;;  %v922_v5 = vpack.c.bf16 %v651_v63, %v650_v62  ;;  %v654_v6 = vmax.f32 %v638_v0, 0.0  ;;  %v655_v7 = vmax.f32 %v639_v1, 0.0 }
 0x10c   : > { %937 = vst [vmem:[%s1203_s3 + $0x20] sm:$0xff] %v917_v2   ;;  %v927_v8 = vpack.c.bf16 %v653_v4, %v652_v3 }
 0x10d   : > { %938 = vst [vmem:[%s1203_s3 + $0x28] sm:$0xff] %v922_v5   ;;  %v932_v9 = vpack.c.bf16 %v655_v7, %v654_v6 }
 0x10e   : > { %939 = vst [vmem:[%s1203_s3 + $0x30] sm:$0xff] %v927_v8  }
 0x10f   : > { %940 = vst [vmem:[%s1203_s3 + $0x38] sm:$0xff] %v932_v9  }
 0x110 PF: > { %s13_s16 = sadd.s32 1, %s1045_s16   ;;  %s1204_s12 = smov %s1033_s13 }
 0x111   : > { %p10_p12 = scmp.ge.s32.totalorder %s13_s16, 7   ;;  %s1205_s13 = smov %s1103_s20 }
 0x112   : > { %s1206_s14 = smov %s1041_s15  ;;  %s1207_s15 = smov %s1209_s17 }
 0x113   :  { %12 = sbr.rel (!%p10_p12) target bundleno = 3 (0x3), region = 122 }

// kernel: _lambda_.26
= control target key start
LH: loop header
LB: loop body
LE: loop exit
PB: predicated region body
PF: predicated region fallthrough
CT: control target
= control target key end

     0   :  { %8 = vsyncpa [#allocation5], 0  ;;  %s1123_s12 = smov 0   ;;  %s1125_s13 = smov 0   ;;  %s1280_s0 = inlined_call_operand.vmem [shape: bf16[128,640], index: 0, kind: input, shape index: {}]   ;;  %s1281_s1 = inlined_call_operand.vmem [shape: bf16[640,128], index: 1, kind: input, shape index: {}]   ;;  %s1282_s2 = inlined_call_operand.hbm [shape: f32[1,128], index: 2, kind: input, shape index: {}]   ;;  %s1283_s3 = inlined_call_operand.vmem [shape: bf16[128,128], index: 3, kind: output, shape index: {}]  }
   0x1   :  { %s1127_s14 = smov 0   ;;  %s1129_s15 = smov 0  }
   0x2   :  { %s1131_s16 = smov 0  }
   0x3 LB: > { %s806_s17 = sadd.s32 4294967295, %s1099_s16   ;;  %s26_s18 = sadd.s32 1, %s1095_s15  ;;  %s1099_s16 = sphi %s1131_s16, %s14_s16   ;;  %s1095_s15 = sphi %s1129_s15, %s1290_s15   ;;  %s1091_s14 = sphi %s1127_s14, %s1289_s14   ;;  %s1087_s13 = sphi %s1125_s13, %s1288_s13   ;;  %s1083_s12 = sphi %s1123_s12, %s1287_s12  }
   0x4   : > { %p27_p0 = scmp.ge.s32.totalorder %s26_s18, 5  ;;  %s42_s19 = sadd.s32 1, %s1087_s13 }
   0x5   : > { %p49_p1 = scmp.ne.s32.totalorder %s1087_s13, %s1083_s12  ;;  %p50_p2 = scmp.eq.s32.totalorder %s1099_s16, 0 }
   0x6   : > { %s1292_s18 = smov (%p27_p0, %s26_s18), 0  ;;  %p807_p4 = scmp.ge.s32.totalorder %s1099_s16, 1 }
   0x7   : > { %p1156_p3 = por %p50_p2, %p49_p1  ;;  %s38_s21 = ssub.s32 %s1095_s15, %s1292_s18 }
   0x8   : > { %p148_p5 = scmp.lt.s32.totalorder %s1099_s16, 6  ;;  %p40_p6 = scmp.eq.s32.totalorder %s38_s21, 0 }
   0x9   : > { %p1168_p8 = scmp.eq.s32.totalorder %s806_s17, 0  ;;  %s161_s27 = sshll.u32 %s1282_s2, 4  ;;  %s162_s27 = int_to_ptr.hbm [resolvable:$true] %s161_s27 }
   0xa   : > { %p1164_p7 = pnand %p807_p4, %p148_p5  ;;  %s1101_s28 = smov [#allocation4]  }
   0xb   : > { %s1173_s24 = scalar_select %p40_p6, %s1087_s13, %s42_s19  }
   0xc   : > { %p978_p9 = pneg %p1164_p7  ;;  %s163_s29 = sshll.u32 %s1101_s28, 4  ;;  %s164_s29 = int_to_ptr.vmem [resolvable:$true] %s163_s29 }
   0xd   : > { %p809_p11 = scmp.ge.s32.totalorder %s1099_s16, 5 }
   0xe   : > { %p979_p10 = pnand %p1168_p8, %p978_p9 }
   0xf   : > { %170 = sbr.rel (%p809_p11) target bundleno = 40 (0x28), region = 20 }
  0x10   : > { %981 = dma.hbm_to_vmem [thread:$0]  (!%p979_p10), %s162_s27, 16, %s164_s29, [#allocation5]  }
  0x14   : > { %173 = sbr.rel (!%p1156_p3) target bundleno = 40 (0x28), region = 24  ;;  %s175_s30 = sand.u32 (%p1156_p3), 1, %s1087_s13  }
  0x15   : > { %s811_s4 = sshll.u32 (%p1156_p3), %s1095_s15, 2  ;;  %s810_s5 = sshll.u32 (%p1156_p3), %s175_s30, 6 }
  0x16   : > { %s1190_s8 = scalar_lea.vmem (%p1156_p3), %s1280_s0, %s811_s4  ;;  %s177_s9 = scalar_lea.vmem (%p1156_p3), [#allocation3], %s810_s5 }
  0x17   : > { %v199_v0 = vld [vmem:[%s1190_s8] sm:$0xf] (%p1156_p3)  ;;  %v201_v1 = vld [vmem:[%s1190_s8 + $0x14] sm:$0xf] (%p1156_p3)  ;;  %v203_v2 = vld [vmem:[%s1190_s8 + $0x28] sm:$0xf] (%p1156_p3) }
  0x18   : > { %200 = vst [vmem:[%s177_s9] sm:$0xf] (%p1156_p3), %v199_v0  ;;  %v205_v3 = vld [vmem:[%s1190_s8 + $0x3c] sm:$0xf] (%p1156_p3)  ;;  %v207_v4 = vld [vmem:[%s1190_s8 + $0x50] sm:$0xf] (%p1156_p3) }
  0x19   : > { %202 = vst [vmem:[%s177_s9 + $0x4] sm:$0xf] %v201_v1  ;;  %v209_v5 = vld [vmem:[%s1190_s8 + $0x64] sm:$0xf]  ;;  %v211_v6 = vld [vmem:[%s1190_s8 + $0x78] sm:$0xf] }
  0x1a   : > { %204 = vst [vmem:[%s177_s9 + $0x8] sm:$0xf] %v203_v2  ;;  %v213_v7 = vld [vmem:[%s1190_s8 + $0x8c] sm:$0xf]  ;;  %v215_v8 = vld [vmem:[%s1190_s8 + $0xa0] sm:$0xf] }
  0x1b   : > { %206 = vst [vmem:[%s177_s9 + $0xc] sm:$0xf] %v205_v3  ;;  %v217_v9 = vld [vmem:[%s1190_s8 + $0xb4] sm:$0xf]  ;;  %v219_v10 = vld [vmem:[%s1190_s8 + $0xc8] sm:$0xf] }
  0x1c   : > { %208 = vst [vmem:[%s177_s9 + $0x10] sm:$0xf] %v207_v4  ;;  %v221_v11 = vld [vmem:[%s1190_s8 + $0xdc] sm:$0xf]  ;;  %v223_v12 = vld [vmem:[%s1190_s8 + $0xf0] sm:$0xf] }
  0x1d   : > { %210 = vst [vmem:[%s177_s9 + $0x14] sm:$0xf] %v209_v5  ;;  %v225_v13 = vld [vmem:[%s1190_s8 + $0x104] sm:$0xf]  ;;  %v227_v14 = vld [vmem:[%s1190_s8 + $0x118] sm:$0xf] }
  0x1e   : > { %212 = vst [vmem:[%s177_s9 + $0x18] sm:$0xf] %v211_v6  ;;  %v229_v15 = vld [vmem:[%s1190_s8 + $0x12c] sm:$0xf] }
  0x1f   : > { %214 = vst [vmem:[%s177_s9 + $0x1c] sm:$0xf] %v213_v7 }
  0x20   : > { %216 = vst [vmem:[%s177_s9 + $0x20] sm:$0xf] %v215_v8 }
  0x21   : > { %218 = vst [vmem:[%s177_s9 + $0x24] sm:$0xf] %v217_v9 }
  0x22   : > { %220 = vst [vmem:[%s177_s9 + $0x28] sm:$0xf] %v219_v10 }
  0x23   : > { %222 = vst [vmem:[%s177_s9 + $0x2c] sm:$0xf] %v221_v11 }
  0x24   : > { %224 = vst [vmem:[%s177_s9 + $0x30] sm:$0xf] %v223_v12 }
  0x25   : > { %226 = vst [vmem:[%s177_s9 + $0x34] sm:$0xf] %v225_v13 }
  0x26   : > { %228 = vst [vmem:[%s177_s9 + $0x38] sm:$0xf] %v227_v14 }
  0x27   : > { %230 = vst [vmem:[%s177_s9 + $0x3c] sm:$0xf] %v229_v15 }
  0x28 PF: > { %301 = sbr.rel (%p1164_p7) target bundleno = 279 (0x117), region = 69  ;;  %s304_s10 = sand.u32 (!%p1164_p7), 1, %s1083_s12  }
  0x29   : > { %s813_s11 = sshll.u32 (!%p1164_p7), %s304_s10, 6 }
  0x2a   : > { %s1211_s17 = scalar_lea.vmem (!%p1164_p7), [#allocation3], %s813_s11 }
  0x2d   : > { %1078 = dma.done.wait (%p1168_p8), [#allocation5], 16  }
  0x2e   : > { %1080 = vsyncadd (%p1168_p8), [#allocation5], 4294967280  ;;  %s815_s19 = sshll.u32 %s1091_s14, 4  ;;  %p817_p13 = scmp.ne.s32.totalorder %s1091_s14, 0 }
  0x2f   : > { %p345_p12 = scmp.lt.s32.totalorder %s815_s19, 79 }
  0x30   : > { %365 = sbr.rel (%p817_p13) target bundleno = 70 (0x46), region = 81 }
  0x31   : > { %s1294_s19 = smov (!%p345_p12, %s815_s19), 79 }
  0x32   : > { %s816_s20 = sshll.u32 %s1294_s19, 2 }
  0x33   : > { %s1221_s22 = scalar_lea.vmem %s1281_s1, %s816_s20 }
  0x35   : > { %v1102_v16 = vmov 0.0  }
  0x36   : > { %366 = vst [vmem:[#allocation2 + $0x30] sm:$0xff] %v1102_v16 }
  0x37   : > { %367 = vst [vmem:[#allocation2] sm:$0xff] %v1102_v16 }
  0x38   : > { %368 = vst [vmem:[#allocation2 + $0x58] sm:$0xff] %v1102_v16 }
  0x39   : > { %369 = vst [vmem:[#allocation2 + $0x18] sm:$0xff] %v1102_v16 }
  0x3a   : > { %370 = vst [vmem:[#allocation2 + $0x50] sm:$0xff] %v1102_v16 }
  0x3b   : > { %371 = vst [vmem:[#allocation2 + $0x68] sm:$0xff] %v1102_v16 }
  0x3c   : > { %372 = vst [vmem:[#allocation2 + $0x8] sm:$0xff] %v1102_v16 }
  0x3d   : > { %373 = vst [vmem:[#allocation2 + $0x48] sm:$0xff] %v1102_v16 }
  0x3e   : > { %374 = vst [vmem:[#allocation2 + $0x40] sm:$0xff] %v1102_v16 }
  0x3f   : > { %375 = vst [vmem:[#allocation2 + $0x20] sm:$0xff] %v1102_v16 }
  0x40   : > { %376 = vst [vmem:[#allocation2 + $0x10] sm:$0xff] %v1102_v16 }
  0x41   : > { %377 = vst [vmem:[#allocation2 + $0x38] sm:$0xff] %v1102_v16 }
  0x42   : > { %378 = vst [vmem:[#allocation2 + $0x60] sm:$0xff] %v1102_v16 }
  0x43   : > { %379 = vst [vmem:[#allocation2 + $0x70] sm:$0xff] %v1102_v16 }
  0x44   : > { %380 = vst [vmem:[#allocation2 + $0x78] sm:$0xff] %v1102_v16 }
  0x45   : > { %381 = vst [vmem:[#allocation2 + $0x28] sm:$0xff] %v1102_v16 }
  0x46 PF: > { %v902_v17 = vld [vmem:[%s1221_s22 + $0x38] sm:$0xff]  ;;  %v901_v18 = vld [vmem:[%s1221_s22 + $0x30] sm:$0xff]  ;;  %v900_v19 = vld [vmem:[%s1221_s22 + $0x28] sm:$0xff]  ;;  %p882_p0 = scmp.ne.s32.totalorder %s1091_s14, 4 }
  0x47   : > { %526 = vmatpush.bf16.msra.mxu0 %v902_v17  ;;  %950 = vmatpush.bf16.msra.mxu1 %v902_v17  ;;  %v899_v20 = vld [vmem:[%s1221_s22 + $0x20] sm:$0xff]  ;;  %v898_v21 = vld [vmem:[%s1221_s22 + $0x18] sm:$0xff]  ;;  %v897_v22 = vld [vmem:[%s1221_s22 + $0x10] sm:$0xff] }
  0x48   : > { %951 = vmatpush.bf16.msra.mxu2 %v902_v17  ;;  %952 = vmatpush.bf16.msra.mxu3 %v902_v17  ;;  %v896_v23 = vld [vmem:[%s1221_s22 + $0x8] sm:$0xff]  ;;  %v895_v24 = vld [vmem:[%s1221_s22] sm:$0xff]  ;;  %v889_v26 = vld [vmem:[%s1211_s17 + $0x10] sm:$0xff] }
  0x49   : > { %v887_v25 = vld [vmem:[%s1211_s17] sm:$0xff]  ;;  %v893_v28 = vld [vmem:[%s1211_s17 + $0x30] sm:$0xff]  ;;  %v888_v29 = vld [vmem:[%s1211_s17 + $0x8] sm:$0xff] }
  0x4a   : > { %v891_v27 = vld [vmem:[%s1211_s17 + $0x20] sm:$0xff]  ;;  %v890_v30 = vld [vmem:[%s1211_s17 + $0x18] sm:$0xff]  ;;  %v892_v31 = vld [vmem:[%s1211_s17 + $0x28] sm:$0xff] }
  0x4b   : > { %527 = vmatpush.bf16.msra.mxu0 %v901_v18  ;;  %953 = vmatpush.bf16.msra.mxu1 %v901_v18  ;;  %v894_v32 = vld [vmem:[%s1211_s17 + $0x38] sm:$0xff]  ;;  %v382_v33 = vld [vmem:[#allocation2 + $0x30] sm:$0xff]  ;;  %v390_v39 = vld [vmem:[#allocation2 + $0x40] sm:$0xff] }
  0x4c   : > { %954 = vmatpush.bf16.msra.mxu2 %v901_v18  ;;  %955 = vmatpush.bf16.msra.mxu3 %v901_v18  ;;  %v386_v34 = vld [vmem:[#allocation2 + $0x50] sm:$0xff]  ;;  %v394_v40 = vld [vmem:[#allocation2 + $0x60] sm:$0xff]  ;;  %v387_v42 = vld [vmem:[#allocation2 + $0x68] sm:$0xff] }
  0x4d   : > { %v383_v41 = vld [vmem:[#allocation2] sm:$0xff]  ;;  %v395_v52 = vld [vmem:[#allocation2 + $0x70] sm:$0xff]  ;;  %v384_v53 = vld [vmem:[#allocation2 + $0x58] sm:$0xff] }
  0x4e   : > { %v391_v51 = vld [vmem:[#allocation2 + $0x20] sm:$0xff]  ;;  %v388_v54 = vld [vmem:[#allocation2 + $0x8] sm:$0xff]  ;;  %v392_v63 = vld [vmem:[#allocation2 + $0x10] sm:$0xff] }
  0x4f   : > { %528 = vmatpush.bf16.msra.mxu0 %v900_v19  ;;  %956 = vmatpush.bf16.msra.mxu1 %v900_v19  ;;  %v396_v0 = vld [vmem:[#allocation2 + $0x78] sm:$0xff]  ;;  %v389_v2 = vld [vmem:[#allocation2 + $0x48] sm:$0xff] }
  0x50   : > { %957 = vmatpush.bf16.msra.mxu2 %v900_v19  ;;  %958 = vmatpush.bf16.msra.mxu3 %v900_v19  ;;  %v385_v1 = vld [vmem:[#allocation2 + $0x18] sm:$0xff]  ;;  %v397_v12 = vld [vmem:[#allocation2 + $0x28] sm:$0xff] }
  0x51   : > { %v393_v11 = vld [vmem:[#allocation2 + $0x38] sm:$0xff] }
  0x53   : > { %529 = vmatpush.bf16.msra.mxu0 %v899_v20  ;;  %959 = vmatpush.bf16.msra.mxu1 %v899_v20 }
  0x54   : > { %960 = vmatpush.bf16.msra.mxu2 %v899_v20  ;;  %961 = vmatpush.bf16.msra.mxu3 %v899_v20 }
  0x57   : > { %530 = vmatpush.bf16.msra.mxu0 %v898_v21  ;;  %962 = vmatpush.bf16.msra.mxu1 %v898_v21 }
  0x58   : > { %963 = vmatpush.bf16.msra.mxu2 %v898_v21  ;;  %964 = vmatpush.bf16.msra.mxu3 %v898_v21 }
  0x5b   : > { %531 = vmatpush.bf16.msra.mxu0 %v897_v22  ;;  %965 = vmatpush.bf16.msra.mxu1 %v897_v22 }
  0x5c   : > { %966 = vmatpush.bf16.msra.mxu2 %v897_v22  ;;  %967 = vmatpush.bf16.msra.mxu3 %v897_v22 }
  0x5f   : > { %532 = vmatpush.bf16.msra.mxu0 %v896_v23  ;;  %968 = vmatpush.bf16.msra.mxu1 %v896_v23 }
  0x60   : > { %969 = vmatpush.bf16.msra.mxu2 %v896_v23  ;;  %970 = vmatpush.bf16.msra.mxu3 %v896_v23 }
  0x63   : > { %533 = vmatpush.bf16.msra.mxu0 %v895_v24  ;;  %971 = vmatpush.bf16.msra.mxu1 %v895_v24 }
  0x64   : > { %972 = vmatpush.bf16.msra.mxu2 %v895_v24  ;;  %973 = vmatpush.bf16.msra.mxu3 %v895_v24 }
  0x66   : > { %534 = vmatmul.bf16.vlgmr.msra.gmra.mxu0 %v887_v25  ;;  %544 = vmatmul.bf16.vlgmr.msra.gmra.mxu1 %v889_v26 }
  0x67   : > { %554 = vmatmul.bf16.vlgmr.msra.gmra.mxu2 %v891_v27  ;;  %564 = vmatmul.bf16.vlgmr.msra.gmra.mxu3 %v893_v28 }
  0x76   : > { %539 = vmatmul.bf16.gmra.mxu0 %v888_v29  ;;  %549 = vmatmul.bf16.gmra.mxu1 %v890_v30 }
  0x77   : > { %559 = vmatmul.bf16.gmra.mxu2 %v892_v31  ;;  %569 = vmatmul.bf16.gmra.mxu3 %v894_v32 }
  0xe3   : > { %v535_v35 = vpop.f32.mrf.mxu0  ;;  %v545_v36 = vpop.f32.mrf.mxu1 }
  0xe4   : > { %v575_v37 = vadd.f32 %v535_v35, %v382_v33  ;;  %v579_v38 = vadd.f32 %v545_v36, %v386_v34 }
  0xe6   : > { %591 = vst [vmem:[#allocation2 + $0x30] sm:$0xff] %v575_v37 }
  0xe7   : > { %595 = vst [vmem:[#allocation2 + $0x50] sm:$0xff] %v579_v38 }
  0xea   : > { %v555_v43 = vpop.f32.mrf.mxu2  ;;  %v565_v44 = vpop.f32.mrf.mxu3 }
  0xeb   : > { %v583_v45 = vadd.f32 %v555_v43, %v390_v39  ;;  %v587_v46 = vadd.f32 %v565_v44, %v394_v40  ;;  %v537_v47 = vpop.f32.mrf.mxu0  ;;  %v547_v48 = vpop.f32.mrf.mxu1 }
  0xec   : > { %v576_v49 = vadd.f32 %v537_v47, %v383_v41  ;;  %v580_v50 = vadd.f32 %v547_v48, %v387_v42 }
  0xed   : > { %599 = vst [vmem:[#allocation2 + $0x40] sm:$0xff] %v583_v45 }
  0xee   : > { %603 = vst [vmem:[#allocation2 + $0x60] sm:$0xff] %v587_v46 }
  0xef   : > { %592 = vst [vmem:[#allocation2] sm:$0xff] %v576_v49 }
  0xf0   : > { %596 = vst [vmem:[#allocation2 + $0x68] sm:$0xff] %v580_v50 }
  0xf2   : > { %v557_v55 = vpop.f32.mrf.mxu2  ;;  %v567_v56 = vpop.f32.mrf.mxu3 }
  0xf3   : > { %v584_v57 = vadd.f32 %v557_v55, %v391_v51  ;;  %v588_v58 = vadd.f32 %v567_v56, %v395_v52  ;;  %v540_v59 = vpop.f32.mrf.mxu0  ;;  %v550_v60 = vpop.f32.mrf.mxu1 }
  0xf4   : > { %v577_v61 = vadd.f32 %v540_v59, %v384_v53  ;;  %v581_v62 = vadd.f32 %v550_v60, %v388_v54 }
  0xf5   : > { %600 = vst [vmem:[#allocation2 + $0x20] sm:$0xff] %v584_v57 }
  0xf6   : > { %604 = vst [vmem:[#allocation2 + $0x70] sm:$0xff] %v588_v58 }
  0xf7   : > { %593 = vst [vmem:[#allocation2 + $0x58] sm:$0xff] %v577_v61 }
  0xf8   : > { %597 = vst [vmem:[#allocation2 + $0x8] sm:$0xff] %v581_v62 }
  0xfa   : > { %v560_v3 = vpop.f32.mrf.mxu2  ;;  %v570_v4 = vpop.f32.mrf.mxu3 }
  0xfb   : > { %v585_v5 = vadd.f32 %v560_v3, %v392_v63  ;;  %v589_v6 = vadd.f32 %v570_v4, %v396_v0  ;;  %v542_v7 = vpop.f32.mrf.mxu0  ;;  %v552_v8 = vpop.f32.mrf.mxu1 }
  0xfc   : > { %v578_v9 = vadd.f32 %v542_v7, %v385_v1  ;;  %v582_v10 = vadd.f32 %v552_v8, %v389_v2 }
  0xfd   : > { %601 = vst [vmem:[#allocation2 + $0x10] sm:$0xff] %v585_v5 }
  0xfe   : > { %605 = vst [vmem:[#allocation2 + $0x78] sm:$0xff] %v589_v6 }
  0xff   : > { %594 = vst [vmem:[#allocation2 + $0x18] sm:$0xff] %v578_v9 }
 0x100   : > { %598 = vst [vmem:[#allocation2 + $0x48] sm:$0xff] %v582_v10 }
 0x102   : > { %v562_v13 = vpop.f32.mrf.mxu2  ;;  %v572_v14 = vpop.f32.mrf.mxu3  ;;  %610 = sbr.rel (%p882_p0) target bundleno = 279 (0x117), region = 85 }
 0x103   : > { %v586_v15 = vadd.f32 %v562_v13, %v393_v11  ;;  %v590_v16 = vadd.f32 %v572_v14, %v397_v12 }
 0x105   : > { %602 = vst [vmem:[#allocation2 + $0x38] sm:$0xff] %v586_v15 }
 0x106   : > { %606 = vst [vmem:[#allocation2 + $0x28] sm:$0xff] %v590_v16 }
 0x107   : > { %v611_v17 = vld [vmem:[#allocation2 + $0x30] sm:$0xff]  ;;  %v612_v18 = vld [vmem:[#allocation2] sm:$0xff]  ;;  %v613_v20 = vld [vmem:[#allocation2 + $0x58] sm:$0xff] }
 0x108   : > { %v1026_v19 = vld [vmem:[#allocation4] ss:$0 sm:$0xff]  ;;  %v614_v21 = vld [vmem:[#allocation2 + $0x18] sm:$0xff]  ;;  %v615_v22 = vld [vmem:[#allocation2 + $0x50] sm:$0xff] }
 0x109   : > { %v616_v23 = vld [vmem:[#allocation2 + $0x68] sm:$0xff]  ;;  %v631_v25 = vadd.f32 %v1026_v19, %v611_v17  ;;  %v632_v26 = vadd.f32 %v1026_v19, %v612_v18  ;;  %v633_v27 = vadd.f32 %v1026_v19, %v613_v20  ;;  %v634_v28 = vadd.f32 %v1026_v19, %v614_v21  ;;  %v619_v34 = vld [vmem:[#allocation2 + $0x40] sm:$0xff]  ;;  %v621_v40 = vld [vmem:[#allocation2 + $0x10] sm:$0xff] }
 0x10a   : > { %v617_v24 = vld [vmem:[#allocation2 + $0x8] sm:$0xff]  ;;  %v635_v30 = vadd.f32 %v1026_v19, %v615_v22  ;;  %v636_v31 = vadd.f32 %v1026_v19, %v616_v23  ;;  %v620_v35 = vld [vmem:[#allocation2 + $0x20] sm:$0xff]  ;;  %v624_v47 = vld [vmem:[#allocation2 + $0x70] sm:$0xff]  ;;  %v639_v50 = vadd.f32 %v1026_v19, %v619_v34  ;;  %v641_v56 = vadd.f32 %v1026_v19, %v621_v40 }
 0x10b   : > { %v618_v29 = vld [vmem:[#allocation2 + $0x48] sm:$0xff]  ;;  %v637_v32 = vadd.f32 %v1026_v19, %v617_v24  ;;  %v647_v36 = vmax.f32 %v631_v25, 0.0  ;;  %v648_v37 = vmax.f32 %v632_v26, 0.0  ;;  %v649_v38 = vmax.f32 %v633_v27, 0.0  ;;  %v623_v46 = vld [vmem:[#allocation2 + $0x60] sm:$0xff]  ;;  %v625_v52 = vld [vmem:[#allocation2 + $0x78] sm:$0xff] }
 0x10c   : > { %v638_v33 = vadd.f32 %v1026_v19, %v618_v29  ;;  %v650_v39 = vmax.f32 %v634_v28, 0.0  ;;  %v622_v41 = vld [vmem:[#allocation2 + $0x38] sm:$0xff]  ;;  %v651_v42 = vmax.f32 %v635_v30, 0.0  ;;  %v652_v43 = vmax.f32 %v636_v31, 0.0 }
 0x10d   : > { %v653_v44 = vmax.f32 %v637_v32, 0.0  ;;  %v906_v48 = vpack.c.bf16 %v648_v37, %v647_v36  ;;  %v640_v51 = vadd.f32 %v1026_v19, %v620_v35  ;;  %v626_v53 = vld [vmem:[#allocation2 + $0x28] sm:$0xff]  ;;  %v642_v57 = vadd.f32 %v1026_v19, %v622_v41 }
 0x10e   : > { %v654_v45 = vmax.f32 %v638_v33, 0.0  ;;  %v911_v49 = vpack.c.bf16 %v650_v39, %v649_v38  ;;  %v916_v54 = vpack.c.bf16 %v652_v43, %v651_v42  ;;  %v655_v58 = vmax.f32 %v639_v50, 0.0 }
 0x10f   : > { %907 = vst [vmem:[%s1283_s3] sm:$0xff] %v906_v48   ;;  %v656_v59 = vmax.f32 %v640_v51, 0.0  ;;  %v643_v60 = vadd.f32 %v1026_v19, %v623_v46  ;;  %v644_v61 = vadd.f32 %v1026_v19, %v624_v47  ;;  %v657_v62 = vmax.f32 %v641_v56, 0.0 }
 0x110   : > { %v921_v55 = vpack.c.bf16 %v654_v45, %v653_v44  ;;  %943 = vst [vmem:[%s1283_s3 + $0x8] sm:$0xff] %v911_v49   ;;  %v658_v63 = vmax.f32 %v642_v57, 0.0  ;;  %v645_v0 = vadd.f32 %v1026_v19, %v625_v52  ;;  %v646_v1 = vadd.f32 %v1026_v19, %v626_v53 }
 0x111   : > { %944 = vst [vmem:[%s1283_s3 + $0x10] sm:$0xff] %v916_v54   ;;  %v926_v2 = vpack.c.bf16 %v656_v59, %v655_v58  ;;  %v659_v3 = vmax.f32 %v643_v60, 0.0  ;;  %v660_v4 = vmax.f32 %v644_v61, 0.0 }
 0x112   : > { %945 = vst [vmem:[%s1283_s3 + $0x18] sm:$0xff] %v921_v55   ;;  %v931_v5 = vpack.c.bf16 %v658_v63, %v657_v62  ;;  %v661_v6 = vmax.f32 %v645_v0, 0.0  ;;  %v662_v7 = vmax.f32 %v646_v1, 0.0 }
 0x113   : > { %946 = vst [vmem:[%s1283_s3 + $0x20] sm:$0xff] %v926_v2   ;;  %v936_v8 = vpack.c.bf16 %v660_v4, %v659_v3 }
 0x114   : > { %947 = vst [vmem:[%s1283_s3 + $0x28] sm:$0xff] %v931_v5   ;;  %v941_v9 = vpack.c.bf16 %v662_v7, %v661_v6 }
 0x115   : > { %948 = vst [vmem:[%s1283_s3 + $0x30] sm:$0xff] %v936_v8  }
 0x116   : > { %949 = vst [vmem:[%s1283_s3 + $0x38] sm:$0xff] %v941_v9  }
 0x117 PF: > { %s14_s16 = sadd.s32 1, %s1099_s16   ;;  %s1287_s12 = smov %s1087_s13 }
 0x118   : > { %p11_p1 = scmp.ge.s32.totalorder %s14_s16, 7   ;;  %s1288_s13 = smov %s1173_s24 }
 0x119   : > { %s1289_s14 = smov %s1095_s15  ;;  %s1290_s15 = smov %s1292_s18 }
 0x11a   :  { %13 = sbr.rel (!%p11_p1) target bundleno = 3 (0x3), region = 125 }
 0x11f   :  { %723 = vsyncpa [#allocation5], 1 }
 0x120   :  { %725 = vsyncpa [#allocation5 + $0x1], 1 }

// kernel: _lambda_.25
= control target key start
LH: loop header
LB: loop body
LE: loop exit
PB: predicated region body
PF: predicated region fallthrough
CT: control target
= control target key end

     0   :  { %s1239_s15 = smov 0   ;;  %s1241_s16 = smov 0   ;;  %s1413_s0 = inlined_call_operand.vmem [shape: bf16[128,640], index: 0, kind: input, shape index: {}]   ;;  %s1414_s1 = inlined_call_operand.vmem [shape: bf16[640,128], index: 1, kind: input, shape index: {}]   ;;  %s1415_s2 = inlined_call_operand.vmem [shape: f32[1,128], index: 2, kind: input, shape index: {}]   ;;  %s1416_s3 = inlined_call_operand.vmem [shape: bf16[128,128], index: 3, kind: input, shape index: {}]   ;;  %s1417_s4 = inlined_call_operand.vmem [shape: bf16[128,128], index: 4, kind: output, shape index: {}]  }
   0x1   :  { %s1243_s17 = smov 0   ;;  %s1245_s18 = smov 0  }
   0x2   :  { %s1247_s19 = smov 0  }
   0x3 LB: > { %s26_s20 = sadd.s32 1, %s1207_s18  ;;  %p49_p1 = scmp.ne.s32.totalorder %s1199_s16, %s1195_s15  ;;  %s1211_s19 = sphi %s1247_s19, %s14_s19   ;;  %s1207_s18 = sphi %s1245_s18, %s1421_s18   ;;  %s1203_s17 = sphi %s1243_s17, %s1420_s17   ;;  %s1199_s16 = sphi %s1241_s16, %s1419_s16   ;;  %s1195_s15 = sphi %s1239_s15, %s1418_s15  }
   0x4   : > { %p27_p0 = scmp.ge.s32.totalorder %s26_s20, 5  ;;  %p50_p2 = scmp.eq.s32.totalorder %s1211_s19, 0 }
   0x5   : > { %s42_s22 = sadd.s32 1, %s1199_s16  ;;  %p928_p5 = scmp.ge.s32.totalorder %s1211_s19, 5 }
   0x6   : > { %s1423_s20 = smov (%p27_p0, %s26_s20), 0  ;;  %p51_p3 = por %p50_p2, %p49_p1 }
   0x7   : > { %s38_s21 = ssub.s32 %s1207_s18, %s1423_s20  ;;  %203 = sbr.rel (%p928_p5) target bundleno = 32 (0x20), region = 24 }
   0x8   : > { %p40_p4 = scmp.eq.s32.totalorder %s38_s21, 0 }
   0xa   : > { %s1274_s23 = scalar_select %p40_p4, %s1199_s16, %s42_s22  }
   0xc   : > { %206 = sbr.rel (!%p51_p3) target bundleno = 32 (0x20), region = 28  ;;  %s208_s24 = sand.u32 (%p51_p3), 1, %s1199_s16  }
   0xd   : > { %s930_s25 = sshll.u32 (%p51_p3), %s1207_s18, 2  ;;  %s929_s26 = sshll.u32 (%p51_p3), %s208_s24, 6 }
   0xe   : > { %s1282_s29 = scalar_lea.vmem (%p51_p3), %s1413_s0, %s930_s25  ;;  %s210_s30 = scalar_lea.vmem (%p51_p3), [#allocation3], %s929_s26 }
   0xf   : > { %v232_v0 = vld [vmem:[%s1282_s29] sm:$0xf] (%p51_p3)  ;;  %v234_v1 = vld [vmem:[%s1282_s29 + $0x14] sm:$0xf] (%p51_p3)  ;;  %v236_v2 = vld [vmem:[%s1282_s29 + $0x28] sm:$0xf] (%p51_p3) }
  0x10   : > { %233 = vst [vmem:[%s210_s30] sm:$0xf] (%p51_p3), %v232_v0  ;;  %v238_v3 = vld [vmem:[%s1282_s29 + $0x3c] sm:$0xf] (%p51_p3)  ;;  %v240_v4 = vld [vmem:[%s1282_s29 + $0x50] sm:$0xf] (%p51_p3) }
  0x11   : > { %235 = vst [vmem:[%s210_s30 + $0x4] sm:$0xf] %v234_v1  ;;  %v242_v5 = vld [vmem:[%s1282_s29 + $0x64] sm:$0xf]  ;;  %v244_v6 = vld [vmem:[%s1282_s29 + $0x78] sm:$0xf] }
  0x12   : > { %237 = vst [vmem:[%s210_s30 + $0x8] sm:$0xf] %v236_v2  ;;  %v246_v7 = vld [vmem:[%s1282_s29 + $0x8c] sm:$0xf]  ;;  %v248_v8 = vld [vmem:[%s1282_s29 + $0xa0] sm:$0xf] }
  0x13   : > { %239 = vst [vmem:[%s210_s30 + $0xc] sm:$0xf] %v238_v3  ;;  %v250_v9 = vld [vmem:[%s1282_s29 + $0xb4] sm:$0xf]  ;;  %v252_v10 = vld [vmem:[%s1282_s29 + $0xc8] sm:$0xf] }
  0x14   : > { %241 = vst [vmem:[%s210_s30 + $0x10] sm:$0xf] %v240_v4  ;;  %v254_v11 = vld [vmem:[%s1282_s29 + $0xdc] sm:$0xf]  ;;  %v256_v12 = vld [vmem:[%s1282_s29 + $0xf0] sm:$0xf] }
  0x15   : > { %243 = vst [vmem:[%s210_s30 + $0x14] sm:$0xf] %v242_v5  ;;  %v258_v13 = vld [vmem:[%s1282_s29 + $0x104] sm:$0xf]  ;;  %v260_v14 = vld [vmem:[%s1282_s29 + $0x118] sm:$0xf] }
  0x16   : > { %245 = vst [vmem:[%s210_s30 + $0x18] sm:$0xf] %v244_v6  ;;  %v262_v15 = vld [vmem:[%s1282_s29 + $0x12c] sm:$0xf] }
  0x17   : > { %247 = vst [vmem:[%s210_s30 + $0x1c] sm:$0xf] %v246_v7 }
  0x18   : > { %249 = vst [vmem:[%s210_s30 + $0x20] sm:$0xf] %v248_v8 }
  0x19   : > { %251 = vst [vmem:[%s210_s30 + $0x24] sm:$0xf] %v250_v9 }
  0x1a   : > { %253 = vst [vmem:[%s210_s30 + $0x28] sm:$0xf] %v252_v10 }
  0x1b   : > { %255 = vst [vmem:[%s210_s30 + $0x2c] sm:$0xf] %v254_v11 }
  0x1c   : > { %257 = vst [vmem:[%s210_s30 + $0x30] sm:$0xf] %v256_v12 }
  0x1d   : > { %259 = vst [vmem:[%s210_s30 + $0x34] sm:$0xf] %v258_v13 }
  0x1e   : > { %261 = vst [vmem:[%s210_s30 + $0x38] sm:$0xf] %v260_v14 }
  0x1f   : > { %263 = vst [vmem:[%s210_s30 + $0x3c] sm:$0xf] %v262_v15 }
  0x20 PF: > { %p931_p6 = scmp.ge.s32.totalorder %s1211_s19, 1  ;;  %p330_p7 = scmp.lt.s32.totalorder %s1211_s19, 6 }
  0x22   : > { %p331_p8 = pnand %p931_p6, %p330_p7 }
  0x23   : > { %s337_s5 = sand.u32 (!%p331_p8), 1, %s1195_s15   ;;  %s933_s6 = sshll.u32 (!%p331_p8), %s1203_s17, 4 }
  0x24   : > { %334 = sbr.rel (%p331_p8) target bundleno = 282 (0x11a), region = 73  ;;  %s932_s7 = sshll.u32 (!%p331_p8), %s337_s5, 6 }
  0x25   : > { %p386_p9 = scmp.lt.s32.totalorder (!%p331_p8), %s933_s6, 79  ;;  %s1309_s12 = scalar_lea.vmem (!%p331_p8), [#allocation3], %s932_s7 }
  0x26   : > { %p935_p10 = scmp.ne.s32.totalorder (!%p331_p8), %s1203_s17, 0 }
  0x29   : > { %s1425_s6 = smov (!%p386_p9, %s933_s6), 79  ;;  %418 = sbr.rel (%p935_p10) target bundleno = 63 (0x3f), region = 81 }
  0x2a   : > { %s934_s8 = sshll.u32 %s1425_s6, 2 }
  0x2b   : > { %s1307_s11 = scalar_lea.vmem %s1414_s1, %s934_s8 }
  0x2e   : > { %v1213_v16 = vmov 0.0  }
  0x2f   : > { %419 = vst [vmem:[#allocation2 + $0x30] sm:$0xff] %v1213_v16 }
  0x30   : > { %420 = vst [vmem:[#allocation2] sm:$0xff] %v1213_v16 }
  0x31   : > { %421 = vst [vmem:[#allocation2 + $0x58] sm:$0xff] %v1213_v16 }
  0x32   : > { %422 = vst [vmem:[#allocation2 + $0x18] sm:$0xff] %v1213_v16 }
  0x33   : > { %423 = vst [vmem:[#allocation2 + $0x50] sm:$0xff] %v1213_v16 }
  0x34   : > { %424 = vst [vmem:[#allocation2 + $0x68] sm:$0xff] %v1213_v16 }
  0x35   : > { %425 = vst [vmem:[#allocation2 + $0x8] sm:$0xff] %v1213_v16 }
  0x36   : > { %426 = vst [vmem:[#allocation2 + $0x48] sm:$0xff] %v1213_v16 }
  0x37   : > { %427 = vst [vmem:[#allocation2 + $0x40] sm:$0xff] %v1213_v16 }
  0x38   : > { %428 = vst [vmem:[#allocation2 + $0x20] sm:$0xff] %v1213_v16 }
  0x39   : > { %429 = vst [vmem:[#allocation2 + $0x10] sm:$0xff] %v1213_v16 }
  0x3a   : > { %430 = vst [vmem:[#allocation2 + $0x38] sm:$0xff] %v1213_v16 }
  0x3b   : > { %431 = vst [vmem:[#allocation2 + $0x60] sm:$0xff] %v1213_v16 }
  0x3c   : > { %432 = vst [vmem:[#allocation2 + $0x70] sm:$0xff] %v1213_v16 }
  0x3d   : > { %433 = vst [vmem:[#allocation2 + $0x78] sm:$0xff] %v1213_v16 }
  0x3e   : > { %434 = vst [vmem:[#allocation2 + $0x28] sm:$0xff] %v1213_v16 }
  0x3f PF: > { %v1020_v17 = vld [vmem:[%s1307_s11 + $0x38] sm:$0xff]  ;;  %v1019_v18 = vld [vmem:[%s1307_s11 + $0x30] sm:$0xff]  ;;  %v1018_v19 = vld [vmem:[%s1307_s11 + $0x28] sm:$0xff]  ;;  %p1000_p11 = scmp.ne.s32.totalorder %s1203_s17, 4 }
  0x40   : > { %579 = vmatpush.bf16.msra.mxu0 %v1020_v17  ;;  %1107 = vmatpush.bf16.msra.mxu1 %v1020_v17  ;;  %v1017_v20 = vld [vmem:[%s1307_s11 + $0x20] sm:$0xff]  ;;  %v1016_v21 = vld [vmem:[%s1307_s11 + $0x18] sm:$0xff]  ;;  %v1015_v22 = vld [vmem:[%s1307_s11 + $0x10] sm:$0xff] }
  0x41   : > { %1108 = vmatpush.bf16.msra.mxu2 %v1020_v17  ;;  %1109 = vmatpush.bf16.msra.mxu3 %v1020_v17  ;;  %v1014_v23 = vld [vmem:[%s1307_s11 + $0x8] sm:$0xff]  ;;  %v1013_v24 = vld [vmem:[%s1307_s11] sm:$0xff]  ;;  %v1007_v26 = vld [vmem:[%s1309_s12 + $0x10] sm:$0xff] }
  0x42   : > { %v1005_v25 = vld [vmem:[%s1309_s12] sm:$0xff]  ;;  %v1011_v28 = vld [vmem:[%s1309_s12 + $0x30] sm:$0xff]  ;;  %v1006_v29 = vld [vmem:[%s1309_s12 + $0x8] sm:$0xff] }
  0x43   : > { %v1009_v27 = vld [vmem:[%s1309_s12 + $0x20] sm:$0xff]  ;;  %v1008_v30 = vld [vmem:[%s1309_s12 + $0x18] sm:$0xff]  ;;  %v1010_v31 = vld [vmem:[%s1309_s12 + $0x28] sm:$0xff] }
  0x44   : > { %580 = vmatpush.bf16.msra.mxu0 %v1019_v18  ;;  %1110 = vmatpush.bf16.msra.mxu1 %v1019_v18  ;;  %v1012_v32 = vld [vmem:[%s1309_s12 + $0x38] sm:$0xff]  ;;  %v435_v33 = vld [vmem:[#allocation2 + $0x30] sm:$0xff]  ;;  %v443_v39 = vld [vmem:[#allocation2 + $0x40] sm:$0xff] }
  0x45   : > { %1111 = vmatpush.bf16.msra.mxu2 %v1019_v18  ;;  %1112 = vmatpush.bf16.msra.mxu3 %v1019_v18  ;;  %v439_v34 = vld [vmem:[#allocation2 + $0x50] sm:$0xff]  ;;  %v447_v40 = vld [vmem:[#allocation2 + $0x60] sm:$0xff]  ;;  %v440_v42 = vld [vmem:[#allocation2 + $0x68] sm:$0xff] }
  0x46   : > { %v436_v41 = vld [vmem:[#allocation2] sm:$0xff]  ;;  %v448_v52 = vld [vmem:[#allocation2 + $0x70] sm:$0xff]  ;;  %v437_v53 = vld [vmem:[#allocation2 + $0x58] sm:$0xff] }
  0x47   : > { %v444_v51 = vld [vmem:[#allocation2 + $0x20] sm:$0xff]  ;;  %v441_v54 = vld [vmem:[#allocation2 + $0x8] sm:$0xff]  ;;  %v445_v63 = vld [vmem:[#allocation2 + $0x10] sm:$0xff] }
  0x48   : > { %581 = vmatpush.bf16.msra.mxu0 %v1018_v19  ;;  %1113 = vmatpush.bf16.msra.mxu1 %v1018_v19  ;;  %v449_v0 = vld [vmem:[#allocation2 + $0x78] sm:$0xff]  ;;  %v442_v2 = vld [vmem:[#allocation2 + $0x48] sm:$0xff] }
  0x49   : > { %1114 = vmatpush.bf16.msra.mxu2 %v1018_v19  ;;  %1115 = vmatpush.bf16.msra.mxu3 %v1018_v19  ;;  %v438_v1 = vld [vmem:[#allocation2 + $0x18] sm:$0xff]  ;;  %v450_v12 = vld [vmem:[#allocation2 + $0x28] sm:$0xff] }
  0x4a   : > { %v446_v11 = vld [vmem:[#allocation2 + $0x38] sm:$0xff] }
  0x4c   : > { %582 = vmatpush.bf16.msra.mxu0 %v1017_v20  ;;  %1116 = vmatpush.bf16.msra.mxu1 %v1017_v20 }
  0x4d   : > { %1117 = vmatpush.bf16.msra.mxu2 %v1017_v20  ;;  %1118 = vmatpush.bf16.msra.mxu3 %v1017_v20 }
  0x50   : > { %583 = vmatpush.bf16.msra.mxu0 %v1016_v21  ;;  %1119 = vmatpush.bf16.msra.mxu1 %v1016_v21 }
  0x51   : > { %1120 = vmatpush.bf16.msra.mxu2 %v1016_v21  ;;  %1121 = vmatpush.bf16.msra.mxu3 %v1016_v21 }
  0x54   : > { %584 = vmatpush.bf16.msra.mxu0 %v1015_v22  ;;  %1122 = vmatpush.bf16.msra.mxu1 %v1015_v22 }
  0x55   : > { %1123 = vmatpush.bf16.msra.mxu2 %v1015_v22  ;;  %1124 = vmatpush.bf16.msra.mxu3 %v1015_v22 }
  0x58   : > { %585 = vmatpush.bf16.msra.mxu0 %v1014_v23  ;;  %1125 = vmatpush.bf16.msra.mxu1 %v1014_v23 }
  0x59   : > { %1126 = vmatpush.bf16.msra.mxu2 %v1014_v23  ;;  %1127 = vmatpush.bf16.msra.mxu3 %v1014_v23 }
  0x5c   : > { %586 = vmatpush.bf16.msra.mxu0 %v1013_v24  ;;  %1128 = vmatpush.bf16.msra.mxu1 %v1013_v24 }
  0x5d   : > { %1129 = vmatpush.bf16.msra.mxu2 %v1013_v24  ;;  %1130 = vmatpush.bf16.msra.mxu3 %v1013_v24 }
  0x5f   : > { %587 = vmatmul.bf16.vlgmr.msra.gmra.mxu0 %v1005_v25  ;;  %597 = vmatmul.bf16.vlgmr.msra.gmra.mxu1 %v1007_v26 }
  0x60   : > { %607 = vmatmul.bf16.vlgmr.msra.gmra.mxu2 %v1009_v27  ;;  %617 = vmatmul.bf16.vlgmr.msra.gmra.mxu3 %v1011_v28 }
  0x6f   : > { %592 = vmatmul.bf16.gmra.mxu0 %v1006_v29  ;;  %602 = vmatmul.bf16.gmra.mxu1 %v1008_v30 }
  0x70   : > { %612 = vmatmul.bf16.gmra.mxu2 %v1010_v31  ;;  %622 = vmatmul.bf16.gmra.mxu3 %v1012_v32 }
  0xdc   : > { %v588_v35 = vpop.f32.mrf.mxu0  ;;  %v598_v36 = vpop.f32.mrf.mxu1 }
  0xdd   : > { %v628_v37 = vadd.f32 %v588_v35, %v435_v33  ;;  %v632_v38 = vadd.f32 %v598_v36, %v439_v34 }
  0xdf   : > { %644 = vst [vmem:[#allocation2 + $0x30] sm:$0xff] %v628_v37 }
  0xe0   : > { %648 = vst [vmem:[#allocation2 + $0x50] sm:$0xff] %v632_v38 }
  0xe3   : > { %v608_v43 = vpop.f32.mrf.mxu2  ;;  %v618_v44 = vpop.f32.mrf.mxu3 }
  0xe4   : > { %v636_v45 = vadd.f32 %v608_v43, %v443_v39  ;;  %v640_v46 = vadd.f32 %v618_v44, %v447_v40  ;;  %v590_v47 = vpop.f32.mrf.mxu0  ;;  %v600_v48 = vpop.f32.mrf.mxu1 }
  0xe5   : > { %v629_v49 = vadd.f32 %v590_v47, %v436_v41  ;;  %v633_v50 = vadd.f32 %v600_v48, %v440_v42 }
  0xe6   : > { %652 = vst [vmem:[#allocation2 + $0x40] sm:$0xff] %v636_v45 }
  0xe7   : > { %656 = vst [vmem:[#allocation2 + $0x60] sm:$0xff] %v640_v46 }
  0xe8   : > { %645 = vst [vmem:[#allocation2] sm:$0xff] %v629_v49 }
  0xe9   : > { %649 = vst [vmem:[#allocation2 + $0x68] sm:$0xff] %v633_v50 }
  0xeb   : > { %v610_v55 = vpop.f32.mrf.mxu2  ;;  %v620_v56 = vpop.f32.mrf.mxu3 }
  0xec   : > { %v637_v57 = vadd.f32 %v610_v55, %v444_v51  ;;  %v641_v58 = vadd.f32 %v620_v56, %v448_v52  ;;  %v593_v59 = vpop.f32.mrf.mxu0  ;;  %v603_v60 = vpop.f32.mrf.mxu1 }
  0xed   : > { %v630_v61 = vadd.f32 %v593_v59, %v437_v53  ;;  %v634_v62 = vadd.f32 %v603_v60, %v441_v54 }
  0xee   : > { %653 = vst [vmem:[#allocation2 + $0x20] sm:$0xff] %v637_v57 }
  0xef   : > { %657 = vst [vmem:[#allocation2 + $0x70] sm:$0xff] %v641_v58 }
  0xf0   : > { %646 = vst [vmem:[#allocation2 + $0x58] sm:$0xff] %v630_v61 }
  0xf1   : > { %650 = vst [vmem:[#allocation2 + $0x8] sm:$0xff] %v634_v62 }
  0xf3   : > { %v613_v3 = vpop.f32.mrf.mxu2  ;;  %v623_v4 = vpop.f32.mrf.mxu3 }
  0xf4   : > { %v638_v5 = vadd.f32 %v613_v3, %v445_v63  ;;  %v642_v6 = vadd.f32 %v623_v4, %v449_v0  ;;  %v595_v7 = vpop.f32.mrf.mxu0  ;;  %v605_v8 = vpop.f32.mrf.mxu1 }
  0xf5   : > { %v631_v9 = vadd.f32 %v595_v7, %v438_v1  ;;  %v635_v10 = vadd.f32 %v605_v8, %v442_v2 }
  0xf6   : > { %654 = vst [vmem:[#allocation2 + $0x10] sm:$0xff] %v638_v5 }
  0xf7   : > { %658 = vst [vmem:[#allocation2 + $0x78] sm:$0xff] %v642_v6 }
  0xf8   : > { %647 = vst [vmem:[#allocation2 + $0x18] sm:$0xff] %v631_v9 }
  0xf9   : > { %651 = vst [vmem:[#allocation2 + $0x48] sm:$0xff] %v635_v10 }
  0xfb   : > { %v615_v13 = vpop.f32.mrf.mxu2  ;;  %v625_v14 = vpop.f32.mrf.mxu3  ;;  %663 = sbr.rel (%p1000_p11) target bundleno = 282 (0x11a), region = 85 }
  0xfc   : > { %v639_v15 = vadd.f32 %v615_v13, %v446_v11  ;;  %v643_v16 = vadd.f32 %v625_v14, %v450_v12 }
  0xfe   : > { %655 = vst [vmem:[#allocation2 + $0x38] sm:$0xff] %v639_v15 }
  0xff   : > { %659 = vst [vmem:[#allocation2 + $0x28] sm:$0xff] %v643_v16 }
 0x100   : > { %v664_v17 = vld [vmem:[#allocation2 + $0x30] sm:$0xff]  ;;  %v665_v18 = vld [vmem:[#allocation2] sm:$0xff]  ;;  %v666_v21 = vld [vmem:[#allocation2 + $0x58] sm:$0xff] }
 0x101   : > { %v1332_v19 = vld [vmem:[%s1415_s2] ss:$0 sm:$0xff]  ;;  %v667_v24 = vld [vmem:[#allocation2 + $0x18] sm:$0xff]  ;;  %v1093_v25 = vld [vmem:[%s1416_s3 + $0x8] sm:$0xff]  }
 0x102   : > { %v1022_v20 = vld [vmem:[%s1416_s3] sm:$0xff]   ;;  %v668_v26 = vld [vmem:[#allocation2 + $0x50] sm:$0xff]  ;;  %v684_v27 = vadd.f32 %v1332_v19, %v664_v17  ;;  %v685_v28 = vadd.f32 %v1332_v19, %v665_v18  ;;  %v686_v29 = vadd.f32 %v1332_v19, %v666_v21  ;;  %v687_v30 = vadd.f32 %v1332_v19, %v667_v24  ;;  %v669_v31 = vld [vmem:[#allocation2 + $0x68] sm:$0xff] }
 0x103   : > { %v1023_v22 = vunpack.c.l.bf16 %v1022_v20  ;;  %v1024_v23 = vunpack.c.h.bf16 %v1022_v20  ;;  %v1094_v32 = vld [vmem:[%s1416_s3 + $0x10] sm:$0xff]   ;;  %v670_v33 = vld [vmem:[#allocation2 + $0x8] sm:$0xff]  ;;  %v1027_v34 = vunpack.c.l.bf16 %v1093_v25  ;;  %v1028_v35 = vunpack.c.h.bf16 %v1093_v25  ;;  %v1095_v43 = vld [vmem:[%s1416_s3 + $0x18] sm:$0xff]  }
 0x104   : > { %v688_v36 = vadd.f32 %v1332_v19, %v668_v26  ;;  %v689_v37 = vadd.f32 %v1332_v19, %v669_v31  ;;  %v671_v38 = vld [vmem:[#allocation2 + $0x48] sm:$0xff]  ;;  %v1031_v41 = vunpack.c.l.bf16 %v1094_v32  ;;  %v1032_v42 = vunpack.c.h.bf16 %v1094_v32  ;;  %v672_v48 = vld [vmem:[#allocation2 + $0x40] sm:$0xff]  ;;  %v674_v59 = vld [vmem:[#allocation2 + $0x10] sm:$0xff] }
 0x105   : > { %v732_v39 = vadd.f32 %v1023_v22, %v684_v27  ;;  %v733_v40 = vadd.f32 %v1024_v23, %v685_v28  ;;  %v734_v44 = vadd.f32 %v1027_v34, %v686_v29  ;;  %v735_v45 = vadd.f32 %v1028_v35, %v687_v30  ;;  %v673_v53 = vld [vmem:[#allocation2 + $0x20] sm:$0xff]  ;;  %v675_v0 = vld [vmem:[#allocation2 + $0x38] sm:$0xff]  ;;  %v1097_v1 = vld [vmem:[%s1416_s3 + $0x28] sm:$0xff]  }
 0x106   : > { %v690_v46 = vadd.f32 %v1332_v19, %v670_v33  ;;  %v691_v47 = vadd.f32 %v1332_v19, %v671_v38  ;;  %v736_v51 = vadd.f32 %v1031_v41, %v688_v36  ;;  %v737_v52 = vadd.f32 %v1032_v42, %v689_v37  ;;  %v1096_v58 = vld [vmem:[%s1416_s3 + $0x20] sm:$0xff]   ;;  %v677_v11 = vld [vmem:[#allocation2 + $0x70] sm:$0xff]  ;;  %v678_v22 = vld [vmem:[#allocation2 + $0x78] sm:$0xff] }
 0x107   : > { %v748_v49 = vmax.f32 %v732_v39, 0.0  ;;  %v749_v50 = vmax.f32 %v733_v40, 0.0  ;;  %v750_v54 = vmax.f32 %v734_v44, 0.0  ;;  %v751_v55 = vmax.f32 %v735_v45, 0.0  ;;  %v676_v6 = vld [vmem:[#allocation2 + $0x60] sm:$0xff]  ;;  %v1098_v12 = vld [vmem:[%s1416_s3 + $0x30] sm:$0xff]  }
 0x108   : > { %v1035_v56 = vunpack.c.l.bf16 %v1095_v43  ;;  %v1036_v57 = vunpack.c.h.bf16 %v1095_v43  ;;  %v752_v61 = vmax.f32 %v736_v51, 0.0  ;;  %v753_v62 = vmax.f32 %v737_v52, 0.0  ;;  %v679_v23 = vld [vmem:[#allocation2 + $0x28] sm:$0xff]  ;;  %v1099_v28 = vld [vmem:[%s1416_s3 + $0x38] sm:$0xff]  }
 0x109   : > { %v1056_v60 = vpack.c.bf16 %v749_v50, %v748_v49  ;;  %v692_v63 = vadd.f32 %v1332_v19, %v672_v48  ;;  %v1061_v2 = vpack.c.bf16 %v751_v55, %v750_v54  ;;  %v693_v5 = vadd.f32 %v1332_v19, %v673_v53 }
 0x10a   : > { %v738_v3 = vadd.f32 %v1035_v56, %v690_v46  ;;  %v739_v4 = vadd.f32 %v1036_v57, %v691_v47  ;;  %v1066_v7 = vpack.c.bf16 %v753_v62, %v752_v61  ;;  %v1039_v8 = vunpack.c.l.bf16 %v1096_v58 }
 0x10b   : > { %1057 = vst [vmem:[%s1417_s4] sm:$0xff] %v1056_v60   ;;  %v1040_v9 = vunpack.c.h.bf16 %v1096_v58  ;;  %v694_v10 = vadd.f32 %v1332_v19, %v674_v59  ;;  %v695_v15 = vadd.f32 %v1332_v19, %v675_v0  ;;  %v1043_v16 = vunpack.c.l.bf16 %v1097_v1 }
 0x10c   : > { %1100 = vst [vmem:[%s1417_s4 + $0x8] sm:$0xff] %v1061_v2   ;;  %v754_v13 = vmax.f32 %v738_v3, 0.0  ;;  %v755_v14 = vmax.f32 %v739_v4, 0.0  ;;  %v740_v17 = vadd.f32 %v1039_v8, %v692_v63  ;;  %v1044_v20 = vunpack.c.h.bf16 %v1097_v1 }
 0x10d   : > { %1101 = vst [vmem:[%s1417_s4 + $0x10] sm:$0xff] %v1066_v7   ;;  %v741_v18 = vadd.f32 %v1040_v9, %v693_v5  ;;  %v696_v21 = vadd.f32 %v1332_v19, %v676_v6  ;;  %v742_v25 = vadd.f32 %v1043_v16, %v694_v10  ;;  %v697_v26 = vadd.f32 %v1332_v19, %v677_v11 }
 0x10e   : > { %v1071_v24 = vpack.c.bf16 %v755_v14, %v754_v13  ;;  %v1047_v27 = vunpack.c.l.bf16 %v1098_v12  ;;  %v756_v29 = vmax.f32 %v740_v17, 0.0  ;;  %v743_v31 = vadd.f32 %v1044_v20, %v695_v15 }
 0x10f   : > { %v757_v30 = vmax.f32 %v741_v18, 0.0  ;;  %v1048_v32 = vunpack.c.h.bf16 %v1098_v12  ;;  %v758_v33 = vmax.f32 %v742_v25, 0.0  ;;  %v698_v35 = vadd.f32 %v1332_v19, %v678_v22 }
 0x110   : > { %1102 = vst [vmem:[%s1417_s4 + $0x18] sm:$0xff] %v1071_v24   ;;  %v744_v34 = vadd.f32 %v1047_v27, %v696_v21  ;;  %v699_v36 = vadd.f32 %v1332_v19, %v679_v23  ;;  %v759_v38 = vmax.f32 %v743_v31, 0.0  ;;  %v1051_v40 = vunpack.c.l.bf16 %v1099_v28 }
 0x111   : > { %v1076_v37 = vpack.c.bf16 %v757_v30, %v756_v29  ;;  %v745_v39 = vadd.f32 %v1048_v32, %v697_v26  ;;  %v1052_v42 = vunpack.c.h.bf16 %v1099_v28 }
 0x112   : > { %v760_v41 = vmax.f32 %v744_v34, 0.0  ;;  %v1081_v43 = vpack.c.bf16 %v759_v38, %v758_v33  ;;  %v746_v45 = vadd.f32 %v1051_v40, %v698_v35 }
 0x113   : > { %1103 = vst [vmem:[%s1417_s4 + $0x20] sm:$0xff] %v1076_v37   ;;  %v761_v44 = vmax.f32 %v745_v39, 0.0  ;;  %v747_v46 = vadd.f32 %v1052_v42, %v699_v36 }
 0x114   : > { %1104 = vst [vmem:[%s1417_s4 + $0x28] sm:$0xff] %v1081_v43   ;;  %v762_v19 = vmax.f32 %v746_v45, 0.0 }
 0x115   : > { %v1086_v47 = vpack.c.bf16 %v761_v44, %v760_v41  ;;  %v763_v48 = vmax.f32 %v747_v46, 0.0 }
 0x117   : > { %1105 = vst [vmem:[%s1417_s4 + $0x30] sm:$0xff] %v1086_v47   ;;  %v1091_v49 = vpack.c.bf16 %v763_v48, %v762_v19 }
 0x119   : > { %1106 = vst [vmem:[%s1417_s4 + $0x38] sm:$0xff] %v1091_v49  }
 0x11a PF: > { %s14_s19 = sadd.s32 1, %s1211_s19   ;;  %s1418_s15 = smov %s1199_s16 }
 0x11b   : > { %p11_p12 = scmp.ge.s32.totalorder %s14_s19, 7   ;;  %s1419_s16 = smov %s1274_s23 }
 0x11c   : > { %s1420_s17 = smov %s1207_s18  ;;  %s1421_s18 = smov %s1423_s20 }
 0x11d   :  { %13 = sbr.rel (!%p11_p12) target bundleno = 3 (0x3), region = 129 }

// kernel: _lambda_.27
= control target key start
LH: loop header
LB: loop body
LE: loop exit
PB: predicated region body
PF: predicated region fallthrough
CT: control target
= control target key end

     0   :  { %9 = vsyncpa [#allocation5], 0  ;;  %s1294_s15 = smov 0   ;;  %s1296_s16 = smov 0   ;;  %s1493_s0 = inlined_call_operand.vmem [shape: bf16[128,640], index: 0, kind: input, shape index: {}]   ;;  %s1494_s1 = inlined_call_operand.vmem [shape: bf16[640,128], index: 1, kind: input, shape index: {}]   ;;  %s1495_s2 = inlined_call_operand.hbm [shape: f32[1,128], index: 2, kind: input, shape index: {}]   ;;  %s1496_s3 = inlined_call_operand.vmem [shape: bf16[128,128], index: 3, kind: input, shape index: {}]   ;;  %s1497_s4 = inlined_call_operand.vmem [shape: bf16[128,128], index: 4, kind: output, shape index: {}]  }
   0x1   :  { %s1298_s17 = smov 0   ;;  %s1300_s18 = smov 0  }
   0x2   :  { %s1302_s19 = smov 0  }
   0x3 LB: > { %s932_s20 = sadd.s32 4294967295, %s1265_s19   ;;  %s27_s21 = sadd.s32 1, %s1261_s18  ;;  %s1265_s19 = sphi %s1302_s19, %s15_s19   ;;  %s1261_s18 = sphi %s1300_s18, %s1504_s18   ;;  %s1257_s17 = sphi %s1298_s17, %s1503_s17   ;;  %s1253_s16 = sphi %s1296_s16, %s1502_s16   ;;  %s1249_s15 = sphi %s1294_s15, %s1501_s15  }
   0x4   : > { %p28_p0 = scmp.ge.s32.totalorder %s27_s21, 5  ;;  %s43_s22 = sadd.s32 1, %s1253_s16 }
   0x5   : > { %p50_p1 = scmp.ne.s32.totalorder %s1253_s16, %s1249_s15  ;;  %p51_p2 = scmp.eq.s32.totalorder %s1265_s19, 0 }
   0x6   : > { %s1506_s21 = smov (%p28_p0, %s27_s21), 0  ;;  %p933_p4 = scmp.ge.s32.totalorder %s1265_s19, 1 }
   0x7   : > { %p1327_p3 = por %p51_p2, %p50_p1  ;;  %s39_s24 = ssub.s32 %s1261_s18, %s1506_s21 }
   0x8   : > { %p177_p5 = scmp.lt.s32.totalorder %s1265_s19, 6  ;;  %p41_p6 = scmp.eq.s32.totalorder %s39_s24, 0 }
   0x9   : > { %p1339_p8 = scmp.eq.s32.totalorder %s932_s20, 0  ;;  %s190_s30 = sshll.u32 %s1495_s2, 4  ;;  %s191_s30 = int_to_ptr.hbm [resolvable:$true] %s190_s30 }
   0xa   : > { %p1335_p7 = pnand %p933_p4, %p177_p5  ;;  %s1267_s5 = smov [#allocation4]  }
   0xb   : > { %s1344_s27 = scalar_select %p41_p6, %s1253_s16, %s43_s22  }
   0xc   : > { %p1144_p9 = pneg %p1335_p7  ;;  %s192_s6 = sshll.u32 %s1267_s5, 4  ;;  %s193_s6 = int_to_ptr.vmem [resolvable:$true] %s192_s6 }
   0xd   : > { %p936_p11 = scmp.ge.s32.totalorder %s1265_s19, 5 }
   0xe   : > { %p1145_p10 = pnand %p1339_p8, %p1144_p9 }
   0xf   : > { %211 = sbr.rel (%p936_p11) target bundleno = 40 (0x28), region = 24 }
  0x10   : > { %1147 = dma.hbm_to_vmem [thread:$0]  (!%p1145_p10), %s191_s30, 16, %s193_s6, [#allocation5]  }
  0x14   : > { %214 = sbr.rel (!%p1327_p3) target bundleno = 40 (0x28), region = 28  ;;  %s216_s7 = sand.u32 (%p1327_p3), 1, %s1253_s16  }
  0x15   : > { %s938_s8 = sshll.u32 (%p1327_p3), %s1261_s18, 2  ;;  %s937_s9 = sshll.u32 (%p1327_p3), %s216_s7, 6 }
  0x16   : > { %s1361_s12 = scalar_lea.vmem (%p1327_p3), %s1493_s0, %s938_s8  ;;  %s218_s13 = scalar_lea.vmem (%p1327_p3), [#allocation3], %s937_s9 }
  0x17   : > { %v240_v0 = vld [vmem:[%s1361_s12] sm:$0xf] (%p1327_p3)  ;;  %v242_v1 = vld [vmem:[%s1361_s12 + $0x14] sm:$0xf] (%p1327_p3)  ;;  %v244_v2 = vld [vmem:[%s1361_s12 + $0x28] sm:$0xf] (%p1327_p3) }
  0x18   : > { %241 = vst [vmem:[%s218_s13] sm:$0xf] (%p1327_p3), %v240_v0  ;;  %v246_v3 = vld [vmem:[%s1361_s12 + $0x3c] sm:$0xf] (%p1327_p3)  ;;  %v248_v4 = vld [vmem:[%s1361_s12 + $0x50] sm:$0xf] (%p1327_p3) }
  0x19   : > { %243 = vst [vmem:[%s218_s13 + $0x4] sm:$0xf] %v242_v1  ;;  %v250_v5 = vld [vmem:[%s1361_s12 + $0x64] sm:$0xf]  ;;  %v252_v6 = vld [vmem:[%s1361_s12 + $0x78] sm:$0xf] }
  0x1a   : > { %245 = vst [vmem:[%s218_s13 + $0x8] sm:$0xf] %v244_v2  ;;  %v254_v7 = vld [vmem:[%s1361_s12 + $0x8c] sm:$0xf]  ;;  %v256_v8 = vld [vmem:[%s1361_s12 + $0xa0] sm:$0xf] }
  0x1b   : > { %247 = vst [vmem:[%s218_s13 + $0xc] sm:$0xf] %v246_v3  ;;  %v258_v9 = vld [vmem:[%s1361_s12 + $0xb4] sm:$0xf]  ;;  %v260_v10 = vld [vmem:[%s1361_s12 + $0xc8] sm:$0xf] }
  0x1c   : > { %249 = vst [vmem:[%s218_s13 + $0x10] sm:$0xf] %v248_v4  ;;  %v262_v11 = vld [vmem:[%s1361_s12 + $0xdc] sm:$0xf]  ;;  %v264_v12 = vld [vmem:[%s1361_s12 + $0xf0] sm:$0xf] }
  0x1d   : > { %251 = vst [vmem:[%s218_s13 + $0x14] sm:$0xf] %v250_v5  ;;  %v266_v13 = vld [vmem:[%s1361_s12 + $0x104] sm:$0xf]  ;;  %v268_v14 = vld [vmem:[%s1361_s12 + $0x118] sm:$0xf] }
  0x1e   : > { %253 = vst [vmem:[%s218_s13 + $0x18] sm:$0xf] %v252_v6  ;;  %v270_v15 = vld [vmem:[%s1361_s12 + $0x12c] sm:$0xf] }
  0x1f   : > { %255 = vst [vmem:[%s218_s13 + $0x1c] sm:$0xf] %v254_v7 }
  0x20   : > { %257 = vst [vmem:[%s218_s13 + $0x20] sm:$0xf] %v256_v8 }
  0x21   : > { %259 = vst [vmem:[%s218_s13 + $0x24] sm:$0xf] %v258_v9 }
  0x22   : > { %261 = vst [vmem:[%s218_s13 + $0x28] sm:$0xf] %v260_v10 }
  0x23   : > { %263 = vst [vmem:[%s218_s13 + $0x2c] sm:$0xf] %v262_v11 }
  0x24   : > { %265 = vst [vmem:[%s218_s13 + $0x30] sm:$0xf] %v264_v12 }
  0x25   : > { %267 = vst [vmem:[%s218_s13 + $0x34] sm:$0xf] %v266_v13 }
  0x26   : > { %269 = vst [vmem:[%s218_s13 + $0x38] sm:$0xf] %v268_v14 }
  0x27   : > { %271 = vst [vmem:[%s218_s13 + $0x3c] sm:$0xf] %v270_v15 }
  0x28 PF: > { %342 = sbr.rel (%p1335_p7) target bundleno = 289 (0x121), region = 73  ;;  %s345_s14 = sand.u32 (!%p1335_p7), 1, %s1249_s15  }
  0x29   : > { %s940_s20 = sshll.u32 (!%p1335_p7), %s345_s14, 6 }
  0x2a   : > { %s1382_s22 = scalar_lea.vmem (!%p1335_p7), [#allocation3], %s940_s20 }
  0x2d   : > { %1244 = dma.done.wait (%p1339_p8), [#allocation5], 16  }
  0x2e   : > { %1246 = vsyncadd (%p1339_p8), [#allocation5], 4294967280  ;;  %s942_s23 = sshll.u32 %s1257_s17, 4  ;;  %p944_p13 = scmp.ne.s32.totalorder %s1257_s17, 0 }
  0x2f   : > { %p396_p12 = scmp.lt.s32.totalorder %s942_s23, 79 }
  0x30   : > { %425 = sbr.rel (%p944_p13) target bundleno = 70 (0x46), region = 85 }
  0x31   : > { %s1508_s23 = smov (!%p396_p12, %s942_s23), 79 }
  0x32   : > { %s943_s24 = sshll.u32 %s1508_s23, 2 }
  0x33   : > { %s1392_s25 = scalar_lea.vmem %s1494_s1, %s943_s24 }
  0x35   : > { %v1268_v16 = vmov 0.0  }
  0x36   : > { %426 = vst [vmem:[#allocation2 + $0x30] sm:$0xff] %v1268_v16 }
  0x37   : > { %427 = vst [vmem:[#allocation2] sm:$0xff] %v1268_v16 }
  0x38   : > { %428 = vst [vmem:[#allocation2 + $0x58] sm:$0xff] %v1268_v16 }
  0x39   : > { %429 = vst [vmem:[#allocation2 + $0x18] sm:$0xff] %v1268_v16 }
  0x3a   : > { %430 = vst [vmem:[#allocation2 + $0x50] sm:$0xff] %v1268_v16 }
  0x3b   : > { %431 = vst [vmem:[#allocation2 + $0x68] sm:$0xff] %v1268_v16 }
  0x3c   : > { %432 = vst [vmem:[#allocation2 + $0x8] sm:$0xff] %v1268_v16 }
  0x3d   : > { %433 = vst [vmem:[#allocation2 + $0x48] sm:$0xff] %v1268_v16 }
  0x3e   : > { %434 = vst [vmem:[#allocation2 + $0x40] sm:$0xff] %v1268_v16 }
  0x3f   : > { %435 = vst [vmem:[#allocation2 + $0x20] sm:$0xff] %v1268_v16 }
  0x40   : > { %436 = vst [vmem:[#allocation2 + $0x10] sm:$0xff] %v1268_v16 }
  0x41   : > { %437 = vst [vmem:[#allocation2 + $0x38] sm:$0xff] %v1268_v16 }
  0x42   : > { %438 = vst [vmem:[#allocation2 + $0x60] sm:$0xff] %v1268_v16 }
  0x43   : > { %439 = vst [vmem:[#allocation2 + $0x70] sm:$0xff] %v1268_v16 }
  0x44   : > { %440 = vst [vmem:[#allocation2 + $0x78] sm:$0xff] %v1268_v16 }
  0x45   : > { %441 = vst [vmem:[#allocation2 + $0x28] sm:$0xff] %v1268_v16 }
  0x46 PF: > { %v1029_v17 = vld [vmem:[%s1392_s25 + $0x38] sm:$0xff]  ;;  %v1028_v18 = vld [vmem:[%s1392_s25 + $0x30] sm:$0xff]  ;;  %v1027_v19 = vld [vmem:[%s1392_s25 + $0x28] sm:$0xff]  ;;  %p1009_p0 = scmp.ne.s32.totalorder %s1257_s17, 4 }
  0x47   : > { %586 = vmatpush.bf16.msra.mxu0 %v1029_v17  ;;  %1116 = vmatpush.bf16.msra.mxu1 %v1029_v17  ;;  %v1026_v20 = vld [vmem:[%s1392_s25 + $0x20] sm:$0xff]  ;;  %v1025_v21 = vld [vmem:[%s1392_s25 + $0x18] sm:$0xff]  ;;  %v1024_v22 = vld [vmem:[%s1392_s25 + $0x10] sm:$0xff] }
  0x48   : > { %1117 = vmatpush.bf16.msra.mxu2 %v1029_v17  ;;  %1118 = vmatpush.bf16.msra.mxu3 %v1029_v17  ;;  %v1023_v23 = vld [vmem:[%s1392_s25 + $0x8] sm:$0xff]  ;;  %v1022_v24 = vld [vmem:[%s1392_s25] sm:$0xff]  ;;  %v1016_v26 = vld [vmem:[%s1382_s22 + $0x10] sm:$0xff] }
  0x49   : > { %v1014_v25 = vld [vmem:[%s1382_s22] sm:$0xff]  ;;  %v1020_v28 = vld [vmem:[%s1382_s22 + $0x30] sm:$0xff]  ;;  %v1015_v29 = vld [vmem:[%s1382_s22 + $0x8] sm:$0xff] }
  0x4a   : > { %v1018_v27 = vld [vmem:[%s1382_s22 + $0x20] sm:$0xff]  ;;  %v1017_v30 = vld [vmem:[%s1382_s22 + $0x18] sm:$0xff]  ;;  %v1019_v31 = vld [vmem:[%s1382_s22 + $0x28] sm:$0xff] }
  0x4b   : > { %587 = vmatpush.bf16.msra.mxu0 %v1028_v18  ;;  %1119 = vmatpush.bf16.msra.mxu1 %v1028_v18  ;;  %v1021_v32 = vld [vmem:[%s1382_s22 + $0x38] sm:$0xff]  ;;  %v442_v33 = vld [vmem:[#allocation2 + $0x30] sm:$0xff]  ;;  %v450_v39 = vld [vmem:[#allocation2 + $0x40] sm:$0xff] }
  0x4c   : > { %1120 = vmatpush.bf16.msra.mxu2 %v1028_v18  ;;  %1121 = vmatpush.bf16.msra.mxu3 %v1028_v18  ;;  %v446_v34 = vld [vmem:[#allocation2 + $0x50] sm:$0xff]  ;;  %v454_v40 = vld [vmem:[#allocation2 + $0x60] sm:$0xff]  ;;  %v447_v42 = vld [vmem:[#allocation2 + $0x68] sm:$0xff] }
  0x4d   : > { %v443_v41 = vld [vmem:[#allocation2] sm:$0xff]  ;;  %v455_v52 = vld [vmem:[#allocation2 + $0x70] sm:$0xff]  ;;  %v444_v53 = vld [vmem:[#allocation2 + $0x58] sm:$0xff] }
  0x4e   : > { %v451_v51 = vld [vmem:[#allocation2 + $0x20] sm:$0xff]  ;;  %v448_v54 = vld [vmem:[#allocation2 + $0x8] sm:$0xff]  ;;  %v452_v63 = vld [vmem:[#allocation2 + $0x10] sm:$0xff] }
  0x4f   : > { %588 = vmatpush.bf16.msra.mxu0 %v1027_v19  ;;  %1122 = vmatpush.bf16.msra.mxu1 %v1027_v19  ;;  %v456_v0 = vld [vmem:[#allocation2 + $0x78] sm:$0xff]  ;;  %v449_v2 = vld [vmem:[#allocation2 + $0x48] sm:$0xff] }
  0x50   : > { %1123 = vmatpush.bf16.msra.mxu2 %v1027_v19  ;;  %1124 = vmatpush.bf16.msra.mxu3 %v1027_v19  ;;  %v445_v1 = vld [vmem:[#allocation2 + $0x18] sm:$0xff]  ;;  %v457_v12 = vld [vmem:[#allocation2 + $0x28] sm:$0xff] }
  0x51   : > { %v453_v11 = vld [vmem:[#allocation2 + $0x38] sm:$0xff] }
  0x53   : > { %589 = vmatpush.bf16.msra.mxu0 %v1026_v20  ;;  %1125 = vmatpush.bf16.msra.mxu1 %v1026_v20 }
  0x54   : > { %1126 = vmatpush.bf16.msra.mxu2 %v1026_v20  ;;  %1127 = vmatpush.bf16.msra.mxu3 %v1026_v20 }
  0x57   : > { %590 = vmatpush.bf16.msra.mxu0 %v1025_v21  ;;  %1128 = vmatpush.bf16.msra.mxu1 %v1025_v21 }
  0x58   : > { %1129 = vmatpush.bf16.msra.mxu2 %v1025_v21  ;;  %1130 = vmatpush.bf16.msra.mxu3 %v1025_v21 }
  0x5b   : > { %591 = vmatpush.bf16.msra.mxu0 %v1024_v22  ;;  %1131 = vmatpush.bf16.msra.mxu1 %v1024_v22 }
  0x5c   : > { %1132 = vmatpush.bf16.msra.mxu2 %v1024_v22  ;;  %1133 = vmatpush.bf16.msra.mxu3 %v1024_v22 }
  0x5f   : > { %592 = vmatpush.bf16.msra.mxu0 %v1023_v23  ;;  %1134 = vmatpush.bf16.msra.mxu1 %v1023_v23 }
  0x60   : > { %1135 = vmatpush.bf16.msra.mxu2 %v1023_v23  ;;  %1136 = vmatpush.bf16.msra.mxu3 %v1023_v23 }
  0x63   : > { %593 = vmatpush.bf16.msra.mxu0 %v1022_v24  ;;  %1137 = vmatpush.bf16.msra.mxu1 %v1022_v24 }
  0x64   : > { %1138 = vmatpush.bf16.msra.mxu2 %v1022_v24  ;;  %1139 = vmatpush.bf16.msra.mxu3 %v1022_v24 }
  0x66   : > { %594 = vmatmul.bf16.vlgmr.msra.gmra.mxu0 %v1014_v25  ;;  %604 = vmatmul.bf16.vlgmr.msra.gmra.mxu1 %v1016_v26 }
  0x67   : > { %614 = vmatmul.bf16.vlgmr.msra.gmra.mxu2 %v1018_v27  ;;  %624 = vmatmul.bf16.vlgmr.msra.gmra.mxu3 %v1020_v28 }
  0x76   : > { %599 = vmatmul.bf16.gmra.mxu0 %v1015_v29  ;;  %609 = vmatmul.bf16.gmra.mxu1 %v1017_v30 }
  0x77   : > { %619 = vmatmul.bf16.gmra.mxu2 %v1019_v31  ;;  %629 = vmatmul.bf16.gmra.mxu3 %v1021_v32 }
  0xe3   : > { %v595_v35 = vpop.f32.mrf.mxu0  ;;  %v605_v36 = vpop.f32.mrf.mxu1 }
  0xe4   : > { %v635_v37 = vadd.f32 %v595_v35, %v442_v33  ;;  %v639_v38 = vadd.f32 %v605_v36, %v446_v34 }
  0xe6   : > { %651 = vst [vmem:[#allocation2 + $0x30] sm:$0xff] %v635_v37 }
  0xe7   : > { %655 = vst [vmem:[#allocation2 + $0x50] sm:$0xff] %v639_v38 }
  0xea   : > { %v615_v43 = vpop.f32.mrf.mxu2  ;;  %v625_v44 = vpop.f32.mrf.mxu3 }
  0xeb   : > { %v643_v45 = vadd.f32 %v615_v43, %v450_v39  ;;  %v647_v46 = vadd.f32 %v625_v44, %v454_v40  ;;  %v597_v47 = vpop.f32.mrf.mxu0  ;;  %v607_v48 = vpop.f32.mrf.mxu1 }
  0xec   : > { %v636_v49 = vadd.f32 %v597_v47, %v443_v41  ;;  %v640_v50 = vadd.f32 %v607_v48, %v447_v42 }
  0xed   : > { %659 = vst [vmem:[#allocation2 + $0x40] sm:$0xff] %v643_v45 }
  0xee   : > { %663 = vst [vmem:[#allocation2 + $0x60] sm:$0xff] %v647_v46 }
  0xef   : > { %652 = vst [vmem:[#allocation2] sm:$0xff] %v636_v49 }
  0xf0   : > { %656 = vst [vmem:[#allocation2 + $0x68] sm:$0xff] %v640_v50 }
  0xf2   : > { %v617_v55 = vpop.f32.mrf.mxu2  ;;  %v627_v56 = vpop.f32.mrf.mxu3 }
  0xf3   : > { %v644_v57 = vadd.f32 %v617_v55, %v451_v51  ;;  %v648_v58 = vadd.f32 %v627_v56, %v455_v52  ;;  %v600_v59 = vpop.f32.mrf.mxu0  ;;  %v610_v60 = vpop.f32.mrf.mxu1 }
  0xf4   : > { %v637_v61 = vadd.f32 %v600_v59, %v444_v53  ;;  %v641_v62 = vadd.f32 %v610_v60, %v448_v54 }
  0xf5   : > { %660 = vst [vmem:[#allocation2 + $0x20] sm:$0xff] %v644_v57 }
  0xf6   : > { %664 = vst [vmem:[#allocation2 + $0x70] sm:$0xff] %v648_v58 }
  0xf7   : > { %653 = vst [vmem:[#allocation2 + $0x58] sm:$0xff] %v637_v61 }
  0xf8   : > { %657 = vst [vmem:[#allocation2 + $0x8] sm:$0xff] %v641_v62 }
  0xfa   : > { %v620_v3 = vpop.f32.mrf.mxu2  ;;  %v630_v4 = vpop.f32.mrf.mxu3 }
  0xfb   : > { %v645_v5 = vadd.f32 %v620_v3, %v452_v63  ;;  %v649_v6 = vadd.f32 %v630_v4, %v456_v0  ;;  %v602_v7 = vpop.f32.mrf.mxu0  ;;  %v612_v8 = vpop.f32.mrf.mxu1 }
  0xfc   : > { %v638_v9 = vadd.f32 %v602_v7, %v445_v1  ;;  %v642_v10 = vadd.f32 %v612_v8, %v449_v2 }
  0xfd   : > { %661 = vst [vmem:[#allocation2 + $0x10] sm:$0xff] %v645_v5 }
  0xfe   : > { %665 = vst [vmem:[#allocation2 + $0x78] sm:$0xff] %v649_v6 }
  0xff   : > { %654 = vst [vmem:[#allocation2 + $0x18] sm:$0xff] %v638_v9 }
 0x100   : > { %658 = vst [vmem:[#allocation2 + $0x48] sm:$0xff] %v642_v10 }
 0x102   : > { %v622_v13 = vpop.f32.mrf.mxu2  ;;  %v632_v14 = vpop.f32.mrf.mxu3  ;;  %670 = sbr.rel (%p1009_p0) target bundleno = 289 (0x121), region = 89 }
 0x103   : > { %v646_v15 = vadd.f32 %v622_v13, %v453_v11  ;;  %v650_v16 = vadd.f32 %v632_v14, %v457_v12 }
 0x105   : > { %662 = vst [vmem:[#allocation2 + $0x38] sm:$0xff] %v646_v15 }
 0x106   : > { %666 = vst [vmem:[#allocation2 + $0x28] sm:$0xff] %v650_v16 }
 0x107   : > { %v671_v17 = vld [vmem:[#allocation2 + $0x30] sm:$0xff]  ;;  %v672_v18 = vld [vmem:[#allocation2] sm:$0xff]  ;;  %v673_v21 = vld [vmem:[#allocation2 + $0x58] sm:$0xff] }
 0x108   : > { %v1412_v19 = vld [vmem:[#allocation4] ss:$0 sm:$0xff]  ;;  %v674_v24 = vld [vmem:[#allocation2 + $0x18] sm:$0xff]  ;;  %v1102_v25 = vld [vmem:[%s1496_s3 + $0x8] sm:$0xff]  }
 0x109   : > { %v1031_v20 = vld [vmem:[%s1496_s3] sm:$0xff]   ;;  %v675_v26 = vld [vmem:[#allocation2 + $0x50] sm:$0xff]  ;;  %v691_v27 = vadd.f32 %v1412_v19, %v671_v17  ;;  %v692_v28 = vadd.f32 %v1412_v19, %v672_v18  ;;  %v693_v29 = vadd.f32 %v1412_v19, %v673_v21  ;;  %v694_v30 = vadd.f32 %v1412_v19, %v674_v24  ;;  %v676_v31 = vld [vmem:[#allocation2 + $0x68] sm:$0xff] }
 0x10a   : > { %v1032_v22 = vunpack.c.l.bf16 %v1031_v20  ;;  %v1033_v23 = vunpack.c.h.bf16 %v1031_v20  ;;  %v1103_v32 = vld [vmem:[%s1496_s3 + $0x10] sm:$0xff]   ;;  %v677_v33 = vld [vmem:[#allocation2 + $0x8] sm:$0xff]  ;;  %v1036_v34 = vunpack.c.l.bf16 %v1102_v25  ;;  %v1037_v35 = vunpack.c.h.bf16 %v1102_v25  ;;  %v1104_v43 = vld [vmem:[%s1496_s3 + $0x18] sm:$0xff]  }
 0x10b   : > { %v695_v36 = vadd.f32 %v1412_v19, %v675_v26  ;;  %v696_v37 = vadd.f32 %v1412_v19, %v676_v31  ;;  %v678_v38 = vld [vmem:[#allocation2 + $0x48] sm:$0xff]  ;;  %v1040_v41 = vunpack.c.l.bf16 %v1103_v32  ;;  %v1041_v42 = vunpack.c.h.bf16 %v1103_v32  ;;  %v679_v48 = vld [vmem:[#allocation2 + $0x40] sm:$0xff]  ;;  %v681_v59 = vld [vmem:[#allocation2 + $0x10] sm:$0xff] }
 0x10c   : > { %v739_v39 = vadd.f32 %v1032_v22, %v691_v27  ;;  %v740_v40 = vadd.f32 %v1033_v23, %v692_v28  ;;  %v741_v44 = vadd.f32 %v1036_v34, %v693_v29  ;;  %v742_v45 = vadd.f32 %v1037_v35, %v694_v30  ;;  %v680_v53 = vld [vmem:[#allocation2 + $0x20] sm:$0xff]  ;;  %v682_v0 = vld [vmem:[#allocation2 + $0x38] sm:$0xff]  ;;  %v1106_v1 = vld [vmem:[%s1496_s3 + $0x28] sm:$0xff]  }
 0x10d   : > { %v697_v46 = vadd.f32 %v1412_v19, %v677_v33  ;;  %v698_v47 = vadd.f32 %v1412_v19, %v678_v38  ;;  %v743_v51 = vadd.f32 %v1040_v41, %v695_v36  ;;  %v744_v52 = vadd.f32 %v1041_v42, %v696_v37  ;;  %v1105_v58 = vld [vmem:[%s1496_s3 + $0x20] sm:$0xff]   ;;  %v684_v11 = vld [vmem:[#allocation2 + $0x70] sm:$0xff]  ;;  %v685_v22 = vld [vmem:[#allocation2 + $0x78] sm:$0xff] }
 0x10e   : > { %v755_v49 = vmax.f32 %v739_v39, 0.0  ;;  %v756_v50 = vmax.f32 %v740_v40, 0.0  ;;  %v757_v54 = vmax.f32 %v741_v44, 0.0  ;;  %v758_v55 = vmax.f32 %v742_v45, 0.0  ;;  %v683_v6 = vld [vmem:[#allocation2 + $0x60] sm:$0xff]  ;;  %v1107_v12 = vld [vmem:[%s1496_s3 + $0x30] sm:$0xff]  }
 0x10f   : > { %v1044_v56 = vunpack.c.l.bf16 %v1104_v43  ;;  %v1045_v57 = vunpack.c.h.bf16 %v1104_v43  ;;  %v759_v61 = vmax.f32 %v743_v51, 0.0  ;;  %v760_v62 = vmax.f32 %v744_v52, 0.0  ;;  %v686_v23 = vld [vmem:[#allocation2 + $0x28] sm:$0xff]  ;;  %v1108_v28 = vld [vmem:[%s1496_s3 + $0x38] sm:$0xff]  }
 0x110   : > { %v1065_v60 = vpack.c.bf16 %v756_v50, %v755_v49  ;;  %v699_v63 = vadd.f32 %v1412_v19, %v679_v48  ;;  %v1070_v2 = vpack.c.bf16 %v758_v55, %v757_v54  ;;  %v700_v5 = vadd.f32 %v1412_v19, %v680_v53 }
 0x111   : > { %v745_v3 = vadd.f32 %v1044_v56, %v697_v46  ;;  %v746_v4 = vadd.f32 %v1045_v57, %v698_v47  ;;  %v1075_v7 = vpack.c.bf16 %v760_v62, %v759_v61  ;;  %v1048_v8 = vunpack.c.l.bf16 %v1105_v58 }
 0x112   : > { %1066 = vst [vmem:[%s1497_s4] sm:$0xff] %v1065_v60   ;;  %v1049_v9 = vunpack.c.h.bf16 %v1105_v58  ;;  %v701_v10 = vadd.f32 %v1412_v19, %v681_v59  ;;  %v702_v15 = vadd.f32 %v1412_v19, %v682_v0  ;;  %v1052_v16 = vunpack.c.l.bf16 %v1106_v1 }
 0x113   : > { %1109 = vst [vmem:[%s1497_s4 + $0x8] sm:$0xff] %v1070_v2   ;;  %v761_v13 = vmax.f32 %v745_v3, 0.0  ;;  %v762_v14 = vmax.f32 %v746_v4, 0.0  ;;  %v747_v17 = vadd.f32 %v1048_v8, %v699_v63  ;;  %v1053_v20 = vunpack.c.h.bf16 %v1106_v1 }
 0x114   : > { %1110 = vst [vmem:[%s1497_s4 + $0x10] sm:$0xff] %v1075_v7   ;;  %v748_v18 = vadd.f32 %v1049_v9, %v700_v5  ;;  %v703_v21 = vadd.f32 %v1412_v19, %v683_v6  ;;  %v749_v25 = vadd.f32 %v1052_v16, %v701_v10  ;;  %v704_v26 = vadd.f32 %v1412_v19, %v684_v11 }
 0x115   : > { %v1080_v24 = vpack.c.bf16 %v762_v14, %v761_v13  ;;  %v1056_v27 = vunpack.c.l.bf16 %v1107_v12  ;;  %v763_v29 = vmax.f32 %v747_v17, 0.0  ;;  %v750_v31 = vadd.f32 %v1053_v20, %v702_v15 }
 0x116   : > { %v764_v30 = vmax.f32 %v748_v18, 0.0  ;;  %v1057_v32 = vunpack.c.h.bf16 %v1107_v12  ;;  %v765_v33 = vmax.f32 %v749_v25, 0.0  ;;  %v705_v35 = vadd.f32 %v1412_v19, %v685_v22 }
 0x117   : > { %1111 = vst [vmem:[%s1497_s4 + $0x18] sm:$0xff] %v1080_v24   ;;  %v751_v34 = vadd.f32 %v1056_v27, %v703_v21  ;;  %v706_v36 = vadd.f32 %v1412_v19, %v686_v23  ;;  %v766_v38 = vmax.f32 %v750_v31, 0.0  ;;  %v1060_v40 = vunpack.c.l.bf16 %v1108_v28 }
 0x118   : > { %v1085_v37 = vpack.c.bf16 %v764_v30, %v763_v29  ;;  %v752_v39 = vadd.f32 %v1057_v32, %v704_v26  ;;  %v1061_v42 = vunpack.c.h.bf16 %v1108_v28 }
 0x119   : > { %v767_v41 = vmax.f32 %v751_v34, 0.0  ;;  %v1090_v43 = vpack.c.bf16 %v766_v38, %v765_v33  ;;  %v753_v45 = vadd.f32 %v1060_v40, %v705_v35 }
 0x11a   : > { %1112 = vst [vmem:[%s1497_s4 + $0x20] sm:$0xff] %v1085_v37   ;;  %v768_v44 = vmax.f32 %v752_v39, 0.0  ;;  %v754_v46 = vadd.f32 %v1061_v42, %v706_v36 }
 0x11b   : > { %1113 = vst [vmem:[%s1497_s4 + $0x28] sm:$0xff] %v1090_v43   ;;  %v769_v19 = vmax.f32 %v753_v45, 0.0 }
 0x11c   : > { %v1095_v47 = vpack.c.bf16 %v768_v44, %v767_v41  ;;  %v770_v48 = vmax.f32 %v754_v46, 0.0 }
 0x11e   : > { %1114 = vst [vmem:[%s1497_s4 + $0x30] sm:$0xff] %v1095_v47   ;;  %v1100_v49 = vpack.c.bf16 %v770_v48, %v769_v19 }
 0x120   : > { %1115 = vst [vmem:[%s1497_s4 + $0x38] sm:$0xff] %v1100_v49  }
 0x121 PF: > { %s15_s19 = sadd.s32 1, %s1265_s19   ;;  %s1501_s15 = smov %s1253_s16 }
 0x122   : > { %p12_p1 = scmp.ge.s32.totalorder %s15_s19, 7   ;;  %s1502_s16 = smov %s1344_s27 }
 0x123   : > { %s1503_s17 = smov %s1261_s18  ;;  %s1504_s18 = smov %s1506_s21 }
 0x124   :  { %14 = sbr.rel (!%p12_p1) target bundleno = 3 (0x3), region = 132 }
 0x129   :  { %831 = vsyncpa [#allocation5], 1 }
 0x12a   :  { %833 = vsyncpa [#allocation5 + $0x1], 1 }

// kernel: _lambda_.28
= control target key start
LH: loop header
LB: loop body
LE: loop exit
PB: predicated region body
PF: predicated region fallthrough
CT: control target
= control target key end

     0   :  { %8 = vsyncpa [#allocation5], 0  ;;  %s807_s12 = smov 0   ;;  %s809_s13 = smov 0   ;;  %s915_s0 = inlined_call_operand.vmem [shape: bf16[32,640], index: 0, kind: input, shape index: {}]   ;;  %s916_s1 = inlined_call_operand.vmem [shape: bf16[640,128], index: 1, kind: input, shape index: {}]   ;;  %s917_s2 = inlined_call_operand.hbm [shape: f32[1,128], index: 2, kind: input, shape index: {}]   ;;  %s918_s3 = inlined_call_operand.vmem [shape: bf16[32,128], index: 3, kind: output, shape index: {}]  }
   0x1   :  { %s811_s14 = smov 0   ;;  %s813_s15 = smov 0  }
   0x2   :  { %s815_s16 = smov 0  }
   0x3 LB: > { %s572_s17 = sadd.s32 4294967295, %s783_s16   ;;  %s26_s18 = sadd.s32 1, %s779_s15  ;;  %s783_s16 = sphi %s815_s16, %s14_s16   ;;  %s779_s15 = sphi %s813_s15, %s925_s15   ;;  %s775_s14 = sphi %s811_s14, %s924_s14   ;;  %s771_s13 = sphi %s809_s13, %s923_s13   ;;  %s767_s12 = sphi %s807_s12, %s922_s12  }
   0x4   : > { %p27_p0 = scmp.ge.s32.totalorder %s26_s18, 5  ;;  %s42_s19 = sadd.s32 1, %s771_s13 }
   0x5   : > { %p49_p1 = scmp.ne.s32.totalorder %s771_s13, %s767_s12  ;;  %p50_p2 = scmp.eq.s32.totalorder %s783_s16, 0 }
   0x6   : > { %s927_s18 = smov (%p27_p0, %s26_s18), 0  ;;  %p573_p4 = scmp.ge.s32.totalorder %s783_s16, 1 }
   0x7   : > { %p840_p3 = por %p50_p2, %p49_p1  ;;  %s38_s21 = ssub.s32 %s779_s15, %s927_s18 }
   0x8   : > { %p148_p5 = scmp.lt.s32.totalorder %s783_s16, 6  ;;  %p40_p6 = scmp.eq.s32.totalorder %s38_s21, 0 }
   0x9   : > { %p852_p8 = scmp.eq.s32.totalorder %s572_s17, 0  ;;  %s161_s27 = sshll.u32 %s917_s2, 4  ;;  %s162_s27 = int_to_ptr.hbm [resolvable:$true] %s161_s27 }
   0xa   : > { %p848_p7 = pnand %p573_p4, %p148_p5  ;;  %s785_s28 = smov [#allocation4]  }
   0xb   : > { %s857_s24 = scalar_select %p40_p6, %s771_s13, %s42_s19  }
   0xc   : > { %p662_p9 = pneg %p848_p7  ;;  %s163_s29 = sshll.u32 %s785_s28, 4  ;;  %s164_s29 = int_to_ptr.vmem [resolvable:$true] %s163_s29 }
   0xd   : > { %p575_p11 = scmp.ge.s32.totalorder %s783_s16, 5 }
   0xe   : > { %p663_p10 = pnand %p852_p8, %p662_p9 }
   0xf   : > { %170 = sbr.rel (%p575_p11) target bundleno = 28 (0x1c), region = 20 }
  0x10   : > { %665 = dma.hbm_to_vmem [thread:$0]  (!%p663_p10), %s162_s27, 16, %s164_s29, [#allocation5]  }
  0x14   : > { %173 = sbr.rel (!%p840_p3) target bundleno = 28 (0x1c), region = 24  ;;  %s175_s30 = sand.u32 (%p840_p3), 1, %s771_s13  }
  0x15   : > { %s577_s4 = sshll.u32 (%p840_p3), %s779_s15, 2  ;;  %s576_s5 = sshll.u32 (%p840_p3), %s175_s30, 4 }
  0x16   : > { %s182_s8 = scalar_lea.vmem (%p840_p3), %s915_s0, %s577_s4  ;;  %s177_s9 = scalar_lea.vmem (%p840_p3), [#allocation3], %s576_s5 }
  0x17   : > { %v199_v0 = vld [vmem:[%s182_s8] sm:$0xf] (%p840_p3)  ;;  %v201_v1 = vld [vmem:[%s182_s8 + $0x14] sm:$0xf] (%p840_p3)  ;;  %v203_v2 = vld [vmem:[%s182_s8 + $0x28] sm:$0xf] (%p840_p3) }
  0x18   : > { %200 = vst [vmem:[%s177_s9] sm:$0xf] (%p840_p3), %v199_v0  ;;  %v205_v3 = vld [vmem:[%s182_s8 + $0x3c] sm:$0xf] (%p840_p3) }
  0x19   : > { %202 = vst [vmem:[%s177_s9 + $0x4] sm:$0xf] %v201_v1 }
  0x1a   : > { %204 = vst [vmem:[%s177_s9 + $0x8] sm:$0xf] %v203_v2 }
  0x1b   : > { %206 = vst [vmem:[%s177_s9 + $0xc] sm:$0xf] %v205_v3 }
  0x1c PF: > { %253 = sbr.rel (%p848_p7) target bundleno = 230 (0xe6), region = 69  ;;  %s256_s10 = sand.u32 (!%p848_p7), 1, %s767_s12  }
  0x1d   : > { %s877_s11 = sshll.u32 (!%p848_p7), %s256_s10, 4 }
  0x1e   : > { %s258_s17 = scalar_lea.vmem (!%p848_p7), [#allocation3], %s877_s11 }
  0x21   : > { %762 = dma.done.wait (%p852_p8), [#allocation5], 16  }
  0x22   : > { %764 = vsyncadd (%p852_p8), [#allocation5], 4294967280  ;;  %s581_s19 = sshll.u32 %s775_s14, 4  ;;  %p583_p13 = scmp.ne.s32.totalorder %s775_s14, 0 }
  0x23   : > { %p297_p12 = scmp.lt.s32.totalorder %s581_s19, 79 }
  0x24   : > { %317 = sbr.rel (%p583_p13) target bundleno = 46 (0x2e), region = 81 }
  0x25   : > { %s929_s19 = smov (!%p297_p12, %s581_s19), 79 }
  0x26   : > { %s582_s20 = sshll.u32 %s929_s19, 2 }
  0x27   : > { %s303_s25 = scalar_lea.vmem %s916_s1, %s582_s20 }
  0x29   : > { %v786_v4 = vmov 0.0  }
  0x2a   : > { %318 = vst [vmem:[#allocation2 + $0x10] sm:$0xff] %v786_v4 }
  0x2b   : > { %319 = vst [vmem:[#allocation2] sm:$0xff] %v786_v4 }
  0x2c   : > { %320 = vst [vmem:[#allocation2 + $0x18] sm:$0xff] %v786_v4 }
  0x2d   : > { %321 = vst [vmem:[#allocation2 + $0x8] sm:$0xff] %v786_v4 }
  0x2e PF: > { %v638_v5 = vld [vmem:[%s303_s25 + $0x38] sm:$0xff]  ;;  %v637_v6 = vld [vmem:[%s303_s25 + $0x30] sm:$0xff]  ;;  %v636_v7 = vld [vmem:[%s303_s25 + $0x28] sm:$0xff]  ;;  %p624_p0 = scmp.ne.s32.totalorder %s775_s14, 4 }
  0x2f   : > { %406 = vmatpush.bf16.msra.mxu0 %v638_v5  ;;  %650 = vmatpush.bf16.msra.mxu1 %v638_v5  ;;  %v635_v8 = vld [vmem:[%s303_s25 + $0x20] sm:$0xff]  ;;  %v634_v9 = vld [vmem:[%s303_s25 + $0x18] sm:$0xff]  ;;  %v633_v10 = vld [vmem:[%s303_s25 + $0x10] sm:$0xff] }
  0x30   : > { %v632_v11 = vld [vmem:[%s303_s25 + $0x8] sm:$0xff]  ;;  %v631_v12 = vld [vmem:[%s303_s25] sm:$0xff] }
  0x31   : > { %v629_v13 = vld [vmem:[%s258_s17] sm:$0xff]  ;;  %v630_v14 = vld [vmem:[%s258_s17 + $0x8] sm:$0xff] }
  0x32   : > { %v322_v15 = vld [vmem:[#allocation2 + $0x10] sm:$0xff]  ;;  %v323_v21 = vld [vmem:[#allocation2] sm:$0xff] }
  0x33   : > { %407 = vmatpush.bf16.msra.mxu0 %v637_v6  ;;  %651 = vmatpush.bf16.msra.mxu1 %v637_v6  ;;  %v324_v16 = vld [vmem:[#allocation2 + $0x18] sm:$0xff] }
  0x34   : > { %v325_v22 = vld [vmem:[#allocation2 + $0x8] sm:$0xff] }
  0x37   : > { %408 = vmatpush.bf16.msra.mxu0 %v636_v7  ;;  %652 = vmatpush.bf16.msra.mxu1 %v636_v7 }
  0x3b   : > { %409 = vmatpush.bf16.msra.mxu0 %v635_v8  ;;  %653 = vmatpush.bf16.msra.mxu1 %v635_v8 }
  0x3f   : > { %410 = vmatpush.bf16.msra.mxu0 %v634_v9  ;;  %654 = vmatpush.bf16.msra.mxu1 %v634_v9 }
  0x43   : > { %411 = vmatpush.bf16.msra.mxu0 %v633_v10  ;;  %655 = vmatpush.bf16.msra.mxu1 %v633_v10 }
  0x47   : > { %412 = vmatpush.bf16.msra.mxu0 %v632_v11  ;;  %656 = vmatpush.bf16.msra.mxu1 %v632_v11 }
  0x4b   : > { %413 = vmatpush.bf16.msra.mxu0 %v631_v12  ;;  %657 = vmatpush.bf16.msra.mxu1 %v631_v12 }
  0x4e   : > { %414 = vmatmul.bf16.vlgmr.msra.gmra.mxu0 %v629_v13  ;;  %419 = vmatmul.bf16.vlgmr.msra.gmra.mxu1 %v630_v14 }
  0xcb   : > { %v415_v17 = vpop.f32.mrf.mxu0  ;;  %v420_v18 = vpop.f32.mrf.mxu1 }
  0xcc   : > { %v425_v19 = vadd.f32 %v415_v17, %v322_v15  ;;  %v427_v20 = vadd.f32 %v420_v18, %v324_v16 }
  0xce   : > { %429 = vst [vmem:[#allocation2 + $0x10] sm:$0xff] %v425_v19 }
  0xcf   : > { %431 = vst [vmem:[#allocation2 + $0x18] sm:$0xff] %v427_v20 }
  0xd3   : > { %v417_v23 = vpop.f32.mrf.mxu0  ;;  %v422_v24 = vpop.f32.mrf.mxu1  ;;  %436 = sbr.rel (%p624_p0) target bundleno = 230 (0xe6), region = 85 }
  0xd4   : > { %v426_v25 = vadd.f32 %v417_v23, %v323_v21  ;;  %v428_v26 = vadd.f32 %v422_v24, %v325_v22 }
  0xd6   : > { %430 = vst [vmem:[#allocation2] sm:$0xff] %v426_v25 }
  0xd7   : > { %432 = vst [vmem:[#allocation2 + $0x8] sm:$0xff] %v428_v26 }
  0xd8   : > { %v437_v27 = vld [vmem:[#allocation2 + $0x10] sm:$0xff]  ;;  %v710_v29 = vld [vmem:[#allocation4] ss:$0 sm:$0xff]  ;;  %v439_v30 = vld [vmem:[#allocation2 + $0x18] sm:$0xff] }
  0xd9   : > { %v445_v32 = vadd.f32 %v710_v29, %v437_v27  ;;  %v447_v34 = vadd.f32 %v710_v29, %v439_v30 }
  0xdb   : > { %v449_v36 = vmax.f32 %v445_v32, 0.0  ;;  %v451_v38 = vmax.f32 %v447_v34, 0.0 }
  0xdd   : > { %v438_v28 = vld [vmem:[#allocation2] sm:$0xff] }
  0xde   : > { %v440_v31 = vld [vmem:[#allocation2 + $0x8] sm:$0xff]  ;;  %v446_v33 = vadd.f32 %v710_v29, %v438_v28 }
  0xdf   : > { %v448_v35 = vadd.f32 %v710_v29, %v440_v31 }
  0xe0   : > { %v450_v37 = vmax.f32 %v446_v33, 0.0 }
  0xe1   : > { %v452_v39 = vmax.f32 %v448_v35, 0.0 }
  0xe2   : > { %v642_v40 = vpack.c.bf16 %v450_v37, %v449_v36 }
  0xe3   : > { %v647_v41 = vpack.c.bf16 %v452_v39, %v451_v38 }
  0xe4   : > { %643 = vst [vmem:[%s918_s3] sm:$0xff] %v642_v40  }
  0xe5   : > { %649 = vst [vmem:[%s918_s3 + $0x8] sm:$0xff] %v647_v41  }
  0xe6 PF: > { %s14_s16 = sadd.s32 1, %s783_s16   ;;  %s922_s12 = smov %s771_s13 }
  0xe7   : > { %p11_p1 = scmp.ge.s32.totalorder %s14_s16, 7   ;;  %s923_s13 = smov %s857_s24 }
  0xe8   : > { %s924_s14 = smov %s779_s15  ;;  %s925_s15 = smov %s927_s18 }
  0xe9   :  { %13 = sbr.rel (!%p11_p1) target bundleno = 3 (0x3), region = 125 }
  0xee   :  { %489 = vsyncpa [#allocation5], 1 }
  0xef   :  { %491 = vsyncpa [#allocation5 + $0x1], 1 }

// kernel: _lambda_.29
= control target key start
LH: loop header
LB: loop body
LE: loop exit
PB: predicated region body
PF: predicated region fallthrough
CT: control target
= control target key end

     0   :  { %8 = vsyncpa [#allocation4], 0  ;;  %s272_s15 = smov [#allocation3]   ;;  %s332_s0 = inlined_call_operand.vmem [shape: bf16[32,128], index: 0, kind: input, shape index: {}]   ;;  %s333_s1 = inlined_call_operand.vmem [shape: bf16[128,128], index: 1, kind: input, shape index: {}]   ;;  %s334_s2 = inlined_call_operand.hbm [shape: f32[1,128], index: 2, kind: input, shape index: {}]   ;;  %s335_s3 = inlined_call_operand.vmem [shape: bf16[32,128], index: 3, kind: output, shape index: {}]  }
   0x1   :  { %s18_s14 = sshll.u32 %s334_s2, 4  ;;  %s20_s16 = sshll.u32 %s272_s15, 4  ;;  %s19_s14 = int_to_ptr.hbm [resolvable:$true] %s18_s14  ;;  %s21_s16 = int_to_ptr.vmem [resolvable:$true] %s20_s16 }
   0x2   :  { %23 = dma.hbm_to_vmem [thread:$0]  %s19_s14, 16, %s21_s16, [#allocation4]  }
   0x3   :  { %270 = dma.done.wait [#allocation4], 16  }
   0x4   :  { %271 = vsyncadd [#allocation4], 4294967280  ;;  %v224_v0 = vld [vmem:[%s333_s1 + $0x38] sm:$0xff]  ;;  %v223_v1 = vld [vmem:[%s333_s1 + $0x30] sm:$0xff] }
   0x5   :  { %120 = vmatpush.bf16.msra.mxu0 %v224_v0  ;;  %236 = vmatpush.bf16.msra.mxu1 %v224_v0  ;;  %v222_v2 = vld [vmem:[%s333_s1 + $0x28] sm:$0xff]  ;;  %v221_v3 = vld [vmem:[%s333_s1 + $0x20] sm:$0xff]  ;;  %v220_v4 = vld [vmem:[%s333_s1 + $0x18] sm:$0xff] }
   0x6   :  { %v219_v5 = vld [vmem:[%s333_s1 + $0x10] sm:$0xff]  ;;  %v218_v6 = vld [vmem:[%s333_s1 + $0x8] sm:$0xff]  ;;  %v217_v7 = vld [vmem:[%s333_s1] sm:$0xff] }
   0x7   :  { %v215_v8 = vld [vmem:[%s332_s0] sm:$0xff]  ;;  %v216_v9 = vld [vmem:[%s332_s0 + $0x8] sm:$0xff] }
   0x8   :  { %v245_v12 = vld [vmem:[#allocation3] ss:$0 sm:$0xff] }
   0x9   :  { %121 = vmatpush.bf16.msra.mxu0 %v223_v1  ;;  %237 = vmatpush.bf16.msra.mxu1 %v223_v1 }
   0xd   :  { %122 = vmatpush.bf16.msra.mxu0 %v222_v2  ;;  %238 = vmatpush.bf16.msra.mxu1 %v222_v2 }
  0x11   :  { %123 = vmatpush.bf16.msra.mxu0 %v221_v3  ;;  %239 = vmatpush.bf16.msra.mxu1 %v221_v3 }
  0x15   :  { %124 = vmatpush.bf16.msra.mxu0 %v220_v4  ;;  %240 = vmatpush.bf16.msra.mxu1 %v220_v4 }
  0x19   :  { %125 = vmatpush.bf16.msra.mxu0 %v219_v5  ;;  %241 = vmatpush.bf16.msra.mxu1 %v219_v5 }
  0x1d   :  { %126 = vmatpush.bf16.msra.mxu0 %v218_v6  ;;  %242 = vmatpush.bf16.msra.mxu1 %v218_v6 }
  0x21   :  { %127 = vmatpush.bf16.msra.mxu0 %v217_v7  ;;  %243 = vmatpush.bf16.msra.mxu1 %v217_v7 }
  0x24   :  { %128 = vmatmul.bf16.vlgmr.msra.gmra.mxu0 %v215_v8  ;;  %133 = vmatmul.bf16.vlgmr.msra.gmra.mxu1 %v216_v9 }
  0xa1   :  { %v129_v10 = vpop.f32.mrf.mxu0  ;;  %v134_v11 = vpop.f32.mrf.mxu1 }
  0xa2   :  { %v158_v15 = vadd.f32 %v245_v12, %v129_v10  ;;  %v160_v16 = vadd.f32 %v245_v12, %v134_v11 }
  0xa9   :  { %v131_v13 = vpop.f32.mrf.mxu0  ;;  %v136_v14 = vpop.f32.mrf.mxu1 }
  0xaa   :  { %v159_v17 = vadd.f32 %v245_v12, %v131_v13  ;;  %v161_v18 = vadd.f32 %v245_v12, %v136_v14 }
  0xac   :  { %v228_v19 = vpack.c.bf16 %v159_v17, %v158_v15  ;;  %v233_v20 = vpack.c.bf16 %v161_v18, %v160_v16 }
  0xae   :  { %229 = vst [vmem:[%s335_s3] sm:$0xff] %v228_v19  }
  0xaf   :  { %235 = vst [vmem:[%s335_s3 + $0x8] sm:$0xff] %v233_v20  }
  0xb0   :  { %174 = vsyncpa [#allocation4], 1 }

// kernel: _lambda_.30
= control target key start
LH: loop header
LB: loop body
LE: loop exit
PB: predicated region body
PF: predicated region fallthrough
CT: control target
= control target key end

     0   :  { %9 = vsyncpa [#allocation5], 0  ;;  %s912_s15 = smov 0   ;;  %s914_s16 = smov 0   ;;  %s1026_s0 = inlined_call_operand.vmem [shape: bf16[32,1152], index: 0, kind: input, shape index: {}]   ;;  %s1027_s1 = inlined_call_operand.vmem [shape: bf16[1152,128], index: 1, kind: input, shape index: {}]   ;;  %s1028_s2 = inlined_call_operand.hbm [shape: f32[1,128], index: 2, kind: input, shape index: {}]   ;;  %s1029_s3 = inlined_call_operand.vmem [shape: bf16[32,128], index: 3, kind: input, shape index: {}]   ;;  %s1030_s4 = inlined_call_operand.vmem [shape: bf16[32,128], index: 4, kind: output, shape index: {}]  }
   0x1   :  { %s916_s17 = smov 0   ;;  %s918_s18 = smov 0  }
   0x2   :  { %s920_s19 = smov 0  }
   0x3 LB: > { %s662_s20 = sadd.s32 4294967295, %s883_s19   ;;  %s27_s21 = sadd.s32 1, %s879_s18  ;;  %s883_s19 = sphi %s920_s19, %s15_s19   ;;  %s879_s18 = sphi %s918_s18, %s1037_s18   ;;  %s875_s17 = sphi %s916_s17, %s1036_s17   ;;  %s871_s16 = sphi %s914_s16, %s1035_s16   ;;  %s867_s15 = sphi %s912_s15, %s1034_s15  }
   0x4   : > { %p28_p0 = scmp.ge.s32.totalorder %s27_s21, 9  ;;  %s43_s22 = sadd.s32 1, %s871_s16 }
   0x5   : > { %p50_p1 = scmp.ne.s32.totalorder %s871_s16, %s867_s15  ;;  %p51_p2 = scmp.eq.s32.totalorder %s883_s19, 0 }
   0x6   : > { %s1039_s21 = smov (%p28_p0, %s27_s21), 0  ;;  %p663_p4 = scmp.ge.s32.totalorder %s883_s19, 1 }
   0x7   : > { %p945_p3 = por %p51_p2, %p50_p1  ;;  %s39_s24 = ssub.s32 %s879_s18, %s1039_s21 }
   0x8   : > { %p177_p5 = scmp.lt.s32.totalorder %s883_s19, 10  ;;  %p41_p6 = scmp.eq.s32.totalorder %s39_s24, 0 }
   0x9   : > { %p957_p8 = scmp.eq.s32.totalorder %s662_s20, 0  ;;  %s190_s30 = sshll.u32 %s1028_s2, 4  ;;  %s191_s30 = int_to_ptr.hbm [resolvable:$true] %s190_s30 }
   0xa   : > { %p953_p7 = pnand %p663_p4, %p177_p5  ;;  %s885_s5 = smov [#allocation4]  }
   0xb   : > { %s962_s27 = scalar_select %p41_p6, %s871_s16, %s43_s22  }
   0xc   : > { %p762_p9 = pneg %p953_p7  ;;  %s192_s6 = sshll.u32 %s885_s5, 4  ;;  %s193_s6 = int_to_ptr.vmem [resolvable:$true] %s192_s6 }
   0xd   : > { %p666_p11 = scmp.ge.s32.totalorder %s883_s19, 9 }
   0xe   : > { %p763_p10 = pnand %p957_p8, %p762_p9 }
   0xf   : > { %211 = sbr.rel (%p666_p11) target bundleno = 28 (0x1c), region = 24 }
  0x10   : > { %765 = dma.hbm_to_vmem [thread:$0]  (!%p763_p10), %s191_s30, 16, %s193_s6, [#allocation5]  }
  0x14   : > { %214 = sbr.rel (!%p945_p3) target bundleno = 28 (0x1c), region = 28  ;;  %s216_s7 = sand.u32 (%p945_p3), 1, %s871_s16  }
  0x15   : > { %s668_s8 = sshll.u32 (%p945_p3), %s879_s18, 2  ;;  %s667_s9 = sshll.u32 (%p945_p3), %s216_s7, 4 }
  0x16   : > { %s223_s12 = scalar_lea.vmem (%p945_p3), %s1026_s0, %s668_s8  ;;  %s218_s13 = scalar_lea.vmem (%p945_p3), [#allocation3], %s667_s9 }
  0x17   : > { %v240_v0 = vld [vmem:[%s223_s12] sm:$0xf] (%p945_p3)  ;;  %v242_v1 = vld [vmem:[%s223_s12 + $0x24] sm:$0xf] (%p945_p3)  ;;  %v244_v2 = vld [vmem:[%s223_s12 + $0x48] sm:$0xf] (%p945_p3) }
  0x18   : > { %241 = vst [vmem:[%s218_s13] sm:$0xf] (%p945_p3), %v240_v0  ;;  %v246_v3 = vld [vmem:[%s223_s12 + $0x6c] sm:$0xf] (%p945_p3) }
  0x19   : > { %243 = vst [vmem:[%s218_s13 + $0x4] sm:$0xf] %v242_v1 }
  0x1a   : > { %245 = vst [vmem:[%s218_s13 + $0x8] sm:$0xf] %v244_v2 }
  0x1b   : > { %247 = vst [vmem:[%s218_s13 + $0xc] sm:$0xf] %v246_v3 }
  0x1c PF: > { %294 = sbr.rel (%p953_p7) target bundleno = 232 (0xe8), region = 73  ;;  %s297_s14 = sand.u32 (!%p953_p7), 1, %s867_s15  }
  0x1d   : > { %s982_s20 = sshll.u32 (!%p953_p7), %s297_s14, 4 }
  0x1e   : > { %s299_s22 = scalar_lea.vmem (!%p953_p7), [#allocation3], %s982_s20 }
  0x21   : > { %862 = dma.done.wait (%p957_p8), [#allocation5], 16  }
  0x22   : > { %864 = vsyncadd (%p957_p8), [#allocation5], 4294967280  ;;  %s672_s23 = sshll.u32 %s875_s17, 4  ;;  %p674_p13 = scmp.ne.s32.totalorder %s875_s17, 0 }
  0x23   : > { %p348_p12 = scmp.lt.s32.totalorder %s672_s23, 143 }
  0x24   : > { %377 = sbr.rel (%p674_p13) target bundleno = 46 (0x2e), region = 85 }
  0x25   : > { %s1041_s23 = smov (!%p348_p12, %s672_s23), 143 }
  0x26   : > { %s673_s24 = sshll.u32 %s1041_s23, 2 }
  0x27   : > { %s354_s29 = scalar_lea.vmem %s1027_s1, %s673_s24 }
  0x29   : > { %v886_v4 = vmov 0.0  }
  0x2a   : > { %378 = vst [vmem:[#allocation2 + $0x10] sm:$0xff] %v886_v4 }
  0x2b   : > { %379 = vst [vmem:[#allocation2] sm:$0xff] %v886_v4 }
  0x2c   : > { %380 = vst [vmem:[#allocation2 + $0x18] sm:$0xff] %v886_v4 }
  0x2d   : > { %381 = vst [vmem:[#allocation2 + $0x8] sm:$0xff] %v886_v4 }
  0x2e PF: > { %v729_v5 = vld [vmem:[%s354_s29 + $0x38] sm:$0xff]  ;;  %v728_v6 = vld [vmem:[%s354_s29 + $0x30] sm:$0xff]  ;;  %v727_v7 = vld [vmem:[%s354_s29 + $0x28] sm:$0xff]  ;;  %p715_p0 = scmp.ne.s32.totalorder %s875_s17, 8 }
  0x2f   : > { %466 = vmatpush.bf16.msra.mxu0 %v729_v5  ;;  %750 = vmatpush.bf16.msra.mxu1 %v729_v5  ;;  %v726_v8 = vld [vmem:[%s354_s29 + $0x20] sm:$0xff]  ;;  %v725_v9 = vld [vmem:[%s354_s29 + $0x18] sm:$0xff]  ;;  %v724_v10 = vld [vmem:[%s354_s29 + $0x10] sm:$0xff] }
  0x30   : > { %v723_v11 = vld [vmem:[%s354_s29 + $0x8] sm:$0xff]  ;;  %v722_v12 = vld [vmem:[%s354_s29] sm:$0xff] }
  0x31   : > { %v720_v13 = vld [vmem:[%s299_s22] sm:$0xff]  ;;  %v721_v14 = vld [vmem:[%s299_s22 + $0x8] sm:$0xff] }
  0x32   : > { %v382_v15 = vld [vmem:[#allocation2 + $0x10] sm:$0xff]  ;;  %v383_v21 = vld [vmem:[#allocation2] sm:$0xff] }
  0x33   : > { %467 = vmatpush.bf16.msra.mxu0 %v728_v6  ;;  %751 = vmatpush.bf16.msra.mxu1 %v728_v6  ;;  %v384_v16 = vld [vmem:[#allocation2 + $0x18] sm:$0xff] }
  0x34   : > { %v385_v22 = vld [vmem:[#allocation2 + $0x8] sm:$0xff] }
  0x37   : > { %468 = vmatpush.bf16.msra.mxu0 %v727_v7  ;;  %752 = vmatpush.bf16.msra.mxu1 %v727_v7 }
  0x3b   : > { %469 = vmatpush.bf16.msra.mxu0 %v726_v8  ;;  %753 = vmatpush.bf16.msra.mxu1 %v726_v8 }
  0x3f   : > { %470 = vmatpush.bf16.msra.mxu0 %v725_v9  ;;  %754 = vmatpush.bf16.msra.mxu1 %v725_v9 }
  0x43   : > { %471 = vmatpush.bf16.msra.mxu0 %v724_v10  ;;  %755 = vmatpush.bf16.msra.mxu1 %v724_v10 }
  0x47   : > { %472 = vmatpush.bf16.msra.mxu0 %v723_v11  ;;  %756 = vmatpush.bf16.msra.mxu1 %v723_v11 }
  0x4b   : > { %473 = vmatpush.bf16.msra.mxu0 %v722_v12  ;;  %757 = vmatpush.bf16.msra.mxu1 %v722_v12 }
  0x4e   : > { %474 = vmatmul.bf16.vlgmr.msra.gmra.mxu0 %v720_v13  ;;  %479 = vmatmul.bf16.vlgmr.msra.gmra.mxu1 %v721_v14 }
  0xcb   : > { %v475_v17 = vpop.f32.mrf.mxu0  ;;  %v480_v18 = vpop.f32.mrf.mxu1 }
  0xcc   : > { %v485_v19 = vadd.f32 %v475_v17, %v382_v15  ;;  %v487_v20 = vadd.f32 %v480_v18, %v384_v16 }
  0xce   : > { %489 = vst [vmem:[#allocation2 + $0x10] sm:$0xff] %v485_v19 }
  0xcf   : > { %491 = vst [vmem:[#allocation2 + $0x18] sm:$0xff] %v487_v20 }
  0xd3   : > { %v477_v23 = vpop.f32.mrf.mxu0  ;;  %v482_v24 = vpop.f32.mrf.mxu1  ;;  %496 = sbr.rel (%p715_p0) target bundleno = 232 (0xe8), region = 89 }
  0xd4   : > { %v486_v25 = vadd.f32 %v477_v23, %v383_v21  ;;  %v488_v26 = vadd.f32 %v482_v24, %v385_v22 }
  0xd6   : > { %490 = vst [vmem:[#allocation2] sm:$0xff] %v486_v25 }
  0xd7   : > { %492 = vst [vmem:[#allocation2 + $0x8] sm:$0xff] %v488_v26 }
  0xd8   : > { %v497_v27 = vld [vmem:[#allocation2 + $0x10] sm:$0xff]  ;;  %v810_v29 = vld [vmem:[#allocation4] ss:$0 sm:$0xff]  ;;  %v499_v31 = vld [vmem:[#allocation2 + $0x18] sm:$0xff] }
  0xd9   : > { %v731_v30 = vld [vmem:[%s1029_s3] sm:$0xff]   ;;  %v748_v35 = vld [vmem:[%s1029_s3 + $0x8] sm:$0xff]   ;;  %v505_v36 = vadd.f32 %v810_v29, %v497_v27  ;;  %v507_v38 = vadd.f32 %v810_v29, %v499_v31 }
  0xda   : > { %v732_v32 = vunpack.c.l.bf16 %v731_v30  ;;  %v733_v33 = vunpack.c.h.bf16 %v731_v30  ;;  %v736_v40 = vunpack.c.l.bf16 %v748_v35  ;;  %v737_v41 = vunpack.c.h.bf16 %v748_v35 }
  0xdc   : > { %v517_v42 = vadd.f32 %v732_v32, %v505_v36  ;;  %v519_v44 = vadd.f32 %v736_v40, %v507_v38 }
  0xdd   : > { %v498_v28 = vld [vmem:[#allocation2] sm:$0xff] }
  0xde   : > { %v500_v34 = vld [vmem:[#allocation2 + $0x8] sm:$0xff]  ;;  %v506_v37 = vadd.f32 %v810_v29, %v498_v28  ;;  %v521_v46 = vmax.f32 %v517_v42, 0.0  ;;  %v523_v48 = vmax.f32 %v519_v44, 0.0 }
  0xdf   : > { %v508_v39 = vadd.f32 %v810_v29, %v500_v34 }
  0xe0   : > { %v518_v43 = vadd.f32 %v733_v33, %v506_v37 }
  0xe1   : > { %v520_v45 = vadd.f32 %v737_v41, %v508_v39 }
  0xe2   : > { %v522_v47 = vmax.f32 %v518_v43, 0.0 }
  0xe3   : > { %v524_v49 = vmax.f32 %v520_v45, 0.0 }
  0xe4   : > { %v741_v50 = vpack.c.bf16 %v522_v47, %v521_v46 }
  0xe5   : > { %v746_v51 = vpack.c.bf16 %v524_v49, %v523_v48 }
  0xe6   : > { %742 = vst [vmem:[%s1030_s4] sm:$0xff] %v741_v50  }
  0xe7   : > { %749 = vst [vmem:[%s1030_s4 + $0x8] sm:$0xff] %v746_v51  }
  0xe8 PF: > { %s15_s19 = sadd.s32 1, %s883_s19   ;;  %s1034_s15 = smov %s871_s16 }
  0xe9   : > { %p12_p1 = scmp.ge.s32.totalorder %s15_s19, 11   ;;  %s1035_s16 = smov %s962_s27 }
  0xea   : > { %s1036_s17 = smov %s879_s18  ;;  %s1037_s18 = smov %s1039_s21 }
  0xeb   :  { %14 = sbr.rel (!%p12_p1) target bundleno = 3 (0x3), region = 132 }
  0xf0   :  { %561 = vsyncpa [#allocation5], 1 }
  0xf1   :  { %563 = vsyncpa [#allocation5 + $0x1], 1 }

// kernel: _lambda_.31
= control target key start
LH: loop header
LB: loop body
LE: loop exit
PB: predicated region body
PF: predicated region fallthrough
CT: control target
= control target key end

     0   :  { %8 = vsyncpa [#allocation5], 0  ;;  %s807_s12 = smov 0   ;;  %s809_s13 = smov 0   ;;  %s915_s0 = inlined_call_operand.vmem [shape: bf16[32,1152], index: 0, kind: input, shape index: {}]   ;;  %s916_s1 = inlined_call_operand.vmem [shape: bf16[1152,128], index: 1, kind: input, shape index: {}]   ;;  %s917_s2 = inlined_call_operand.hbm [shape: f32[1,128], index: 2, kind: input, shape index: {}]   ;;  %s918_s3 = inlined_call_operand.vmem [shape: bf16[32,128], index: 3, kind: output, shape index: {}]  }
   0x1   :  { %s811_s14 = smov 0   ;;  %s813_s15 = smov 0  }
   0x2   :  { %s815_s16 = smov 0  }
   0x3 LB: > { %s572_s17 = sadd.s32 4294967295, %s783_s16   ;;  %s26_s18 = sadd.s32 1, %s779_s15  ;;  %s783_s16 = sphi %s815_s16, %s14_s16   ;;  %s779_s15 = sphi %s813_s15, %s925_s15   ;;  %s775_s14 = sphi %s811_s14, %s924_s14   ;;  %s771_s13 = sphi %s809_s13, %s923_s13   ;;  %s767_s12 = sphi %s807_s12, %s922_s12  }
   0x4   : > { %p27_p0 = scmp.ge.s32.totalorder %s26_s18, 9  ;;  %s42_s19 = sadd.s32 1, %s771_s13 }
   0x5   : > { %p49_p1 = scmp.ne.s32.totalorder %s771_s13, %s767_s12  ;;  %p50_p2 = scmp.eq.s32.totalorder %s783_s16, 0 }
   0x6   : > { %s927_s18 = smov (%p27_p0, %s26_s18), 0  ;;  %p573_p4 = scmp.ge.s32.totalorder %s783_s16, 1 }
   0x7   : > { %p840_p3 = por %p50_p2, %p49_p1  ;;  %s38_s21 = ssub.s32 %s779_s15, %s927_s18 }
   0x8   : > { %p148_p5 = scmp.lt.s32.totalorder %s783_s16, 10  ;;  %p40_p6 = scmp.eq.s32.totalorder %s38_s21, 0 }
   0x9   : > { %p852_p8 = scmp.eq.s32.totalorder %s572_s17, 0  ;;  %s161_s27 = sshll.u32 %s917_s2, 4  ;;  %s162_s27 = int_to_ptr.hbm [resolvable:$true] %s161_s27 }
   0xa   : > { %p848_p7 = pnand %p573_p4, %p148_p5  ;;  %s785_s28 = smov [#allocation4]  }
   0xb   : > { %s857_s24 = scalar_select %p40_p6, %s771_s13, %s42_s19  }
   0xc   : > { %p662_p9 = pneg %p848_p7  ;;  %s163_s29 = sshll.u32 %s785_s28, 4  ;;  %s164_s29 = int_to_ptr.vmem [resolvable:$true] %s163_s29 }
   0xd   : > { %p575_p11 = scmp.ge.s32.totalorder %s783_s16, 9 }
   0xe   : > { %p663_p10 = pnand %p852_p8, %p662_p9 }
   0xf   : > { %170 = sbr.rel (%p575_p11) target bundleno = 28 (0x1c), region = 20 }
  0x10   : > { %665 = dma.hbm_to_vmem [thread:$0]  (!%p663_p10), %s162_s27, 16, %s164_s29, [#allocation5]  }
  0x14   : > { %173 = sbr.rel (!%p840_p3) target bundleno = 28 (0x1c), region = 24  ;;  %s175_s30 = sand.u32 (%p840_p3), 1, %s771_s13  }
  0x15   : > { %s577_s4 = sshll.u32 (%p840_p3), %s779_s15, 2  ;;  %s576_s5 = sshll.u32 (%p840_p3), %s175_s30, 4 }
  0x16   : > { %s182_s8 = scalar_lea.vmem (%p840_p3), %s915_s0, %s577_s4  ;;  %s177_s9 = scalar_lea.vmem (%p840_p3), [#allocation3], %s576_s5 }
  0x17   : > { %v199_v0 = vld [vmem:[%s182_s8] sm:$0xf] (%p840_p3)  ;;  %v201_v1 = vld [vmem:[%s182_s8 + $0x24] sm:$0xf] (%p840_p3)  ;;  %v203_v2 = vld [vmem:[%s182_s8 + $0x48] sm:$0xf] (%p840_p3) }
  0x18   : > { %200 = vst [vmem:[%s177_s9] sm:$0xf] (%p840_p3), %v199_v0  ;;  %v205_v3 = vld [vmem:[%s182_s8 + $0x6c] sm:$0xf] (%p840_p3) }
  0x19   : > { %202 = vst [vmem:[%s177_s9 + $0x4] sm:$0xf] %v201_v1 }
  0x1a   : > { %204 = vst [vmem:[%s177_s9 + $0x8] sm:$0xf] %v203_v2 }
  0x1b   : > { %206 = vst [vmem:[%s177_s9 + $0xc] sm:$0xf] %v205_v3 }
  0x1c PF: > { %253 = sbr.rel (%p848_p7) target bundleno = 230 (0xe6), region = 69  ;;  %s256_s10 = sand.u32 (!%p848_p7), 1, %s767_s12  }
  0x1d   : > { %s877_s11 = sshll.u32 (!%p848_p7), %s256_s10, 4 }
  0x1e   : > { %s258_s17 = scalar_lea.vmem (!%p848_p7), [#allocation3], %s877_s11 }
  0x21   : > { %762 = dma.done.wait (%p852_p8), [#allocation5], 16  }
  0x22   : > { %764 = vsyncadd (%p852_p8), [#allocation5], 4294967280  ;;  %s581_s19 = sshll.u32 %s775_s14, 4  ;;  %p583_p13 = scmp.ne.s32.totalorder %s775_s14, 0 }
  0x23   : > { %p297_p12 = scmp.lt.s32.totalorder %s581_s19, 143 }
  0x24   : > { %317 = sbr.rel (%p583_p13) target bundleno = 46 (0x2e), region = 81 }
  0x25   : > { %s929_s19 = smov (!%p297_p12, %s581_s19), 143 }
  0x26   : > { %s582_s20 = sshll.u32 %s929_s19, 2 }
  0x27   : > { %s303_s25 = scalar_lea.vmem %s916_s1, %s582_s20 }
  0x29   : > { %v786_v4 = vmov 0.0  }
  0x2a   : > { %318 = vst [vmem:[#allocation2 + $0x10] sm:$0xff] %v786_v4 }
  0x2b   : > { %319 = vst [vmem:[#allocation2] sm:$0xff] %v786_v4 }
  0x2c   : > { %320 = vst [vmem:[#allocation2 + $0x18] sm:$0xff] %v786_v4 }
  0x2d   : > { %321 = vst [vmem:[#allocation2 + $0x8] sm:$0xff] %v786_v4 }
  0x2e PF: > { %v638_v5 = vld [vmem:[%s303_s25 + $0x38] sm:$0xff]  ;;  %v637_v6 = vld [vmem:[%s303_s25 + $0x30] sm:$0xff]  ;;  %v636_v7 = vld [vmem:[%s303_s25 + $0x28] sm:$0xff]  ;;  %p624_p0 = scmp.ne.s32.totalorder %s775_s14, 8 }
  0x2f   : > { %406 = vmatpush.bf16.msra.mxu0 %v638_v5  ;;  %650 = vmatpush.bf16.msra.mxu1 %v638_v5  ;;  %v635_v8 = vld [vmem:[%s303_s25 + $0x20] sm:$0xff]  ;;  %v634_v9 = vld [vmem:[%s303_s25 + $0x18] sm:$0xff]  ;;  %v633_v10 = vld [vmem:[%s303_s25 + $0x10] sm:$0xff] }
  0x30   : > { %v632_v11 = vld [vmem:[%s303_s25 + $0x8] sm:$0xff]  ;;  %v631_v12 = vld [vmem:[%s303_s25] sm:$0xff] }
  0x31   : > { %v629_v13 = vld [vmem:[%s258_s17] sm:$0xff]  ;;  %v630_v14 = vld [vmem:[%s258_s17 + $0x8] sm:$0xff] }
  0x32   : > { %v322_v15 = vld [vmem:[#allocation2 + $0x10] sm:$0xff]  ;;  %v323_v21 = vld [vmem:[#allocation2] sm:$0xff] }
  0x33   : > { %407 = vmatpush.bf16.msra.mxu0 %v637_v6  ;;  %651 = vmatpush.bf16.msra.mxu1 %v637_v6  ;;  %v324_v16 = vld [vmem:[#allocation2 + $0x18] sm:$0xff] }
  0x34   : > { %v325_v22 = vld [vmem:[#allocation2 + $0x8] sm:$0xff] }
  0x37   : > { %408 = vmatpush.bf16.msra.mxu0 %v636_v7  ;;  %652 = vmatpush.bf16.msra.mxu1 %v636_v7 }
  0x3b   : > { %409 = vmatpush.bf16.msra.mxu0 %v635_v8  ;;  %653 = vmatpush.bf16.msra.mxu1 %v635_v8 }
  0x3f   : > { %410 = vmatpush.bf16.msra.mxu0 %v634_v9  ;;  %654 = vmatpush.bf16.msra.mxu1 %v634_v9 }
  0x43   : > { %411 = vmatpush.bf16.msra.mxu0 %v633_v10  ;;  %655 = vmatpush.bf16.msra.mxu1 %v633_v10 }
  0x47   : > { %412 = vmatpush.bf16.msra.mxu0 %v632_v11  ;;  %656 = vmatpush.bf16.msra.mxu1 %v632_v11 }
  0x4b   : > { %413 = vmatpush.bf16.msra.mxu0 %v631_v12  ;;  %657 = vmatpush.bf16.msra.mxu1 %v631_v12 }
  0x4e   : > { %414 = vmatmul.bf16.vlgmr.msra.gmra.mxu0 %v629_v13  ;;  %419 = vmatmul.bf16.vlgmr.msra.gmra.mxu1 %v630_v14 }
  0xcb   : > { %v415_v17 = vpop.f32.mrf.mxu0  ;;  %v420_v18 = vpop.f32.mrf.mxu1 }
  0xcc   : > { %v425_v19 = vadd.f32 %v415_v17, %v322_v15  ;;  %v427_v20 = vadd.f32 %v420_v18, %v324_v16 }
  0xce   : > { %429 = vst [vmem:[#allocation2 + $0x10] sm:$0xff] %v425_v19 }
  0xcf   : > { %431 = vst [vmem:[#allocation2 + $0x18] sm:$0xff] %v427_v20 }
  0xd3   : > { %v417_v23 = vpop.f32.mrf.mxu0  ;;  %v422_v24 = vpop.f32.mrf.mxu1  ;;  %436 = sbr.rel (%p624_p0) target bundleno = 230 (0xe6), region = 85 }
  0xd4   : > { %v426_v25 = vadd.f32 %v417_v23, %v323_v21  ;;  %v428_v26 = vadd.f32 %v422_v24, %v325_v22 }
  0xd6   : > { %430 = vst [vmem:[#allocation2] sm:$0xff] %v426_v25 }
  0xd7   : > { %432 = vst [vmem:[#allocation2 + $0x8] sm:$0xff] %v428_v26 }
  0xd8   : > { %v437_v27 = vld [vmem:[#allocation2 + $0x10] sm:$0xff]  ;;  %v710_v29 = vld [vmem:[#allocation4] ss:$0 sm:$0xff]  ;;  %v439_v30 = vld [vmem:[#allocation2 + $0x18] sm:$0xff] }
  0xd9   : > { %v445_v32 = vadd.f32 %v710_v29, %v437_v27  ;;  %v447_v34 = vadd.f32 %v710_v29, %v439_v30 }
  0xdb   : > { %v449_v36 = vmax.f32 %v445_v32, 0.0  ;;  %v451_v38 = vmax.f32 %v447_v34, 0.0 }
  0xdd   : > { %v438_v28 = vld [vmem:[#allocation2] sm:$0xff] }
  0xde   : > { %v440_v31 = vld [vmem:[#allocation2 + $0x8] sm:$0xff]  ;;  %v446_v33 = vadd.f32 %v710_v29, %v438_v28 }
  0xdf   : > { %v448_v35 = vadd.f32 %v710_v29, %v440_v31 }
  0xe0   : > { %v450_v37 = vmax.f32 %v446_v33, 0.0 }
  0xe1   : > { %v452_v39 = vmax.f32 %v448_v35, 0.0 }
  0xe2   : > { %v642_v40 = vpack.c.bf16 %v450_v37, %v449_v36 }
  0xe3   : > { %v647_v41 = vpack.c.bf16 %v452_v39, %v451_v38 }
  0xe4   : > { %643 = vst [vmem:[%s918_s3] sm:$0xff] %v642_v40  }
  0xe5   : > { %649 = vst [vmem:[%s918_s3 + $0x8] sm:$0xff] %v647_v41  }
  0xe6 PF: > { %s14_s16 = sadd.s32 1, %s783_s16   ;;  %s922_s12 = smov %s771_s13 }
  0xe7   : > { %p11_p1 = scmp.ge.s32.totalorder %s14_s16, 11   ;;  %s923_s13 = smov %s857_s24 }
  0xe8   : > { %s924_s14 = smov %s779_s15  ;;  %s925_s15 = smov %s927_s18 }
  0xe9   :  { %13 = sbr.rel (!%p11_p1) target bundleno = 3 (0x3), region = 125 }
  0xee   :  { %489 = vsyncpa [#allocation5], 1 }
  0xef   :  { %491 = vsyncpa [#allocation5 + $0x1], 1 }

// kernel: _lambda_.32
= control target key start
LH: loop header
LB: loop body
LE: loop exit
PB: predicated region body
PF: predicated region fallthrough
CT: control target
= control target key end

     0   :  { %s857_s15 = smov 0   ;;  %s859_s16 = smov 0   ;;  %s956_s0 = inlined_call_operand.vmem [shape: bf16[32,1152], index: 0, kind: input, shape index: {}]   ;;  %s957_s1 = inlined_call_operand.vmem [shape: bf16[1152,128], index: 1, kind: input, shape index: {}]   ;;  %s958_s2 = inlined_call_operand.vmem [shape: f32[1,128], index: 2, kind: input, shape index: {}]   ;;  %s959_s3 = inlined_call_operand.vmem [shape: bf16[32,128], index: 3, kind: input, shape index: {}]   ;;  %s960_s4 = inlined_call_operand.vmem [shape: bf16[32,128], index: 4, kind: output, shape index: {}]  }
   0x1   :  { %s861_s17 = smov 0   ;;  %s863_s18 = smov 0  }
   0x2   :  { %s865_s19 = smov 0  }
   0x3 LB: > { %s26_s20 = sadd.s32 1, %s825_s18  ;;  %p49_p1 = scmp.ne.s32.totalorder %s817_s16, %s813_s15  ;;  %s829_s19 = sphi %s865_s19, %s14_s19   ;;  %s825_s18 = sphi %s863_s18, %s964_s18   ;;  %s821_s17 = sphi %s861_s17, %s963_s17   ;;  %s817_s16 = sphi %s859_s16, %s962_s16   ;;  %s813_s15 = sphi %s857_s15, %s961_s15  }
   0x4   : > { %p27_p0 = scmp.ge.s32.totalorder %s26_s20, 9  ;;  %p50_p2 = scmp.eq.s32.totalorder %s829_s19, 0 }
   0x5   : > { %s42_s22 = sadd.s32 1, %s817_s16  ;;  %p658_p5 = scmp.ge.s32.totalorder %s829_s19, 9 }
   0x6   : > { %s966_s20 = smov (%p27_p0, %s26_s20), 0  ;;  %p51_p3 = por %p50_p2, %p49_p1 }
   0x7   : > { %s38_s21 = ssub.s32 %s825_s18, %s966_s20  ;;  %203 = sbr.rel (%p658_p5) target bundleno = 20 (0x14), region = 24 }
   0x8   : > { %p40_p4 = scmp.eq.s32.totalorder %s38_s21, 0 }
   0xa   : > { %s892_s23 = scalar_select %p40_p4, %s817_s16, %s42_s22  }
   0xc   : > { %206 = sbr.rel (!%p51_p3) target bundleno = 20 (0x14), region = 28  ;;  %s208_s24 = sand.u32 (%p51_p3), 1, %s817_s16  }
   0xd   : > { %s660_s25 = sshll.u32 (%p51_p3), %s825_s18, 2  ;;  %s659_s26 = sshll.u32 (%p51_p3), %s208_s24, 4 }
   0xe   : > { %s215_s29 = scalar_lea.vmem (%p51_p3), %s956_s0, %s660_s25  ;;  %s210_s30 = scalar_lea.vmem (%p51_p3), [#allocation3], %s659_s26 }
   0xf   : > { %v232_v0 = vld [vmem:[%s215_s29] sm:$0xf] (%p51_p3)  ;;  %v234_v1 = vld [vmem:[%s215_s29 + $0x24] sm:$0xf] (%p51_p3)  ;;  %v236_v2 = vld [vmem:[%s215_s29 + $0x48] sm:$0xf] (%p51_p3) }
  0x10   : > { %233 = vst [vmem:[%s210_s30] sm:$0xf] (%p51_p3), %v232_v0  ;;  %v238_v3 = vld [vmem:[%s215_s29 + $0x6c] sm:$0xf] (%p51_p3) }
  0x11   : > { %235 = vst [vmem:[%s210_s30 + $0x4] sm:$0xf] %v234_v1 }
  0x12   : > { %237 = vst [vmem:[%s210_s30 + $0x8] sm:$0xf] %v236_v2 }
  0x13   : > { %239 = vst [vmem:[%s210_s30 + $0xc] sm:$0xf] %v238_v3 }
  0x14 PF: > { %p661_p6 = scmp.ge.s32.totalorder %s829_s19, 1  ;;  %p282_p7 = scmp.lt.s32.totalorder %s829_s19, 10 }
  0x16   : > { %p283_p8 = pnand %p661_p6, %p282_p7 }
  0x17   : > { %s289_s5 = sand.u32 (!%p283_p8), 1, %s813_s15   ;;  %s663_s6 = sshll.u32 (!%p283_p8), %s821_s17, 4 }
  0x18   : > { %286 = sbr.rel (%p283_p8) target bundleno = 225 (0xe1), region = 73  ;;  %s904_s7 = sshll.u32 (!%p283_p8), %s289_s5, 4 }
  0x19   : > { %p338_p9 = scmp.lt.s32.totalorder (!%p283_p8), %s663_s6, 143  ;;  %s291_s12 = scalar_lea.vmem (!%p283_p8), [#allocation3], %s904_s7 }
  0x1a   : > { %p665_p10 = scmp.ne.s32.totalorder (!%p283_p8), %s821_s17, 0 }
  0x1d   : > { %s968_s6 = smov (!%p338_p9, %s663_s6), 143  ;;  %370 = sbr.rel (%p665_p10) target bundleno = 39 (0x27), region = 81 }
  0x1e   : > { %s664_s8 = sshll.u32 %s968_s6, 2 }
  0x1f   : > { %s909_s11 = scalar_lea.vmem %s957_s1, %s664_s8 }
  0x22   : > { %v831_v4 = vmov 0.0  }
  0x23   : > { %371 = vst [vmem:[#allocation2 + $0x10] sm:$0xff] %v831_v4 }
  0x24   : > { %372 = vst [vmem:[#allocation2] sm:$0xff] %v831_v4 }
  0x25   : > { %373 = vst [vmem:[#allocation2 + $0x18] sm:$0xff] %v831_v4 }
  0x26   : > { %374 = vst [vmem:[#allocation2 + $0x8] sm:$0xff] %v831_v4 }
  0x27 PF: > { %v720_v5 = vld [vmem:[%s909_s11 + $0x38] sm:$0xff]  ;;  %v719_v6 = vld [vmem:[%s909_s11 + $0x30] sm:$0xff]  ;;  %v718_v7 = vld [vmem:[%s909_s11 + $0x28] sm:$0xff]  ;;  %p706_p11 = scmp.ne.s32.totalorder %s821_s17, 8 }
  0x28   : > { %459 = vmatpush.bf16.msra.mxu0 %v720_v5  ;;  %741 = vmatpush.bf16.msra.mxu1 %v720_v5  ;;  %v717_v8 = vld [vmem:[%s909_s11 + $0x20] sm:$0xff]  ;;  %v716_v9 = vld [vmem:[%s909_s11 + $0x18] sm:$0xff]  ;;  %v715_v10 = vld [vmem:[%s909_s11 + $0x10] sm:$0xff] }
  0x29   : > { %v714_v11 = vld [vmem:[%s909_s11 + $0x8] sm:$0xff]  ;;  %v713_v12 = vld [vmem:[%s909_s11] sm:$0xff] }
  0x2a   : > { %v711_v13 = vld [vmem:[%s291_s12] sm:$0xff]  ;;  %v712_v14 = vld [vmem:[%s291_s12 + $0x8] sm:$0xff] }
  0x2b   : > { %v375_v15 = vld [vmem:[#allocation2 + $0x10] sm:$0xff]  ;;  %v376_v21 = vld [vmem:[#allocation2] sm:$0xff] }
  0x2c   : > { %460 = vmatpush.bf16.msra.mxu0 %v719_v6  ;;  %742 = vmatpush.bf16.msra.mxu1 %v719_v6  ;;  %v377_v16 = vld [vmem:[#allocation2 + $0x18] sm:$0xff] }
  0x2d   : > { %v378_v22 = vld [vmem:[#allocation2 + $0x8] sm:$0xff] }
  0x30   : > { %461 = vmatpush.bf16.msra.mxu0 %v718_v7  ;;  %743 = vmatpush.bf16.msra.mxu1 %v718_v7 }
  0x34   : > { %462 = vmatpush.bf16.msra.mxu0 %v717_v8  ;;  %744 = vmatpush.bf16.msra.mxu1 %v717_v8 }
  0x38   : > { %463 = vmatpush.bf16.msra.mxu0 %v716_v9  ;;  %745 = vmatpush.bf16.msra.mxu1 %v716_v9 }
  0x3c   : > { %464 = vmatpush.bf16.msra.mxu0 %v715_v10  ;;  %746 = vmatpush.bf16.msra.mxu1 %v715_v10 }
  0x40   : > { %465 = vmatpush.bf16.msra.mxu0 %v714_v11  ;;  %747 = vmatpush.bf16.msra.mxu1 %v714_v11 }
  0x44   : > { %466 = vmatpush.bf16.msra.mxu0 %v713_v12  ;;  %748 = vmatpush.bf16.msra.mxu1 %v713_v12 }
  0x47   : > { %467 = vmatmul.bf16.vlgmr.msra.gmra.mxu0 %v711_v13  ;;  %472 = vmatmul.bf16.vlgmr.msra.gmra.mxu1 %v712_v14 }
  0xc4   : > { %v468_v17 = vpop.f32.mrf.mxu0  ;;  %v473_v18 = vpop.f32.mrf.mxu1 }
  0xc5   : > { %v478_v19 = vadd.f32 %v468_v17, %v375_v15  ;;  %v480_v20 = vadd.f32 %v473_v18, %v377_v16 }
  0xc7   : > { %482 = vst [vmem:[#allocation2 + $0x10] sm:$0xff] %v478_v19 }
  0xc8   : > { %484 = vst [vmem:[#allocation2 + $0x18] sm:$0xff] %v480_v20 }
  0xcc   : > { %v470_v23 = vpop.f32.mrf.mxu0  ;;  %v475_v24 = vpop.f32.mrf.mxu1  ;;  %489 = sbr.rel (%p706_p11) target bundleno = 225 (0xe1), region = 85 }
  0xcd   : > { %v479_v25 = vadd.f32 %v470_v23, %v376_v21  ;;  %v481_v26 = vadd.f32 %v475_v24, %v378_v22 }
  0xcf   : > { %483 = vst [vmem:[#allocation2] sm:$0xff] %v479_v25 }
  0xd0   : > { %485 = vst [vmem:[#allocation2 + $0x8] sm:$0xff] %v481_v26 }
  0xd1   : > { %v490_v27 = vld [vmem:[#allocation2 + $0x10] sm:$0xff]  ;;  %v790_v29 = vld [vmem:[%s958_s2] ss:$0 sm:$0xff]  ;;  %v492_v31 = vld [vmem:[#allocation2 + $0x18] sm:$0xff] }
  0xd2   : > { %v722_v30 = vld [vmem:[%s959_s3] sm:$0xff]   ;;  %v739_v35 = vld [vmem:[%s959_s3 + $0x8] sm:$0xff]   ;;  %v498_v36 = vadd.f32 %v790_v29, %v490_v27  ;;  %v500_v38 = vadd.f32 %v790_v29, %v492_v31 }
  0xd3   : > { %v723_v32 = vunpack.c.l.bf16 %v722_v30  ;;  %v724_v33 = vunpack.c.h.bf16 %v722_v30  ;;  %v727_v40 = vunpack.c.l.bf16 %v739_v35  ;;  %v728_v41 = vunpack.c.h.bf16 %v739_v35 }
  0xd5   : > { %v510_v42 = vadd.f32 %v723_v32, %v498_v36  ;;  %v512_v44 = vadd.f32 %v727_v40, %v500_v38 }
  0xd6   : > { %v491_v28 = vld [vmem:[#allocation2] sm:$0xff] }
  0xd7   : > { %v493_v34 = vld [vmem:[#allocation2 + $0x8] sm:$0xff]  ;;  %v499_v37 = vadd.f32 %v790_v29, %v491_v28  ;;  %v514_v46 = vmax.f32 %v510_v42, 0.0  ;;  %v516_v48 = vmax.f32 %v512_v44, 0.0 }
  0xd8   : > { %v501_v39 = vadd.f32 %v790_v29, %v493_v34 }
  0xd9   : > { %v511_v43 = vadd.f32 %v724_v33, %v499_v37 }
  0xda   : > { %v513_v45 = vadd.f32 %v728_v41, %v501_v39 }
  0xdb   : > { %v515_v47 = vmax.f32 %v511_v43, 0.0 }
  0xdc   : > { %v517_v49 = vmax.f32 %v513_v45, 0.0 }
  0xdd   : > { %v732_v50 = vpack.c.bf16 %v515_v47, %v514_v46 }
  0xde   : > { %v737_v51 = vpack.c.bf16 %v517_v49, %v516_v48 }
  0xdf   : > { %733 = vst [vmem:[%s960_s4] sm:$0xff] %v732_v50  }
  0xe0   : > { %740 = vst [vmem:[%s960_s4 + $0x8] sm:$0xff] %v737_v51  }
  0xe1 PF: > { %s14_s19 = sadd.s32 1, %s829_s19   ;;  %s961_s15 = smov %s817_s16 }
  0xe2   : > { %p11_p12 = scmp.ge.s32.totalorder %s14_s19, 11   ;;  %s962_s16 = smov %s892_s23 }
  0xe3   : > { %s963_s17 = smov %s825_s18  ;;  %s964_s18 = smov %s966_s20 }
  0xe4   :  { %13 = sbr.rel (!%p11_p12) target bundleno = 3 (0x3), region = 129 }

// kernel: _lambda_.33
= control target key start
LH: loop header
LB: loop body
LE: loop exit
PB: predicated region body
PF: predicated region fallthrough
CT: control target
= control target key end

     0   :  { %s708_s12 = smov 0   ;;  %s710_s13 = smov 0   ;;  %s791_s0 = inlined_call_operand.vmem [shape: bf16[8,1152], index: 0, kind: input, shape index: {}]   ;;  %s792_s1 = inlined_call_operand.vmem [shape: bf16[1152,256], index: 1, kind: input, shape index: {}]   ;;  %s793_s2 = inlined_call_operand.vmem [shape: f32[1,256], index: 2, kind: input, shape index: {}]   ;;  %s794_s3 = inlined_call_operand.vmem [shape: bf16[8,256], index: 3, kind: output, shape index: {}]  }
   0x1   :  { %s712_s14 = smov 0  }
   0x2 LB: > { %s25_s15 = sadd.s32 1, %s681_s13  ;;  %p546_p0 = scmp.ge.s32.totalorder %s685_s14, 1  ;;  %s685_s14 = sphi %s712_s14, %s13_s14   ;;  %s681_s13 = sphi %s710_s13, %s796_s13   ;;  %s677_s12 = sphi %s708_s12, %s795_s12  }
   0x3   : > { %p26_p1 = scmp.ge.s32.totalorder %s25_s15, 9  ;;  %p192_p2 = scmp.lt.s32.totalorder %s685_s14, 10 }
   0x5   : > { %s798_s15 = smov (%p26_p1, %s25_s15), 0  ;;  %p193_p3 = pnand %p546_p0, %p192_p2 }
   0x6   : > { %p239_p4 = scmp.lt.s32.totalorder (!%p193_p3), %s677_s12, 8  ;;  %s548_s16 = sshll.u32 (!%p193_p3), %s677_s12, 4 }
   0x7   : > { %196 = sbr.rel (%p193_p3) target bundleno = 201 (0xc9), region = 32  ;;  %p247_p5 = scmp.lt.s32.totalorder (!%p193_p3), %s548_s16, 143 }
   0x8   : > { %p551_p6 = scmp.ne.s32.totalorder (!%p193_p3), %s677_s12, 0 }
   0xc   : > { %s240_s17 = scalar_select %p239_p4, %s677_s12, 8 }
   0xd   : > { %s800_s16 = smov (!%p247_p5, %s548_s16), 143  ;;  %275 = sbr.rel (%p551_p6) target bundleno = 21 (0x15), region = 36 }
   0xe   : > { %s547_s18 = sshll.u32 %s240_s17, 2  ;;  %s621_s22 = sshll.u32 %s800_s16, 3 }
   0xf   : > { %s734_s21 = scalar_lea.vmem %s791_s0, %s547_s18  ;;  %s739_s25 = scalar_lea.vmem %s792_s1, %s621_s22 }
  0x12   : > { %v687_v0 = vmov 0.0  }
  0x13   : > { %276 = vst [vmem:[#allocation2] sm:$0xff] %v687_v0 }
  0x14   : > { %277 = vst [vmem:[#allocation2 + $0x8] sm:$0xff] %v687_v0 }
  0x15 PF: > { %v610_v1 = vld [vmem:[%s739_s25 + $0x70] sm:$0xf]  ;;  %v637_v2 = vld [vmem:[%s739_s25 + $0x74] sm:$0xf0]  ;;  %v636_v3 = vld [vmem:[%s739_s25 + $0x74] sm:$0xf] }
  0x16   : > { %v611_v4 = vor.u32 %v637_v2, %v610_v1  ;;  %v612_v5 = vld [vmem:[%s739_s25 + $0x78] sm:$0xf0]  ;;  %v602_v6 = vld [vmem:[%s739_s25 + $0x60] sm:$0xf]  ;;  %v635_v7 = vld [vmem:[%s739_s25 + $0x64] sm:$0xf0] }
  0x17   : > { %v615_v8 = vor.u32 %v636_v3, %v612_v5  ;;  %v634_v9 = vld [vmem:[%s739_s25 + $0x64] sm:$0xf]  ;;  %v604_v10 = vld [vmem:[%s739_s25 + $0x68] sm:$0xf0]  ;;  %v603_v11 = vor.u32 %v635_v7, %v602_v6  ;;  %v594_v13 = vld [vmem:[%s739_s25 + $0x50] sm:$0xf] }
  0x18   : > { %377 = vmatpush.bf16.msra.mxu0 %v611_v4  ;;  %v607_v12 = vor.u32 %v634_v9, %v604_v10  ;;  %v633_v14 = vld [vmem:[%s739_s25 + $0x54] sm:$0xf0]  ;;  %v632_v15 = vld [vmem:[%s739_s25 + $0x54] sm:$0xf]  ;;  %v596_v16 = vld [vmem:[%s739_s25 + $0x58] sm:$0xf0] }
  0x19   : > { %390 = vmatpush.bf16.msra.mxu1 %v615_v8  ;;  %v595_v17 = vor.u32 %v633_v14, %v594_v13  ;;  %v599_v18 = vor.u32 %v632_v15, %v596_v16  ;;  %v586_v19 = vld [vmem:[%s739_s25 + $0x40] sm:$0xf]  ;;  %v631_v20 = vld [vmem:[%s739_s25 + $0x44] sm:$0xf0]  ;;  %v630_v21 = vld [vmem:[%s739_s25 + $0x44] sm:$0xf] }
  0x1a   : > { %v588_v22 = vld [vmem:[%s739_s25 + $0x48] sm:$0xf0]  ;;  %v587_v23 = vor.u32 %v631_v20, %v586_v19  ;;  %v578_v25 = vld [vmem:[%s739_s25 + $0x30] sm:$0xf]  ;;  %v629_v26 = vld [vmem:[%s739_s25 + $0x34] sm:$0xf0] }
  0x1b   : > { %v591_v24 = vor.u32 %v630_v21, %v588_v22  ;;  %v628_v27 = vld [vmem:[%s739_s25 + $0x34] sm:$0xf]  ;;  %v580_v28 = vld [vmem:[%s739_s25 + $0x38] sm:$0xf0]  ;;  %v579_v29 = vor.u32 %v629_v26, %v578_v25  ;;  %v570_v31 = vld [vmem:[%s739_s25 + $0x20] sm:$0xf] }
  0x1c   : > { %378 = vmatpush.bf16.msra.mxu0 %v603_v11  ;;  %v583_v30 = vor.u32 %v628_v27, %v580_v28  ;;  %v627_v32 = vld [vmem:[%s739_s25 + $0x24] sm:$0xf0]  ;;  %v626_v33 = vld [vmem:[%s739_s25 + $0x24] sm:$0xf]  ;;  %v572_v34 = vld [vmem:[%s739_s25 + $0x28] sm:$0xf0] }
  0x1d   : > { %391 = vmatpush.bf16.msra.mxu1 %v607_v12  ;;  %v571_v35 = vor.u32 %v627_v32, %v570_v31  ;;  %v575_v36 = vor.u32 %v626_v33, %v572_v34  ;;  %v562_v37 = vld [vmem:[%s739_s25 + $0x10] sm:$0xf]  ;;  %v625_v38 = vld [vmem:[%s739_s25 + $0x14] sm:$0xf0]  ;;  %v624_v39 = vld [vmem:[%s739_s25 + $0x14] sm:$0xf] }
  0x1e   : > { %v564_v40 = vld [vmem:[%s739_s25 + $0x18] sm:$0xf0]  ;;  %v563_v41 = vor.u32 %v625_v38, %v562_v37  ;;  %v554_v43 = vld [vmem:[%s739_s25] sm:$0xf]  ;;  %v623_v44 = vld [vmem:[%s739_s25 + $0x4] sm:$0xf0] }
  0x1f   : > { %v567_v42 = vor.u32 %v624_v39, %v564_v40  ;;  %v622_v45 = vld [vmem:[%s739_s25 + $0x4] sm:$0xf]  ;;  %v556_v46 = vld [vmem:[%s739_s25 + $0x8] sm:$0xf0]  ;;  %v555_v47 = vor.u32 %v623_v44, %v554_v43  ;;  %v280_v49 = vld [vmem:[%s734_s21] sm:$0xf] }
  0x20   : > { %379 = vmatpush.bf16.msra.mxu0 %v595_v17  ;;  %v559_v48 = vor.u32 %v622_v45, %v556_v46  ;;  %v278_v50 = vld [vmem:[#allocation2] sm:$0xff]  ;;  %v279_v51 = vld [vmem:[#allocation2 + $0x8] sm:$0xff]  ;;  %p616_p7 = scmp.ne.s32.totalorder %s677_s12, 8 }
  0x21   : > { %392 = vmatpush.bf16.msra.mxu1 %v599_v18 }
  0x24   : > { %380 = vmatpush.bf16.msra.mxu0 %v587_v23 }
  0x25   : > { %393 = vmatpush.bf16.msra.mxu1 %v591_v24 }
  0x28   : > { %381 = vmatpush.bf16.msra.mxu0 %v579_v29 }
  0x29   : > { %394 = vmatpush.bf16.msra.mxu1 %v583_v30 }
  0x2c   : > { %382 = vmatpush.bf16.msra.mxu0 %v571_v35 }
  0x2d   : > { %395 = vmatpush.bf16.msra.mxu1 %v575_v36 }
  0x30   : > { %383 = vmatpush.bf16.msra.mxu0 %v563_v41 }
  0x31   : > { %396 = vmatpush.bf16.msra.mxu1 %v567_v42 }
  0x34   : > { %384 = vmatpush.bf16.msra.mxu0 %v555_v47 }
  0x35   : > { %397 = vmatpush.bf16.msra.mxu1 %v559_v48 }
  0x37   : > { %385 = vmatmul.bf16.vlgmr.msra.gmra.mxu0 %v280_v49 }
  0x38   : > { %398 = vmatmul.bf16.vlgmr.msra.gmra.mxu1 %v280_v49 }
  0xb4   : > { %v386_v52 = vpop.f32.mrf.mxu0 }
  0xb5   : > { %v403_v53 = vadd.f32 %v386_v52, %v278_v50  ;;  %v399_v54 = vpop.f32.mrf.mxu1 }
  0xb6   : > { %v404_v55 = vadd.f32 %v399_v54, %v279_v51 }
  0xb7   : > { %405 = vst [vmem:[#allocation2] sm:$0xff] %v403_v53 }
  0xb8   : > { %406 = vst [vmem:[#allocation2 + $0x8] sm:$0xff] %v404_v55 }
  0xb9   : > { %410 = sbr.rel (%p616_p7) target bundleno = 201 (0xc9), region = 40 }
  0xbc   : > { %v388_v56 = vpop.f32.mrf.mxu0 }
  0xbd   : > { %v401_v57 = vpop.f32.mrf.mxu1 }
  0xbe   : > { %v411_v58 = vld [vmem:[#allocation2] sm:$0xff] }
  0xbf   : > { %v412_v59 = vld [vmem:[#allocation2 + $0x8] sm:$0xff]  ;;  %v413_v60 = vld [vmem:[%s793_s2] sm:$0x3] }
  0xc0   : > { %v415_v61 = vperm.slane %v413_v60, 0  ;;  %v416_v62 = vperm.slane %v413_v60, 1 }
  0xc2   : > { %v419_v63 = vadd.f32 %v415_v61, %v411_v58  ;;  %v420_v0 = vadd.f32 %v416_v62, %v412_v59 }
  0xc4   : > { %v421_v1 = vmax.f32 %v419_v63, 0.0  ;;  %v422_v2 = vmax.f32 %v420_v0, 0.0 }
  0xc6   : > { %v423_v3 = vpack.c.bf16 %v422_v2, %v421_v1 }
  0xc8   : > { %424 = vst [vmem:[%s794_s3] sm:$0xff] %v423_v3 }
  0xc9 PF: > { %s13_s14 = sadd.s32 1, %s685_s14   ;;  %s795_s12 = smov %s681_s13 }
  0xca   : > { %p10_p8 = scmp.ge.s32.totalorder %s13_s14, 11   ;;  %s796_s13 = smov %s798_s15 }
  0xcc   :  { %12 = sbr.rel (!%p10_p8) target bundleno = 2 (0x2), region = 76 }

// kernel: _lambda_.34
= control target key start
LH: loop header
LB: loop body
LE: loop exit
PB: predicated region body
PF: predicated region fallthrough
CT: control target
= control target key end

     0   :  { %s373_s1 = inlined_call_operand.vmem [shape: bf16[128,256], index: 1, kind: input, shape index: {}]   ;;  %s374_s0 = inlined_call_operand.vmem [shape: bf16[8,128], index: 0, kind: input, shape index: {}]   ;;  %s375_s2 = inlined_call_operand.vmem [shape: f32[1,256], index: 2, kind: input, shape index: {}]   ;;  %s376_s3 = inlined_call_operand.vmem [shape: bf16[8,256], index: 3, kind: output, shape index: {}]  }
   0x1   :  { %v226_v0 = vld [vmem:[%s373_s1 + $0x70] sm:$0xf]  ;;  %v247_v1 = vld [vmem:[%s373_s1 + $0x74] sm:$0xf0]  ;;  %v246_v2 = vld [vmem:[%s373_s1 + $0x74] sm:$0xf] }
   0x2   :  { %v227_v3 = vor.u32 %v247_v1, %v226_v0  ;;  %v228_v4 = vld [vmem:[%s373_s1 + $0x78] sm:$0xf0]  ;;  %v218_v5 = vld [vmem:[%s373_s1 + $0x60] sm:$0xf]  ;;  %v245_v6 = vld [vmem:[%s373_s1 + $0x64] sm:$0xf0] }
   0x3   :  { %v231_v7 = vor.u32 %v246_v2, %v228_v4  ;;  %v244_v8 = vld [vmem:[%s373_s1 + $0x64] sm:$0xf]  ;;  %v220_v9 = vld [vmem:[%s373_s1 + $0x68] sm:$0xf0]  ;;  %v219_v10 = vor.u32 %v245_v6, %v218_v5  ;;  %v210_v12 = vld [vmem:[%s373_s1 + $0x50] sm:$0xf] }
   0x4   :  { %119 = vmatpush.bf16.msra.mxu0 %v227_v3  ;;  %v223_v11 = vor.u32 %v244_v8, %v220_v9  ;;  %v243_v13 = vld [vmem:[%s373_s1 + $0x54] sm:$0xf0]  ;;  %v242_v14 = vld [vmem:[%s373_s1 + $0x54] sm:$0xf]  ;;  %v212_v15 = vld [vmem:[%s373_s1 + $0x58] sm:$0xf0] }
   0x5   :  { %132 = vmatpush.bf16.msra.mxu1 %v231_v7  ;;  %v211_v16 = vor.u32 %v243_v13, %v210_v12  ;;  %v215_v17 = vor.u32 %v242_v14, %v212_v15  ;;  %v202_v18 = vld [vmem:[%s373_s1 + $0x40] sm:$0xf]  ;;  %v241_v19 = vld [vmem:[%s373_s1 + $0x44] sm:$0xf0]  ;;  %v240_v20 = vld [vmem:[%s373_s1 + $0x44] sm:$0xf] }
   0x6   :  { %v204_v21 = vld [vmem:[%s373_s1 + $0x48] sm:$0xf0]  ;;  %v203_v22 = vor.u32 %v241_v19, %v202_v18  ;;  %v194_v24 = vld [vmem:[%s373_s1 + $0x30] sm:$0xf]  ;;  %v239_v25 = vld [vmem:[%s373_s1 + $0x34] sm:$0xf0] }
   0x7   :  { %v207_v23 = vor.u32 %v240_v20, %v204_v21  ;;  %v238_v26 = vld [vmem:[%s373_s1 + $0x34] sm:$0xf]  ;;  %v196_v27 = vld [vmem:[%s373_s1 + $0x38] sm:$0xf0]  ;;  %v195_v28 = vor.u32 %v239_v25, %v194_v24  ;;  %v186_v30 = vld [vmem:[%s373_s1 + $0x20] sm:$0xf] }
   0x8   :  { %120 = vmatpush.bf16.msra.mxu0 %v219_v10  ;;  %v199_v29 = vor.u32 %v238_v26, %v196_v27  ;;  %v237_v31 = vld [vmem:[%s373_s1 + $0x24] sm:$0xf0]  ;;  %v236_v32 = vld [vmem:[%s373_s1 + $0x24] sm:$0xf]  ;;  %v188_v33 = vld [vmem:[%s373_s1 + $0x28] sm:$0xf0] }
   0x9   :  { %133 = vmatpush.bf16.msra.mxu1 %v223_v11  ;;  %v187_v34 = vor.u32 %v237_v31, %v186_v30  ;;  %v191_v35 = vor.u32 %v236_v32, %v188_v33  ;;  %v178_v36 = vld [vmem:[%s373_s1 + $0x10] sm:$0xf]  ;;  %v235_v37 = vld [vmem:[%s373_s1 + $0x14] sm:$0xf0]  ;;  %v234_v38 = vld [vmem:[%s373_s1 + $0x14] sm:$0xf] }
   0xa   :  { %v180_v39 = vld [vmem:[%s373_s1 + $0x18] sm:$0xf0]  ;;  %v179_v40 = vor.u32 %v235_v37, %v178_v36  ;;  %v170_v42 = vld [vmem:[%s373_s1] sm:$0xf]  ;;  %v233_v43 = vld [vmem:[%s373_s1 + $0x4] sm:$0xf0] }
   0xb   :  { %v183_v41 = vor.u32 %v234_v38, %v180_v39  ;;  %v232_v44 = vld [vmem:[%s373_s1 + $0x4] sm:$0xf]  ;;  %v172_v45 = vld [vmem:[%s373_s1 + $0x8] sm:$0xf0]  ;;  %v171_v46 = vor.u32 %v233_v43, %v170_v42  ;;  %v22_v48 = vld [vmem:[%s374_s0] sm:$0xf] }
   0xc   :  { %121 = vmatpush.bf16.msra.mxu0 %v211_v16  ;;  %v175_v47 = vor.u32 %v232_v44, %v172_v45  ;;  %v154_v49 = vld [vmem:[%s375_s2] sm:$0x3] }
   0xd   :  { %134 = vmatpush.bf16.msra.mxu1 %v215_v17  ;;  %v156_v50 = vperm.slane %v154_v49, 0  ;;  %v157_v51 = vperm.slane %v154_v49, 1 }
  0x10   :  { %122 = vmatpush.bf16.msra.mxu0 %v203_v22 }
  0x11   :  { %135 = vmatpush.bf16.msra.mxu1 %v207_v23 }
  0x14   :  { %123 = vmatpush.bf16.msra.mxu0 %v195_v28 }
  0x15   :  { %136 = vmatpush.bf16.msra.mxu1 %v199_v29 }
  0x18   :  { %124 = vmatpush.bf16.msra.mxu0 %v187_v34 }
  0x19   :  { %137 = vmatpush.bf16.msra.mxu1 %v191_v35 }
  0x1c   :  { %125 = vmatpush.bf16.msra.mxu0 %v179_v40 }
  0x1d   :  { %138 = vmatpush.bf16.msra.mxu1 %v183_v41 }
  0x20   :  { %126 = vmatpush.bf16.msra.mxu0 %v171_v46 }
  0x21   :  { %139 = vmatpush.bf16.msra.mxu1 %v175_v47 }
  0x23   :  { %127 = vmatmul.bf16.vlgmr.msra.gmra.mxu0 %v22_v48 }
  0x24   :  { %140 = vmatmul.bf16.vlgmr.msra.gmra.mxu1 %v22_v48 }
  0xa0   :  { %v128_v52 = vpop.f32.mrf.mxu0 }
  0xa1   :  { %v160_v53 = vadd.f32 %v156_v50, %v128_v52  ;;  %v141_v54 = vpop.f32.mrf.mxu1 }
  0xa2   :  { %v161_v55 = vadd.f32 %v157_v51, %v141_v54 }
  0xa4   :  { %v162_v56 = vpack.c.bf16 %v161_v55, %v160_v53 }
  0xa6   :  { %163 = vst [vmem:[%s376_s3] sm:$0xff] %v162_v56 }
  0xa8   :  { %v130_v57 = vpop.f32.mrf.mxu0 }
  0xa9   :  { %v143_v58 = vpop.f32.mrf.mxu1 }

// kernel: _lambda_.36
= control target key start
LH: loop header
LB: loop body
LE: loop exit
PB: predicated region body
PF: predicated region fallthrough
CT: control target
= control target key end

     0   :  { %s923_s12 = smov 0   ;;  %s925_s13 = smov 0   ;;  %s1037_s0 = inlined_call_operand.vmem [shape: bf16[8,2304], index: 0, kind: input, shape index: {}]   ;;  %s1038_s1 = inlined_call_operand.vmem [shape: bf16[2304,256], index: 1, kind: input, shape index: {}]   ;;  %s1039_s2 = inlined_call_operand.vmem [shape: f32[1,256], index: 2, kind: input, shape index: {}]   ;;  %s1040_s3 = inlined_call_operand.vmem [shape: bf16[8,256], index: 3, kind: output, shape index: {}]  }
   0x1   :  { %s927_s14 = smov 0  }
   0x2 LB: > { %s25_s15 = sadd.s32 1, %s896_s13  ;;  %p680_p0 = scmp.ge.s32.totalorder %s900_s14, 1  ;;  %s900_s14 = sphi %s927_s14, %s13_s14   ;;  %s896_s13 = sphi %s925_s13, %s1042_s13   ;;  %s892_s12 = sphi %s923_s12, %s1041_s12  }
   0x3   : > { %p26_p1 = scmp.ge.s32.totalorder %s25_s15, 9  ;;  %p194_p2 = scmp.lt.s32.totalorder %s900_s14, 10 }
   0x5   : > { %s1044_s15 = smov (%p26_p1, %s25_s15), 0  ;;  %p195_p3 = pnand %p680_p0, %p194_p2 }
   0x6   : > { %s681_s16 = sshll.u32 (!%p195_p3), %s892_s12, 1  ;;  %s683_s17 = sshll.u32 (!%p195_p3), %s892_s12, 5 }
   0x7   : > { %198 = sbr.rel (%p195_p3) target bundleno = 210 (0xd2), region = 32  ;;  %p243_p4 = scmp.lt.s32.totalorder (!%p195_p3), %s681_s16, 17 }
   0x8   : > { %p252_p5 = scmp.lt.s32.totalorder (!%p195_p3), %s683_s17, 287  ;;  %p686_p6 = scmp.ne.s32.totalorder (!%p195_p3), %s892_s12, 0 }
   0xc   : > { %s1046_s16 = smov (!%p243_p4, %s681_s16), 17  ;;  %s1048_s17 = smov (!%p252_p5, %s683_s17), 287 }
   0xd   : > { %s682_s18 = sshll.u32 %s1046_s16, 2  ;;  %s820_s22 = sshll.u32 %s1048_s17, 3 }
   0xe   : > { %s948_s21 = scalar_lea.vmem %s1037_s0, %s682_s18  ;;  %s953_s25 = scalar_lea.vmem %s1038_s1, %s820_s22 }
   0xf   : > { %280 = sbr.rel (%p686_p6) target bundleno = 23 (0x17), region = 36 }
  0x14   : > { %v902_v0 = vmov 0.0  }
  0x15   : > { %281 = vst [vmem:[#allocation2] sm:$0xff] %v902_v0 }
  0x16   : > { %282 = vst [vmem:[#allocation2 + $0x8] sm:$0xff] %v902_v0 }
  0x17 PF: > { %v745_v1 = vld [vmem:[%s953_s25 + $0x70] sm:$0xf]  ;;  %v836_v2 = vld [vmem:[%s953_s25 + $0x74] sm:$0xf0]  ;;  %v835_v6 = vld [vmem:[%s953_s25 + $0x74] sm:$0xf] }
  0x18   : > { %v809_v3 = vld [vmem:[%s953_s25 + $0xf0] sm:$0xf]  ;;  %v746_v4 = vor.u32 %v836_v2, %v745_v1  ;;  %v852_v5 = vld [vmem:[%s953_s25 + $0xf4] sm:$0xf0]  ;;  %v747_v7 = vld [vmem:[%s953_s25 + $0x78] sm:$0xf0] }
  0x19   : > { %v810_v8 = vor.u32 %v852_v5, %v809_v3  ;;  %v750_v9 = vor.u32 %v835_v6, %v747_v7  ;;  %v851_v10 = vld [vmem:[%s953_s25 + $0xf4] sm:$0xf]  ;;  %v811_v11 = vld [vmem:[%s953_s25 + $0xf8] sm:$0xf0]  ;;  %v737_v12 = vld [vmem:[%s953_s25 + $0x60] sm:$0xf] }
  0x1a   : > { %485 = vmatpush.bf16.msra.mxu0 %v746_v4  ;;  %v814_v13 = vor.u32 %v851_v10, %v811_v11  ;;  %v834_v14 = vld [vmem:[%s953_s25 + $0x64] sm:$0xf0]  ;;  %v801_v15 = vld [vmem:[%s953_s25 + $0xe0] sm:$0xf]  ;;  %v833_v19 = vld [vmem:[%s953_s25 + $0x64] sm:$0xf] }
  0x1b   : > { %v850_v16 = vld [vmem:[%s953_s25 + $0xe4] sm:$0xf0]  ;;  %498 = vmatpush.bf16.msra.mxu1 %v810_v8  ;;  %511 = vmatpush.bf16.msra.mxu2 %v750_v9  ;;  %v738_v17 = vor.u32 %v834_v14, %v737_v12  ;;  %v739_v20 = vld [vmem:[%s953_s25 + $0x68] sm:$0xf0]  ;;  %v849_v21 = vld [vmem:[%s953_s25 + $0xe4] sm:$0xf] }
  0x1c   : > { %v802_v18 = vor.u32 %v850_v16, %v801_v15  ;;  %524 = vmatpush.bf16.msra.mxu3 %v814_v13  ;;  %v742_v22 = vor.u32 %v833_v19, %v739_v20  ;;  %v803_v23 = vld [vmem:[%s953_s25 + $0xe8] sm:$0xf0]  ;;  %v729_v24 = vld [vmem:[%s953_s25 + $0x50] sm:$0xf]  ;;  %v832_v25 = vld [vmem:[%s953_s25 + $0x54] sm:$0xf0] }
  0x1d   : > { %v806_v26 = vor.u32 %v849_v21, %v803_v23  ;;  %v793_v27 = vld [vmem:[%s953_s25 + $0xd0] sm:$0xf]  ;;  %v848_v28 = vld [vmem:[%s953_s25 + $0xd4] sm:$0xf0]  ;;  %v831_v29 = vld [vmem:[%s953_s25 + $0x54] sm:$0xf]  ;;  %v730_v30 = vor.u32 %v832_v25, %v729_v24 }
  0x1e   : > { %486 = vmatpush.bf16.msra.mxu0 %v738_v17  ;;  %v731_v31 = vld [vmem:[%s953_s25 + $0x58] sm:$0xf0]  ;;  %v847_v32 = vld [vmem:[%s953_s25 + $0xd4] sm:$0xf]  ;;  %v794_v34 = vor.u32 %v848_v28, %v793_v27  ;;  %v721_v36 = vld [vmem:[%s953_s25 + $0x40] sm:$0xf] }
  0x1f   : > { %v795_v33 = vld [vmem:[%s953_s25 + $0xd8] sm:$0xf0]  ;;  %499 = vmatpush.bf16.msra.mxu1 %v802_v18  ;;  %512 = vmatpush.bf16.msra.mxu2 %v742_v22  ;;  %v734_v35 = vor.u32 %v831_v29, %v731_v31  ;;  %v830_v37 = vld [vmem:[%s953_s25 + $0x44] sm:$0xf0]  ;;  %v785_v38 = vld [vmem:[%s953_s25 + $0xc0] sm:$0xf] }
  0x20   : > { %525 = vmatpush.bf16.msra.mxu3 %v806_v26  ;;  %v798_v39 = vor.u32 %v847_v32, %v795_v33  ;;  %v846_v40 = vld [vmem:[%s953_s25 + $0xc4] sm:$0xf0]  ;;  %v829_v41 = vld [vmem:[%s953_s25 + $0x44] sm:$0xf]  ;;  %v723_v42 = vld [vmem:[%s953_s25 + $0x48] sm:$0xf0]  ;;  %v722_v45 = vor.u32 %v830_v37, %v721_v36 }
  0x21   : > { %v845_v43 = vld [vmem:[%s953_s25 + $0xc4] sm:$0xf]  ;;  %v787_v44 = vld [vmem:[%s953_s25 + $0xc8] sm:$0xf0]  ;;  %v786_v46 = vor.u32 %v846_v40, %v785_v38  ;;  %v726_v47 = vor.u32 %v829_v41, %v723_v42  ;;  %v713_v48 = vld [vmem:[%s953_s25 + $0x30] sm:$0xf] }
  0x22   : > { %487 = vmatpush.bf16.msra.mxu0 %v730_v30  ;;  %v828_v49 = vld [vmem:[%s953_s25 + $0x34] sm:$0xf0]  ;;  %v777_v50 = vld [vmem:[%s953_s25 + $0xb0] sm:$0xf]  ;;  %v790_v51 = vor.u32 %v845_v43, %v787_v44  ;;  %v827_v53 = vld [vmem:[%s953_s25 + $0x34] sm:$0xf] }
  0x23   : > { %500 = vmatpush.bf16.msra.mxu1 %v794_v34  ;;  %513 = vmatpush.bf16.msra.mxu2 %v734_v35  ;;  %v844_v52 = vld [vmem:[%s953_s25 + $0xb4] sm:$0xf0]  ;;  %v715_v54 = vld [vmem:[%s953_s25 + $0x38] sm:$0xf0]  ;;  %v843_v55 = vld [vmem:[%s953_s25 + $0xb4] sm:$0xf]  ;;  %v714_v57 = vor.u32 %v828_v49, %v713_v48 }
  0x24   : > { %526 = vmatpush.bf16.msra.mxu3 %v798_v39  ;;  %v779_v56 = vld [vmem:[%s953_s25 + $0xb8] sm:$0xf0]  ;;  %v778_v58 = vor.u32 %v844_v52, %v777_v50  ;;  %v718_v59 = vor.u32 %v827_v53, %v715_v54  ;;  %v705_v60 = vld [vmem:[%s953_s25 + $0x20] sm:$0xf]  ;;  %v826_v61 = vld [vmem:[%s953_s25 + $0x24] sm:$0xf0] }
  0x25   : > { %v769_v62 = vld [vmem:[%s953_s25 + $0xa0] sm:$0xf]  ;;  %v782_v63 = vor.u32 %v843_v55, %v779_v56  ;;  %v842_v0 = vld [vmem:[%s953_s25 + $0xa4] sm:$0xf0]  ;;  %v825_v1 = vld [vmem:[%s953_s25 + $0x24] sm:$0xf]  ;;  %v706_v5 = vor.u32 %v826_v61, %v705_v60 }
  0x26   : > { %488 = vmatpush.bf16.msra.mxu0 %v722_v45  ;;  %v707_v2 = vld [vmem:[%s953_s25 + $0x28] sm:$0xf0]  ;;  %v841_v3 = vld [vmem:[%s953_s25 + $0xa4] sm:$0xf]  ;;  %v770_v6 = vor.u32 %v842_v0, %v769_v62  ;;  %v697_v8 = vld [vmem:[%s953_s25 + $0x10] sm:$0xf] }
  0x27   : > { %501 = vmatpush.bf16.msra.mxu1 %v786_v46  ;;  %514 = vmatpush.bf16.msra.mxu2 %v726_v47  ;;  %v771_v4 = vld [vmem:[%s953_s25 + $0xa8] sm:$0xf0]  ;;  %v710_v7 = vor.u32 %v825_v1, %v707_v2  ;;  %v824_v9 = vld [vmem:[%s953_s25 + $0x14] sm:$0xf0]  ;;  %v761_v10 = vld [vmem:[%s953_s25 + $0x90] sm:$0xf] }
  0x28   : > { %527 = vmatpush.bf16.msra.mxu3 %v790_v51  ;;  %v774_v11 = vor.u32 %v841_v3, %v771_v4  ;;  %v840_v12 = vld [vmem:[%s953_s25 + $0x94] sm:$0xf0]  ;;  %v823_v13 = vld [vmem:[%s953_s25 + $0x14] sm:$0xf]  ;;  %v699_v14 = vld [vmem:[%s953_s25 + $0x18] sm:$0xf0]  ;;  %v698_v17 = vor.u32 %v824_v9, %v697_v8 }
  0x29   : > { %v839_v15 = vld [vmem:[%s953_s25 + $0x94] sm:$0xf]  ;;  %v763_v16 = vld [vmem:[%s953_s25 + $0x98] sm:$0xf0]  ;;  %v285_v18 = vld [vmem:[%s948_s21] sm:$0xff]  ;;  %v762_v19 = vor.u32 %v840_v12, %v761_v10  ;;  %v702_v20 = vor.u32 %v823_v13, %v699_v14  ;;  %p815_p7 = scmp.ne.s32.totalorder %s892_s12, 8 }
  0x2a   : > { %489 = vmatpush.bf16.msra.mxu0 %v714_v57  ;;  %v689_v21 = vld [vmem:[%s953_s25] sm:$0xf]  ;;  %v822_v22 = vld [vmem:[%s953_s25 + $0x4] sm:$0xf0]  ;;  %v766_v24 = vor.u32 %v839_v15, %v763_v16  ;;  %v821_v26 = vld [vmem:[%s953_s25 + $0x4] sm:$0xf]  ;;  %v319_v30 = vunpack.c.l.b16 %v285_v18  ;;  %v320_v32 = vunpack.c.h.b16 %v285_v18 }
  0x2b   : > { %502 = vmatpush.bf16.msra.mxu1 %v778_v58  ;;  %515 = vmatpush.bf16.msra.mxu2 %v718_v59  ;;  %v753_v23 = vld [vmem:[%s953_s25 + $0x80] sm:$0xf]  ;;  %v838_v25 = vld [vmem:[%s953_s25 + $0x84] sm:$0xf0]  ;;  %v691_v27 = vld [vmem:[%s953_s25 + $0x8] sm:$0xf0]  ;;  %v690_v31 = vor.u32 %v822_v22, %v689_v21 }
  0x2c   : > { %528 = vmatpush.bf16.msra.mxu3 %v782_v63  ;;  %v837_v28 = vld [vmem:[%s953_s25 + $0x84] sm:$0xf]  ;;  %v755_v29 = vld [vmem:[%s953_s25 + $0x88] sm:$0xf0]  ;;  %v754_v33 = vor.u32 %v838_v25, %v753_v23  ;;  %v694_v34 = vor.u32 %v821_v26, %v691_v27  ;;  %v321_v36 = vpack.c.b16 %v319_v30, %v319_v30  ;;  %v322_v37 = vpack.c.b16 %v320_v32, %v320_v32 }
  0x2d   : > { %v758_v35 = vor.u32 %v837_v28, %v755_v29  ;;  %v283_v39 = vld [vmem:[#allocation2] sm:$0xff]  ;;  %v284_v44 = vld [vmem:[#allocation2 + $0x8] sm:$0xff] }
  0x2e   : > { %490 = vmatpush.bf16.msra.mxu0 %v706_v5 }
  0x2f   : > { %503 = vmatpush.bf16.msra.mxu1 %v770_v6  ;;  %516 = vmatpush.bf16.msra.mxu2 %v710_v7 }
  0x30   : > { %529 = vmatpush.bf16.msra.mxu3 %v774_v11 }
  0x32   : > { %491 = vmatpush.bf16.msra.mxu0 %v698_v17 }
  0x33   : > { %504 = vmatpush.bf16.msra.mxu1 %v762_v19  ;;  %517 = vmatpush.bf16.msra.mxu2 %v702_v20 }
  0x34   : > { %530 = vmatpush.bf16.msra.mxu3 %v766_v24 }
  0x36   : > { %492 = vmatpush.bf16.msra.mxu0 %v690_v31 }
  0x37   : > { %505 = vmatpush.bf16.msra.mxu1 %v754_v33  ;;  %518 = vmatpush.bf16.msra.mxu2 %v694_v34 }
  0x38   : > { %531 = vmatpush.bf16.msra.mxu3 %v758_v35 }
  0x39   : > { %493 = vmatmul.bf16.vlgmr.msra.gmra.mxu0 %v321_v36 }
  0x3a   : > { %506 = vmatmul.bf16.vlgmr.msra.gmra.mxu1 %v322_v37  ;;  %519 = vmatmul.bf16.vlgmr.msra.gmra.mxu2 %v321_v36 }
  0x3b   : > { %532 = vmatmul.bf16.vlgmr.msra.gmra.mxu3 %v322_v37 }
  0xb6   : > { %v494_v38 = vpop.f32.mrf.mxu0 }
  0xb7   : > { %v507_v40 = vpop.f32.mrf.mxu1 }
  0xb8   : > { %v508_v41 = vadd.f32 %v507_v40, %v494_v38 }
  0xba   : > { %v537_v42 = vadd.f32 %v508_v41, %v283_v39 }
  0xbc   : > { %539 = vst [vmem:[#allocation2] sm:$0xff] %v537_v42 }
  0xbd   : > { %v520_v43 = vpop.f32.mrf.mxu2 }
  0xbe   : > { %v533_v45 = vpop.f32.mrf.mxu3  ;;  %v496_v46 = vpop.f32.mrf.mxu0 }
  0xbf   : > { %v534_v47 = vadd.f32 %v533_v45, %v520_v43  ;;  %v509_v48 = vpop.f32.mrf.mxu1 }
  0xc1   : > { %v538_v49 = vadd.f32 %v534_v47, %v284_v44 }
  0xc2   : > { %544 = sbr.rel (%p815_p7) target bundleno = 210 (0xd2), region = 40 }
  0xc3   : > { %540 = vst [vmem:[#allocation2 + $0x8] sm:$0xff] %v538_v49 }
  0xc5   : > { %v522_v50 = vpop.f32.mrf.mxu2 }
  0xc6   : > { %v535_v51 = vpop.f32.mrf.mxu3 }
  0xc7   : > { %v545_v52 = vld [vmem:[#allocation2] sm:$0xff] }
  0xc8   : > { %v547_v54 = vld [vmem:[%s1039_s2] sm:$0x3] }
  0xc9   : > { %v549_v55 = vperm.slane %v547_v54, 0  ;;  %v550_v56 = vperm.slane %v547_v54, 1 }
  0xca   : > { %v546_v53 = vld [vmem:[#allocation2 + $0x8] sm:$0xff] }
  0xcb   : > { %v553_v57 = vadd.f32 %v549_v55, %v545_v52  ;;  %v554_v58 = vadd.f32 %v550_v56, %v546_v53 }
  0xcd   : > { %v555_v59 = vmax.f32 %v553_v57, 0.0  ;;  %v556_v60 = vmax.f32 %v554_v58, 0.0 }
  0xcf   : > { %v557_v61 = vpack.c.bf16 %v556_v60, %v555_v59 }
  0xd1   : > { %558 = vst [vmem:[%s1040_s3] sm:$0xff] %v557_v61 }
  0xd2 PF: > { %s13_s14 = sadd.s32 1, %s900_s14   ;;  %s1041_s12 = smov %s896_s13 }
  0xd3   : > { %p10_p8 = scmp.ge.s32.totalorder %s13_s14, 11   ;;  %s1042_s13 = smov %s1044_s15 }
  0xd5   :  { %12 = sbr.rel (!%p10_p8) target bundleno = 2 (0x2), region = 76 }

// kernel: _lambda_.35
= control target key start
LH: loop header
LB: loop body
LE: loop exit
PB: predicated region body
PF: predicated region fallthrough
CT: control target
= control target key end

     0   :  { %s1018_s15 = smov 0   ;;  %s1020_s16 = smov 0   ;;  %s1135_s0 = inlined_call_operand.vmem [shape: bf16[8,2304], index: 0, kind: input, shape index: {}]   ;;  %s1136_s1 = inlined_call_operand.vmem [shape: bf16[2304,256], index: 1, kind: input, shape index: {}]   ;;  %s1137_s2 = inlined_call_operand.vmem [shape: f32[1,256], index: 2, kind: input, shape index: {}]   ;;  %s1138_s3 = inlined_call_operand.vmem [shape: bf16[8,256], index: 3, kind: input, shape index: {}]   ;;  %s1139_s4 = inlined_call_operand.vmem [shape: bf16[8,256], index: 4, kind: output, shape index: {}]  }
   0x1   :  { %s1022_s17 = smov 0  }
   0x2 LB: > { %s26_s18 = sadd.s32 1, %s986_s16  ;;  %p770_p0 = scmp.ge.s32.totalorder %s990_s17, 1  ;;  %s990_s17 = sphi %s1022_s17, %s14_s17   ;;  %s986_s16 = sphi %s1020_s16, %s1141_s16   ;;  %s982_s15 = sphi %s1018_s15, %s1140_s15  }
   0x3   : > { %p27_p1 = scmp.ge.s32.totalorder %s26_s18, 9  ;;  %p236_p2 = scmp.lt.s32.totalorder %s990_s17, 10 }
   0x5   : > { %s1143_s18 = smov (%p27_p1, %s26_s18), 0  ;;  %p237_p3 = pnand %p770_p0, %p236_p2 }
   0x6   : > { %s771_s19 = sshll.u32 (!%p237_p3), %s982_s15, 1  ;;  %s773_s20 = sshll.u32 (!%p237_p3), %s982_s15, 5 }
   0x7   : > { %240 = sbr.rel (%p237_p3) target bundleno = 212 (0xd4), region = 36  ;;  %p296_p4 = scmp.lt.s32.totalorder (!%p237_p3), %s771_s19, 17 }
   0x8   : > { %p305_p5 = scmp.lt.s32.totalorder (!%p237_p3), %s773_s20, 287  ;;  %p776_p6 = scmp.ne.s32.totalorder (!%p237_p3), %s982_s15, 0 }
   0xc   : > { %s1145_s19 = smov (!%p296_p4, %s771_s19), 17  ;;  %s1147_s20 = smov (!%p305_p5, %s773_s20), 287 }
   0xd   : > { %s772_s21 = sshll.u32 %s1145_s19, 2  ;;  %s910_s25 = sshll.u32 %s1147_s20, 3 }
   0xe   : > { %s1043_s24 = scalar_lea.vmem %s1135_s0, %s772_s21  ;;  %s1048_s28 = scalar_lea.vmem %s1136_s1, %s910_s25 }
   0xf   : > { %343 = sbr.rel (%p776_p6) target bundleno = 23 (0x17), region = 40 }
  0x14   : > { %v992_v0 = vmov 0.0  }
  0x15   : > { %344 = vst [vmem:[#allocation2] sm:$0xff] %v992_v0 }
  0x16   : > { %345 = vst [vmem:[#allocation2 + $0x8] sm:$0xff] %v992_v0 }
  0x17 PF: > { %v835_v1 = vld [vmem:[%s1048_s28 + $0x70] sm:$0xf]  ;;  %v926_v2 = vld [vmem:[%s1048_s28 + $0x74] sm:$0xf0]  ;;  %v925_v6 = vld [vmem:[%s1048_s28 + $0x74] sm:$0xf] }
  0x18   : > { %v899_v3 = vld [vmem:[%s1048_s28 + $0xf0] sm:$0xf]  ;;  %v836_v4 = vor.u32 %v926_v2, %v835_v1  ;;  %v942_v5 = vld [vmem:[%s1048_s28 + $0xf4] sm:$0xf0]  ;;  %v837_v7 = vld [vmem:[%s1048_s28 + $0x78] sm:$0xf0] }
  0x19   : > { %v900_v8 = vor.u32 %v942_v5, %v899_v3  ;;  %v840_v9 = vor.u32 %v925_v6, %v837_v7  ;;  %v941_v10 = vld [vmem:[%s1048_s28 + $0xf4] sm:$0xf]  ;;  %v901_v11 = vld [vmem:[%s1048_s28 + $0xf8] sm:$0xf0]  ;;  %v827_v12 = vld [vmem:[%s1048_s28 + $0x60] sm:$0xf] }
  0x1a   : > { %548 = vmatpush.bf16.msra.mxu0 %v836_v4  ;;  %v904_v13 = vor.u32 %v941_v10, %v901_v11  ;;  %v924_v14 = vld [vmem:[%s1048_s28 + $0x64] sm:$0xf0]  ;;  %v891_v15 = vld [vmem:[%s1048_s28 + $0xe0] sm:$0xf]  ;;  %v923_v19 = vld [vmem:[%s1048_s28 + $0x64] sm:$0xf] }
  0x1b   : > { %v940_v16 = vld [vmem:[%s1048_s28 + $0xe4] sm:$0xf0]  ;;  %561 = vmatpush.bf16.msra.mxu1 %v900_v8  ;;  %574 = vmatpush.bf16.msra.mxu2 %v840_v9  ;;  %v828_v17 = vor.u32 %v924_v14, %v827_v12  ;;  %v829_v20 = vld [vmem:[%s1048_s28 + $0x68] sm:$0xf0]  ;;  %v939_v21 = vld [vmem:[%s1048_s28 + $0xe4] sm:$0xf] }
  0x1c   : > { %v892_v18 = vor.u32 %v940_v16, %v891_v15  ;;  %587 = vmatpush.bf16.msra.mxu3 %v904_v13  ;;  %v832_v22 = vor.u32 %v923_v19, %v829_v20  ;;  %v893_v23 = vld [vmem:[%s1048_s28 + $0xe8] sm:$0xf0]  ;;  %v819_v24 = vld [vmem:[%s1048_s28 + $0x50] sm:$0xf]  ;;  %v922_v25 = vld [vmem:[%s1048_s28 + $0x54] sm:$0xf0] }
  0x1d   : > { %v896_v26 = vor.u32 %v939_v21, %v893_v23  ;;  %v883_v27 = vld [vmem:[%s1048_s28 + $0xd0] sm:$0xf]  ;;  %v938_v28 = vld [vmem:[%s1048_s28 + $0xd4] sm:$0xf0]  ;;  %v921_v29 = vld [vmem:[%s1048_s28 + $0x54] sm:$0xf]  ;;  %v820_v30 = vor.u32 %v922_v25, %v819_v24 }
  0x1e   : > { %549 = vmatpush.bf16.msra.mxu0 %v828_v17  ;;  %v821_v31 = vld [vmem:[%s1048_s28 + $0x58] sm:$0xf0]  ;;  %v937_v32 = vld [vmem:[%s1048_s28 + $0xd4] sm:$0xf]  ;;  %v884_v34 = vor.u32 %v938_v28, %v883_v27  ;;  %v811_v36 = vld [vmem:[%s1048_s28 + $0x40] sm:$0xf] }
  0x1f   : > { %v885_v33 = vld [vmem:[%s1048_s28 + $0xd8] sm:$0xf0]  ;;  %562 = vmatpush.bf16.msra.mxu1 %v892_v18  ;;  %575 = vmatpush.bf16.msra.mxu2 %v832_v22  ;;  %v824_v35 = vor.u32 %v921_v29, %v821_v31  ;;  %v920_v37 = vld [vmem:[%s1048_s28 + $0x44] sm:$0xf0]  ;;  %v875_v38 = vld [vmem:[%s1048_s28 + $0xc0] sm:$0xf] }
  0x20   : > { %588 = vmatpush.bf16.msra.mxu3 %v896_v26  ;;  %v888_v39 = vor.u32 %v937_v32, %v885_v33  ;;  %v936_v40 = vld [vmem:[%s1048_s28 + $0xc4] sm:$0xf0]  ;;  %v919_v41 = vld [vmem:[%s1048_s28 + $0x44] sm:$0xf]  ;;  %v813_v42 = vld [vmem:[%s1048_s28 + $0x48] sm:$0xf0]  ;;  %v812_v45 = vor.u32 %v920_v37, %v811_v36 }
  0x21   : > { %v935_v43 = vld [vmem:[%s1048_s28 + $0xc4] sm:$0xf]  ;;  %v877_v44 = vld [vmem:[%s1048_s28 + $0xc8] sm:$0xf0]  ;;  %v876_v46 = vor.u32 %v936_v40, %v875_v38  ;;  %v816_v47 = vor.u32 %v919_v41, %v813_v42  ;;  %v803_v48 = vld [vmem:[%s1048_s28 + $0x30] sm:$0xf] }
  0x22   : > { %550 = vmatpush.bf16.msra.mxu0 %v820_v30  ;;  %v918_v49 = vld [vmem:[%s1048_s28 + $0x34] sm:$0xf0]  ;;  %v867_v50 = vld [vmem:[%s1048_s28 + $0xb0] sm:$0xf]  ;;  %v880_v51 = vor.u32 %v935_v43, %v877_v44  ;;  %v917_v53 = vld [vmem:[%s1048_s28 + $0x34] sm:$0xf] }
  0x23   : > { %563 = vmatpush.bf16.msra.mxu1 %v884_v34  ;;  %576 = vmatpush.bf16.msra.mxu2 %v824_v35  ;;  %v934_v52 = vld [vmem:[%s1048_s28 + $0xb4] sm:$0xf0]  ;;  %v805_v54 = vld [vmem:[%s1048_s28 + $0x38] sm:$0xf0]  ;;  %v933_v55 = vld [vmem:[%s1048_s28 + $0xb4] sm:$0xf]  ;;  %v804_v57 = vor.u32 %v918_v49, %v803_v48 }
  0x24   : > { %589 = vmatpush.bf16.msra.mxu3 %v888_v39  ;;  %v869_v56 = vld [vmem:[%s1048_s28 + $0xb8] sm:$0xf0]  ;;  %v868_v58 = vor.u32 %v934_v52, %v867_v50  ;;  %v808_v59 = vor.u32 %v917_v53, %v805_v54  ;;  %v795_v60 = vld [vmem:[%s1048_s28 + $0x20] sm:$0xf]  ;;  %v916_v61 = vld [vmem:[%s1048_s28 + $0x24] sm:$0xf0] }
  0x25   : > { %v859_v62 = vld [vmem:[%s1048_s28 + $0xa0] sm:$0xf]  ;;  %v872_v63 = vor.u32 %v933_v55, %v869_v56  ;;  %v932_v0 = vld [vmem:[%s1048_s28 + $0xa4] sm:$0xf0]  ;;  %v915_v1 = vld [vmem:[%s1048_s28 + $0x24] sm:$0xf]  ;;  %v796_v5 = vor.u32 %v916_v61, %v795_v60 }
  0x26   : > { %551 = vmatpush.bf16.msra.mxu0 %v812_v45  ;;  %v797_v2 = vld [vmem:[%s1048_s28 + $0x28] sm:$0xf0]  ;;  %v931_v3 = vld [vmem:[%s1048_s28 + $0xa4] sm:$0xf]  ;;  %v860_v6 = vor.u32 %v932_v0, %v859_v62  ;;  %v787_v8 = vld [vmem:[%s1048_s28 + $0x10] sm:$0xf] }
  0x27   : > { %564 = vmatpush.bf16.msra.mxu1 %v876_v46  ;;  %577 = vmatpush.bf16.msra.mxu2 %v816_v47  ;;  %v861_v4 = vld [vmem:[%s1048_s28 + $0xa8] sm:$0xf0]  ;;  %v800_v7 = vor.u32 %v915_v1, %v797_v2  ;;  %v914_v9 = vld [vmem:[%s1048_s28 + $0x14] sm:$0xf0]  ;;  %v851_v10 = vld [vmem:[%s1048_s28 + $0x90] sm:$0xf] }
  0x28   : > { %590 = vmatpush.bf16.msra.mxu3 %v880_v51  ;;  %v864_v11 = vor.u32 %v931_v3, %v861_v4  ;;  %v930_v12 = vld [vmem:[%s1048_s28 + $0x94] sm:$0xf0]  ;;  %v913_v13 = vld [vmem:[%s1048_s28 + $0x14] sm:$0xf]  ;;  %v789_v14 = vld [vmem:[%s1048_s28 + $0x18] sm:$0xf0]  ;;  %v788_v17 = vor.u32 %v914_v9, %v787_v8 }
  0x29   : > { %v929_v15 = vld [vmem:[%s1048_s28 + $0x94] sm:$0xf]  ;;  %v853_v16 = vld [vmem:[%s1048_s28 + $0x98] sm:$0xf0]  ;;  %v348_v18 = vld [vmem:[%s1043_s24] sm:$0xff]  ;;  %v852_v19 = vor.u32 %v930_v12, %v851_v10  ;;  %v792_v20 = vor.u32 %v913_v13, %v789_v14  ;;  %p905_p7 = scmp.ne.s32.totalorder %s982_s15, 8 }
  0x2a   : > { %552 = vmatpush.bf16.msra.mxu0 %v804_v57  ;;  %v779_v21 = vld [vmem:[%s1048_s28] sm:$0xf]  ;;  %v912_v22 = vld [vmem:[%s1048_s28 + $0x4] sm:$0xf0]  ;;  %v856_v24 = vor.u32 %v929_v15, %v853_v16  ;;  %v911_v26 = vld [vmem:[%s1048_s28 + $0x4] sm:$0xf]  ;;  %v382_v30 = vunpack.c.l.b16 %v348_v18  ;;  %v383_v32 = vunpack.c.h.b16 %v348_v18 }
  0x2b   : > { %565 = vmatpush.bf16.msra.mxu1 %v868_v58  ;;  %578 = vmatpush.bf16.msra.mxu2 %v808_v59  ;;  %v843_v23 = vld [vmem:[%s1048_s28 + $0x80] sm:$0xf]  ;;  %v928_v25 = vld [vmem:[%s1048_s28 + $0x84] sm:$0xf0]  ;;  %v781_v27 = vld [vmem:[%s1048_s28 + $0x8] sm:$0xf0]  ;;  %v780_v31 = vor.u32 %v912_v22, %v779_v21 }
  0x2c   : > { %591 = vmatpush.bf16.msra.mxu3 %v872_v63  ;;  %v927_v28 = vld [vmem:[%s1048_s28 + $0x84] sm:$0xf]  ;;  %v845_v29 = vld [vmem:[%s1048_s28 + $0x88] sm:$0xf0]  ;;  %v844_v33 = vor.u32 %v928_v25, %v843_v23  ;;  %v784_v34 = vor.u32 %v911_v26, %v781_v27  ;;  %v384_v36 = vpack.c.b16 %v382_v30, %v382_v30  ;;  %v385_v37 = vpack.c.b16 %v383_v32, %v383_v32 }
  0x2d   : > { %v848_v35 = vor.u32 %v927_v28, %v845_v29  ;;  %v346_v39 = vld [vmem:[#allocation2] sm:$0xff]  ;;  %v347_v44 = vld [vmem:[#allocation2 + $0x8] sm:$0xff] }
  0x2e   : > { %553 = vmatpush.bf16.msra.mxu0 %v796_v5 }
  0x2f   : > { %566 = vmatpush.bf16.msra.mxu1 %v860_v6  ;;  %579 = vmatpush.bf16.msra.mxu2 %v800_v7 }
  0x30   : > { %592 = vmatpush.bf16.msra.mxu3 %v864_v11 }
  0x32   : > { %554 = vmatpush.bf16.msra.mxu0 %v788_v17 }
  0x33   : > { %567 = vmatpush.bf16.msra.mxu1 %v852_v19  ;;  %580 = vmatpush.bf16.msra.mxu2 %v792_v20 }
  0x34   : > { %593 = vmatpush.bf16.msra.mxu3 %v856_v24 }
  0x36   : > { %555 = vmatpush.bf16.msra.mxu0 %v780_v31 }
  0x37   : > { %568 = vmatpush.bf16.msra.mxu1 %v844_v33  ;;  %581 = vmatpush.bf16.msra.mxu2 %v784_v34 }
  0x38   : > { %594 = vmatpush.bf16.msra.mxu3 %v848_v35 }
  0x39   : > { %556 = vmatmul.bf16.vlgmr.msra.gmra.mxu0 %v384_v36 }
  0x3a   : > { %569 = vmatmul.bf16.vlgmr.msra.gmra.mxu1 %v385_v37  ;;  %582 = vmatmul.bf16.vlgmr.msra.gmra.mxu2 %v384_v36 }
  0x3b   : > { %595 = vmatmul.bf16.vlgmr.msra.gmra.mxu3 %v385_v37 }
  0xb6   : > { %v557_v38 = vpop.f32.mrf.mxu0 }
  0xb7   : > { %v570_v40 = vpop.f32.mrf.mxu1 }
  0xb8   : > { %v571_v41 = vadd.f32 %v570_v40, %v557_v38 }
  0xba   : > { %v600_v42 = vadd.f32 %v571_v41, %v346_v39 }
  0xbc   : > { %602 = vst [vmem:[#allocation2] sm:$0xff] %v600_v42 }
  0xbd   : > { %v583_v43 = vpop.f32.mrf.mxu2 }
  0xbe   : > { %v596_v45 = vpop.f32.mrf.mxu3  ;;  %v559_v46 = vpop.f32.mrf.mxu0 }
  0xbf   : > { %v597_v47 = vadd.f32 %v596_v45, %v583_v43  ;;  %v572_v48 = vpop.f32.mrf.mxu1 }
  0xc1   : > { %v601_v49 = vadd.f32 %v597_v47, %v347_v44 }
  0xc2   : > { %607 = sbr.rel (%p905_p7) target bundleno = 212 (0xd4), region = 44 }
  0xc3   : > { %603 = vst [vmem:[#allocation2 + $0x8] sm:$0xff] %v601_v49 }
  0xc5   : > { %v585_v50 = vpop.f32.mrf.mxu2 }
  0xc6   : > { %v598_v51 = vpop.f32.mrf.mxu3 }
  0xc7   : > { %v608_v52 = vld [vmem:[#allocation2] sm:$0xff] }
  0xc8   : > { %v610_v54 = vld [vmem:[%s1137_s2] sm:$0x3] }
  0xc9   : > { %v612_v55 = vperm.slane %v610_v54, 0  ;;  %v613_v56 = vperm.slane %v610_v54, 1  ;;  %v618_v57 = vld [vmem:[%s1138_s3] sm:$0xff] }
  0xca   : > { %v609_v53 = vld [vmem:[#allocation2 + $0x8] sm:$0xff]  ;;  %v619_v58 = vunpack.c.l.bf16 %v618_v57  ;;  %v620_v59 = vunpack.c.h.bf16 %v618_v57 }
  0xcb   : > { %v616_v60 = vadd.f32 %v612_v55, %v608_v52  ;;  %v617_v61 = vadd.f32 %v613_v56, %v609_v53 }
  0xcd   : > { %v621_v62 = vadd.f32 %v619_v58, %v616_v60  ;;  %v622_v63 = vadd.f32 %v620_v59, %v617_v61 }
  0xcf   : > { %v623_v0 = vmax.f32 %v621_v62, 0.0  ;;  %v624_v1 = vmax.f32 %v622_v63, 0.0 }
  0xd1   : > { %v625_v2 = vpack.c.bf16 %v624_v1, %v623_v0 }
  0xd3   : > { %626 = vst [vmem:[%s1139_s4] sm:$0xff] %v625_v2 }
  0xd4 PF: > { %s14_s17 = sadd.s32 1, %s990_s17   ;;  %s1140_s15 = smov %s986_s16 }
  0xd5   : > { %p11_p8 = scmp.ge.s32.totalorder %s14_s17, 11   ;;  %s1141_s16 = smov %s1143_s18 }
  0xd7   :  { %13 = sbr.rel (!%p11_p8) target bundleno = 2 (0x2), region = 83 }

// kernel: _lambda_.38
= control target key start
LH: loop header
LB: loop body
LE: loop exit
PB: predicated region body
PF: predicated region fallthrough
CT: control target
= control target key end

     0   :  { %s1143_s12 = smov 0   ;;  %s1145_s13 = smov 0   ;;  %s1389_s0 = inlined_call_operand.vmem [shape: bf16[8,2304], index: 0, kind: input, shape index: {}]   ;;  %s1390_s1 = inlined_call_operand.vmem [shape: bf16[2304,512], index: 1, kind: input, shape index: {}]   ;;  %s1391_s2 = inlined_call_operand.vmem [shape: f32[1,512], index: 2, kind: input, shape index: {}]   ;;  %s1392_s3 = inlined_call_operand.vmem [shape: bf16[8,512], index: 3, kind: output, shape index: {}]  }
   0x1   :  { %s1147_s14 = smov 0   ;;  %s1149_s15 = smov 0  }
   0x2   :  { %s1151_s16 = smov 0   ;;  %s1153_s17 = smov 0  }
   0x3   :  { %s1155_s18 = smov 0  }
   0x4 LB: > { %s25_s19 = sadd.s32 1, %s1112_s16  ;;  %s28_s20 = sadd.s32 1, %s1116_s17  ;;  %s1120_s18 = sphi %s1155_s18, %s13_s18   ;;  %s1116_s17 = sphi %s1153_s17, %s1398_s17   ;;  %s1112_s16 = sphi %s1151_s16, %s1397_s16   ;;  %s1108_s15 = sphi %s1149_s15, %s1396_s15   ;;  %s1104_s14 = sphi %s1147_s14, %s1395_s14   ;;  %s1100_s13 = sphi %s1145_s13, %s1394_s13   ;;  %s1096_s12 = sphi %s1143_s12, %s1393_s12  }
   0x5   : > { %p26_p0 = scmp.ge.s32.totalorder %s25_s19, 9  ;;  %p76_p1 = scmp.ne.s32.totalorder %s1100_s13, %s1096_s12 }
   0x6   : > { %p77_p2 = scmp.eq.s32.totalorder %s1120_s18, 0  ;;  %s69_s24 = sadd.s32 1, %s1100_s13 }
   0x7   : > { %s1400_s19 = smov (%p26_p0, %s25_s19), 0  ;;  %s1402_s20 = smov (!%p26_p0, %s28_s20), %s1116_s17 }
   0x8   : > { %p78_p3 = por %p77_p2, %p76_p1  ;;  %p30_p4 = scmp.ge.s32.totalorder %s1402_s20, 2 }
   0x9   : > { %s64_s21 = ssub.s32 %s1112_s16, %s1400_s19  ;;  %p831_p6 = scmp.ge.s32.totalorder %s1120_s18, 18 }
   0xa   : > { %s1404_s20 = smov (%p30_p4, %s1402_s20), 0 }
   0xb   : > { %s65_s22 = ssub.s32 %s1116_s17, %s1404_s20  ;;  %156 = sbr.rel (%p831_p6) target bundleno = 55 (0x37), region = 16 }
   0xc   : > { %s66_s23 = sor.u32 %s65_s22, %s64_s21 }
   0xd   : > { %p67_p5 = scmp.eq.s32.totalorder %s66_s23, 0 }
   0xf   : > { %s1194_s25 = scalar_select %p67_p5, %s1100_s13, %s69_s24  }
  0x10   : > { %172 = sbr.rel (!%p78_p3) target bundleno = 55 (0x37), region = 24  ;;  %s174_s26 = sand.u32 (%p78_p3), 1, %s1100_s13  }
  0x11   : > { %s834_s27 = sshll.u32 (%p78_p3), %s1116_s17, 1  ;;  %s832_s28 = sshll.u32 (%p78_p3), %s174_s26, 8 }
  0x12   : > { %s976_s29 = sshll.u32 (%p78_p3), %s1112_s16, 7  ;;  %s1208_s8 = scalar_lea.vmem (%p78_p3), [#allocation3], %s832_s28 }
  0x13   : > { %s180_s30 = sadd.s32 (%p78_p3), %s976_s29, %s834_s27 }
  0x14   : > { %s836_s4 = sshll.u32 (%p78_p3), %s180_s30, 2 }
  0x15   : > { %s1203_s7 = scalar_lea.vmem %s1390_s1, %s836_s4 }
  0x16   : > { %v273_v0 = vld [vmem:[%s1203_s7] sm:$0xff]  ;;  %v275_v1 = vld [vmem:[%s1203_s7 + $0x10] sm:$0xff] }
  0x17   : > { %v277_v2 = vld [vmem:[%s1203_s7 + $0x20] sm:$0xff]  ;;  %274 = vst [vmem:[%s1208_s8] sm:$0xff] %v273_v0  ;;  %v279_v3 = vld [vmem:[%s1203_s7 + $0x30] sm:$0xff] }
  0x18   : > { %276 = vst [vmem:[%s1208_s8 + $0x8] sm:$0xff] %v275_v1  ;;  %v281_v4 = vld [vmem:[%s1203_s7 + $0x40] sm:$0xff]  ;;  %v283_v5 = vld [vmem:[%s1203_s7 + $0x50] sm:$0xff] }
  0x19   : > { %278 = vst [vmem:[%s1208_s8 + $0x10] sm:$0xff] %v277_v2  ;;  %v285_v6 = vld [vmem:[%s1203_s7 + $0x60] sm:$0xff]  ;;  %v287_v7 = vld [vmem:[%s1203_s7 + $0x70] sm:$0xff] }
  0x1a   : > { %280 = vst [vmem:[%s1208_s8 + $0x18] sm:$0xff] %v279_v3  ;;  %v289_v8 = vld [vmem:[%s1203_s7 + $0x80] sm:$0xff]  ;;  %v291_v9 = vld [vmem:[%s1203_s7 + $0x90] sm:$0xff] }
  0x1b   : > { %282 = vst [vmem:[%s1208_s8 + $0x20] sm:$0xff] %v281_v4  ;;  %v293_v10 = vld [vmem:[%s1203_s7 + $0xa0] sm:$0xff]  ;;  %v295_v11 = vld [vmem:[%s1203_s7 + $0xb0] sm:$0xff] }
  0x1c   : > { %284 = vst [vmem:[%s1208_s8 + $0x28] sm:$0xff] %v283_v5  ;;  %v297_v12 = vld [vmem:[%s1203_s7 + $0xc0] sm:$0xff]  ;;  %v299_v13 = vld [vmem:[%s1203_s7 + $0xd0] sm:$0xff] }
  0x1d   : > { %286 = vst [vmem:[%s1208_s8 + $0x30] sm:$0xff] %v285_v6  ;;  %v301_v14 = vld [vmem:[%s1203_s7 + $0xe0] sm:$0xff]  ;;  %v303_v15 = vld [vmem:[%s1203_s7 + $0xf0] sm:$0xff] }
  0x1e   : > { %288 = vst [vmem:[%s1208_s8 + $0x38] sm:$0xff] %v287_v7  ;;  %v305_v16 = vld [vmem:[%s1203_s7 + $0x100] sm:$0xff]  ;;  %v307_v17 = vld [vmem:[%s1203_s7 + $0x110] sm:$0xff] }
  0x1f   : > { %290 = vst [vmem:[%s1208_s8 + $0x40] sm:$0xff] %v289_v8  ;;  %v309_v18 = vld [vmem:[%s1203_s7 + $0x120] sm:$0xff]  ;;  %v311_v19 = vld [vmem:[%s1203_s7 + $0x130] sm:$0xff] }
  0x20   : > { %292 = vst [vmem:[%s1208_s8 + $0x48] sm:$0xff] %v291_v9  ;;  %v313_v20 = vld [vmem:[%s1203_s7 + $0x140] sm:$0xff]  ;;  %v315_v21 = vld [vmem:[%s1203_s7 + $0x150] sm:$0xff] }
  0x21   : > { %294 = vst [vmem:[%s1208_s8 + $0x50] sm:$0xff] %v293_v10  ;;  %v317_v22 = vld [vmem:[%s1203_s7 + $0x160] sm:$0xff]  ;;  %v319_v23 = vld [vmem:[%s1203_s7 + $0x170] sm:$0xff] }
  0x22   : > { %296 = vst [vmem:[%s1208_s8 + $0x58] sm:$0xff] %v295_v11  ;;  %v321_v24 = vld [vmem:[%s1203_s7 + $0x180] sm:$0xff]  ;;  %v323_v25 = vld [vmem:[%s1203_s7 + $0x190] sm:$0xff] }
  0x23   : > { %298 = vst [vmem:[%s1208_s8 + $0x60] sm:$0xff] %v297_v12  ;;  %v325_v26 = vld [vmem:[%s1203_s7 + $0x1a0] sm:$0xff]  ;;  %v327_v27 = vld [vmem:[%s1203_s7 + $0x1b0] sm:$0xff] }
  0x24   : > { %300 = vst [vmem:[%s1208_s8 + $0x68] sm:$0xff] %v299_v13  ;;  %v329_v28 = vld [vmem:[%s1203_s7 + $0x1c0] sm:$0xff]  ;;  %v331_v29 = vld [vmem:[%s1203_s7 + $0x1d0] sm:$0xff] }
  0x25   : > { %302 = vst [vmem:[%s1208_s8 + $0x70] sm:$0xff] %v301_v14  ;;  %v333_v30 = vld [vmem:[%s1203_s7 + $0x1e0] sm:$0xff]  ;;  %v335_v31 = vld [vmem:[%s1203_s7 + $0x1f0] sm:$0xff] }
  0x26   : > { %304 = vst [vmem:[%s1208_s8 + $0x78] sm:$0xff] %v303_v15 }
  0x27   : > { %306 = vst [vmem:[%s1208_s8 + $0x80] sm:$0xff] %v305_v16 }
  0x28   : > { %308 = vst [vmem:[%s1208_s8 + $0x88] sm:$0xff] %v307_v17 }
  0x29   : > { %310 = vst [vmem:[%s1208_s8 + $0x90] sm:$0xff] %v309_v18 }
  0x2a   : > { %312 = vst [vmem:[%s1208_s8 + $0x98] sm:$0xff] %v311_v19 }
  0x2b   : > { %314 = vst [vmem:[%s1208_s8 + $0xa0] sm:$0xff] %v313_v20 }
  0x2c   : > { %316 = vst [vmem:[%s1208_s8 + $0xa8] sm:$0xff] %v315_v21 }
  0x2d   : > { %318 = vst [vmem:[%s1208_s8 + $0xb0] sm:$0xff] %v317_v22 }
  0x2e   : > { %320 = vst [vmem:[%s1208_s8 + $0xb8] sm:$0xff] %v319_v23 }
  0x2f   : > { %322 = vst [vmem:[%s1208_s8 + $0xc0] sm:$0xff] %v321_v24 }
  0x30   : > { %324 = vst [vmem:[%s1208_s8 + $0xc8] sm:$0xff] %v323_v25 }
  0x31   : > { %326 = vst [vmem:[%s1208_s8 + $0xd0] sm:$0xff] %v325_v26 }
  0x32   : > { %328 = vst [vmem:[%s1208_s8 + $0xd8] sm:$0xff] %v327_v27 }
  0x33   : > { %330 = vst [vmem:[%s1208_s8 + $0xe0] sm:$0xff] %v329_v28 }
  0x34   : > { %332 = vst [vmem:[%s1208_s8 + $0xe8] sm:$0xff] %v331_v29 }
  0x35   : > { %334 = vst [vmem:[%s1208_s8 + $0xf0] sm:$0xff] %v333_v30 }
  0x36   : > { %336 = vst [vmem:[%s1208_s8 + $0xf8] sm:$0xff] %v335_v31 }
  0x37 PF: > { %p837_p7 = scmp.ge.s32.totalorder %s1120_s18, 1  ;;  %p349_p8 = scmp.lt.s32.totalorder %s1120_s18, 19 }
  0x39   : > { %p350_p9 = pnand %p837_p7, %p349_p8 }
  0x3a   : > { %s356_s9 = sand.u32 (!%p350_p9), 1, %s1096_s12   ;;  %s839_s10 = sshll.u32 (!%p350_p9), %s1104_s14, 1 }
  0x3b   : > { %353 = sbr.rel (%p350_p9) target bundleno = 262 (0x106), region = 66  ;;  %s838_s11 = sshll.u32 (!%p350_p9), %s356_s9, 8 }
  0x3c   : > { %p399_p10 = scmp.lt.s32.totalorder (!%p350_p9), %s839_s10, 17  ;;  %s841_s21 = sshll.u32 (!%p350_p9), %s1108_s15, 1 }
  0x3d   : > { %p409_p11 = scmp.lt.s32.totalorder (!%p350_p9), %s841_s21, 3  ;;  %s1293_s5 = scalar_lea.vmem (!%p350_p9), [#allocation3], %s838_s11 }
  0x3e   : > { %p844_p12 = scmp.ne.s32.totalorder (!%p350_p9), %s1104_s14, 0 }
  0x40   : > { %s1406_s10 = smov (!%p399_p10, %s839_s10), 17  ;;  %s1408_s21 = smov (!%p409_p11, %s841_s21), 3 }
  0x41   : > { %s840_s22 = sshll.u32 %s1406_s10, 2  ;;  %s411_s12 = scalar_lea.vmem %s1391_s2, %s1408_s21 }
  0x42   : > { %s1279_s26 = scalar_lea.vmem %s1389_s0, %s840_s22  ;;  %s843_s29 = sshll.u32 %s1408_s21, 2 }
  0x43   : > { %s1291_s15 = scalar_lea.vmem %s1392_s3, %s843_s29  ;;  %426 = sbr.rel (%p844_p12) target bundleno = 75 (0x4b), region = 74 }
  0x48   : > { %v1122_v32 = vmov 0.0  }
  0x49   : > { %427 = vst [vmem:[#allocation2] sm:$0xff] %v1122_v32 }
  0x4a   : > { %428 = vst [vmem:[#allocation2 + $0x8] sm:$0xff] %v1122_v32 }
  0x4b PF: > { %v903_v33 = vld [vmem:[%s1293_s5 + $0x70] sm:$0xf]  ;;  %v992_v34 = vld [vmem:[%s1293_s5 + $0x74] sm:$0xf0]  ;;  %v991_v38 = vld [vmem:[%s1293_s5 + $0x74] sm:$0xf] }
  0x4c   : > { %v967_v35 = vld [vmem:[%s1293_s5 + $0xf0] sm:$0xf]  ;;  %v904_v36 = vor.u32 %v992_v34, %v903_v33  ;;  %v1008_v37 = vld [vmem:[%s1293_s5 + $0xf4] sm:$0xf0]  ;;  %v905_v39 = vld [vmem:[%s1293_s5 + $0x78] sm:$0xf0] }
  0x4d   : > { %v968_v40 = vor.u32 %v1008_v37, %v967_v35  ;;  %v908_v41 = vor.u32 %v991_v38, %v905_v39  ;;  %v1007_v42 = vld [vmem:[%s1293_s5 + $0xf4] sm:$0xf]  ;;  %v969_v43 = vld [vmem:[%s1293_s5 + $0xf8] sm:$0xf0]  ;;  %v895_v44 = vld [vmem:[%s1293_s5 + $0x60] sm:$0xf] }
  0x4e   : > { %631 = vmatpush.bf16.msra.mxu0 %v904_v36  ;;  %v972_v45 = vor.u32 %v1007_v42, %v969_v43  ;;  %v990_v46 = vld [vmem:[%s1293_s5 + $0x64] sm:$0xf0]  ;;  %v959_v47 = vld [vmem:[%s1293_s5 + $0xe0] sm:$0xf]  ;;  %v989_v51 = vld [vmem:[%s1293_s5 + $0x64] sm:$0xf] }
  0x4f   : > { %v1006_v48 = vld [vmem:[%s1293_s5 + $0xe4] sm:$0xf0]  ;;  %644 = vmatpush.bf16.msra.mxu1 %v968_v40  ;;  %657 = vmatpush.bf16.msra.mxu2 %v908_v41  ;;  %v896_v49 = vor.u32 %v990_v46, %v895_v44  ;;  %v897_v52 = vld [vmem:[%s1293_s5 + $0x68] sm:$0xf0]  ;;  %v1005_v53 = vld [vmem:[%s1293_s5 + $0xe4] sm:$0xf] }
  0x50   : > { %v960_v50 = vor.u32 %v1006_v48, %v959_v47  ;;  %670 = vmatpush.bf16.msra.mxu3 %v972_v45  ;;  %v900_v54 = vor.u32 %v989_v51, %v897_v52  ;;  %v961_v55 = vld [vmem:[%s1293_s5 + $0xe8] sm:$0xf0]  ;;  %v887_v56 = vld [vmem:[%s1293_s5 + $0x50] sm:$0xf]  ;;  %v988_v57 = vld [vmem:[%s1293_s5 + $0x54] sm:$0xf0] }
  0x51   : > { %v964_v58 = vor.u32 %v1005_v53, %v961_v55  ;;  %v951_v59 = vld [vmem:[%s1293_s5 + $0xd0] sm:$0xf]  ;;  %v1004_v60 = vld [vmem:[%s1293_s5 + $0xd4] sm:$0xf0]  ;;  %v987_v61 = vld [vmem:[%s1293_s5 + $0x54] sm:$0xf]  ;;  %v888_v62 = vor.u32 %v988_v57, %v887_v56 }
  0x52   : > { %632 = vmatpush.bf16.msra.mxu0 %v896_v49  ;;  %v889_v63 = vld [vmem:[%s1293_s5 + $0x58] sm:$0xf0]  ;;  %v1003_v0 = vld [vmem:[%s1293_s5 + $0xd4] sm:$0xf]  ;;  %v952_v2 = vor.u32 %v1004_v60, %v951_v59  ;;  %v879_v4 = vld [vmem:[%s1293_s5 + $0x40] sm:$0xf] }
  0x53   : > { %v953_v1 = vld [vmem:[%s1293_s5 + $0xd8] sm:$0xf0]  ;;  %645 = vmatpush.bf16.msra.mxu1 %v960_v50  ;;  %658 = vmatpush.bf16.msra.mxu2 %v900_v54  ;;  %v892_v3 = vor.u32 %v987_v61, %v889_v63  ;;  %v986_v5 = vld [vmem:[%s1293_s5 + $0x44] sm:$0xf0]  ;;  %v943_v6 = vld [vmem:[%s1293_s5 + $0xc0] sm:$0xf] }
  0x54   : > { %671 = vmatpush.bf16.msra.mxu3 %v964_v58  ;;  %v956_v7 = vor.u32 %v1003_v0, %v953_v1  ;;  %v1002_v8 = vld [vmem:[%s1293_s5 + $0xc4] sm:$0xf0]  ;;  %v985_v9 = vld [vmem:[%s1293_s5 + $0x44] sm:$0xf]  ;;  %v881_v10 = vld [vmem:[%s1293_s5 + $0x48] sm:$0xf0]  ;;  %v880_v13 = vor.u32 %v986_v5, %v879_v4 }
  0x55   : > { %v1001_v11 = vld [vmem:[%s1293_s5 + $0xc4] sm:$0xf]  ;;  %v945_v12 = vld [vmem:[%s1293_s5 + $0xc8] sm:$0xf0]  ;;  %v944_v14 = vor.u32 %v1002_v8, %v943_v6  ;;  %v884_v15 = vor.u32 %v985_v9, %v881_v10  ;;  %v871_v16 = vld [vmem:[%s1293_s5 + $0x30] sm:$0xf] }
  0x56   : > { %633 = vmatpush.bf16.msra.mxu0 %v888_v62  ;;  %v984_v17 = vld [vmem:[%s1293_s5 + $0x34] sm:$0xf0]  ;;  %v935_v18 = vld [vmem:[%s1293_s5 + $0xb0] sm:$0xf]  ;;  %v948_v19 = vor.u32 %v1001_v11, %v945_v12  ;;  %v983_v21 = vld [vmem:[%s1293_s5 + $0x34] sm:$0xf] }
  0x57   : > { %646 = vmatpush.bf16.msra.mxu1 %v952_v2  ;;  %659 = vmatpush.bf16.msra.mxu2 %v892_v3  ;;  %v1000_v20 = vld [vmem:[%s1293_s5 + $0xb4] sm:$0xf0]  ;;  %v873_v22 = vld [vmem:[%s1293_s5 + $0x38] sm:$0xf0]  ;;  %v999_v23 = vld [vmem:[%s1293_s5 + $0xb4] sm:$0xf]  ;;  %v872_v25 = vor.u32 %v984_v17, %v871_v16 }
  0x58   : > { %672 = vmatpush.bf16.msra.mxu3 %v956_v7  ;;  %v937_v24 = vld [vmem:[%s1293_s5 + $0xb8] sm:$0xf0]  ;;  %v936_v26 = vor.u32 %v1000_v20, %v935_v18  ;;  %v876_v27 = vor.u32 %v983_v21, %v873_v22  ;;  %v863_v28 = vld [vmem:[%s1293_s5 + $0x20] sm:$0xf]  ;;  %v982_v29 = vld [vmem:[%s1293_s5 + $0x24] sm:$0xf0] }
  0x59   : > { %v927_v30 = vld [vmem:[%s1293_s5 + $0xa0] sm:$0xf]  ;;  %v940_v31 = vor.u32 %v999_v23, %v937_v24  ;;  %v998_v32 = vld [vmem:[%s1293_s5 + $0xa4] sm:$0xf0]  ;;  %v981_v33 = vld [vmem:[%s1293_s5 + $0x24] sm:$0xf]  ;;  %v864_v37 = vor.u32 %v982_v29, %v863_v28 }
  0x5a   : > { %634 = vmatpush.bf16.msra.mxu0 %v880_v13  ;;  %v865_v34 = vld [vmem:[%s1293_s5 + $0x28] sm:$0xf0]  ;;  %v997_v35 = vld [vmem:[%s1293_s5 + $0xa4] sm:$0xf]  ;;  %v928_v38 = vor.u32 %v998_v32, %v927_v30  ;;  %v855_v40 = vld [vmem:[%s1293_s5 + $0x10] sm:$0xf] }
  0x5b   : > { %647 = vmatpush.bf16.msra.mxu1 %v944_v14  ;;  %660 = vmatpush.bf16.msra.mxu2 %v884_v15  ;;  %v929_v36 = vld [vmem:[%s1293_s5 + $0xa8] sm:$0xf0]  ;;  %v868_v39 = vor.u32 %v981_v33, %v865_v34  ;;  %v980_v41 = vld [vmem:[%s1293_s5 + $0x14] sm:$0xf0]  ;;  %v919_v42 = vld [vmem:[%s1293_s5 + $0x90] sm:$0xf] }
  0x5c   : > { %673 = vmatpush.bf16.msra.mxu3 %v948_v19  ;;  %v932_v43 = vor.u32 %v997_v35, %v929_v36  ;;  %v996_v44 = vld [vmem:[%s1293_s5 + $0x94] sm:$0xf0]  ;;  %v979_v45 = vld [vmem:[%s1293_s5 + $0x14] sm:$0xf]  ;;  %v857_v46 = vld [vmem:[%s1293_s5 + $0x18] sm:$0xf0]  ;;  %v856_v49 = vor.u32 %v980_v41, %v855_v40 }
  0x5d   : > { %v995_v47 = vld [vmem:[%s1293_s5 + $0x94] sm:$0xf]  ;;  %v921_v48 = vld [vmem:[%s1293_s5 + $0x98] sm:$0xf0]  ;;  %v920_v51 = vor.u32 %v996_v44, %v919_v42  ;;  %v860_v52 = vor.u32 %v979_v45, %v857_v46  ;;  %v847_v53 = vld [vmem:[%s1293_s5] sm:$0xf] }
  0x5e   : > { %635 = vmatpush.bf16.msra.mxu0 %v872_v25  ;;  %v431_v50 = vld [vmem:[%s1279_s26] sm:$0xff]  ;;  %v978_v54 = vld [vmem:[%s1293_s5 + $0x4] sm:$0xf0]  ;;  %v911_v55 = vld [vmem:[%s1293_s5 + $0x80] sm:$0xf]  ;;  %v924_v56 = vor.u32 %v995_v47, %v921_v48  ;;  %p973_p13 = scmp.ne.s32.totalorder %s1104_s14, 8 }
  0x5f   : > { %648 = vmatpush.bf16.msra.mxu1 %v936_v26  ;;  %661 = vmatpush.bf16.msra.mxu2 %v876_v27  ;;  %v994_v57 = vld [vmem:[%s1293_s5 + $0x84] sm:$0xf0]  ;;  %v977_v58 = vld [vmem:[%s1293_s5 + $0x4] sm:$0xf]  ;;  %v849_v59 = vld [vmem:[%s1293_s5 + $0x8] sm:$0xf0]  ;;  %v465_v62 = vunpack.c.l.b16 %v431_v50  ;;  %v848_v63 = vor.u32 %v978_v54, %v847_v53  ;;  %v466_v0 = vunpack.c.h.b16 %v431_v50 }
  0x60   : > { %674 = vmatpush.bf16.msra.mxu3 %v940_v31  ;;  %v993_v60 = vld [vmem:[%s1293_s5 + $0x84] sm:$0xf]  ;;  %v913_v61 = vld [vmem:[%s1293_s5 + $0x88] sm:$0xf0]  ;;  %v912_v1 = vor.u32 %v994_v57, %v911_v55  ;;  %v852_v2 = vor.u32 %v977_v58, %v849_v59  ;;  %v429_v7 = vld [vmem:[#allocation2] sm:$0xff] }
  0x61   : > { %v916_v3 = vor.u32 %v993_v60, %v913_v61  ;;  %v467_v4 = vpack.c.b16 %v465_v62, %v465_v62  ;;  %v468_v5 = vpack.c.b16 %v466_v0, %v466_v0  ;;  %v430_v12 = vld [vmem:[#allocation2 + $0x8] sm:$0xff] }
  0x62   : > { %636 = vmatpush.bf16.msra.mxu0 %v864_v37 }
  0x63   : > { %649 = vmatpush.bf16.msra.mxu1 %v928_v38  ;;  %662 = vmatpush.bf16.msra.mxu2 %v868_v39 }
  0x64   : > { %675 = vmatpush.bf16.msra.mxu3 %v932_v43 }
  0x66   : > { %637 = vmatpush.bf16.msra.mxu0 %v856_v49 }
  0x67   : > { %650 = vmatpush.bf16.msra.mxu1 %v920_v51  ;;  %663 = vmatpush.bf16.msra.mxu2 %v860_v52 }
  0x68   : > { %676 = vmatpush.bf16.msra.mxu3 %v924_v56 }
  0x6a   : > { %638 = vmatpush.bf16.msra.mxu0 %v848_v63 }
  0x6b   : > { %651 = vmatpush.bf16.msra.mxu1 %v912_v1  ;;  %664 = vmatpush.bf16.msra.mxu2 %v852_v2 }
  0x6c   : > { %677 = vmatpush.bf16.msra.mxu3 %v916_v3 }
  0x6d   : > { %639 = vmatmul.bf16.vlgmr.msra.gmra.mxu0 %v467_v4 }
  0x6e   : > { %652 = vmatmul.bf16.vlgmr.msra.gmra.mxu1 %v468_v5  ;;  %665 = vmatmul.bf16.vlgmr.msra.gmra.mxu2 %v467_v4 }
  0x6f   : > { %678 = vmatmul.bf16.vlgmr.msra.gmra.mxu3 %v468_v5 }
  0xea   : > { %v640_v6 = vpop.f32.mrf.mxu0 }
  0xeb   : > { %v653_v8 = vpop.f32.mrf.mxu1 }
  0xec   : > { %v654_v9 = vadd.f32 %v653_v8, %v640_v6 }
  0xee   : > { %v683_v10 = vadd.f32 %v654_v9, %v429_v7 }
  0xf0   : > { %685 = vst [vmem:[#allocation2] sm:$0xff] %v683_v10 }
  0xf1   : > { %v666_v11 = vpop.f32.mrf.mxu2 }
  0xf2   : > { %v679_v13 = vpop.f32.mrf.mxu3  ;;  %v642_v14 = vpop.f32.mrf.mxu0 }
  0xf3   : > { %v680_v15 = vadd.f32 %v679_v13, %v666_v11  ;;  %v655_v16 = vpop.f32.mrf.mxu1 }
  0xf5   : > { %v684_v17 = vadd.f32 %v680_v15, %v430_v12 }
  0xf6   : > { %690 = sbr.rel (%p973_p13) target bundleno = 262 (0x106), region = 78 }
  0xf7   : > { %686 = vst [vmem:[#allocation2 + $0x8] sm:$0xff] %v684_v17 }
  0xf9   : > { %v668_v18 = vpop.f32.mrf.mxu2 }
  0xfa   : > { %v681_v19 = vpop.f32.mrf.mxu3 }
  0xfb   : > { %v691_v20 = vld [vmem:[#allocation2] sm:$0xff] }
  0xfc   : > { %v693_v22 = vld [vmem:[%s411_s12] sm:$0x3] }
  0xfd   : > { %v695_v23 = vperm.slane %v693_v22, 0  ;;  %v696_v24 = vperm.slane %v693_v22, 1 }
  0xfe   : > { %v692_v21 = vld [vmem:[#allocation2 + $0x8] sm:$0xff] }
  0xff   : > { %v699_v25 = vadd.f32 %v695_v23, %v691_v20  ;;  %v700_v26 = vadd.f32 %v696_v24, %v692_v21 }
 0x101   : > { %v701_v27 = vmax.f32 %v699_v25, 0.0  ;;  %v702_v28 = vmax.f32 %v700_v26, 0.0 }
 0x103   : > { %v703_v29 = vpack.c.bf16 %v702_v28, %v701_v27 }
 0x105   : > { %704 = vst [vmem:[%s1291_s15] sm:$0xff] %v703_v29 }
 0x106 PF: > { %s13_s18 = sadd.s32 1, %s1120_s18   ;;  %s1393_s12 = smov %s1100_s13 }
 0x107   : > { %p10_p0 = scmp.ge.s32.totalorder %s13_s18, 20   ;;  %s1394_s13 = smov %s1194_s25 }
 0x108   : > { %s1395_s14 = smov %s1112_s16  ;;  %s1396_s15 = smov %s1116_s17 }
 0x109   : > { %s1397_s16 = smov %s1400_s19  ;;  %s1398_s17 = smov %s1404_s20 }
 0x10a   :  { %12 = sbr.rel (!%p10_p0) target bundleno = 4 (0x4), region = 119 }

// kernel: _lambda_.39
= control target key start
LH: loop header
LB: loop body
LE: loop exit
PB: predicated region body
PF: predicated region fallthrough
CT: control target
= control target key end

     0   :  { %s1101_s12 = smov 0   ;;  %s1103_s13 = smov 0   ;;  %s1306_s0 = inlined_call_operand.vmem [shape: bf16[8,256], index: 0, kind: input, shape index: {}]   ;;  %s1307_s1 = inlined_call_operand.vmem [shape: bf16[256,512], index: 1, kind: input, shape index: {}]   ;;  %s1308_s2 = inlined_call_operand.vmem [shape: f32[1,512], index: 2, kind: input, shape index: {}]   ;;  %s1309_s3 = inlined_call_operand.vmem [shape: bf16[8,512], index: 3, kind: output, shape index: {}]  }
   0x1   :  { %s1105_s14 = smov 0   ;;  %s1107_s15 = smov 0  }
   0x2   :  { %s1109_s16 = smov 0  }
   0x3 LB: > { %s28_s17 = sadd.s32 1, %s1075_s15  ;;  %p76_p1 = scmp.ne.s32.totalorder %s1067_s13, %s1063_s12  ;;  %s1079_s16 = sphi %s1109_s16, %s13_s16   ;;  %s1075_s15 = sphi %s1107_s15, %s1313_s15   ;;  %s1071_s14 = sphi %s1105_s14, %s1312_s14   ;;  %s1067_s13 = sphi %s1103_s13, %s1311_s13   ;;  %s1063_s12 = sphi %s1101_s12, %s1310_s12  }
   0x4   : > { %p30_p0 = scmp.ge.s32.totalorder %s28_s17, 2  ;;  %p77_p2 = scmp.eq.s32.totalorder %s1079_s16, 0 }
   0x5   : > { %s69_s19 = sadd.s32 1, %s1067_s13  ;;  %p829_p5 = scmp.ge.s32.totalorder %s1079_s16, 2 }
   0x6   : > { %s1315_s17 = smov (%p30_p0, %s28_s17), 0  ;;  %p78_p3 = por %p77_p2, %p76_p1 }
   0x7   : > { %s65_s18 = ssub.s32 %s1075_s15, %s1315_s17  ;;  %169 = sbr.rel (%p829_p5) target bundleno = 48 (0x30), region = 20 }
   0x8   : > { %p67_p4 = scmp.eq.s32.totalorder %s65_s18, 0 }
   0xa   : > { %s1136_s20 = scalar_select %p67_p4, %s1067_s13, %s69_s19  }
   0xc   : > { %172 = sbr.rel (!%p78_p3) target bundleno = 48 (0x30), region = 24  ;;  %s174_s21 = sand.u32 (%p78_p3), 1, %s1067_s13  }
   0xd   : > { %s968_s22 = sshll.u32 (%p78_p3), %s1075_s15, 3  ;;  %s830_s23 = sshll.u32 (%p78_p3), %s174_s21, 8 }
   0xe   : > { %s1144_s26 = scalar_lea.vmem (%p78_p3), %s1307_s1, %s968_s22  ;;  %s1149_s27 = scalar_lea.vmem (%p78_p3), [#allocation3], %s830_s23 }
   0xf   : > { %v273_v0 = vld [vmem:[%s1144_s26] sm:$0xff] (%p78_p3)  ;;  %v275_v1 = vld [vmem:[%s1144_s26 + $0x10] sm:$0xff] (%p78_p3) }
  0x10   : > { %v277_v2 = vld [vmem:[%s1144_s26 + $0x20] sm:$0xff] (%p78_p3)  ;;  %274 = vst [vmem:[%s1149_s27] sm:$0xff] (%p78_p3), %v273_v0  ;;  %v279_v3 = vld [vmem:[%s1144_s26 + $0x30] sm:$0xff] (%p78_p3) }
  0x11   : > { %276 = vst [vmem:[%s1149_s27 + $0x8] sm:$0xff] %v275_v1  ;;  %v281_v4 = vld [vmem:[%s1144_s26 + $0x40] sm:$0xff]  ;;  %v283_v5 = vld [vmem:[%s1144_s26 + $0x50] sm:$0xff] }
  0x12   : > { %278 = vst [vmem:[%s1149_s27 + $0x10] sm:$0xff] %v277_v2  ;;  %v285_v6 = vld [vmem:[%s1144_s26 + $0x60] sm:$0xff]  ;;  %v287_v7 = vld [vmem:[%s1144_s26 + $0x70] sm:$0xff] }
  0x13   : > { %280 = vst [vmem:[%s1149_s27 + $0x18] sm:$0xff] %v279_v3  ;;  %v289_v8 = vld [vmem:[%s1144_s26 + $0x80] sm:$0xff]  ;;  %v291_v9 = vld [vmem:[%s1144_s26 + $0x90] sm:$0xff] }
  0x14   : > { %282 = vst [vmem:[%s1149_s27 + $0x20] sm:$0xff] %v281_v4  ;;  %v293_v10 = vld [vmem:[%s1144_s26 + $0xa0] sm:$0xff]  ;;  %v295_v11 = vld [vmem:[%s1144_s26 + $0xb0] sm:$0xff] }
  0x15   : > { %284 = vst [vmem:[%s1149_s27 + $0x28] sm:$0xff] %v283_v5  ;;  %v297_v12 = vld [vmem:[%s1144_s26 + $0xc0] sm:$0xff]  ;;  %v299_v13 = vld [vmem:[%s1144_s26 + $0xd0] sm:$0xff] }
  0x16   : > { %286 = vst [vmem:[%s1149_s27 + $0x30] sm:$0xff] %v285_v6  ;;  %v301_v14 = vld [vmem:[%s1144_s26 + $0xe0] sm:$0xff]  ;;  %v303_v15 = vld [vmem:[%s1144_s26 + $0xf0] sm:$0xff] }
  0x17   : > { %288 = vst [vmem:[%s1149_s27 + $0x38] sm:$0xff] %v287_v7  ;;  %v305_v16 = vld [vmem:[%s1144_s26 + $0x100] sm:$0xff]  ;;  %v307_v17 = vld [vmem:[%s1144_s26 + $0x110] sm:$0xff] }
  0x18   : > { %290 = vst [vmem:[%s1149_s27 + $0x40] sm:$0xff] %v289_v8  ;;  %v309_v18 = vld [vmem:[%s1144_s26 + $0x120] sm:$0xff]  ;;  %v311_v19 = vld [vmem:[%s1144_s26 + $0x130] sm:$0xff] }
  0x19   : > { %292 = vst [vmem:[%s1149_s27 + $0x48] sm:$0xff] %v291_v9  ;;  %v313_v20 = vld [vmem:[%s1144_s26 + $0x140] sm:$0xff]  ;;  %v315_v21 = vld [vmem:[%s1144_s26 + $0x150] sm:$0xff] }
  0x1a   : > { %294 = vst [vmem:[%s1149_s27 + $0x50] sm:$0xff] %v293_v10  ;;  %v317_v22 = vld [vmem:[%s1144_s26 + $0x160] sm:$0xff]  ;;  %v319_v23 = vld [vmem:[%s1144_s26 + $0x170] sm:$0xff] }
  0x1b   : > { %296 = vst [vmem:[%s1149_s27 + $0x58] sm:$0xff] %v295_v11  ;;  %v321_v24 = vld [vmem:[%s1144_s26 + $0x180] sm:$0xff]  ;;  %v323_v25 = vld [vmem:[%s1144_s26 + $0x190] sm:$0xff] }
  0x1c   : > { %298 = vst [vmem:[%s1149_s27 + $0x60] sm:$0xff] %v297_v12  ;;  %v325_v26 = vld [vmem:[%s1144_s26 + $0x1a0] sm:$0xff]  ;;  %v327_v27 = vld [vmem:[%s1144_s26 + $0x1b0] sm:$0xff] }
  0x1d   : > { %300 = vst [vmem:[%s1149_s27 + $0x68] sm:$0xff] %v299_v13  ;;  %v329_v28 = vld [vmem:[%s1144_s26 + $0x1c0] sm:$0xff]  ;;  %v331_v29 = vld [vmem:[%s1144_s26 + $0x1d0] sm:$0xff] }
  0x1e   : > { %302 = vst [vmem:[%s1149_s27 + $0x70] sm:$0xff] %v301_v14  ;;  %v333_v30 = vld [vmem:[%s1144_s26 + $0x1e0] sm:$0xff]  ;;  %v335_v31 = vld [vmem:[%s1144_s26 + $0x1f0] sm:$0xff] }
  0x1f   : > { %304 = vst [vmem:[%s1149_s27 + $0x78] sm:$0xff] %v303_v15 }
  0x20   : > { %306 = vst [vmem:[%s1149_s27 + $0x80] sm:$0xff] %v305_v16 }
  0x21   : > { %308 = vst [vmem:[%s1149_s27 + $0x88] sm:$0xff] %v307_v17 }
  0x22   : > { %310 = vst [vmem:[%s1149_s27 + $0x90] sm:$0xff] %v309_v18 }
  0x23   : > { %312 = vst [vmem:[%s1149_s27 + $0x98] sm:$0xff] %v311_v19 }
  0x24   : > { %314 = vst [vmem:[%s1149_s27 + $0xa0] sm:$0xff] %v313_v20 }
  0x25   : > { %316 = vst [vmem:[%s1149_s27 + $0xa8] sm:$0xff] %v315_v21 }
  0x26   : > { %318 = vst [vmem:[%s1149_s27 + $0xb0] sm:$0xff] %v317_v22 }
  0x27   : > { %320 = vst [vmem:[%s1149_s27 + $0xb8] sm:$0xff] %v319_v23 }
  0x28   : > { %322 = vst [vmem:[%s1149_s27 + $0xc0] sm:$0xff] %v321_v24 }
  0x29   : > { %324 = vst [vmem:[%s1149_s27 + $0xc8] sm:$0xff] %v323_v25 }
  0x2a   : > { %326 = vst [vmem:[%s1149_s27 + $0xd0] sm:$0xff] %v325_v26 }
  0x2b   : > { %328 = vst [vmem:[%s1149_s27 + $0xd8] sm:$0xff] %v327_v27 }
  0x2c   : > { %330 = vst [vmem:[%s1149_s27 + $0xe0] sm:$0xff] %v329_v28 }
  0x2d   : > { %332 = vst [vmem:[%s1149_s27 + $0xe8] sm:$0xff] %v331_v29 }
  0x2e   : > { %334 = vst [vmem:[%s1149_s27 + $0xf0] sm:$0xff] %v333_v30 }
  0x2f   : > { %336 = vst [vmem:[%s1149_s27 + $0xf8] sm:$0xff] %v335_v31 }
  0x30 PF: > { %p833_p6 = scmp.ge.s32.totalorder %s1079_s16, 1  ;;  %p349_p7 = scmp.lt.s32.totalorder %s1079_s16, 3 }
  0x32   : > { %p350_p8 = pnand %p833_p6, %p349_p7 }
  0x33   : > { %s356_s28 = sand.u32 (!%p350_p8), 1, %s1063_s12   ;;  %s835_s6 = sshll.u32 (!%p350_p8), %s1071_s14, 1 }
  0x34   : > { %353 = sbr.rel (%p350_p8) target bundleno = 233 (0xe9), region = 66  ;;  %s834_s29 = sshll.u32 (!%p350_p8), %s356_s28, 8 }
  0x35   : > { %s1215_s30 = scalar_lea.vmem (!%p350_p8), [#allocation3], %s834_s29  ;;  %p409_p9 = scmp.lt.s32.totalorder (!%p350_p8), %s835_s6, 3 }
  0x39   : > { %v896_v32 = vld [vmem:[%s1215_s30 + $0x70] sm:$0xf]  ;;  %v984_v33 = vld [vmem:[%s1215_s30 + $0x74] sm:$0xf0]  ;;  %v983_v37 = vld [vmem:[%s1215_s30 + $0x74] sm:$0xf] }
  0x3a   : > { %v960_v34 = vld [vmem:[%s1215_s30 + $0xf0] sm:$0xf]  ;;  %v897_v35 = vor.u32 %v984_v33, %v896_v32  ;;  %v1000_v36 = vld [vmem:[%s1215_s30 + $0xf4] sm:$0xf0]  ;;  %v898_v38 = vld [vmem:[%s1215_s30 + $0x78] sm:$0xf0] }
  0x3b   : > { %v961_v39 = vor.u32 %v1000_v36, %v960_v34  ;;  %v901_v40 = vor.u32 %v983_v37, %v898_v38  ;;  %v999_v41 = vld [vmem:[%s1215_s30 + $0xf4] sm:$0xf]  ;;  %v962_v42 = vld [vmem:[%s1215_s30 + $0xf8] sm:$0xf0]  ;;  %v888_v43 = vld [vmem:[%s1215_s30 + $0x60] sm:$0xf] }
  0x3c   : > { %631 = vmatpush.bf16.msra.mxu0 %v897_v35  ;;  %v965_v44 = vor.u32 %v999_v41, %v962_v42  ;;  %v982_v45 = vld [vmem:[%s1215_s30 + $0x64] sm:$0xf0]  ;;  %v952_v46 = vld [vmem:[%s1215_s30 + $0xe0] sm:$0xf]  ;;  %v981_v50 = vld [vmem:[%s1215_s30 + $0x64] sm:$0xf] }
  0x3d   : > { %v998_v47 = vld [vmem:[%s1215_s30 + $0xe4] sm:$0xf0]  ;;  %644 = vmatpush.bf16.msra.mxu1 %v961_v39  ;;  %657 = vmatpush.bf16.msra.mxu2 %v901_v40  ;;  %v889_v48 = vor.u32 %v982_v45, %v888_v43  ;;  %v890_v51 = vld [vmem:[%s1215_s30 + $0x68] sm:$0xf0]  ;;  %v997_v52 = vld [vmem:[%s1215_s30 + $0xe4] sm:$0xf] }
  0x3e   : > { %v953_v49 = vor.u32 %v998_v47, %v952_v46  ;;  %670 = vmatpush.bf16.msra.mxu3 %v965_v44  ;;  %v893_v53 = vor.u32 %v981_v50, %v890_v51  ;;  %v954_v54 = vld [vmem:[%s1215_s30 + $0xe8] sm:$0xf0]  ;;  %v880_v55 = vld [vmem:[%s1215_s30 + $0x50] sm:$0xf]  ;;  %v980_v56 = vld [vmem:[%s1215_s30 + $0x54] sm:$0xf0] }
  0x3f   : > { %v957_v57 = vor.u32 %v997_v52, %v954_v54  ;;  %v944_v58 = vld [vmem:[%s1215_s30 + $0xd0] sm:$0xf]  ;;  %v996_v59 = vld [vmem:[%s1215_s30 + $0xd4] sm:$0xf0]  ;;  %v979_v60 = vld [vmem:[%s1215_s30 + $0x54] sm:$0xf]  ;;  %v881_v61 = vor.u32 %v980_v56, %v880_v55 }
  0x40   : > { %632 = vmatpush.bf16.msra.mxu0 %v889_v48  ;;  %v882_v62 = vld [vmem:[%s1215_s30 + $0x58] sm:$0xf0]  ;;  %v995_v63 = vld [vmem:[%s1215_s30 + $0xd4] sm:$0xf]  ;;  %v945_v1 = vor.u32 %v996_v59, %v944_v58  ;;  %v872_v3 = vld [vmem:[%s1215_s30 + $0x40] sm:$0xf] }
  0x41   : > { %v946_v0 = vld [vmem:[%s1215_s30 + $0xd8] sm:$0xf0]  ;;  %645 = vmatpush.bf16.msra.mxu1 %v953_v49  ;;  %658 = vmatpush.bf16.msra.mxu2 %v893_v53  ;;  %v885_v2 = vor.u32 %v979_v60, %v882_v62  ;;  %v978_v4 = vld [vmem:[%s1215_s30 + $0x44] sm:$0xf0]  ;;  %v936_v5 = vld [vmem:[%s1215_s30 + $0xc0] sm:$0xf] }
  0x42   : > { %671 = vmatpush.bf16.msra.mxu3 %v957_v57  ;;  %v949_v6 = vor.u32 %v995_v63, %v946_v0  ;;  %v994_v7 = vld [vmem:[%s1215_s30 + $0xc4] sm:$0xf0]  ;;  %v977_v8 = vld [vmem:[%s1215_s30 + $0x44] sm:$0xf]  ;;  %v874_v9 = vld [vmem:[%s1215_s30 + $0x48] sm:$0xf0]  ;;  %v873_v12 = vor.u32 %v978_v4, %v872_v3 }
  0x43   : > { %v993_v10 = vld [vmem:[%s1215_s30 + $0xc4] sm:$0xf]  ;;  %v938_v11 = vld [vmem:[%s1215_s30 + $0xc8] sm:$0xf0]  ;;  %v937_v13 = vor.u32 %v994_v7, %v936_v5  ;;  %v877_v14 = vor.u32 %v977_v8, %v874_v9  ;;  %v864_v15 = vld [vmem:[%s1215_s30 + $0x30] sm:$0xf] }
  0x44   : > { %633 = vmatpush.bf16.msra.mxu0 %v881_v61  ;;  %v976_v16 = vld [vmem:[%s1215_s30 + $0x34] sm:$0xf0]  ;;  %v928_v17 = vld [vmem:[%s1215_s30 + $0xb0] sm:$0xf]  ;;  %v941_v18 = vor.u32 %v993_v10, %v938_v11  ;;  %v975_v20 = vld [vmem:[%s1215_s30 + $0x34] sm:$0xf] }
  0x45   : > { %646 = vmatpush.bf16.msra.mxu1 %v945_v1  ;;  %659 = vmatpush.bf16.msra.mxu2 %v885_v2  ;;  %v992_v19 = vld [vmem:[%s1215_s30 + $0xb4] sm:$0xf0]  ;;  %v866_v21 = vld [vmem:[%s1215_s30 + $0x38] sm:$0xf0]  ;;  %v991_v22 = vld [vmem:[%s1215_s30 + $0xb4] sm:$0xf]  ;;  %v865_v24 = vor.u32 %v976_v16, %v864_v15 }
  0x46   : > { %672 = vmatpush.bf16.msra.mxu3 %v949_v6  ;;  %v930_v23 = vld [vmem:[%s1215_s30 + $0xb8] sm:$0xf0]  ;;  %v929_v25 = vor.u32 %v992_v19, %v928_v17  ;;  %v869_v26 = vor.u32 %v975_v20, %v866_v21  ;;  %v856_v27 = vld [vmem:[%s1215_s30 + $0x20] sm:$0xf]  ;;  %v974_v28 = vld [vmem:[%s1215_s30 + $0x24] sm:$0xf0] }
  0x47   : > { %v920_v29 = vld [vmem:[%s1215_s30 + $0xa0] sm:$0xf]  ;;  %v933_v30 = vor.u32 %v991_v22, %v930_v23  ;;  %v990_v31 = vld [vmem:[%s1215_s30 + $0xa4] sm:$0xf0]  ;;  %v973_v32 = vld [vmem:[%s1215_s30 + $0x24] sm:$0xf]  ;;  %v857_v36 = vor.u32 %v974_v28, %v856_v27 }
  0x48   : > { %634 = vmatpush.bf16.msra.mxu0 %v873_v12  ;;  %v858_v33 = vld [vmem:[%s1215_s30 + $0x28] sm:$0xf0]  ;;  %v989_v34 = vld [vmem:[%s1215_s30 + $0xa4] sm:$0xf]  ;;  %v921_v37 = vor.u32 %v990_v31, %v920_v29  ;;  %v848_v39 = vld [vmem:[%s1215_s30 + $0x10] sm:$0xf] }
  0x49   : > { %647 = vmatpush.bf16.msra.mxu1 %v937_v13  ;;  %660 = vmatpush.bf16.msra.mxu2 %v877_v14  ;;  %v922_v35 = vld [vmem:[%s1215_s30 + $0xa8] sm:$0xf0]  ;;  %v861_v38 = vor.u32 %v973_v32, %v858_v33  ;;  %v972_v40 = vld [vmem:[%s1215_s30 + $0x14] sm:$0xf0]  ;;  %v912_v41 = vld [vmem:[%s1215_s30 + $0x90] sm:$0xf] }
  0x4a   : > { %673 = vmatpush.bf16.msra.mxu3 %v941_v18  ;;  %v925_v42 = vor.u32 %v989_v34, %v922_v35  ;;  %v988_v43 = vld [vmem:[%s1215_s30 + $0x94] sm:$0xf0]  ;;  %v971_v44 = vld [vmem:[%s1215_s30 + $0x14] sm:$0xf]  ;;  %v850_v45 = vld [vmem:[%s1215_s30 + $0x18] sm:$0xf0]  ;;  %v849_v48 = vor.u32 %v972_v40, %v848_v39 }
  0x4b   : > { %v987_v46 = vld [vmem:[%s1215_s30 + $0x94] sm:$0xf]  ;;  %v914_v47 = vld [vmem:[%s1215_s30 + $0x98] sm:$0xf0]  ;;  %v431_v49 = vld [vmem:[%s1306_s0] sm:$0xff]  ;;  %v913_v50 = vor.u32 %v988_v43, %v912_v41  ;;  %v853_v51 = vor.u32 %v971_v44, %v850_v45  ;;  %s1317_s6 = smov (!%p409_p9, %s835_s6), 3 }
  0x4c   : > { %635 = vmatpush.bf16.msra.mxu0 %v865_v24  ;;  %v840_v52 = vld [vmem:[%s1215_s30] sm:$0xf]  ;;  %v970_v53 = vld [vmem:[%s1215_s30 + $0x4] sm:$0xf0]  ;;  %v917_v55 = vor.u32 %v987_v46, %v914_v47  ;;  %v969_v57 = vld [vmem:[%s1215_s30 + $0x4] sm:$0xf]  ;;  %v465_v61 = vunpack.c.l.b16 %v431_v49  ;;  %v466_v63 = vunpack.c.h.b16 %v431_v49  ;;  %s411_s9 = scalar_lea.vmem %s1308_s2, %s1317_s6 }
  0x4d   : > { %648 = vmatpush.bf16.msra.mxu1 %v929_v25  ;;  %661 = vmatpush.bf16.msra.mxu2 %v869_v26  ;;  %v904_v54 = vld [vmem:[%s1215_s30 + $0x80] sm:$0xf]  ;;  %v986_v56 = vld [vmem:[%s1215_s30 + $0x84] sm:$0xf0]  ;;  %v842_v58 = vld [vmem:[%s1215_s30 + $0x8] sm:$0xf0]  ;;  %v841_v62 = vor.u32 %v970_v53, %v840_v52 }
  0x4e   : > { %674 = vmatpush.bf16.msra.mxu3 %v933_v30  ;;  %v985_v59 = vld [vmem:[%s1215_s30 + $0x84] sm:$0xf]  ;;  %v906_v60 = vld [vmem:[%s1215_s30 + $0x88] sm:$0xf0]  ;;  %v905_v0 = vor.u32 %v986_v56, %v904_v54  ;;  %v845_v1 = vor.u32 %v969_v57, %v842_v58  ;;  %v467_v3 = vpack.c.b16 %v465_v61, %v465_v61  ;;  %v468_v4 = vpack.c.b16 %v466_v63, %v466_v63  ;;  %v692_v7 = vld [vmem:[%s411_s9] sm:$0x3] }
  0x4f   : > { %v909_v2 = vor.u32 %v985_v59, %v906_v60  ;;  %v694_v9 = vperm.slane %v692_v7, 0  ;;  %v695_v11 = vperm.slane %v692_v7, 1  ;;  %s837_s10 = sshll.u32 %s1317_s6, 2 }
  0x50   : > { %636 = vmatpush.bf16.msra.mxu0 %v857_v36  ;;  %s421_s14 = scalar_lea.vmem %s1309_s3, %s837_s10 }
  0x51   : > { %649 = vmatpush.bf16.msra.mxu1 %v921_v37  ;;  %662 = vmatpush.bf16.msra.mxu2 %v861_v38 }
  0x52   : > { %675 = vmatpush.bf16.msra.mxu3 %v925_v42 }
  0x54   : > { %637 = vmatpush.bf16.msra.mxu0 %v849_v48 }
  0x55   : > { %650 = vmatpush.bf16.msra.mxu1 %v913_v50  ;;  %663 = vmatpush.bf16.msra.mxu2 %v853_v51 }
  0x56   : > { %676 = vmatpush.bf16.msra.mxu3 %v917_v55 }
  0x58   : > { %638 = vmatpush.bf16.msra.mxu0 %v841_v62 }
  0x59   : > { %651 = vmatpush.bf16.msra.mxu1 %v905_v0  ;;  %664 = vmatpush.bf16.msra.mxu2 %v845_v1 }
  0x5a   : > { %677 = vmatpush.bf16.msra.mxu3 %v909_v2 }
  0x5b   : > { %639 = vmatmul.bf16.vlgmr.msra.gmra.mxu0 %v467_v3 }
  0x5c   : > { %652 = vmatmul.bf16.vlgmr.msra.gmra.mxu1 %v468_v4  ;;  %665 = vmatmul.bf16.vlgmr.msra.gmra.mxu2 %v467_v3 }
  0x5d   : > { %678 = vmatmul.bf16.vlgmr.msra.gmra.mxu3 %v468_v4 }
  0xd8   : > { %v640_v5 = vpop.f32.mrf.mxu0 }
  0xd9   : > { %v653_v6 = vpop.f32.mrf.mxu1 }
  0xda   : > { %v654_v8 = vadd.f32 %v653_v6, %v640_v5 }
  0xdc   : > { %v698_v14 = vadd.f32 %v694_v9, %v654_v8 }
  0xdf   : > { %v666_v10 = vpop.f32.mrf.mxu2 }
  0xe0   : > { %v679_v12 = vpop.f32.mrf.mxu3  ;;  %v642_v13 = vpop.f32.mrf.mxu0 }
  0xe1   : > { %v680_v15 = vadd.f32 %v679_v12, %v666_v10  ;;  %v655_v16 = vpop.f32.mrf.mxu1 }
  0xe3   : > { %v699_v17 = vadd.f32 %v695_v11, %v680_v15 }
  0xe5   : > { %v700_v18 = vpack.c.bf16 %v699_v17, %v698_v14 }
  0xe7   : > { %701 = vst [vmem:[%s421_s14] sm:$0xff] %v700_v18  ;;  %v668_v19 = vpop.f32.mrf.mxu2 }
  0xe8   : > { %v681_v20 = vpop.f32.mrf.mxu3 }
  0xe9 PF: > { %s13_s16 = sadd.s32 1, %s1079_s16   ;;  %s1310_s12 = smov %s1067_s13 }
  0xea   : > { %p10_p10 = scmp.ge.s32.totalorder %s13_s16, 4   ;;  %s1311_s13 = smov %s1136_s20 }
  0xeb   : > { %s1312_s14 = smov %s1075_s15  ;;  %s1313_s15 = smov %s1315_s17 }
  0xec   :  { %12 = sbr.rel (!%p10_p10) target bundleno = 3 (0x3), region = 119 }

// kernel: _lambda_.40
= control target key start
LH: loop header
LB: loop body
LE: loop exit
PB: predicated region body
PF: predicated region fallthrough
CT: control target
= control target key end

     0   :  { %s1776_s15 = smov 0   ;;  %s1778_s16 = smov 0   ;;  %s2173_s0 = inlined_call_operand.vmem [shape: bf16[8,4608], index: 0, kind: input, shape index: {}]   ;;  %s2174_s1 = inlined_call_operand.vmem [shape: bf16[4608,512], index: 1, kind: input, shape index: {}]   ;;  %s2175_s2 = inlined_call_operand.vmem [shape: f32[1,512], index: 2, kind: input, shape index: {}]   ;;  %s2176_s3 = inlined_call_operand.vmem [shape: bf16[8,512], index: 3, kind: input, shape index: {}]   ;;  %s2177_s4 = inlined_call_operand.vmem [shape: bf16[8,512], index: 4, kind: output, shape index: {}]  }
   0x1   :  { %s1780_s17 = smov 0   ;;  %s1782_s18 = smov 0  }
   0x2   :  { %s1784_s19 = smov 0   ;;  %s1786_s20 = smov 0  }
   0x3   :  { %s1788_s21 = smov 0  }
   0x4 LB: > { %s26_s22 = sadd.s32 1, %s1740_s19  ;;  %s29_s23 = sadd.s32 1, %s1744_s20  ;;  %s1748_s21 = sphi %s1788_s21, %s14_s21   ;;  %s1744_s20 = sphi %s1786_s20, %s2183_s20   ;;  %s1740_s19 = sphi %s1784_s19, %s2182_s19   ;;  %s1736_s18 = sphi %s1782_s18, %s2181_s18   ;;  %s1732_s17 = sphi %s1780_s17, %s2180_s17   ;;  %s1728_s16 = sphi %s1778_s16, %s2179_s16   ;;  %s1724_s15 = sphi %s1776_s15, %s2178_s15  }
   0x5   : > { %p27_p0 = scmp.ge.s32.totalorder %s26_s22, 9  ;;  %p77_p1 = scmp.ne.s32.totalorder %s1728_s16, %s1724_s15 }
   0x6   : > { %p78_p2 = scmp.eq.s32.totalorder %s1748_s21, 0  ;;  %s70_s27 = sadd.s32 1, %s1728_s16 }
   0x7   : > { %s2185_s22 = smov (%p27_p0, %s26_s22), 0  ;;  %s2187_s23 = smov (!%p27_p0, %s29_s23), %s1744_s20 }
   0x8   : > { %p79_p3 = por %p78_p2, %p77_p1  ;;  %p31_p4 = scmp.ge.s32.totalorder %s2187_s23, 2 }
   0x9   : > { %s65_s24 = ssub.s32 %s1740_s19, %s2185_s22  ;;  %p1297_p6 = scmp.ge.s32.totalorder %s1748_s21, 18 }
   0xa   : > { %s2189_s23 = smov (%p31_p4, %s2187_s23), 0 }
   0xb   : > { %s66_s25 = ssub.s32 %s1744_s20, %s2189_s23  ;;  %185 = sbr.rel (%p1297_p6) target bundleno = 87 (0x57), region = 16 }
   0xc   : > { %s67_s26 = sor.u32 %s66_s25, %s65_s24 }
   0xd   : > { %p68_p5 = scmp.eq.s32.totalorder %s67_s26, 0 }
   0xf   : > { %s1827_s28 = scalar_select %p68_p5, %s1728_s16, %s70_s27  }
  0x10   : > { %201 = sbr.rel (!%p79_p3) target bundleno = 87 (0x57), region = 24  ;;  %s203_s29 = sand.u32 (%p79_p3), 1, %s1728_s16  }
  0x11   : > { %s1300_s30 = sshll.u32 (%p79_p3), %s1744_s20, 1  ;;  %s1298_s5 = sshll.u32 (%p79_p3), %s203_s29, 9 }
  0x12   : > { %s1572_s6 = sshll.u32 (%p79_p3), %s1740_s19, 8  ;;  %s1841_s12 = scalar_lea.vmem (%p79_p3), [#allocation3], %s1298_s5 }
  0x13   : > { %s209_s7 = sadd.s32 (%p79_p3), %s1572_s6, %s1300_s30 }
  0x14   : > { %s1302_s8 = sshll.u32 (%p79_p3), %s209_s7, 2 }
  0x15   : > { %s1836_s11 = scalar_lea.vmem %s2174_s1, %s1302_s8 }
  0x16   : > { %v366_v0 = vld [vmem:[%s1836_s11] sm:$0xff]  ;;  %v368_v1 = vld [vmem:[%s1836_s11 + $0x10] sm:$0xff] }
  0x17   : > { %v370_v2 = vld [vmem:[%s1836_s11 + $0x20] sm:$0xff]  ;;  %367 = vst [vmem:[%s1841_s12] sm:$0xff] %v366_v0  ;;  %v372_v3 = vld [vmem:[%s1836_s11 + $0x30] sm:$0xff] }
  0x18   : > { %369 = vst [vmem:[%s1841_s12 + $0x8] sm:$0xff] %v368_v1  ;;  %v374_v4 = vld [vmem:[%s1836_s11 + $0x40] sm:$0xff]  ;;  %v376_v5 = vld [vmem:[%s1836_s11 + $0x50] sm:$0xff] }
  0x19   : > { %371 = vst [vmem:[%s1841_s12 + $0x10] sm:$0xff] %v370_v2  ;;  %v378_v6 = vld [vmem:[%s1836_s11 + $0x60] sm:$0xff]  ;;  %v380_v7 = vld [vmem:[%s1836_s11 + $0x70] sm:$0xff] }
  0x1a   : > { %373 = vst [vmem:[%s1841_s12 + $0x18] sm:$0xff] %v372_v3  ;;  %v382_v8 = vld [vmem:[%s1836_s11 + $0x80] sm:$0xff]  ;;  %v384_v9 = vld [vmem:[%s1836_s11 + $0x90] sm:$0xff] }
  0x1b   : > { %375 = vst [vmem:[%s1841_s12 + $0x20] sm:$0xff] %v374_v4  ;;  %v386_v10 = vld [vmem:[%s1836_s11 + $0xa0] sm:$0xff]  ;;  %v388_v11 = vld [vmem:[%s1836_s11 + $0xb0] sm:$0xff] }
  0x1c   : > { %377 = vst [vmem:[%s1841_s12 + $0x28] sm:$0xff] %v376_v5  ;;  %v390_v12 = vld [vmem:[%s1836_s11 + $0xc0] sm:$0xff]  ;;  %v392_v13 = vld [vmem:[%s1836_s11 + $0xd0] sm:$0xff] }
  0x1d   : > { %379 = vst [vmem:[%s1841_s12 + $0x30] sm:$0xff] %v378_v6  ;;  %v394_v14 = vld [vmem:[%s1836_s11 + $0xe0] sm:$0xff]  ;;  %v396_v15 = vld [vmem:[%s1836_s11 + $0xf0] sm:$0xff] }
  0x1e   : > { %381 = vst [vmem:[%s1841_s12 + $0x38] sm:$0xff] %v380_v7  ;;  %v398_v16 = vld [vmem:[%s1836_s11 + $0x100] sm:$0xff]  ;;  %v400_v17 = vld [vmem:[%s1836_s11 + $0x110] sm:$0xff] }
  0x1f   : > { %383 = vst [vmem:[%s1841_s12 + $0x40] sm:$0xff] %v382_v8  ;;  %v402_v18 = vld [vmem:[%s1836_s11 + $0x120] sm:$0xff]  ;;  %v404_v19 = vld [vmem:[%s1836_s11 + $0x130] sm:$0xff] }
  0x20   : > { %385 = vst [vmem:[%s1841_s12 + $0x48] sm:$0xff] %v384_v9  ;;  %v406_v20 = vld [vmem:[%s1836_s11 + $0x140] sm:$0xff]  ;;  %v408_v21 = vld [vmem:[%s1836_s11 + $0x150] sm:$0xff] }
  0x21   : > { %387 = vst [vmem:[%s1841_s12 + $0x50] sm:$0xff] %v386_v10  ;;  %v410_v22 = vld [vmem:[%s1836_s11 + $0x160] sm:$0xff]  ;;  %v412_v23 = vld [vmem:[%s1836_s11 + $0x170] sm:$0xff] }
  0x22   : > { %389 = vst [vmem:[%s1841_s12 + $0x58] sm:$0xff] %v388_v11  ;;  %v414_v24 = vld [vmem:[%s1836_s11 + $0x180] sm:$0xff]  ;;  %v416_v25 = vld [vmem:[%s1836_s11 + $0x190] sm:$0xff] }
  0x23   : > { %391 = vst [vmem:[%s1841_s12 + $0x60] sm:$0xff] %v390_v12  ;;  %v418_v26 = vld [vmem:[%s1836_s11 + $0x1a0] sm:$0xff]  ;;  %v420_v27 = vld [vmem:[%s1836_s11 + $0x1b0] sm:$0xff] }
  0x24   : > { %393 = vst [vmem:[%s1841_s12 + $0x68] sm:$0xff] %v392_v13  ;;  %v422_v28 = vld [vmem:[%s1836_s11 + $0x1c0] sm:$0xff]  ;;  %v424_v29 = vld [vmem:[%s1836_s11 + $0x1d0] sm:$0xff] }
  0x25   : > { %395 = vst [vmem:[%s1841_s12 + $0x70] sm:$0xff] %v394_v14  ;;  %v426_v30 = vld [vmem:[%s1836_s11 + $0x1e0] sm:$0xff]  ;;  %v428_v31 = vld [vmem:[%s1836_s11 + $0x1f0] sm:$0xff] }
  0x26   : > { %397 = vst [vmem:[%s1841_s12 + $0x78] sm:$0xff] %v396_v15  ;;  %v430_v32 = vld [vmem:[%s1836_s11 + $0x200] sm:$0xff]  ;;  %v432_v33 = vld [vmem:[%s1836_s11 + $0x210] sm:$0xff] }
  0x27   : > { %399 = vst [vmem:[%s1841_s12 + $0x80] sm:$0xff] %v398_v16  ;;  %v434_v34 = vld [vmem:[%s1836_s11 + $0x220] sm:$0xff]  ;;  %v436_v35 = vld [vmem:[%s1836_s11 + $0x230] sm:$0xff] }
  0x28   : > { %401 = vst [vmem:[%s1841_s12 + $0x88] sm:$0xff] %v400_v17  ;;  %v438_v36 = vld [vmem:[%s1836_s11 + $0x240] sm:$0xff]  ;;  %v440_v37 = vld [vmem:[%s1836_s11 + $0x250] sm:$0xff] }
  0x29   : > { %403 = vst [vmem:[%s1841_s12 + $0x90] sm:$0xff] %v402_v18  ;;  %v442_v38 = vld [vmem:[%s1836_s11 + $0x260] sm:$0xff]  ;;  %v444_v39 = vld [vmem:[%s1836_s11 + $0x270] sm:$0xff] }
  0x2a   : > { %405 = vst [vmem:[%s1841_s12 + $0x98] sm:$0xff] %v404_v19  ;;  %v446_v40 = vld [vmem:[%s1836_s11 + $0x280] sm:$0xff]  ;;  %v448_v41 = vld [vmem:[%s1836_s11 + $0x290] sm:$0xff] }
  0x2b   : > { %407 = vst [vmem:[%s1841_s12 + $0xa0] sm:$0xff] %v406_v20  ;;  %v450_v42 = vld [vmem:[%s1836_s11 + $0x2a0] sm:$0xff]  ;;  %v452_v43 = vld [vmem:[%s1836_s11 + $0x2b0] sm:$0xff] }
  0x2c   : > { %409 = vst [vmem:[%s1841_s12 + $0xa8] sm:$0xff] %v408_v21  ;;  %v454_v44 = vld [vmem:[%s1836_s11 + $0x2c0] sm:$0xff]  ;;  %v456_v45 = vld [vmem:[%s1836_s11 + $0x2d0] sm:$0xff] }
  0x2d   : > { %411 = vst [vmem:[%s1841_s12 + $0xb0] sm:$0xff] %v410_v22  ;;  %v458_v46 = vld [vmem:[%s1836_s11 + $0x2e0] sm:$0xff]  ;;  %v460_v47 = vld [vmem:[%s1836_s11 + $0x2f0] sm:$0xff] }
  0x2e   : > { %413 = vst [vmem:[%s1841_s12 + $0xb8] sm:$0xff] %v412_v23  ;;  %v462_v48 = vld [vmem:[%s1836_s11 + $0x300] sm:$0xff]  ;;  %v464_v49 = vld [vmem:[%s1836_s11 + $0x310] sm:$0xff] }
  0x2f   : > { %415 = vst [vmem:[%s1841_s12 + $0xc0] sm:$0xff] %v414_v24  ;;  %v466_v50 = vld [vmem:[%s1836_s11 + $0x320] sm:$0xff]  ;;  %v468_v51 = vld [vmem:[%s1836_s11 + $0x330] sm:$0xff] }
  0x30   : > { %417 = vst [vmem:[%s1841_s12 + $0xc8] sm:$0xff] %v416_v25  ;;  %v470_v52 = vld [vmem:[%s1836_s11 + $0x340] sm:$0xff]  ;;  %v472_v53 = vld [vmem:[%s1836_s11 + $0x350] sm:$0xff] }
  0x31   : > { %419 = vst [vmem:[%s1841_s12 + $0xd0] sm:$0xff] %v418_v26  ;;  %v474_v54 = vld [vmem:[%s1836_s11 + $0x360] sm:$0xff]  ;;  %v476_v55 = vld [vmem:[%s1836_s11 + $0x370] sm:$0xff] }
  0x32   : > { %421 = vst [vmem:[%s1841_s12 + $0xd8] sm:$0xff] %v420_v27  ;;  %v478_v56 = vld [vmem:[%s1836_s11 + $0x380] sm:$0xff]  ;;  %v480_v57 = vld [vmem:[%s1836_s11 + $0x390] sm:$0xff] }
  0x33   : > { %423 = vst [vmem:[%s1841_s12 + $0xe0] sm:$0xff] %v422_v28  ;;  %v482_v58 = vld [vmem:[%s1836_s11 + $0x3a0] sm:$0xff]  ;;  %v484_v59 = vld [vmem:[%s1836_s11 + $0x3b0] sm:$0xff] }
  0x34   : > { %425 = vst [vmem:[%s1841_s12 + $0xe8] sm:$0xff] %v424_v29  ;;  %v486_v60 = vld [vmem:[%s1836_s11 + $0x3c0] sm:$0xff]  ;;  %v488_v61 = vld [vmem:[%s1836_s11 + $0x3d0] sm:$0xff] }
  0x35   : > { %427 = vst [vmem:[%s1841_s12 + $0xf0] sm:$0xff] %v426_v30  ;;  %v490_v62 = vld [vmem:[%s1836_s11 + $0x3e0] sm:$0xff]  ;;  %v492_v63 = vld [vmem:[%s1836_s11 + $0x3f0] sm:$0xff] }
  0x36   : > { %429 = vst [vmem:[%s1841_s12 + $0xf8] sm:$0xff] %v428_v31 }
  0x37   : > { %431 = vst [vmem:[%s1841_s12 + $0x100] sm:$0xff] %v430_v32 }
  0x38   : > { %433 = vst [vmem:[%s1841_s12 + $0x108] sm:$0xff] %v432_v33 }
  0x39   : > { %435 = vst [vmem:[%s1841_s12 + $0x110] sm:$0xff] %v434_v34 }
  0x3a   : > { %437 = vst [vmem:[%s1841_s12 + $0x118] sm:$0xff] %v436_v35 }
  0x3b   : > { %439 = vst [vmem:[%s1841_s12 + $0x120] sm:$0xff] %v438_v36 }
  0x3c   : > { %441 = vst [vmem:[%s1841_s12 + $0x128] sm:$0xff] %v440_v37 }
  0x3d   : > { %443 = vst [vmem:[%s1841_s12 + $0x130] sm:$0xff] %v442_v38 }
  0x3e   : > { %445 = vst [vmem:[%s1841_s12 + $0x138] sm:$0xff] %v444_v39 }
  0x3f   : > { %447 = vst [vmem:[%s1841_s12 + $0x140] sm:$0xff] %v446_v40 }
  0x40   : > { %449 = vst [vmem:[%s1841_s12 + $0x148] sm:$0xff] %v448_v41 }
  0x41   : > { %451 = vst [vmem:[%s1841_s12 + $0x150] sm:$0xff] %v450_v42 }
  0x42   : > { %453 = vst [vmem:[%s1841_s12 + $0x158] sm:$0xff] %v452_v43 }
  0x43   : > { %455 = vst [vmem:[%s1841_s12 + $0x160] sm:$0xff] %v454_v44 }
  0x44   : > { %457 = vst [vmem:[%s1841_s12 + $0x168] sm:$0xff] %v456_v45 }
  0x45   : > { %459 = vst [vmem:[%s1841_s12 + $0x170] sm:$0xff] %v458_v46 }
  0x46   : > { %461 = vst [vmem:[%s1841_s12 + $0x178] sm:$0xff] %v460_v47 }
  0x47   : > { %463 = vst [vmem:[%s1841_s12 + $0x180] sm:$0xff] %v462_v48 }
  0x48   : > { %465 = vst [vmem:[%s1841_s12 + $0x188] sm:$0xff] %v464_v49 }
  0x49   : > { %467 = vst [vmem:[%s1841_s12 + $0x190] sm:$0xff] %v466_v50 }
  0x4a   : > { %469 = vst [vmem:[%s1841_s12 + $0x198] sm:$0xff] %v468_v51 }
  0x4b   : > { %471 = vst [vmem:[%s1841_s12 + $0x1a0] sm:$0xff] %v470_v52 }
  0x4c   : > { %473 = vst [vmem:[%s1841_s12 + $0x1a8] sm:$0xff] %v472_v53 }
  0x4d   : > { %475 = vst [vmem:[%s1841_s12 + $0x1b0] sm:$0xff] %v474_v54 }
  0x4e   : > { %477 = vst [vmem:[%s1841_s12 + $0x1b8] sm:$0xff] %v476_v55 }
  0x4f   : > { %479 = vst [vmem:[%s1841_s12 + $0x1c0] sm:$0xff] %v478_v56 }
  0x50   : > { %481 = vst [vmem:[%s1841_s12 + $0x1c8] sm:$0xff] %v480_v57 }
  0x51   : > { %483 = vst [vmem:[%s1841_s12 + $0x1d0] sm:$0xff] %v482_v58 }
  0x52   : > { %485 = vst [vmem:[%s1841_s12 + $0x1d8] sm:$0xff] %v484_v59 }
  0x53   : > { %487 = vst [vmem:[%s1841_s12 + $0x1e0] sm:$0xff] %v486_v60 }
  0x54   : > { %489 = vst [vmem:[%s1841_s12 + $0x1e8] sm:$0xff] %v488_v61 }
  0x55   : > { %491 = vst [vmem:[%s1841_s12 + $0x1f0] sm:$0xff] %v490_v62 }
  0x56   : > { %493 = vst [vmem:[%s1841_s12 + $0x1f8] sm:$0xff] %v492_v63 }
  0x57 PF: > { %p1303_p7 = scmp.ge.s32.totalorder %s1748_s21, 1  ;;  %p519_p8 = scmp.lt.s32.totalorder %s1748_s21, 19 }
  0x59   : > { %p520_p9 = pnand %p1303_p7, %p519_p8 }
  0x5a   : > { %s526_s13 = sand.u32 (!%p520_p9), 1, %s1724_s15   ;;  %s1305_s14 = sshll.u32 (!%p520_p9), %s1732_s17, 2 }
  0x5b   : > { %523 = sbr.rel (%p520_p9) target bundleno = 331 (0x14b), region = 70  ;;  %s1304_s24 = sshll.u32 (!%p520_p9), %s526_s13, 9 }
  0x5c   : > { %p580_p10 = scmp.lt.s32.totalorder (!%p520_p9), %s1305_s14, 35  ;;  %s1307_s25 = sshll.u32 (!%p520_p9), %s1736_s18, 1 }
  0x5d   : > { %p590_p11 = scmp.lt.s32.totalorder (!%p520_p9), %s1307_s25, 3  ;;  %s1995_s13 = scalar_lea.vmem (!%p520_p9), [#allocation3], %s1304_s24 }
  0x5e   : > { %p1312_p12 = scmp.ne.s32.totalorder (!%p520_p9), %s1732_s17, 0 }
  0x60   : > { %s2191_s14 = smov (!%p580_p10, %s1305_s14), 35  ;;  %s2193_s25 = smov (!%p590_p11, %s1307_s25), 3 }
  0x61   : > { %s1306_s26 = sshll.u32 %s2191_s14, 2  ;;  %s592_s15 = scalar_lea.vmem %s2175_s2, %s2193_s25 }
  0x62   : > { %s1976_s30 = scalar_lea.vmem %s2173_s0, %s1306_s26  ;;  %s1309_s7 = sshll.u32 %s2193_s25, 2 }
  0x63   : > { %s1988_s18 = scalar_lea.vmem %s2176_s3, %s1309_s7  ;;  %s1993_s12 = scalar_lea.vmem %s2177_s4, %s1309_s7 }
  0x64   : > { %617 = sbr.rel (%p1312_p12) target bundleno = 108 (0x6c), region = 78 }
  0x69   : > { %v1750_v0 = vmov 0.0  }
  0x6a   : > { %618 = vst [vmem:[#allocation2] sm:$0xff] %v1750_v0 }
  0x6b   : > { %619 = vst [vmem:[#allocation2 + $0x8] sm:$0xff] %v1750_v0 }
  0x6c PF: > { %v1371_v1 = vld [vmem:[%s1995_s13 + $0x70] sm:$0xf]  ;;  %v1588_v2 = vld [vmem:[%s1995_s13 + $0x74] sm:$0xf0]  ;;  %v1363_v12 = vld [vmem:[%s1995_s13 + $0x60] sm:$0xf] }
  0x6d   : > { %v1435_v3 = vld [vmem:[%s1995_s13 + $0xf0] sm:$0xf]  ;;  %v1372_v4 = vor.u32 %v1588_v2, %v1371_v1  ;;  %v1604_v5 = vld [vmem:[%s1995_s13 + $0xf4] sm:$0xf0]  ;;  %v1586_v14 = vld [vmem:[%s1995_s13 + $0x64] sm:$0xf0] }
  0x6e   : > { %v1499_v6 = vld [vmem:[%s1995_s13 + $0x170] sm:$0xf]  ;;  %v1620_v7 = vld [vmem:[%s1995_s13 + $0x174] sm:$0xf0]  ;;  %v1436_v8 = vor.u32 %v1604_v5, %v1435_v3  ;;  %v1427_v15 = vld [vmem:[%s1995_s13 + $0xe0] sm:$0xf]  ;;  %v1364_v17 = vor.u32 %v1586_v14, %v1363_v12 }
  0x6f   : > { %v1500_v9 = vor.u32 %v1620_v7, %v1499_v6  ;;  %v1563_v10 = vld [vmem:[%s1995_s13 + $0x1f0] sm:$0xf]  ;;  %v1636_v11 = vld [vmem:[%s1995_s13 + $0x1f4] sm:$0xf0]  ;;  %1022 = vmatpush.bf16.msra.mxu0 %v1372_v4  ;;  %v1602_v16 = vld [vmem:[%s1995_s13 + $0xe4] sm:$0xf0] }
  0x70   : > { %v1564_v13 = vor.u32 %v1636_v11, %v1563_v10  ;;  %1035 = vmatpush.bf16.msra.mxu1 %v1436_v8  ;;  %v1428_v18 = vor.u32 %v1602_v16, %v1427_v15  ;;  %v1491_v19 = vld [vmem:[%s1995_s13 + $0x160] sm:$0xf]  ;;  %v1618_v20 = vld [vmem:[%s1995_s13 + $0x164] sm:$0xf0]  ;;  %v1355_v24 = vld [vmem:[%s1995_s13 + $0x50] sm:$0xf] }
  0x71   : > { %1048 = vmatpush.bf16.msra.mxu2 %v1500_v9  ;;  %v1555_v21 = vld [vmem:[%s1995_s13 + $0x1e0] sm:$0xf]  ;;  %v1492_v22 = vor.u32 %v1618_v20, %v1491_v19  ;;  %v1634_v23 = vld [vmem:[%s1995_s13 + $0x1e4] sm:$0xf0]  ;;  %v1584_v25 = vld [vmem:[%s1995_s13 + $0x54] sm:$0xf0] }
  0x72   : > { %1061 = vmatpush.bf16.msra.mxu3 %v1564_v13  ;;  %v1556_v26 = vor.u32 %v1634_v23, %v1555_v21  ;;  %v1419_v27 = vld [vmem:[%s1995_s13 + $0xd0] sm:$0xf]  ;;  %v1600_v28 = vld [vmem:[%s1995_s13 + $0xd4] sm:$0xf0]  ;;  %v1356_v30 = vor.u32 %v1584_v25, %v1355_v24  ;;  %v1347_v36 = vld [vmem:[%s1995_s13 + $0x40] sm:$0xf] }
  0x73   : > { %v1483_v29 = vld [vmem:[%s1995_s13 + $0x150] sm:$0xf]  ;;  %1023 = vmatpush.bf16.msra.mxu0 %v1364_v17  ;;  %v1616_v31 = vld [vmem:[%s1995_s13 + $0x154] sm:$0xf0]  ;;  %v1420_v34 = vor.u32 %v1600_v28, %v1419_v27  ;;  %v1582_v37 = vld [vmem:[%s1995_s13 + $0x44] sm:$0xf0] }
  0x74   : > { %v1547_v32 = vld [vmem:[%s1995_s13 + $0x1d0] sm:$0xf]  ;;  %v1632_v33 = vld [vmem:[%s1995_s13 + $0x1d4] sm:$0xf0]  ;;  %1036 = vmatpush.bf16.msra.mxu1 %v1428_v18  ;;  %v1484_v35 = vor.u32 %v1616_v31, %v1483_v29  ;;  %v1411_v38 = vld [vmem:[%s1995_s13 + $0xc0] sm:$0xf]  ;;  %v1348_v45 = vor.u32 %v1582_v37, %v1347_v36 }
  0x75   : > { %1049 = vmatpush.bf16.msra.mxu2 %v1492_v22  ;;  %v1548_v39 = vor.u32 %v1632_v33, %v1547_v32  ;;  %v1598_v40 = vld [vmem:[%s1995_s13 + $0xc4] sm:$0xf0]  ;;  %v1475_v41 = vld [vmem:[%s1995_s13 + $0x140] sm:$0xf]  ;;  %v1339_v48 = vld [vmem:[%s1995_s13 + $0x30] sm:$0xf] }
  0x76   : > { %1062 = vmatpush.bf16.msra.mxu3 %v1556_v26  ;;  %v1614_v42 = vld [vmem:[%s1995_s13 + $0x144] sm:$0xf0]  ;;  %v1539_v43 = vld [vmem:[%s1995_s13 + $0x1c0] sm:$0xf]  ;;  %v1412_v46 = vor.u32 %v1598_v40, %v1411_v38  ;;  %v1580_v49 = vld [vmem:[%s1995_s13 + $0x34] sm:$0xf0] }
  0x77   : > { %v1630_v44 = vld [vmem:[%s1995_s13 + $0x1c4] sm:$0xf0]  ;;  %1024 = vmatpush.bf16.msra.mxu0 %v1356_v30  ;;  %v1476_v47 = vor.u32 %v1614_v42, %v1475_v41  ;;  %v1403_v50 = vld [vmem:[%s1995_s13 + $0xb0] sm:$0xf]  ;;  %v1596_v52 = vld [vmem:[%s1995_s13 + $0xb4] sm:$0xf0]  ;;  %v1340_v57 = vor.u32 %v1580_v49, %v1339_v48 }
  0x78   : > { %1037 = vmatpush.bf16.msra.mxu1 %v1420_v34  ;;  %v1540_v51 = vor.u32 %v1630_v44, %v1539_v43  ;;  %v1467_v53 = vld [vmem:[%s1995_s13 + $0x130] sm:$0xf]  ;;  %v1612_v54 = vld [vmem:[%s1995_s13 + $0x134] sm:$0xf0]  ;;  %v1404_v58 = vor.u32 %v1596_v52, %v1403_v50  ;;  %v1331_v60 = vld [vmem:[%s1995_s13 + $0x20] sm:$0xf] }
  0x79   : > { %1050 = vmatpush.bf16.msra.mxu2 %v1484_v35  ;;  %v1531_v55 = vld [vmem:[%s1995_s13 + $0x1b0] sm:$0xf]  ;;  %v1628_v56 = vld [vmem:[%s1995_s13 + $0x1b4] sm:$0xf0]  ;;  %v1468_v59 = vor.u32 %v1612_v54, %v1467_v53  ;;  %v1578_v61 = vld [vmem:[%s1995_s13 + $0x24] sm:$0xf0] }
  0x7a   : > { %1063 = vmatpush.bf16.msra.mxu3 %v1548_v39  ;;  %v1395_v62 = vld [vmem:[%s1995_s13 + $0xa0] sm:$0xf]  ;;  %v1532_v63 = vor.u32 %v1628_v56, %v1531_v55  ;;  %v1594_v0 = vld [vmem:[%s1995_s13 + $0xa4] sm:$0xf0]  ;;  %v1332_v5 = vor.u32 %v1578_v61, %v1331_v60  ;;  %v1323_v8 = vld [vmem:[%s1995_s13 + $0x10] sm:$0xf] }
  0x7b   : > { %1025 = vmatpush.bf16.msra.mxu0 %v1348_v45  ;;  %v1459_v1 = vld [vmem:[%s1995_s13 + $0x120] sm:$0xf]  ;;  %v1610_v2 = vld [vmem:[%s1995_s13 + $0x124] sm:$0xf0]  ;;  %v1396_v6 = vor.u32 %v1594_v0, %v1395_v62  ;;  %v1576_v9 = vld [vmem:[%s1995_s13 + $0x14] sm:$0xf0] }
  0x7c   : > { %1038 = vmatpush.bf16.msra.mxu1 %v1412_v46  ;;  %v1523_v3 = vld [vmem:[%s1995_s13 + $0x1a0] sm:$0xf]  ;;  %v1626_v4 = vld [vmem:[%s1995_s13 + $0x1a4] sm:$0xf0]  ;;  %v1460_v7 = vor.u32 %v1610_v2, %v1459_v1  ;;  %v1387_v10 = vld [vmem:[%s1995_s13 + $0x90] sm:$0xf]  ;;  %v1324_v17 = vor.u32 %v1576_v9, %v1323_v8 }
  0x7d   : > { %1051 = vmatpush.bf16.msra.mxu2 %v1476_v47  ;;  %v1524_v11 = vor.u32 %v1626_v4, %v1523_v3  ;;  %v1592_v12 = vld [vmem:[%s1995_s13 + $0x94] sm:$0xf0]  ;;  %v1451_v13 = vld [vmem:[%s1995_s13 + $0x110] sm:$0xf]  ;;  %v1315_v18 = vld [vmem:[%s1995_s13] sm:$0xf] }
  0x7e   : > { %1064 = vmatpush.bf16.msra.mxu3 %v1540_v51  ;;  %v1608_v14 = vld [vmem:[%s1995_s13 + $0x114] sm:$0xf0]  ;;  %v1515_v15 = vld [vmem:[%s1995_s13 + $0x190] sm:$0xf]  ;;  %v1574_v19 = vld [vmem:[%s1995_s13 + $0x4] sm:$0xf0]  ;;  %v1388_v21 = vor.u32 %v1592_v12, %v1387_v10 }
  0x7f   : > { %1026 = vmatpush.bf16.msra.mxu0 %v1340_v57  ;;  %v1624_v16 = vld [vmem:[%s1995_s13 + $0x194] sm:$0xf0]  ;;  %v1379_v20 = vld [vmem:[%s1995_s13 + $0x80] sm:$0xf]  ;;  %v1452_v22 = vor.u32 %v1608_v14, %v1451_v13  ;;  %v1590_v23 = vld [vmem:[%s1995_s13 + $0x84] sm:$0xf0]  ;;  %v1316_v33 = vor.u32 %v1574_v19, %v1315_v18 }
  0x80   : > { %1039 = vmatpush.bf16.msra.mxu1 %v1404_v58  ;;  %v1443_v24 = vld [vmem:[%s1995_s13 + $0x100] sm:$0xf]  ;;  %v1606_v25 = vld [vmem:[%s1995_s13 + $0x104] sm:$0xf0]  ;;  %v1516_v26 = vor.u32 %v1624_v16, %v1515_v15  ;;  %v1587_v29 = vld [vmem:[%s1995_s13 + $0x74] sm:$0xf]  ;;  %v1380_v38 = vor.u32 %v1590_v23, %v1379_v20 }
  0x81   : > { %1052 = vmatpush.bf16.msra.mxu2 %v1468_v59  ;;  %v1507_v27 = vld [vmem:[%s1995_s13 + $0x180] sm:$0xf]  ;;  %v1622_v28 = vld [vmem:[%s1995_s13 + $0x184] sm:$0xf0]  ;;  %v1373_v30 = vld [vmem:[%s1995_s13 + $0x78] sm:$0xf0]  ;;  %v1444_v39 = vor.u32 %v1606_v25, %v1443_v24 }
  0x82   : > { %1065 = vmatpush.bf16.msra.mxu3 %v1532_v63  ;;  %v1603_v31 = vld [vmem:[%s1995_s13 + $0xf4] sm:$0xf]  ;;  %v623_v32 = vld [vmem:[%s1976_s30 + $0x8] sm:$0xff]  ;;  %v1508_v43 = vor.u32 %v1622_v28, %v1507_v27  ;;  %v1376_v44 = vor.u32 %v1587_v29, %v1373_v30  ;;  %v1585_v48 = vld [vmem:[%s1995_s13 + $0x64] sm:$0xf]  ;;  %p1569_p13 = scmp.ne.s32.totalorder %s1732_s17, 8 }
  0x83   : > { %1027 = vmatpush.bf16.msra.mxu0 %v1332_v5  ;;  %v1437_v34 = vld [vmem:[%s1995_s13 + $0xf8] sm:$0xf0]  ;;  %v1619_v35 = vld [vmem:[%s1995_s13 + $0x174] sm:$0xf]  ;;  %v692_v37 = vunpack.c.l.b16 %v623_v32  ;;  %v693_v42 = vunpack.c.h.b16 %v623_v32  ;;  %v1365_v49 = vld [vmem:[%s1995_s13 + $0x68] sm:$0xf0] }
  0x84   : > { %1040 = vmatpush.bf16.msra.mxu1 %v1396_v6  ;;  %v1501_v36 = vld [vmem:[%s1995_s13 + $0x178] sm:$0xf0]  ;;  %v1635_v40 = vld [vmem:[%s1995_s13 + $0x1f4] sm:$0xf]  ;;  %v1440_v46 = vor.u32 %v1603_v31, %v1437_v34  ;;  %v1601_v50 = vld [vmem:[%s1995_s13 + $0xe4] sm:$0xf]  ;;  %v1368_v62 = vor.u32 %v1585_v48, %v1365_v49 }
  0x85   : > { %1053 = vmatpush.bf16.msra.mxu2 %v1460_v7  ;;  %v1565_v41 = vld [vmem:[%s1995_s13 + $0x1f8] sm:$0xf0]  ;;  %v622_v45 = vld [vmem:[%s1976_s30] sm:$0xff]  ;;  %v1504_v47 = vor.u32 %v1619_v35, %v1501_v36  ;;  %v1429_v54 = vld [vmem:[%s1995_s13 + $0xe8] sm:$0xf0]  ;;  %v2078_v57 = vpack.c.b16 %v692_v37, %v692_v37  ;;  %v2082_v60 = vpack.c.b16 %v693_v42, %v693_v42 }
  0x86   : > { %1066 = vmatpush.bf16.msra.mxu3 %v1524_v11  ;;  %v690_v51 = vunpack.c.l.b16 %v622_v45  ;;  %v691_v52 = vunpack.c.h.b16 %v622_v45  ;;  %v1568_v53 = vor.u32 %v1635_v40, %v1565_v41  ;;  %v1617_v55 = vld [vmem:[%s1995_s13 + $0x164] sm:$0xf]  ;;  %v1493_v56 = vld [vmem:[%s1995_s13 + $0x168] sm:$0xf0]  ;;  %v1432_v0 = vor.u32 %v1601_v50, %v1429_v54  ;;  %v1583_v2 = vld [vmem:[%s1995_s13 + $0x54] sm:$0xf] }
  0x87   : > { %1028 = vmatpush.bf16.msra.mxu0 %v1324_v17  ;;  %v1633_v58 = vld [vmem:[%s1995_s13 + $0x1e4] sm:$0xf]  ;;  %v1557_v59 = vld [vmem:[%s1995_s13 + $0x1e8] sm:$0xf0]  ;;  %v1496_v1 = vor.u32 %v1617_v55, %v1493_v56  ;;  %v1357_v3 = vld [vmem:[%s1995_s13 + $0x58] sm:$0xf0] }
  0x88   : > { %1041 = vmatpush.bf16.msra.mxu1 %v1388_v21  ;;  %v2084_v61 = vpack.c.b16 %v690_v51, %v690_v51  ;;  %v2086_v63 = vpack.c.b16 %v691_v52, %v691_v52  ;;  %v1599_v4 = vld [vmem:[%s1995_s13 + $0xd4] sm:$0xf]  ;;  %v1560_v5 = vor.u32 %v1633_v58, %v1557_v59  ;;  %v1421_v6 = vld [vmem:[%s1995_s13 + $0xd8] sm:$0xf0]  ;;  %v1360_v11 = vor.u32 %v1583_v2, %v1357_v3  ;;  %v1581_v14 = vld [vmem:[%s1995_s13 + $0x44] sm:$0xf] }
  0x89   : > { %1054 = vmatpush.bf16.msra.mxu2 %v1452_v22  ;;  %v1615_v7 = vld [vmem:[%s1995_s13 + $0x154] sm:$0xf]  ;;  %v1485_v8 = vld [vmem:[%s1995_s13 + $0x158] sm:$0xf0]  ;;  %v1424_v12 = vor.u32 %v1599_v4, %v1421_v6  ;;  %v1349_v15 = vld [vmem:[%s1995_s13 + $0x48] sm:$0xf0] }
  0x8a   : > { %1067 = vmatpush.bf16.msra.mxu3 %v1516_v26  ;;  %v1631_v9 = vld [vmem:[%s1995_s13 + $0x1d4] sm:$0xf]  ;;  %v1549_v10 = vld [vmem:[%s1995_s13 + $0x1d8] sm:$0xf0]  ;;  %v1488_v13 = vor.u32 %v1615_v7, %v1485_v8  ;;  %v1597_v16 = vld [vmem:[%s1995_s13 + $0xc4] sm:$0xf]  ;;  %v1352_v23 = vor.u32 %v1581_v14, %v1349_v15 }
  0x8b   : > { %1029 = vmatpush.bf16.msra.mxu0 %v1316_v33  ;;  %v1552_v17 = vor.u32 %v1631_v9, %v1549_v10  ;;  %v1413_v18 = vld [vmem:[%s1995_s13 + $0xc8] sm:$0xf0]  ;;  %v1613_v19 = vld [vmem:[%s1995_s13 + $0x144] sm:$0xf]  ;;  %v1579_v26 = vld [vmem:[%s1995_s13 + $0x34] sm:$0xf] }
  0x8c   : > { %1042 = vmatpush.bf16.msra.mxu1 %v1380_v38  ;;  %v1477_v20 = vld [vmem:[%s1995_s13 + $0x148] sm:$0xf0]  ;;  %v1629_v21 = vld [vmem:[%s1995_s13 + $0x1c4] sm:$0xf]  ;;  %v1416_v24 = vor.u32 %v1597_v16, %v1413_v18  ;;  %v1341_v27 = vld [vmem:[%s1995_s13 + $0x38] sm:$0xf0] }
  0x8d   : > { %1055 = vmatpush.bf16.msra.mxu2 %v1444_v39  ;;  %v1541_v22 = vld [vmem:[%s1995_s13 + $0x1c8] sm:$0xf0]  ;;  %v1480_v25 = vor.u32 %v1613_v19, %v1477_v20  ;;  %v1595_v28 = vld [vmem:[%s1995_s13 + $0xb4] sm:$0xf]  ;;  %v1405_v30 = vld [vmem:[%s1995_s13 + $0xb8] sm:$0xf0]  ;;  %v1344_v35 = vor.u32 %v1579_v26, %v1341_v27 }
  0x8e   : > { %1068 = vmatpush.bf16.msra.mxu3 %v1508_v43  ;;  %1030 = vmatmul.bf16.vlgmr.msra.gmra.mxu0 %v2084_v61  ;;  %v1544_v29 = vor.u32 %v1629_v21, %v1541_v22  ;;  %v1611_v31 = vld [vmem:[%s1995_s13 + $0x134] sm:$0xf]  ;;  %v1469_v32 = vld [vmem:[%s1995_s13 + $0x138] sm:$0xf0]  ;;  %v1408_v36 = vor.u32 %v1595_v28, %v1405_v30  ;;  %v1577_v38 = vld [vmem:[%s1995_s13 + $0x24] sm:$0xf] }
  0x8f   : > { %1074 = vmatpush.bf16.msrb.mxu0 %v1376_v44  ;;  %1043 = vmatmul.bf16.vlgmr.msra.gmra.mxu1 %v2086_v63  ;;  %v1627_v33 = vld [vmem:[%s1995_s13 + $0x1b4] sm:$0xf]  ;;  %v1533_v34 = vld [vmem:[%s1995_s13 + $0x1b8] sm:$0xf0]  ;;  %v1472_v37 = vor.u32 %v1611_v31, %v1469_v32  ;;  %v1333_v39 = vld [vmem:[%s1995_s13 + $0x28] sm:$0xf0] }
  0x90   : > { %1087 = vmatpush.bf16.msrb.mxu1 %v1440_v46  ;;  %1056 = vmatmul.bf16.vlgmr.msra.gmra.mxu2 %v2078_v57  ;;  %v1593_v40 = vld [vmem:[%s1995_s13 + $0xa4] sm:$0xf]  ;;  %v1536_v41 = vor.u32 %v1627_v33, %v1533_v34  ;;  %v1397_v42 = vld [vmem:[%s1995_s13 + $0xa8] sm:$0xf0]  ;;  %v1575_v50 = vld [vmem:[%s1995_s13 + $0x14] sm:$0xf] }
  0x91   : > { %1100 = vmatpush.bf16.msrb.mxu2 %v1504_v47  ;;  %1069 = vmatmul.bf16.vlgmr.msra.gmra.mxu3 %v2082_v60  ;;  %v1609_v43 = vld [vmem:[%s1995_s13 + $0x124] sm:$0xf]  ;;  %v1461_v44 = vld [vmem:[%s1995_s13 + $0x128] sm:$0xf0]  ;;  %v1336_v47 = vor.u32 %v1577_v38, %v1333_v39  ;;  %v1400_v48 = vor.u32 %v1593_v40, %v1397_v42  ;;  %v1325_v51 = vld [vmem:[%s1995_s13 + $0x18] sm:$0xf0] }
  0x92   : > { %1113 = vmatpush.bf16.msrb.mxu3 %v1568_v53  ;;  %v1625_v45 = vld [vmem:[%s1995_s13 + $0x1a4] sm:$0xf]  ;;  %v1525_v46 = vld [vmem:[%s1995_s13 + $0x1a8] sm:$0xf0]  ;;  %v1464_v49 = vor.u32 %v1609_v43, %v1461_v44  ;;  %v1591_v52 = vld [vmem:[%s1995_s13 + $0x94] sm:$0xf] }
  0x93   : > { %1075 = vmatpush.bf16.msrb.mxu0 %v1368_v62  ;;  %v1528_v53 = vor.u32 %v1625_v45, %v1525_v46  ;;  %v1389_v54 = vld [vmem:[%s1995_s13 + $0x98] sm:$0xf0]  ;;  %v1607_v55 = vld [vmem:[%s1995_s13 + $0x114] sm:$0xf]  ;;  %v1328_v62 = vor.u32 %v1575_v50, %v1325_v51  ;;  %v1573_v2 = vld [vmem:[%s1995_s13 + $0x4] sm:$0xf] }
  0x94   : > { %1088 = vmatpush.bf16.msrb.mxu1 %v1432_v0  ;;  %v1453_v56 = vld [vmem:[%s1995_s13 + $0x118] sm:$0xf0]  ;;  %v1623_v58 = vld [vmem:[%s1995_s13 + $0x194] sm:$0xf]  ;;  %v1392_v0 = vor.u32 %v1591_v52, %v1389_v54  ;;  %v1317_v3 = vld [vmem:[%s1995_s13 + $0x8] sm:$0xf0] }
  0x95   : > { %1101 = vmatpush.bf16.msrb.mxu2 %v1496_v1  ;;  %v1517_v59 = vld [vmem:[%s1995_s13 + $0x198] sm:$0xf0]  ;;  %v1456_v1 = vor.u32 %v1607_v55, %v1453_v56  ;;  %v1589_v4 = vld [vmem:[%s1995_s13 + $0x84] sm:$0xf]  ;;  %v1381_v6 = vld [vmem:[%s1995_s13 + $0x88] sm:$0xf0] }
  0x96   : > { %1114 = vmatpush.bf16.msrb.mxu3 %v1560_v5  ;;  %v1520_v5 = vor.u32 %v1623_v58, %v1517_v59  ;;  %v1605_v7 = vld [vmem:[%s1995_s13 + $0x104] sm:$0xf]  ;;  %v1445_v8 = vld [vmem:[%s1995_s13 + $0x108] sm:$0xf0]  ;;  %v620_v21 = vld [vmem:[#allocation2] sm:$0xff] }
  0x97   : > { %1076 = vmatpush.bf16.msrb.mxu0 %v1360_v11  ;;  %v1621_v9 = vld [vmem:[%s1995_s13 + $0x184] sm:$0xf]  ;;  %v1509_v10 = vld [vmem:[%s1995_s13 + $0x188] sm:$0xf0]  ;;  %v1320_v11 = vor.u32 %v1573_v2, %v1317_v3  ;;  %v621_v31 = vld [vmem:[#allocation2 + $0x8] sm:$0xff] }
  0x98   : > { %1089 = vmatpush.bf16.msrb.mxu1 %v1424_v12  ;;  %v1384_v12 = vor.u32 %v1589_v4, %v1381_v6  ;;  %v1512_v14 = vor.u32 %v1621_v9, %v1509_v10 }
  0x99   : > { %1102 = vmatpush.bf16.msrb.mxu2 %v1488_v13  ;;  %v1448_v13 = vor.u32 %v1605_v7, %v1445_v8 }
  0x9a   : > { %1115 = vmatpush.bf16.msrb.mxu3 %v1552_v17 }
  0x9b   : > { %1077 = vmatpush.bf16.msrb.mxu0 %v1352_v23 }
  0x9c   : > { %1090 = vmatpush.bf16.msrb.mxu1 %v1416_v24 }
  0x9d   : > { %1103 = vmatpush.bf16.msrb.mxu2 %v1480_v25 }
  0x9e   : > { %1116 = vmatpush.bf16.msrb.mxu3 %v1544_v29 }
  0x9f   : > { %1078 = vmatpush.bf16.msrb.mxu0 %v1344_v35 }
  0xa0   : > { %1091 = vmatpush.bf16.msrb.mxu1 %v1408_v36 }
  0xa1   : > { %1104 = vmatpush.bf16.msrb.mxu2 %v1472_v37 }
  0xa2   : > { %1117 = vmatpush.bf16.msrb.mxu3 %v1536_v41 }
  0xa3   : > { %1079 = vmatpush.bf16.msrb.mxu0 %v1336_v47 }
  0xa4   : > { %1092 = vmatpush.bf16.msrb.mxu1 %v1400_v48 }
  0xa5   : > { %1105 = vmatpush.bf16.msrb.mxu2 %v1464_v49 }
  0xa6   : > { %1118 = vmatpush.bf16.msrb.mxu3 %v1528_v53 }
  0xa7   : > { %1080 = vmatpush.bf16.msrb.mxu0 %v1328_v62 }
  0xa8   : > { %1093 = vmatpush.bf16.msrb.mxu1 %v1392_v0 }
  0xa9   : > { %1106 = vmatpush.bf16.msrb.mxu2 %v1456_v1 }
  0xaa   : > { %1119 = vmatpush.bf16.msrb.mxu3 %v1520_v5 }
  0xab   : > { %1081 = vmatpush.bf16.msrb.mxu0 %v1320_v11 }
  0xac   : > { %1094 = vmatpush.bf16.msrb.mxu1 %v1384_v12 }
  0xad   : > { %1107 = vmatpush.bf16.msrb.mxu2 %v1448_v13 }
  0xae   : > { %1120 = vmatpush.bf16.msrb.mxu3 %v1512_v14  ;;  %1082 = vmatmul.bf16.vlgmr.msrb.gmra.mxu0 %v2084_v61 }
  0xaf   : > { %1095 = vmatmul.bf16.vlgmr.msrb.gmra.mxu1 %v2086_v63 }
  0xb0   : > { %1108 = vmatmul.bf16.vlgmr.msrb.gmra.mxu2 %v2078_v57 }
  0xb1   : > { %1121 = vmatmul.bf16.vlgmr.msrb.gmra.mxu3 %v2082_v60 }
 0x10b   : > { %v1031_v15 = vpop.f32.mrf.mxu0 }
 0x10c   : > { %v1044_v16 = vpop.f32.mrf.mxu1 }
 0x10d   : > { %v1045_v17 = vadd.f32 %v1044_v16, %v1031_v15 }
 0x113   : > { %v1057_v18 = vpop.f32.mrf.mxu2  ;;  %v1033_v23 = vpop.f32.mrf.mxu0 }
 0x114   : > { %v1058_v19 = vadd.f32 %v1057_v18, %v1045_v17  ;;  %v1070_v20 = vpop.f32.mrf.mxu3  ;;  %v1046_v24 = vpop.f32.mrf.mxu1 }
 0x116   : > { %v1071_v22 = vadd.f32 %v1070_v20, %v1058_v19 }
 0x118   : > { %v1126_v25 = vadd.f32 %v1071_v22, %v620_v21 }
 0x11a   : > { %1128 = vst [vmem:[#allocation2] sm:$0xff] %v1126_v25 }
 0x11b   : > { %v1059_v26 = vpop.f32.mrf.mxu2 }
 0x11c   : > { %v1072_v61 = vpop.f32.mrf.mxu3 }
 0x12b   : > { %v1083_v27 = vpop.f32.mrf.mxu0 }
 0x12c   : > { %v1096_v63 = vpop.f32.mrf.mxu1 }
 0x12d   : > { %v1097_v28 = vadd.f32 %v1096_v63, %v1083_v27 }
 0x133   : > { %v1109_v57 = vpop.f32.mrf.mxu2  ;;  %v1085_v30 = vpop.f32.mrf.mxu0 }
 0x134   : > { %v1110_v29 = vadd.f32 %v1109_v57, %v1097_v28  ;;  %v1122_v60 = vpop.f32.mrf.mxu3  ;;  %v1098_v32 = vpop.f32.mrf.mxu1 }
 0x136   : > { %v1123_v33 = vadd.f32 %v1122_v60, %v1110_v29 }
 0x138   : > { %v1127_v34 = vadd.f32 %v1123_v33, %v621_v31  ;;  %1133 = sbr.rel (%p1569_p13) target bundleno = 331 (0x14b), region = 82 }
 0x13a   : > { %1129 = vst [vmem:[#allocation2 + $0x8] sm:$0xff] %v1127_v34 }
 0x13b   : > { %v1111_v35 = vpop.f32.mrf.mxu2 }
 0x13c   : > { %v1124_v36 = vpop.f32.mrf.mxu3 }
 0x13d   : > { %v1134_v37 = vld [vmem:[#allocation2] sm:$0xff] }
 0x13e   : > { %v1136_v39 = vld [vmem:[%s592_s15] sm:$0x3] }
 0x13f   : > { %v1138_v40 = vperm.slane %v1136_v39, 0  ;;  %v1139_v41 = vperm.slane %v1136_v39, 1  ;;  %v1144_v42 = vld [vmem:[%s1988_s18] sm:$0xff] }
 0x140   : > { %v1145_v43 = vunpack.c.l.bf16 %v1144_v42  ;;  %v1146_v44 = vunpack.c.h.bf16 %v1144_v42 }
 0x141   : > { %v1135_v38 = vld [vmem:[#allocation2 + $0x8] sm:$0xff]  ;;  %v1142_v45 = vadd.f32 %v1138_v40, %v1134_v37 }
 0x142   : > { %v1143_v46 = vadd.f32 %v1139_v41, %v1135_v38 }
 0x143   : > { %v1147_v47 = vadd.f32 %v1145_v43, %v1142_v45 }
 0x144   : > { %v1148_v48 = vadd.f32 %v1146_v44, %v1143_v46 }
 0x145   : > { %v1149_v49 = vmax.f32 %v1147_v47, 0.0 }
 0x146   : > { %v1150_v50 = vmax.f32 %v1148_v48, 0.0 }
 0x148   : > { %v1151_v51 = vpack.c.bf16 %v1150_v50, %v1149_v49 }
 0x14a   : > { %1152 = vst [vmem:[%s1993_s12] sm:$0xff] %v1151_v51 }
 0x14b PF: > { %s14_s21 = sadd.s32 1, %s1748_s21   ;;  %s2178_s15 = smov %s1728_s16 }
 0x14c   : > { %p11_p0 = scmp.ge.s32.totalorder %s14_s21, 20   ;;  %s2179_s16 = smov %s1827_s28 }
 0x14d   : > { %s2180_s17 = smov %s1740_s19  ;;  %s2181_s18 = smov %s1744_s20 }
 0x14e   : > { %s2182_s19 = smov %s2185_s22  ;;  %s2183_s20 = smov %s2189_s23 }
 0x14f   :  { %13 = sbr.rel (!%p11_p0) target bundleno = 4 (0x4), region = 126 }

// kernel: _lambda_.41
= control target key start
LH: loop header
LB: loop body
LE: loop exit
PB: predicated region body
PF: predicated region fallthrough
CT: control target
= control target key end

     0   :  { %s1683_s12 = smov 0   ;;  %s1685_s13 = smov 0   ;;  %s2074_s0 = inlined_call_operand.vmem [shape: bf16[8,4608], index: 0, kind: input, shape index: {}]   ;;  %s2075_s1 = inlined_call_operand.vmem [shape: bf16[4608,512], index: 1, kind: input, shape index: {}]   ;;  %s2076_s2 = inlined_call_operand.vmem [shape: f32[1,512], index: 2, kind: input, shape index: {}]   ;;  %s2077_s3 = inlined_call_operand.vmem [shape: bf16[8,512], index: 3, kind: output, shape index: {}]  }
   0x1   :  { %s1687_s14 = smov 0   ;;  %s1689_s15 = smov 0  }
   0x2   :  { %s1691_s16 = smov 0   ;;  %s1693_s17 = smov 0  }
   0x3   :  { %s1695_s18 = smov 0  }
   0x4 LB: > { %s25_s19 = sadd.s32 1, %s1652_s16  ;;  %s28_s20 = sadd.s32 1, %s1656_s17  ;;  %s1660_s18 = sphi %s1695_s18, %s13_s18   ;;  %s1656_s17 = sphi %s1693_s17, %s2083_s17   ;;  %s1652_s16 = sphi %s1691_s16, %s2082_s16   ;;  %s1648_s15 = sphi %s1689_s15, %s2081_s15   ;;  %s1644_s14 = sphi %s1687_s14, %s2080_s14   ;;  %s1640_s13 = sphi %s1685_s13, %s2079_s13   ;;  %s1636_s12 = sphi %s1683_s12, %s2078_s12  }
   0x5   : > { %p26_p0 = scmp.ge.s32.totalorder %s25_s19, 9  ;;  %p76_p1 = scmp.ne.s32.totalorder %s1640_s13, %s1636_s12 }
   0x6   : > { %p77_p2 = scmp.eq.s32.totalorder %s1660_s18, 0  ;;  %s69_s24 = sadd.s32 1, %s1640_s13 }
   0x7   : > { %s2085_s19 = smov (%p26_p0, %s25_s19), 0  ;;  %s2087_s20 = smov (!%p26_p0, %s28_s20), %s1656_s17 }
   0x8   : > { %p78_p3 = por %p77_p2, %p76_p1  ;;  %p30_p4 = scmp.ge.s32.totalorder %s2087_s20, 2 }
   0x9   : > { %s64_s21 = ssub.s32 %s1652_s16, %s2085_s19  ;;  %p1211_p6 = scmp.ge.s32.totalorder %s1660_s18, 18 }
   0xa   : > { %s2089_s20 = smov (%p30_p4, %s2087_s20), 0 }
   0xb   : > { %s65_s22 = ssub.s32 %s1656_s17, %s2089_s20  ;;  %156 = sbr.rel (%p1211_p6) target bundleno = 87 (0x57), region = 16 }
   0xc   : > { %s66_s23 = sor.u32 %s65_s22, %s64_s21 }
   0xd   : > { %p67_p5 = scmp.eq.s32.totalorder %s66_s23, 0 }
   0xf   : > { %s1734_s25 = scalar_select %p67_p5, %s1640_s13, %s69_s24  }
  0x10   : > { %172 = sbr.rel (!%p78_p3) target bundleno = 87 (0x57), region = 24  ;;  %s174_s26 = sand.u32 (%p78_p3), 1, %s1640_s13  }
  0x11   : > { %s1214_s27 = sshll.u32 (%p78_p3), %s1656_s17, 1  ;;  %s1212_s28 = sshll.u32 (%p78_p3), %s174_s26, 9 }
  0x12   : > { %s1484_s29 = sshll.u32 (%p78_p3), %s1652_s16, 8  ;;  %s1748_s8 = scalar_lea.vmem (%p78_p3), [#allocation3], %s1212_s28 }
  0x13   : > { %s180_s30 = sadd.s32 (%p78_p3), %s1484_s29, %s1214_s27 }
  0x14   : > { %s1216_s4 = sshll.u32 (%p78_p3), %s180_s30, 2 }
  0x15   : > { %s1743_s7 = scalar_lea.vmem %s2075_s1, %s1216_s4 }
  0x16   : > { %v337_v0 = vld [vmem:[%s1743_s7] sm:$0xff]  ;;  %v339_v1 = vld [vmem:[%s1743_s7 + $0x10] sm:$0xff] }
  0x17   : > { %v341_v2 = vld [vmem:[%s1743_s7 + $0x20] sm:$0xff]  ;;  %338 = vst [vmem:[%s1748_s8] sm:$0xff] %v337_v0  ;;  %v343_v3 = vld [vmem:[%s1743_s7 + $0x30] sm:$0xff] }
  0x18   : > { %340 = vst [vmem:[%s1748_s8 + $0x8] sm:$0xff] %v339_v1  ;;  %v345_v4 = vld [vmem:[%s1743_s7 + $0x40] sm:$0xff]  ;;  %v347_v5 = vld [vmem:[%s1743_s7 + $0x50] sm:$0xff] }
  0x19   : > { %342 = vst [vmem:[%s1748_s8 + $0x10] sm:$0xff] %v341_v2  ;;  %v349_v6 = vld [vmem:[%s1743_s7 + $0x60] sm:$0xff]  ;;  %v351_v7 = vld [vmem:[%s1743_s7 + $0x70] sm:$0xff] }
  0x1a   : > { %344 = vst [vmem:[%s1748_s8 + $0x18] sm:$0xff] %v343_v3  ;;  %v353_v8 = vld [vmem:[%s1743_s7 + $0x80] sm:$0xff]  ;;  %v355_v9 = vld [vmem:[%s1743_s7 + $0x90] sm:$0xff] }
  0x1b   : > { %346 = vst [vmem:[%s1748_s8 + $0x20] sm:$0xff] %v345_v4  ;;  %v357_v10 = vld [vmem:[%s1743_s7 + $0xa0] sm:$0xff]  ;;  %v359_v11 = vld [vmem:[%s1743_s7 + $0xb0] sm:$0xff] }
  0x1c   : > { %348 = vst [vmem:[%s1748_s8 + $0x28] sm:$0xff] %v347_v5  ;;  %v361_v12 = vld [vmem:[%s1743_s7 + $0xc0] sm:$0xff]  ;;  %v363_v13 = vld [vmem:[%s1743_s7 + $0xd0] sm:$0xff] }
  0x1d   : > { %350 = vst [vmem:[%s1748_s8 + $0x30] sm:$0xff] %v349_v6  ;;  %v365_v14 = vld [vmem:[%s1743_s7 + $0xe0] sm:$0xff]  ;;  %v367_v15 = vld [vmem:[%s1743_s7 + $0xf0] sm:$0xff] }
  0x1e   : > { %352 = vst [vmem:[%s1748_s8 + $0x38] sm:$0xff] %v351_v7  ;;  %v369_v16 = vld [vmem:[%s1743_s7 + $0x100] sm:$0xff]  ;;  %v371_v17 = vld [vmem:[%s1743_s7 + $0x110] sm:$0xff] }
  0x1f   : > { %354 = vst [vmem:[%s1748_s8 + $0x40] sm:$0xff] %v353_v8  ;;  %v373_v18 = vld [vmem:[%s1743_s7 + $0x120] sm:$0xff]  ;;  %v375_v19 = vld [vmem:[%s1743_s7 + $0x130] sm:$0xff] }
  0x20   : > { %356 = vst [vmem:[%s1748_s8 + $0x48] sm:$0xff] %v355_v9  ;;  %v377_v20 = vld [vmem:[%s1743_s7 + $0x140] sm:$0xff]  ;;  %v379_v21 = vld [vmem:[%s1743_s7 + $0x150] sm:$0xff] }
  0x21   : > { %358 = vst [vmem:[%s1748_s8 + $0x50] sm:$0xff] %v357_v10  ;;  %v381_v22 = vld [vmem:[%s1743_s7 + $0x160] sm:$0xff]  ;;  %v383_v23 = vld [vmem:[%s1743_s7 + $0x170] sm:$0xff] }
  0x22   : > { %360 = vst [vmem:[%s1748_s8 + $0x58] sm:$0xff] %v359_v11  ;;  %v385_v24 = vld [vmem:[%s1743_s7 + $0x180] sm:$0xff]  ;;  %v387_v25 = vld [vmem:[%s1743_s7 + $0x190] sm:$0xff] }
  0x23   : > { %362 = vst [vmem:[%s1748_s8 + $0x60] sm:$0xff] %v361_v12  ;;  %v389_v26 = vld [vmem:[%s1743_s7 + $0x1a0] sm:$0xff]  ;;  %v391_v27 = vld [vmem:[%s1743_s7 + $0x1b0] sm:$0xff] }
  0x24   : > { %364 = vst [vmem:[%s1748_s8 + $0x68] sm:$0xff] %v363_v13  ;;  %v393_v28 = vld [vmem:[%s1743_s7 + $0x1c0] sm:$0xff]  ;;  %v395_v29 = vld [vmem:[%s1743_s7 + $0x1d0] sm:$0xff] }
  0x25   : > { %366 = vst [vmem:[%s1748_s8 + $0x70] sm:$0xff] %v365_v14  ;;  %v397_v30 = vld [vmem:[%s1743_s7 + $0x1e0] sm:$0xff]  ;;  %v399_v31 = vld [vmem:[%s1743_s7 + $0x1f0] sm:$0xff] }
  0x26   : > { %368 = vst [vmem:[%s1748_s8 + $0x78] sm:$0xff] %v367_v15  ;;  %v401_v32 = vld [vmem:[%s1743_s7 + $0x200] sm:$0xff]  ;;  %v403_v33 = vld [vmem:[%s1743_s7 + $0x210] sm:$0xff] }
  0x27   : > { %370 = vst [vmem:[%s1748_s8 + $0x80] sm:$0xff] %v369_v16  ;;  %v405_v34 = vld [vmem:[%s1743_s7 + $0x220] sm:$0xff]  ;;  %v407_v35 = vld [vmem:[%s1743_s7 + $0x230] sm:$0xff] }
  0x28   : > { %372 = vst [vmem:[%s1748_s8 + $0x88] sm:$0xff] %v371_v17  ;;  %v409_v36 = vld [vmem:[%s1743_s7 + $0x240] sm:$0xff]  ;;  %v411_v37 = vld [vmem:[%s1743_s7 + $0x250] sm:$0xff] }
  0x29   : > { %374 = vst [vmem:[%s1748_s8 + $0x90] sm:$0xff] %v373_v18  ;;  %v413_v38 = vld [vmem:[%s1743_s7 + $0x260] sm:$0xff]  ;;  %v415_v39 = vld [vmem:[%s1743_s7 + $0x270] sm:$0xff] }
  0x2a   : > { %376 = vst [vmem:[%s1748_s8 + $0x98] sm:$0xff] %v375_v19  ;;  %v417_v40 = vld [vmem:[%s1743_s7 + $0x280] sm:$0xff]  ;;  %v419_v41 = vld [vmem:[%s1743_s7 + $0x290] sm:$0xff] }
  0x2b   : > { %378 = vst [vmem:[%s1748_s8 + $0xa0] sm:$0xff] %v377_v20  ;;  %v421_v42 = vld [vmem:[%s1743_s7 + $0x2a0] sm:$0xff]  ;;  %v423_v43 = vld [vmem:[%s1743_s7 + $0x2b0] sm:$0xff] }
  0x2c   : > { %380 = vst [vmem:[%s1748_s8 + $0xa8] sm:$0xff] %v379_v21  ;;  %v425_v44 = vld [vmem:[%s1743_s7 + $0x2c0] sm:$0xff]  ;;  %v427_v45 = vld [vmem:[%s1743_s7 + $0x2d0] sm:$0xff] }
  0x2d   : > { %382 = vst [vmem:[%s1748_s8 + $0xb0] sm:$0xff] %v381_v22  ;;  %v429_v46 = vld [vmem:[%s1743_s7 + $0x2e0] sm:$0xff]  ;;  %v431_v47 = vld [vmem:[%s1743_s7 + $0x2f0] sm:$0xff] }
  0x2e   : > { %384 = vst [vmem:[%s1748_s8 + $0xb8] sm:$0xff] %v383_v23  ;;  %v433_v48 = vld [vmem:[%s1743_s7 + $0x300] sm:$0xff]  ;;  %v435_v49 = vld [vmem:[%s1743_s7 + $0x310] sm:$0xff] }
  0x2f   : > { %386 = vst [vmem:[%s1748_s8 + $0xc0] sm:$0xff] %v385_v24  ;;  %v437_v50 = vld [vmem:[%s1743_s7 + $0x320] sm:$0xff]  ;;  %v439_v51 = vld [vmem:[%s1743_s7 + $0x330] sm:$0xff] }
  0x30   : > { %388 = vst [vmem:[%s1748_s8 + $0xc8] sm:$0xff] %v387_v25  ;;  %v441_v52 = vld [vmem:[%s1743_s7 + $0x340] sm:$0xff]  ;;  %v443_v53 = vld [vmem:[%s1743_s7 + $0x350] sm:$0xff] }
  0x31   : > { %390 = vst [vmem:[%s1748_s8 + $0xd0] sm:$0xff] %v389_v26  ;;  %v445_v54 = vld [vmem:[%s1743_s7 + $0x360] sm:$0xff]  ;;  %v447_v55 = vld [vmem:[%s1743_s7 + $0x370] sm:$0xff] }
  0x32   : > { %392 = vst [vmem:[%s1748_s8 + $0xd8] sm:$0xff] %v391_v27  ;;  %v449_v56 = vld [vmem:[%s1743_s7 + $0x380] sm:$0xff]  ;;  %v451_v57 = vld [vmem:[%s1743_s7 + $0x390] sm:$0xff] }
  0x33   : > { %394 = vst [vmem:[%s1748_s8 + $0xe0] sm:$0xff] %v393_v28  ;;  %v453_v58 = vld [vmem:[%s1743_s7 + $0x3a0] sm:$0xff]  ;;  %v455_v59 = vld [vmem:[%s1743_s7 + $0x3b0] sm:$0xff] }
  0x34   : > { %396 = vst [vmem:[%s1748_s8 + $0xe8] sm:$0xff] %v395_v29  ;;  %v457_v60 = vld [vmem:[%s1743_s7 + $0x3c0] sm:$0xff]  ;;  %v459_v61 = vld [vmem:[%s1743_s7 + $0x3d0] sm:$0xff] }
  0x35   : > { %398 = vst [vmem:[%s1748_s8 + $0xf0] sm:$0xff] %v397_v30  ;;  %v461_v62 = vld [vmem:[%s1743_s7 + $0x3e0] sm:$0xff]  ;;  %v463_v63 = vld [vmem:[%s1743_s7 + $0x3f0] sm:$0xff] }
  0x36   : > { %400 = vst [vmem:[%s1748_s8 + $0xf8] sm:$0xff] %v399_v31 }
  0x37   : > { %402 = vst [vmem:[%s1748_s8 + $0x100] sm:$0xff] %v401_v32 }
  0x38   : > { %404 = vst [vmem:[%s1748_s8 + $0x108] sm:$0xff] %v403_v33 }
  0x39   : > { %406 = vst [vmem:[%s1748_s8 + $0x110] sm:$0xff] %v405_v34 }
  0x3a   : > { %408 = vst [vmem:[%s1748_s8 + $0x118] sm:$0xff] %v407_v35 }
  0x3b   : > { %410 = vst [vmem:[%s1748_s8 + $0x120] sm:$0xff] %v409_v36 }
  0x3c   : > { %412 = vst [vmem:[%s1748_s8 + $0x128] sm:$0xff] %v411_v37 }
  0x3d   : > { %414 = vst [vmem:[%s1748_s8 + $0x130] sm:$0xff] %v413_v38 }
  0x3e   : > { %416 = vst [vmem:[%s1748_s8 + $0x138] sm:$0xff] %v415_v39 }
  0x3f   : > { %418 = vst [vmem:[%s1748_s8 + $0x140] sm:$0xff] %v417_v40 }
  0x40   : > { %420 = vst [vmem:[%s1748_s8 + $0x148] sm:$0xff] %v419_v41 }
  0x41   : > { %422 = vst [vmem:[%s1748_s8 + $0x150] sm:$0xff] %v421_v42 }
  0x42   : > { %424 = vst [vmem:[%s1748_s8 + $0x158] sm:$0xff] %v423_v43 }
  0x43   : > { %426 = vst [vmem:[%s1748_s8 + $0x160] sm:$0xff] %v425_v44 }
  0x44   : > { %428 = vst [vmem:[%s1748_s8 + $0x168] sm:$0xff] %v427_v45 }
  0x45   : > { %430 = vst [vmem:[%s1748_s8 + $0x170] sm:$0xff] %v429_v46 }
  0x46   : > { %432 = vst [vmem:[%s1748_s8 + $0x178] sm:$0xff] %v431_v47 }
  0x47   : > { %434 = vst [vmem:[%s1748_s8 + $0x180] sm:$0xff] %v433_v48 }
  0x48   : > { %436 = vst [vmem:[%s1748_s8 + $0x188] sm:$0xff] %v435_v49 }
  0x49   : > { %438 = vst [vmem:[%s1748_s8 + $0x190] sm:$0xff] %v437_v50 }
  0x4a   : > { %440 = vst [vmem:[%s1748_s8 + $0x198] sm:$0xff] %v439_v51 }
  0x4b   : > { %442 = vst [vmem:[%s1748_s8 + $0x1a0] sm:$0xff] %v441_v52 }
  0x4c   : > { %444 = vst [vmem:[%s1748_s8 + $0x1a8] sm:$0xff] %v443_v53 }
  0x4d   : > { %446 = vst [vmem:[%s1748_s8 + $0x1b0] sm:$0xff] %v445_v54 }
  0x4e   : > { %448 = vst [vmem:[%s1748_s8 + $0x1b8] sm:$0xff] %v447_v55 }
  0x4f   : > { %450 = vst [vmem:[%s1748_s8 + $0x1c0] sm:$0xff] %v449_v56 }
  0x50   : > { %452 = vst [vmem:[%s1748_s8 + $0x1c8] sm:$0xff] %v451_v57 }
  0x51   : > { %454 = vst [vmem:[%s1748_s8 + $0x1d0] sm:$0xff] %v453_v58 }
  0x52   : > { %456 = vst [vmem:[%s1748_s8 + $0x1d8] sm:$0xff] %v455_v59 }
  0x53   : > { %458 = vst [vmem:[%s1748_s8 + $0x1e0] sm:$0xff] %v457_v60 }
  0x54   : > { %460 = vst [vmem:[%s1748_s8 + $0x1e8] sm:$0xff] %v459_v61 }
  0x55   : > { %462 = vst [vmem:[%s1748_s8 + $0x1f0] sm:$0xff] %v461_v62 }
  0x56   : > { %464 = vst [vmem:[%s1748_s8 + $0x1f8] sm:$0xff] %v463_v63 }
  0x57 PF: > { %p1217_p7 = scmp.ge.s32.totalorder %s1660_s18, 1  ;;  %p477_p8 = scmp.lt.s32.totalorder %s1660_s18, 19 }
  0x59   : > { %p478_p9 = pnand %p1217_p7, %p477_p8 }
  0x5a   : > { %s484_s9 = sand.u32 (!%p478_p9), 1, %s1636_s12   ;;  %s1219_s10 = sshll.u32 (!%p478_p9), %s1644_s14, 2 }
  0x5b   : > { %481 = sbr.rel (%p478_p9) target bundleno = 328 (0x148), region = 66  ;;  %s1218_s11 = sshll.u32 (!%p478_p9), %s484_s9, 9 }
  0x5c   : > { %p527_p10 = scmp.lt.s32.totalorder (!%p478_p9), %s1219_s10, 35  ;;  %s1221_s21 = sshll.u32 (!%p478_p9), %s1648_s15, 1 }
  0x5d   : > { %p537_p11 = scmp.lt.s32.totalorder (!%p478_p9), %s1221_s21, 3  ;;  %s1897_s5 = scalar_lea.vmem (!%p478_p9), [#allocation3], %s1218_s11 }
  0x5e   : > { %p1224_p12 = scmp.ne.s32.totalorder (!%p478_p9), %s1644_s14, 0 }
  0x60   : > { %s2091_s10 = smov (!%p527_p10, %s1219_s10), 35  ;;  %s2093_s21 = smov (!%p537_p11, %s1221_s21), 3 }
  0x61   : > { %s1220_s22 = sshll.u32 %s2091_s10, 2  ;;  %s539_s12 = scalar_lea.vmem %s2076_s2, %s2093_s21 }
  0x62   : > { %s1883_s26 = scalar_lea.vmem %s2074_s0, %s1220_s22  ;;  %s1223_s29 = sshll.u32 %s2093_s21, 2 }
  0x63   : > { %s1895_s15 = scalar_lea.vmem %s2077_s3, %s1223_s29  ;;  %554 = sbr.rel (%p1224_p12) target bundleno = 107 (0x6b), region = 74 }
  0x68   : > { %v1662_v0 = vmov 0.0  }
  0x69   : > { %555 = vst [vmem:[#allocation2] sm:$0xff] %v1662_v0 }
  0x6a   : > { %556 = vst [vmem:[#allocation2 + $0x8] sm:$0xff] %v1662_v0 }
  0x6b PF: > { %v1283_v1 = vld [vmem:[%s1897_s5 + $0x70] sm:$0xf]  ;;  %v1500_v2 = vld [vmem:[%s1897_s5 + $0x74] sm:$0xf0]  ;;  %v1275_v12 = vld [vmem:[%s1897_s5 + $0x60] sm:$0xf] }
  0x6c   : > { %v1347_v3 = vld [vmem:[%s1897_s5 + $0xf0] sm:$0xf]  ;;  %v1284_v4 = vor.u32 %v1500_v2, %v1283_v1  ;;  %v1516_v5 = vld [vmem:[%s1897_s5 + $0xf4] sm:$0xf0]  ;;  %v1498_v14 = vld [vmem:[%s1897_s5 + $0x64] sm:$0xf0] }
  0x6d   : > { %v1411_v6 = vld [vmem:[%s1897_s5 + $0x170] sm:$0xf]  ;;  %v1532_v7 = vld [vmem:[%s1897_s5 + $0x174] sm:$0xf0]  ;;  %v1348_v8 = vor.u32 %v1516_v5, %v1347_v3  ;;  %v1339_v15 = vld [vmem:[%s1897_s5 + $0xe0] sm:$0xf]  ;;  %v1276_v17 = vor.u32 %v1498_v14, %v1275_v12 }
  0x6e   : > { %v1412_v9 = vor.u32 %v1532_v7, %v1411_v6  ;;  %v1475_v10 = vld [vmem:[%s1897_s5 + $0x1f0] sm:$0xf]  ;;  %v1548_v11 = vld [vmem:[%s1897_s5 + $0x1f4] sm:$0xf0]  ;;  %959 = vmatpush.bf16.msra.mxu0 %v1284_v4  ;;  %v1514_v16 = vld [vmem:[%s1897_s5 + $0xe4] sm:$0xf0] }
  0x6f   : > { %v1476_v13 = vor.u32 %v1548_v11, %v1475_v10  ;;  %972 = vmatpush.bf16.msra.mxu1 %v1348_v8  ;;  %v1340_v18 = vor.u32 %v1514_v16, %v1339_v15  ;;  %v1403_v19 = vld [vmem:[%s1897_s5 + $0x160] sm:$0xf]  ;;  %v1530_v20 = vld [vmem:[%s1897_s5 + $0x164] sm:$0xf0]  ;;  %v1267_v24 = vld [vmem:[%s1897_s5 + $0x50] sm:$0xf] }
  0x70   : > { %985 = vmatpush.bf16.msra.mxu2 %v1412_v9  ;;  %v1467_v21 = vld [vmem:[%s1897_s5 + $0x1e0] sm:$0xf]  ;;  %v1404_v22 = vor.u32 %v1530_v20, %v1403_v19  ;;  %v1546_v23 = vld [vmem:[%s1897_s5 + $0x1e4] sm:$0xf0]  ;;  %v1496_v25 = vld [vmem:[%s1897_s5 + $0x54] sm:$0xf0] }
  0x71   : > { %998 = vmatpush.bf16.msra.mxu3 %v1476_v13  ;;  %v1468_v26 = vor.u32 %v1546_v23, %v1467_v21  ;;  %v1331_v27 = vld [vmem:[%s1897_s5 + $0xd0] sm:$0xf]  ;;  %v1512_v28 = vld [vmem:[%s1897_s5 + $0xd4] sm:$0xf0]  ;;  %v1268_v30 = vor.u32 %v1496_v25, %v1267_v24  ;;  %v1259_v36 = vld [vmem:[%s1897_s5 + $0x40] sm:$0xf] }
  0x72   : > { %v1395_v29 = vld [vmem:[%s1897_s5 + $0x150] sm:$0xf]  ;;  %960 = vmatpush.bf16.msra.mxu0 %v1276_v17  ;;  %v1528_v31 = vld [vmem:[%s1897_s5 + $0x154] sm:$0xf0]  ;;  %v1332_v34 = vor.u32 %v1512_v28, %v1331_v27  ;;  %v1494_v37 = vld [vmem:[%s1897_s5 + $0x44] sm:$0xf0] }
  0x73   : > { %v1459_v32 = vld [vmem:[%s1897_s5 + $0x1d0] sm:$0xf]  ;;  %v1544_v33 = vld [vmem:[%s1897_s5 + $0x1d4] sm:$0xf0]  ;;  %973 = vmatpush.bf16.msra.mxu1 %v1340_v18  ;;  %v1396_v35 = vor.u32 %v1528_v31, %v1395_v29  ;;  %v1323_v38 = vld [vmem:[%s1897_s5 + $0xc0] sm:$0xf]  ;;  %v1260_v45 = vor.u32 %v1494_v37, %v1259_v36 }
  0x74   : > { %986 = vmatpush.bf16.msra.mxu2 %v1404_v22  ;;  %v1460_v39 = vor.u32 %v1544_v33, %v1459_v32  ;;  %v1510_v40 = vld [vmem:[%s1897_s5 + $0xc4] sm:$0xf0]  ;;  %v1387_v41 = vld [vmem:[%s1897_s5 + $0x140] sm:$0xf]  ;;  %v1251_v48 = vld [vmem:[%s1897_s5 + $0x30] sm:$0xf] }
  0x75   : > { %999 = vmatpush.bf16.msra.mxu3 %v1468_v26  ;;  %v1526_v42 = vld [vmem:[%s1897_s5 + $0x144] sm:$0xf0]  ;;  %v1451_v43 = vld [vmem:[%s1897_s5 + $0x1c0] sm:$0xf]  ;;  %v1324_v46 = vor.u32 %v1510_v40, %v1323_v38  ;;  %v1492_v49 = vld [vmem:[%s1897_s5 + $0x34] sm:$0xf0] }
  0x76   : > { %v1542_v44 = vld [vmem:[%s1897_s5 + $0x1c4] sm:$0xf0]  ;;  %961 = vmatpush.bf16.msra.mxu0 %v1268_v30  ;;  %v1388_v47 = vor.u32 %v1526_v42, %v1387_v41  ;;  %v1315_v50 = vld [vmem:[%s1897_s5 + $0xb0] sm:$0xf]  ;;  %v1508_v52 = vld [vmem:[%s1897_s5 + $0xb4] sm:$0xf0]  ;;  %v1252_v57 = vor.u32 %v1492_v49, %v1251_v48 }
  0x77   : > { %974 = vmatpush.bf16.msra.mxu1 %v1332_v34  ;;  %v1452_v51 = vor.u32 %v1542_v44, %v1451_v43  ;;  %v1379_v53 = vld [vmem:[%s1897_s5 + $0x130] sm:$0xf]  ;;  %v1524_v54 = vld [vmem:[%s1897_s5 + $0x134] sm:$0xf0]  ;;  %v1316_v58 = vor.u32 %v1508_v52, %v1315_v50  ;;  %v1243_v60 = vld [vmem:[%s1897_s5 + $0x20] sm:$0xf] }
  0x78   : > { %987 = vmatpush.bf16.msra.mxu2 %v1396_v35  ;;  %v1443_v55 = vld [vmem:[%s1897_s5 + $0x1b0] sm:$0xf]  ;;  %v1540_v56 = vld [vmem:[%s1897_s5 + $0x1b4] sm:$0xf0]  ;;  %v1380_v59 = vor.u32 %v1524_v54, %v1379_v53  ;;  %v1490_v61 = vld [vmem:[%s1897_s5 + $0x24] sm:$0xf0] }
  0x79   : > { %1000 = vmatpush.bf16.msra.mxu3 %v1460_v39  ;;  %v1307_v62 = vld [vmem:[%s1897_s5 + $0xa0] sm:$0xf]  ;;  %v1444_v63 = vor.u32 %v1540_v56, %v1443_v55  ;;  %v1506_v0 = vld [vmem:[%s1897_s5 + $0xa4] sm:$0xf0]  ;;  %v1244_v5 = vor.u32 %v1490_v61, %v1243_v60  ;;  %v1235_v8 = vld [vmem:[%s1897_s5 + $0x10] sm:$0xf] }
  0x7a   : > { %962 = vmatpush.bf16.msra.mxu0 %v1260_v45  ;;  %v1371_v1 = vld [vmem:[%s1897_s5 + $0x120] sm:$0xf]  ;;  %v1522_v2 = vld [vmem:[%s1897_s5 + $0x124] sm:$0xf0]  ;;  %v1308_v6 = vor.u32 %v1506_v0, %v1307_v62  ;;  %v1488_v9 = vld [vmem:[%s1897_s5 + $0x14] sm:$0xf0] }
  0x7b   : > { %975 = vmatpush.bf16.msra.mxu1 %v1324_v46  ;;  %v1435_v3 = vld [vmem:[%s1897_s5 + $0x1a0] sm:$0xf]  ;;  %v1538_v4 = vld [vmem:[%s1897_s5 + $0x1a4] sm:$0xf0]  ;;  %v1372_v7 = vor.u32 %v1522_v2, %v1371_v1  ;;  %v1299_v10 = vld [vmem:[%s1897_s5 + $0x90] sm:$0xf]  ;;  %v1236_v17 = vor.u32 %v1488_v9, %v1235_v8 }
  0x7c   : > { %988 = vmatpush.bf16.msra.mxu2 %v1388_v47  ;;  %v1436_v11 = vor.u32 %v1538_v4, %v1435_v3  ;;  %v1504_v12 = vld [vmem:[%s1897_s5 + $0x94] sm:$0xf0]  ;;  %v1363_v13 = vld [vmem:[%s1897_s5 + $0x110] sm:$0xf]  ;;  %v1227_v18 = vld [vmem:[%s1897_s5] sm:$0xf] }
  0x7d   : > { %1001 = vmatpush.bf16.msra.mxu3 %v1452_v51  ;;  %v1520_v14 = vld [vmem:[%s1897_s5 + $0x114] sm:$0xf0]  ;;  %v1427_v15 = vld [vmem:[%s1897_s5 + $0x190] sm:$0xf]  ;;  %v1486_v19 = vld [vmem:[%s1897_s5 + $0x4] sm:$0xf0]  ;;  %v1300_v21 = vor.u32 %v1504_v12, %v1299_v10 }
  0x7e   : > { %963 = vmatpush.bf16.msra.mxu0 %v1252_v57  ;;  %v1536_v16 = vld [vmem:[%s1897_s5 + $0x194] sm:$0xf0]  ;;  %v1291_v20 = vld [vmem:[%s1897_s5 + $0x80] sm:$0xf]  ;;  %v1364_v22 = vor.u32 %v1520_v14, %v1363_v13  ;;  %v1502_v23 = vld [vmem:[%s1897_s5 + $0x84] sm:$0xf0]  ;;  %v1228_v33 = vor.u32 %v1486_v19, %v1227_v18 }
  0x7f   : > { %976 = vmatpush.bf16.msra.mxu1 %v1316_v58  ;;  %v1355_v24 = vld [vmem:[%s1897_s5 + $0x100] sm:$0xf]  ;;  %v1518_v25 = vld [vmem:[%s1897_s5 + $0x104] sm:$0xf0]  ;;  %v1428_v26 = vor.u32 %v1536_v16, %v1427_v15  ;;  %v1499_v29 = vld [vmem:[%s1897_s5 + $0x74] sm:$0xf]  ;;  %v1292_v38 = vor.u32 %v1502_v23, %v1291_v20 }
  0x80   : > { %989 = vmatpush.bf16.msra.mxu2 %v1380_v59  ;;  %v1419_v27 = vld [vmem:[%s1897_s5 + $0x180] sm:$0xf]  ;;  %v1534_v28 = vld [vmem:[%s1897_s5 + $0x184] sm:$0xf0]  ;;  %v1285_v30 = vld [vmem:[%s1897_s5 + $0x78] sm:$0xf0]  ;;  %v1356_v39 = vor.u32 %v1518_v25, %v1355_v24 }
  0x81   : > { %1002 = vmatpush.bf16.msra.mxu3 %v1444_v63  ;;  %v1515_v31 = vld [vmem:[%s1897_s5 + $0xf4] sm:$0xf]  ;;  %v560_v32 = vld [vmem:[%s1883_s26 + $0x8] sm:$0xff]  ;;  %v1420_v43 = vor.u32 %v1534_v28, %v1419_v27  ;;  %v1288_v44 = vor.u32 %v1499_v29, %v1285_v30  ;;  %v1497_v48 = vld [vmem:[%s1897_s5 + $0x64] sm:$0xf]  ;;  %p1481_p13 = scmp.ne.s32.totalorder %s1644_s14, 8 }
  0x82   : > { %964 = vmatpush.bf16.msra.mxu0 %v1244_v5  ;;  %v1349_v34 = vld [vmem:[%s1897_s5 + $0xf8] sm:$0xf0]  ;;  %v1531_v35 = vld [vmem:[%s1897_s5 + $0x174] sm:$0xf]  ;;  %v629_v37 = vunpack.c.l.b16 %v560_v32  ;;  %v630_v42 = vunpack.c.h.b16 %v560_v32  ;;  %v1277_v49 = vld [vmem:[%s1897_s5 + $0x68] sm:$0xf0] }
  0x83   : > { %977 = vmatpush.bf16.msra.mxu1 %v1308_v6  ;;  %v1413_v36 = vld [vmem:[%s1897_s5 + $0x178] sm:$0xf0]  ;;  %v1547_v40 = vld [vmem:[%s1897_s5 + $0x1f4] sm:$0xf]  ;;  %v1352_v46 = vor.u32 %v1515_v31, %v1349_v34  ;;  %v1513_v50 = vld [vmem:[%s1897_s5 + $0xe4] sm:$0xf]  ;;  %v1280_v62 = vor.u32 %v1497_v48, %v1277_v49 }
  0x84   : > { %990 = vmatpush.bf16.msra.mxu2 %v1372_v7  ;;  %v1477_v41 = vld [vmem:[%s1897_s5 + $0x1f8] sm:$0xf0]  ;;  %v559_v45 = vld [vmem:[%s1883_s26] sm:$0xff]  ;;  %v1416_v47 = vor.u32 %v1531_v35, %v1413_v36  ;;  %v1341_v54 = vld [vmem:[%s1897_s5 + $0xe8] sm:$0xf0]  ;;  %v1980_v57 = vpack.c.b16 %v629_v37, %v629_v37  ;;  %v1984_v60 = vpack.c.b16 %v630_v42, %v630_v42 }
  0x85   : > { %1003 = vmatpush.bf16.msra.mxu3 %v1436_v11  ;;  %v627_v51 = vunpack.c.l.b16 %v559_v45  ;;  %v628_v52 = vunpack.c.h.b16 %v559_v45  ;;  %v1480_v53 = vor.u32 %v1547_v40, %v1477_v41  ;;  %v1529_v55 = vld [vmem:[%s1897_s5 + $0x164] sm:$0xf]  ;;  %v1405_v56 = vld [vmem:[%s1897_s5 + $0x168] sm:$0xf0]  ;;  %v1344_v0 = vor.u32 %v1513_v50, %v1341_v54  ;;  %v1495_v2 = vld [vmem:[%s1897_s5 + $0x54] sm:$0xf] }
  0x86   : > { %965 = vmatpush.bf16.msra.mxu0 %v1236_v17  ;;  %v1545_v58 = vld [vmem:[%s1897_s5 + $0x1e4] sm:$0xf]  ;;  %v1469_v59 = vld [vmem:[%s1897_s5 + $0x1e8] sm:$0xf0]  ;;  %v1408_v1 = vor.u32 %v1529_v55, %v1405_v56  ;;  %v1269_v3 = vld [vmem:[%s1897_s5 + $0x58] sm:$0xf0] }
  0x87   : > { %978 = vmatpush.bf16.msra.mxu1 %v1300_v21  ;;  %v1986_v61 = vpack.c.b16 %v627_v51, %v627_v51  ;;  %v1988_v63 = vpack.c.b16 %v628_v52, %v628_v52  ;;  %v1511_v4 = vld [vmem:[%s1897_s5 + $0xd4] sm:$0xf]  ;;  %v1472_v5 = vor.u32 %v1545_v58, %v1469_v59  ;;  %v1333_v6 = vld [vmem:[%s1897_s5 + $0xd8] sm:$0xf0]  ;;  %v1272_v11 = vor.u32 %v1495_v2, %v1269_v3  ;;  %v1493_v14 = vld [vmem:[%s1897_s5 + $0x44] sm:$0xf] }
  0x88   : > { %991 = vmatpush.bf16.msra.mxu2 %v1364_v22  ;;  %v1527_v7 = vld [vmem:[%s1897_s5 + $0x154] sm:$0xf]  ;;  %v1397_v8 = vld [vmem:[%s1897_s5 + $0x158] sm:$0xf0]  ;;  %v1336_v12 = vor.u32 %v1511_v4, %v1333_v6  ;;  %v1261_v15 = vld [vmem:[%s1897_s5 + $0x48] sm:$0xf0] }
  0x89   : > { %1004 = vmatpush.bf16.msra.mxu3 %v1428_v26  ;;  %v1543_v9 = vld [vmem:[%s1897_s5 + $0x1d4] sm:$0xf]  ;;  %v1461_v10 = vld [vmem:[%s1897_s5 + $0x1d8] sm:$0xf0]  ;;  %v1400_v13 = vor.u32 %v1527_v7, %v1397_v8  ;;  %v1509_v16 = vld [vmem:[%s1897_s5 + $0xc4] sm:$0xf]  ;;  %v1264_v23 = vor.u32 %v1493_v14, %v1261_v15 }
  0x8a   : > { %966 = vmatpush.bf16.msra.mxu0 %v1228_v33  ;;  %v1464_v17 = vor.u32 %v1543_v9, %v1461_v10  ;;  %v1325_v18 = vld [vmem:[%s1897_s5 + $0xc8] sm:$0xf0]  ;;  %v1525_v19 = vld [vmem:[%s1897_s5 + $0x144] sm:$0xf]  ;;  %v1491_v26 = vld [vmem:[%s1897_s5 + $0x34] sm:$0xf] }
  0x8b   : > { %979 = vmatpush.bf16.msra.mxu1 %v1292_v38  ;;  %v1389_v20 = vld [vmem:[%s1897_s5 + $0x148] sm:$0xf0]  ;;  %v1541_v21 = vld [vmem:[%s1897_s5 + $0x1c4] sm:$0xf]  ;;  %v1328_v24 = vor.u32 %v1509_v16, %v1325_v18  ;;  %v1253_v27 = vld [vmem:[%s1897_s5 + $0x38] sm:$0xf0] }
  0x8c   : > { %992 = vmatpush.bf16.msra.mxu2 %v1356_v39  ;;  %v1453_v22 = vld [vmem:[%s1897_s5 + $0x1c8] sm:$0xf0]  ;;  %v1392_v25 = vor.u32 %v1525_v19, %v1389_v20  ;;  %v1507_v28 = vld [vmem:[%s1897_s5 + $0xb4] sm:$0xf]  ;;  %v1317_v30 = vld [vmem:[%s1897_s5 + $0xb8] sm:$0xf0]  ;;  %v1256_v35 = vor.u32 %v1491_v26, %v1253_v27 }
  0x8d   : > { %1005 = vmatpush.bf16.msra.mxu3 %v1420_v43  ;;  %967 = vmatmul.bf16.vlgmr.msra.gmra.mxu0 %v1986_v61  ;;  %v1456_v29 = vor.u32 %v1541_v21, %v1453_v22  ;;  %v1523_v31 = vld [vmem:[%s1897_s5 + $0x134] sm:$0xf]  ;;  %v1381_v32 = vld [vmem:[%s1897_s5 + $0x138] sm:$0xf0]  ;;  %v1320_v36 = vor.u32 %v1507_v28, %v1317_v30  ;;  %v1489_v38 = vld [vmem:[%s1897_s5 + $0x24] sm:$0xf] }
  0x8e   : > { %1011 = vmatpush.bf16.msrb.mxu0 %v1288_v44  ;;  %980 = vmatmul.bf16.vlgmr.msra.gmra.mxu1 %v1988_v63  ;;  %v1539_v33 = vld [vmem:[%s1897_s5 + $0x1b4] sm:$0xf]  ;;  %v1445_v34 = vld [vmem:[%s1897_s5 + $0x1b8] sm:$0xf0]  ;;  %v1384_v37 = vor.u32 %v1523_v31, %v1381_v32  ;;  %v1245_v39 = vld [vmem:[%s1897_s5 + $0x28] sm:$0xf0] }
  0x8f   : > { %1024 = vmatpush.bf16.msrb.mxu1 %v1352_v46  ;;  %993 = vmatmul.bf16.vlgmr.msra.gmra.mxu2 %v1980_v57  ;;  %v1505_v40 = vld [vmem:[%s1897_s5 + $0xa4] sm:$0xf]  ;;  %v1448_v41 = vor.u32 %v1539_v33, %v1445_v34  ;;  %v1309_v42 = vld [vmem:[%s1897_s5 + $0xa8] sm:$0xf0]  ;;  %v1487_v50 = vld [vmem:[%s1897_s5 + $0x14] sm:$0xf] }
  0x90   : > { %1037 = vmatpush.bf16.msrb.mxu2 %v1416_v47  ;;  %1006 = vmatmul.bf16.vlgmr.msra.gmra.mxu3 %v1984_v60  ;;  %v1521_v43 = vld [vmem:[%s1897_s5 + $0x124] sm:$0xf]  ;;  %v1373_v44 = vld [vmem:[%s1897_s5 + $0x128] sm:$0xf0]  ;;  %v1248_v47 = vor.u32 %v1489_v38, %v1245_v39  ;;  %v1312_v48 = vor.u32 %v1505_v40, %v1309_v42  ;;  %v1237_v51 = vld [vmem:[%s1897_s5 + $0x18] sm:$0xf0] }
  0x91   : > { %1050 = vmatpush.bf16.msrb.mxu3 %v1480_v53  ;;  %v1537_v45 = vld [vmem:[%s1897_s5 + $0x1a4] sm:$0xf]  ;;  %v1437_v46 = vld [vmem:[%s1897_s5 + $0x1a8] sm:$0xf0]  ;;  %v1376_v49 = vor.u32 %v1521_v43, %v1373_v44  ;;  %v1503_v52 = vld [vmem:[%s1897_s5 + $0x94] sm:$0xf] }
  0x92   : > { %1012 = vmatpush.bf16.msrb.mxu0 %v1280_v62  ;;  %v1440_v53 = vor.u32 %v1537_v45, %v1437_v46  ;;  %v1301_v54 = vld [vmem:[%s1897_s5 + $0x98] sm:$0xf0]  ;;  %v1519_v55 = vld [vmem:[%s1897_s5 + $0x114] sm:$0xf]  ;;  %v1240_v62 = vor.u32 %v1487_v50, %v1237_v51  ;;  %v1485_v2 = vld [vmem:[%s1897_s5 + $0x4] sm:$0xf] }
  0x93   : > { %1025 = vmatpush.bf16.msrb.mxu1 %v1344_v0  ;;  %v1365_v56 = vld [vmem:[%s1897_s5 + $0x118] sm:$0xf0]  ;;  %v1535_v58 = vld [vmem:[%s1897_s5 + $0x194] sm:$0xf]  ;;  %v1304_v0 = vor.u32 %v1503_v52, %v1301_v54  ;;  %v1229_v3 = vld [vmem:[%s1897_s5 + $0x8] sm:$0xf0] }
  0x94   : > { %1038 = vmatpush.bf16.msrb.mxu2 %v1408_v1  ;;  %v1429_v59 = vld [vmem:[%s1897_s5 + $0x198] sm:$0xf0]  ;;  %v1368_v1 = vor.u32 %v1519_v55, %v1365_v56  ;;  %v1501_v4 = vld [vmem:[%s1897_s5 + $0x84] sm:$0xf]  ;;  %v1293_v6 = vld [vmem:[%s1897_s5 + $0x88] sm:$0xf0] }
  0x95   : > { %1051 = vmatpush.bf16.msrb.mxu3 %v1472_v5  ;;  %v1432_v5 = vor.u32 %v1535_v58, %v1429_v59  ;;  %v1517_v7 = vld [vmem:[%s1897_s5 + $0x104] sm:$0xf]  ;;  %v1357_v8 = vld [vmem:[%s1897_s5 + $0x108] sm:$0xf0]  ;;  %v557_v21 = vld [vmem:[#allocation2] sm:$0xff] }
  0x96   : > { %1013 = vmatpush.bf16.msrb.mxu0 %v1272_v11  ;;  %v1533_v9 = vld [vmem:[%s1897_s5 + $0x184] sm:$0xf]  ;;  %v1421_v10 = vld [vmem:[%s1897_s5 + $0x188] sm:$0xf0]  ;;  %v1232_v11 = vor.u32 %v1485_v2, %v1229_v3  ;;  %v558_v31 = vld [vmem:[#allocation2 + $0x8] sm:$0xff] }
  0x97   : > { %1026 = vmatpush.bf16.msrb.mxu1 %v1336_v12  ;;  %v1296_v12 = vor.u32 %v1501_v4, %v1293_v6  ;;  %v1424_v14 = vor.u32 %v1533_v9, %v1421_v10 }
  0x98   : > { %1039 = vmatpush.bf16.msrb.mxu2 %v1400_v13  ;;  %v1360_v13 = vor.u32 %v1517_v7, %v1357_v8 }
  0x99   : > { %1052 = vmatpush.bf16.msrb.mxu3 %v1464_v17 }
  0x9a   : > { %1014 = vmatpush.bf16.msrb.mxu0 %v1264_v23 }
  0x9b   : > { %1027 = vmatpush.bf16.msrb.mxu1 %v1328_v24 }
  0x9c   : > { %1040 = vmatpush.bf16.msrb.mxu2 %v1392_v25 }
  0x9d   : > { %1053 = vmatpush.bf16.msrb.mxu3 %v1456_v29 }
  0x9e   : > { %1015 = vmatpush.bf16.msrb.mxu0 %v1256_v35 }
  0x9f   : > { %1028 = vmatpush.bf16.msrb.mxu1 %v1320_v36 }
  0xa0   : > { %1041 = vmatpush.bf16.msrb.mxu2 %v1384_v37 }
  0xa1   : > { %1054 = vmatpush.bf16.msrb.mxu3 %v1448_v41 }
  0xa2   : > { %1016 = vmatpush.bf16.msrb.mxu0 %v1248_v47 }
  0xa3   : > { %1029 = vmatpush.bf16.msrb.mxu1 %v1312_v48 }
  0xa4   : > { %1042 = vmatpush.bf16.msrb.mxu2 %v1376_v49 }
  0xa5   : > { %1055 = vmatpush.bf16.msrb.mxu3 %v1440_v53 }
  0xa6   : > { %1017 = vmatpush.bf16.msrb.mxu0 %v1240_v62 }
  0xa7   : > { %1030 = vmatpush.bf16.msrb.mxu1 %v1304_v0 }
  0xa8   : > { %1043 = vmatpush.bf16.msrb.mxu2 %v1368_v1 }
  0xa9   : > { %1056 = vmatpush.bf16.msrb.mxu3 %v1432_v5 }
  0xaa   : > { %1018 = vmatpush.bf16.msrb.mxu0 %v1232_v11 }
  0xab   : > { %1031 = vmatpush.bf16.msrb.mxu1 %v1296_v12 }
  0xac   : > { %1044 = vmatpush.bf16.msrb.mxu2 %v1360_v13 }
  0xad   : > { %1057 = vmatpush.bf16.msrb.mxu3 %v1424_v14  ;;  %1019 = vmatmul.bf16.vlgmr.msrb.gmra.mxu0 %v1986_v61 }
  0xae   : > { %1032 = vmatmul.bf16.vlgmr.msrb.gmra.mxu1 %v1988_v63 }
  0xaf   : > { %1045 = vmatmul.bf16.vlgmr.msrb.gmra.mxu2 %v1980_v57 }
  0xb0   : > { %1058 = vmatmul.bf16.vlgmr.msrb.gmra.mxu3 %v1984_v60 }
 0x10a   : > { %v968_v15 = vpop.f32.mrf.mxu0 }
 0x10b   : > { %v981_v16 = vpop.f32.mrf.mxu1 }
 0x10c   : > { %v982_v17 = vadd.f32 %v981_v16, %v968_v15 }
 0x112   : > { %v994_v18 = vpop.f32.mrf.mxu2  ;;  %v970_v23 = vpop.f32.mrf.mxu0 }
 0x113   : > { %v995_v19 = vadd.f32 %v994_v18, %v982_v17  ;;  %v1007_v20 = vpop.f32.mrf.mxu3  ;;  %v983_v24 = vpop.f32.mrf.mxu1 }
 0x115   : > { %v1008_v22 = vadd.f32 %v1007_v20, %v995_v19 }
 0x117   : > { %v1063_v25 = vadd.f32 %v1008_v22, %v557_v21 }
 0x119   : > { %1065 = vst [vmem:[#allocation2] sm:$0xff] %v1063_v25 }
 0x11a   : > { %v996_v26 = vpop.f32.mrf.mxu2 }
 0x11b   : > { %v1009_v61 = vpop.f32.mrf.mxu3 }
 0x12a   : > { %v1020_v27 = vpop.f32.mrf.mxu0 }
 0x12b   : > { %v1033_v63 = vpop.f32.mrf.mxu1 }
 0x12c   : > { %v1034_v28 = vadd.f32 %v1033_v63, %v1020_v27 }
 0x132   : > { %v1046_v57 = vpop.f32.mrf.mxu2  ;;  %v1022_v30 = vpop.f32.mrf.mxu0 }
 0x133   : > { %v1047_v29 = vadd.f32 %v1046_v57, %v1034_v28  ;;  %v1059_v60 = vpop.f32.mrf.mxu3  ;;  %v1035_v32 = vpop.f32.mrf.mxu1 }
 0x135   : > { %v1060_v33 = vadd.f32 %v1059_v60, %v1047_v29 }
 0x137   : > { %v1064_v34 = vadd.f32 %v1060_v33, %v558_v31  ;;  %1070 = sbr.rel (%p1481_p13) target bundleno = 328 (0x148), region = 78 }
 0x139   : > { %1066 = vst [vmem:[#allocation2 + $0x8] sm:$0xff] %v1064_v34 }
 0x13a   : > { %v1048_v35 = vpop.f32.mrf.mxu2 }
 0x13b   : > { %v1061_v36 = vpop.f32.mrf.mxu3 }
 0x13c   : > { %v1071_v37 = vld [vmem:[#allocation2] sm:$0xff] }
 0x13d   : > { %v1073_v39 = vld [vmem:[%s539_s12] sm:$0x3] }
 0x13e   : > { %v1075_v40 = vperm.slane %v1073_v39, 0  ;;  %v1076_v41 = vperm.slane %v1073_v39, 1 }
 0x140   : > { %v1072_v38 = vld [vmem:[#allocation2 + $0x8] sm:$0xff]  ;;  %v1079_v42 = vadd.f32 %v1075_v40, %v1071_v37 }
 0x141   : > { %v1080_v43 = vadd.f32 %v1076_v41, %v1072_v38 }
 0x142   : > { %v1081_v44 = vmax.f32 %v1079_v42, 0.0 }
 0x143   : > { %v1082_v45 = vmax.f32 %v1080_v43, 0.0 }
 0x145   : > { %v1083_v46 = vpack.c.bf16 %v1082_v45, %v1081_v44 }
 0x147   : > { %1084 = vst [vmem:[%s1895_s15] sm:$0xff] %v1083_v46 }
 0x148 PF: > { %s13_s18 = sadd.s32 1, %s1660_s18   ;;  %s2078_s12 = smov %s1640_s13 }
 0x149   : > { %p10_p0 = scmp.ge.s32.totalorder %s13_s18, 20   ;;  %s2079_s13 = smov %s1734_s25 }
 0x14a   : > { %s2080_s14 = smov %s1652_s16  ;;  %s2081_s15 = smov %s1656_s17 }
 0x14b   : > { %s2082_s16 = smov %s2085_s19  ;;  %s2083_s17 = smov %s2089_s20 }
 0x14c   :  { %12 = sbr.rel (!%p10_p0) target bundleno = 4 (0x4), region = 119 }

// kernel: _lambda_.43
= control target key start
LH: loop header
LB: loop body
LE: loop exit
PB: predicated region body
PF: predicated region fallthrough
CT: control target
= control target key end

     0   :  { %vm351_vm0 = vcmask 1041409   ;;  %vm354_vm1 = vcmask 1042434   ;;  %vm357_vm2 = vcmask 1043459   ;;  %vm360_vm3 = vcmask 1044484   ;;  %s3576_s1 = inlined_call_operand.vmem [shape: bf16[512,512], index: 1, kind: input, shape index: {}]   ;;  %s3577_s0 = inlined_call_operand.vmem [shape: bf16[8,1,512], index: 0, kind: input, shape index: {}]   ;;  %s3578_s3 = inlined_call_operand.vmem [shape: bf16[512,128], index: 3, kind: input, shape index: {}]   ;;  %s3579_s4 = inlined_call_operand.vmem [shape: f32[1,128], index: 4, kind: input, shape index: {}]   ;;  %s3580_s2 = inlined_call_operand.vmem [shape: f32[1,512], index: 2, kind: input, shape index: {}]   ;;  %s3581_s5 = inlined_call_operand.vmem [shape: f32[8,128], index: 5, kind: output, shape index: {}]  }
   0x1   :  { %v1708_v0 = vld [vmem:[%s3576_s1 + $0xe0] sm:$0xf]  ;;  %v2264_v1 = vld [vmem:[%s3576_s1 + $0xec] sm:$0xf0]  ;;  %vm363_vm4 = vcmask 1045509   ;;  %vm366_vm5 = vcmask 1046534  }
   0x2   :  { %v1836_v2 = vld [vmem:[%s3576_s1 + $0x1e0] sm:$0xf]  ;;  %v1709_v3 = vor.u32 %v2264_v1, %v1708_v0  ;;  %v2296_v4 = vld [vmem:[%s3576_s1 + $0x1ec] sm:$0xf0]  ;;  %vm369_vm6 = vcmask 1047559  }
   0x3   :  { %v1964_v5 = vld [vmem:[%s3576_s1 + $0x2e0] sm:$0xf]  ;;  %v2328_v6 = vld [vmem:[%s3576_s1 + $0x2ec] sm:$0xf0]  ;;  %v1837_v7 = vor.u32 %v2296_v4, %v1836_v2 }
   0x4   :  { %v1965_v8 = vor.u32 %v2328_v6, %v1964_v5  ;;  %v2092_v9 = vld [vmem:[%s3576_s1 + $0x3e0] sm:$0xf]  ;;  %v2360_v10 = vld [vmem:[%s3576_s1 + $0x3ec] sm:$0xf0]  ;;  %1061 = vmatpush.bf16.msra.mxu0 %v1709_v3 }
   0x5   :  { %v1692_v11 = vld [vmem:[%s3576_s1 + $0xc0] sm:$0xf]  ;;  %v2093_v12 = vor.u32 %v2360_v10, %v2092_v9  ;;  %v2260_v13 = vld [vmem:[%s3576_s1 + $0xcc] sm:$0xf0]  ;;  %1074 = vmatpush.bf16.msra.mxu1 %v1837_v7 }
   0x6   :  { %v1820_v14 = vld [vmem:[%s3576_s1 + $0x1c0] sm:$0xf]  ;;  %v2292_v15 = vld [vmem:[%s3576_s1 + $0x1cc] sm:$0xf0]  ;;  %1087 = vmatpush.bf16.msra.mxu2 %v1965_v8  ;;  %v1693_v16 = vor.u32 %v2260_v13, %v1692_v11 }
   0x7   :  { %v1821_v17 = vor.u32 %v2292_v15, %v1820_v14  ;;  %v1948_v18 = vld [vmem:[%s3576_s1 + $0x2c0] sm:$0xf]  ;;  %v2324_v19 = vld [vmem:[%s3576_s1 + $0x2cc] sm:$0xf0]  ;;  %1100 = vmatpush.bf16.msra.mxu3 %v2093_v12 }
   0x8   :  { %v2076_v20 = vld [vmem:[%s3576_s1 + $0x3c0] sm:$0xf]  ;;  %v1949_v21 = vor.u32 %v2324_v19, %v1948_v18  ;;  %v2356_v22 = vld [vmem:[%s3576_s1 + $0x3cc] sm:$0xf0]  ;;  %1062 = vmatpush.bf16.msra.mxu0 %v1693_v16 }
   0x9   :  { %v1676_v23 = vld [vmem:[%s3576_s1 + $0xa0] sm:$0xf]  ;;  %v2256_v24 = vld [vmem:[%s3576_s1 + $0xac] sm:$0xf0]  ;;  %v2077_v25 = vor.u32 %v2356_v22, %v2076_v20  ;;  %1075 = vmatpush.bf16.msra.mxu1 %v1821_v17 }
   0xa   :  { %v1804_v26 = vld [vmem:[%s3576_s1 + $0x1a0] sm:$0xf]  ;;  %v2288_v27 = vld [vmem:[%s3576_s1 + $0x1ac] sm:$0xf0]  ;;  %v1677_v29 = vor.u32 %v2256_v24, %v1676_v23  ;;  %1088 = vmatpush.bf16.msra.mxu2 %v1949_v21 }
   0xb   :  { %v1932_v28 = vld [vmem:[%s3576_s1 + $0x2a0] sm:$0xf]  ;;  %v2320_v30 = vld [vmem:[%s3576_s1 + $0x2ac] sm:$0xf0]  ;;  %v1805_v33 = vor.u32 %v2288_v27, %v1804_v26  ;;  %1101 = vmatpush.bf16.msra.mxu3 %v2077_v25  ;;  %v2653_v25 = vld [vmem:[%s3576_s1 + $0xe4] sm:$0xf] }
   0xc   :  { %v2060_v31 = vld [vmem:[%s3576_s1 + $0x3a0] sm:$0xf]  ;;  %v2352_v32 = vld [vmem:[%s3576_s1 + $0x3ac] sm:$0xf0]  ;;  %v1933_v34 = vor.u32 %v2320_v30, %v1932_v28  ;;  %1063 = vmatpush.bf16.msra.mxu0 %v1677_v29  ;;  %v2658_v26 = vld [vmem:[%s3576_s1 + $0xf0] sm:$0xf0] }
   0xd   :  { %v1660_v35 = vld [vmem:[%s3576_s1 + $0x80] sm:$0xf]  ;;  %v2252_v36 = vld [vmem:[%s3576_s1 + $0x8c] sm:$0xf0]  ;;  %v2061_v38 = vor.u32 %v2352_v32, %v2060_v31  ;;  %1076 = vmatpush.bf16.msra.mxu1 %v1805_v33  ;;  %v2663_v29 = vld [vmem:[%s3576_s1 + $0x1e4] sm:$0xf] }
   0xe   :  { %v1788_v37 = vld [vmem:[%s3576_s1 + $0x180] sm:$0xf]  ;;  %v2284_v39 = vld [vmem:[%s3576_s1 + $0x18c] sm:$0xf0]  ;;  %v1661_v44 = vor.u32 %v2252_v36, %v1660_v35  ;;  %1089 = vmatpush.bf16.msra.mxu2 %v1933_v34  ;;  %v2668_v30 = vld [vmem:[%s3576_s1 + $0x1f0] sm:$0xf0] }
   0xf   :  { %v1916_v40 = vld [vmem:[%s3576_s1 + $0x280] sm:$0xf]  ;;  %v2316_v41 = vld [vmem:[%s3576_s1 + $0x28c] sm:$0xf0]  ;;  %v1789_v45 = vor.u32 %v2284_v39, %v1788_v37  ;;  %1102 = vmatpush.bf16.msra.mxu3 %v2061_v38  ;;  %v2673_v31 = vld [vmem:[%s3576_s1 + $0x2e4] sm:$0xf] }
  0x10   :  { %v2044_v42 = vld [vmem:[%s3576_s1 + $0x380] sm:$0xf]  ;;  %v2348_v43 = vld [vmem:[%s3576_s1 + $0x38c] sm:$0xf0]  ;;  %v1917_v46 = vor.u32 %v2316_v41, %v1916_v40  ;;  %1064 = vmatpush.bf16.msra.mxu0 %v1661_v44  ;;  %v2678_v32 = vld [vmem:[%s3576_s1 + $0x2f0] sm:$0xf0] }
  0x11   :  { %v1644_v47 = vld [vmem:[%s3576_s1 + $0x60] sm:$0xf]  ;;  %v2248_v48 = vld [vmem:[%s3576_s1 + $0x6c] sm:$0xf0]  ;;  %v2045_v50 = vor.u32 %v2348_v43, %v2044_v42  ;;  %1077 = vmatpush.bf16.msra.mxu1 %v1789_v45  ;;  %v2683_v33 = vld [vmem:[%s3576_s1 + $0x3e4] sm:$0xf] }
  0x12   :  { %v1772_v49 = vld [vmem:[%s3576_s1 + $0x160] sm:$0xf]  ;;  %v2280_v51 = vld [vmem:[%s3576_s1 + $0x16c] sm:$0xf0]  ;;  %v1645_v56 = vor.u32 %v2248_v48, %v1644_v47  ;;  %1090 = vmatpush.bf16.msra.mxu2 %v1917_v46  ;;  %v2688_v34 = vld [vmem:[%s3576_s1 + $0x3f0] sm:$0xf0] }
  0x13   :  { %v1900_v52 = vld [vmem:[%s3576_s1 + $0x260] sm:$0xf]  ;;  %v2312_v53 = vld [vmem:[%s3576_s1 + $0x26c] sm:$0xf0]  ;;  %v1773_v57 = vor.u32 %v2280_v51, %v1772_v49  ;;  %1103 = vmatpush.bf16.msra.mxu3 %v2045_v50  ;;  %v2693_v35 = vld [vmem:[%s3576_s1 + $0xc4] sm:$0xf] }
  0x14   :  { %v2028_v54 = vld [vmem:[%s3576_s1 + $0x360] sm:$0xf]  ;;  %v2344_v55 = vld [vmem:[%s3576_s1 + $0x36c] sm:$0xf0]  ;;  %v1901_v58 = vor.u32 %v2312_v53, %v1900_v52  ;;  %1065 = vmatpush.bf16.msra.mxu0 %v1645_v56  ;;  %v2698_v36 = vld [vmem:[%s3576_s1 + $0xd0] sm:$0xf0]  ;;  %v1713_v52 = vor.u32 %v2653_v25, %v2658_v26  ;;  %v1841_v56 = vor.u32 %v2663_v29, %v2668_v30 }
  0x15   :  { %v1628_v59 = vld [vmem:[%s3576_s1 + $0x40] sm:$0xf]  ;;  %v2244_v60 = vld [vmem:[%s3576_s1 + $0x4c] sm:$0xf0]  ;;  %v2029_v62 = vor.u32 %v2344_v55, %v2028_v54  ;;  %1078 = vmatpush.bf16.msra.mxu1 %v1773_v57  ;;  %v2703_v38 = vld [vmem:[%s3576_s1 + $0x1c4] sm:$0xf]  ;;  %v1969_v57 = vor.u32 %v2673_v31, %v2678_v32 }
  0x16   :  { %v1756_v61 = vld [vmem:[%s3576_s1 + $0x140] sm:$0xf]  ;;  %v2276_v63 = vld [vmem:[%s3576_s1 + $0x14c] sm:$0xf0]  ;;  %v1629_v4 = vor.u32 %v2244_v60, %v1628_v59  ;;  %1091 = vmatpush.bf16.msra.mxu2 %v1901_v58  ;;  %v2708_v39 = vld [vmem:[%s3576_s1 + $0x1d0] sm:$0xf0]  ;;  %v2097_v58 = vor.u32 %v2683_v33, %v2688_v34  ;;  %v1697_v59 = vor.u32 %v2693_v35, %v2698_v36 }
  0x17   :  { %v1884_v0 = vld [vmem:[%s3576_s1 + $0x240] sm:$0xf]  ;;  %v2308_v1 = vld [vmem:[%s3576_s1 + $0x24c] sm:$0xf0]  ;;  %v1757_v7 = vor.u32 %v2276_v63, %v1756_v61  ;;  %1104 = vmatpush.bf16.msra.mxu3 %v2029_v62  ;;  %v2713_v40 = vld [vmem:[%s3576_s1 + $0x2c4] sm:$0xf]  ;;  %v1825_v63 = vor.u32 %v2703_v38, %v2708_v39 }
  0x18   :  { %v2012_v2 = vld [vmem:[%s3576_s1 + $0x340] sm:$0xf]  ;;  %v2340_v3 = vld [vmem:[%s3576_s1 + $0x34c] sm:$0xf0]  ;;  %v1885_v8 = vor.u32 %v2308_v1, %v1884_v0  ;;  %1066 = vmatpush.bf16.msra.mxu0 %v1629_v4  ;;  %v2718_v41 = vld [vmem:[%s3576_s1 + $0x2d0] sm:$0xf0] }
  0x19   :  { %v1612_v5 = vld [vmem:[%s3576_s1 + $0x20] sm:$0xf]  ;;  %v2240_v6 = vld [vmem:[%s3576_s1 + $0x2c] sm:$0xf0]  ;;  %v2013_v12 = vor.u32 %v2340_v3, %v2012_v2  ;;  %1079 = vmatpush.bf16.msra.mxu1 %v1757_v7  ;;  %v2723_v42 = vld [vmem:[%s3576_s1 + $0x3c4] sm:$0xf]  ;;  %v1953_v0 = vor.u32 %v2713_v40, %v2718_v41 }
  0x1a   :  { %v1740_v9 = vld [vmem:[%s3576_s1 + $0x120] sm:$0xf]  ;;  %v2272_v10 = vld [vmem:[%s3576_s1 + $0x12c] sm:$0xf0]  ;;  %v1613_v20 = vor.u32 %v2240_v6, %v1612_v5  ;;  %1092 = vmatpush.bf16.msra.mxu2 %v1885_v8  ;;  %v2728_v43 = vld [vmem:[%s3576_s1 + $0x3d0] sm:$0xf0] }
  0x1b   :  { %v1868_v11 = vld [vmem:[%s3576_s1 + $0x220] sm:$0xf]  ;;  %v2304_v13 = vld [vmem:[%s3576_s1 + $0x22c] sm:$0xf0]  ;;  %v1741_v27 = vor.u32 %v2272_v10, %v1740_v9  ;;  %1105 = vmatpush.bf16.msra.mxu3 %v2013_v12  ;;  %v2733_v44 = vld [vmem:[%s3576_s1 + $0xa4] sm:$0xf]  ;;  %v2081_v1 = vor.u32 %v2723_v42, %v2728_v43 }
  0x1c   :  { %v1996_v14 = vld [vmem:[%s3576_s1 + $0x320] sm:$0xf]  ;;  %v2336_v15 = vld [vmem:[%s3576_s1 + $0x32c] sm:$0xf0]  ;;  %v1869_v28 = vor.u32 %v2304_v13, %v1868_v11  ;;  %1067 = vmatpush.bf16.msra.mxu0 %v1613_v20  ;;  %v2741_v47 = vld [vmem:[%s3576_s1 + $0xb0] sm:$0xf0] }
  0x1d   :  { %v2615_v16 = vld [vmem:[%s3576_s1] sm:$0xf]  ;;  %v2236_v17 = vld [vmem:[%s3576_s1 + $0xc] sm:$0xf0]  ;;  %v1997_v37 = vor.u32 %v2336_v15, %v1996_v14  ;;  %v2746_v48 = vld [vmem:[%s3576_s1 + $0x1a4] sm:$0xf]  ;;  %1080 = vmatpush.bf16.msra.mxu1 %v1741_v27  ;;  %v1681_v2 = vor.u32 %v2733_v44, %v2741_v47 }
  0x1e   :  { %v2623_v18 = vld [vmem:[%s3576_s1 + $0x100] sm:$0xf]  ;;  %v2628_v19 = vld [vmem:[%s3576_s1 + $0x10c] sm:$0xf0]  ;;  %v1597_v45 = vor.u32 %v2236_v17, %v2615_v16  ;;  %v2751_v49 = vld [vmem:[%s3576_s1 + $0x1b0] sm:$0xf0]  ;;  %1093 = vmatpush.bf16.msra.mxu2 %v1869_v28 }
  0x1f   :  { %v2633_v21 = vld [vmem:[%s3576_s1 + $0x200] sm:$0xf]  ;;  %v2638_v22 = vld [vmem:[%s3576_s1 + $0x20c] sm:$0xf0]  ;;  %v1725_v46 = vor.u32 %v2628_v19, %v2623_v18  ;;  %v2762_v53 = vld [vmem:[%s3576_s1 + $0x2a4] sm:$0xf]  ;;  %1106 = vmatpush.bf16.msra.mxu3 %v1997_v37  ;;  %v1809_v6 = vor.u32 %v2746_v48, %v2751_v49 }
  0x20   :  { %v2643_v23 = vld [vmem:[%s3576_s1 + $0x300] sm:$0xf]  ;;  %v2648_v24 = vld [vmem:[%s3576_s1 + $0x30c] sm:$0xf0]  ;;  %v1853_v50 = vor.u32 %v2638_v22, %v2633_v21  ;;  %v2767_v54 = vld [vmem:[%s3576_s1 + $0x2b0] sm:$0xf0]  ;;  %1068 = vmatpush.bf16.msra.mxu0 %v1597_v45 }
  0x21   :  { %v1981_v51 = vor.u32 %v2648_v24, %v2643_v23  ;;  %v2772_v55 = vld [vmem:[%s3576_s1 + $0x3a4] sm:$0xf]  ;;  %v2785_v60 = vld [vmem:[%s3576_s1 + $0x3b0] sm:$0xf0]  ;;  %v1937_v7 = vor.u32 %v2762_v53, %v2767_v54  ;;  %1081 = vmatpush.bf16.msra.mxu1 %v1725_v46  ;;  %v2410_v17 = vld [vmem:[%s3577_s0 + $0x8] sm:$0xff]  }
  0x22   :  { %v2790_v61 = vld [vmem:[%s3576_s1 + $0x84] sm:$0xf]  ;;  %v2795_v62 = vld [vmem:[%s3576_s1 + $0x90] sm:$0xf0]  ;;  %v2065_v8 = vor.u32 %v2772_v55, %v2785_v60  ;;  %1094 = vmatpush.bf16.msra.mxu2 %v1853_v50  ;;  %v2862_v21 = vunpack.c.l.bf16 %v2410_v17  ;;  %v2864_v22 = vunpack.c.h.bf16 %v2410_v17  ;;  %v2412_v23 = vld [vmem:[%s3577_s0 + $0x18] sm:$0xff]  }
  0x23   :  { %v2808_v3 = vld [vmem:[%s3576_s1 + $0x184] sm:$0xf]  ;;  %v2813_v4 = vld [vmem:[%s3576_s1 + $0x190] sm:$0xf0]  ;;  %v1665_v9 = vor.u32 %v2790_v61, %v2795_v62  ;;  %1107 = vmatpush.bf16.msra.mxu3 %v1981_v51  ;;  %v2873_v26 = vunpack.c.l.bf16 %v2412_v23  ;;  %v2875_v27 = vunpack.c.h.bf16 %v2412_v23 }
  0x24   :  { %v2818_v5 = vld [vmem:[%s3576_s1 + $0x284] sm:$0xf]  ;;  %v2831_v10 = vld [vmem:[%s3576_s1 + $0x290] sm:$0xf0]  ;;  %v1793_v13 = vor.u32 %v2808_v3, %v2813_v4  ;;  %1113 = vmatpush.bf16.msrb.mxu0 %v1713_v52  ;;  %v62_v30 = vperm.slane %v2862_v21, 4  ;;  %v66_v31 = vperm.slane %v2864_v22, 4 }
  0x25   :  { %v2836_v11 = vld [vmem:[%s3576_s1 + $0x384] sm:$0xf]  ;;  %v2841_v12 = vld [vmem:[%s3576_s1 + $0x390] sm:$0xf0]  ;;  %v1921_v14 = vor.u32 %v2818_v5, %v2831_v10  ;;  %1126 = vmatpush.bf16.msrb.mxu1 %v1841_v56  ;;  %v78_v34 = vperm.slane %v2873_v26, 4  ;;  %v82_v35 = vperm.slane %v2875_v27, 4 }
  0x26   :  { %v2049_v15 = vor.u32 %v2836_v11, %v2841_v12  ;;  %v2395_v16 = vld [vmem:[%s3577_s0] sm:$0xff]   ;;  %v2411_v18 = vld [vmem:[%s3577_s0 + $0x10] sm:$0xff]   ;;  %1139 = vmatpush.bf16.msrb.mxu2 %v1969_v57  ;;  %v126_v38 = vpack.c.bf16 %v62_v30, %v62_v30  ;;  %v130_v39 = vpack.c.bf16 %v66_v31, %v66_v31  ;;  %v60_v61 = vperm.slane %v2862_v21, 0 }
  0x27   :  { %v2858_v19 = vunpack.c.l.bf16 %v2395_v16  ;;  %v2860_v20 = vunpack.c.h.bf16 %v2395_v16  ;;  %v2869_v24 = vunpack.c.l.bf16 %v2411_v18  ;;  %v2871_v25 = vunpack.c.h.bf16 %v2411_v18  ;;  %1152 = vmatpush.bf16.msrb.mxu3 %v2097_v58  ;;  %v2246_v51 = vld [vmem:[%s3576_s1 + $0x64] sm:$0xf]  ;;  %v1646_v52 = vld [vmem:[%s3576_s1 + $0x70] sm:$0xf0] }
  0x28   :  { %1114 = vmatpush.bf16.msrb.mxu0 %v1697_v59  ;;  %v142_v42 = vpack.c.bf16 %v78_v34, %v78_v34  ;;  %v146_v43 = vpack.c.bf16 %v82_v35, %v82_v35  ;;  %v328_v50 = vunpack.c.l.b16 %v126_v38  ;;  %v2278_v56 = vld [vmem:[%s3576_s1 + $0x164] sm:$0xf]  ;;  %v332_v57 = vunpack.c.l.b16 %v130_v39  ;;  %v1902_v16 = vld [vmem:[%s3576_s1 + $0x270] sm:$0xf0] }
  0x29   :  { %v54_v28 = vperm.slane %v2858_v19, 4  ;;  %v58_v29 = vperm.slane %v2860_v20, 4  ;;  %v70_v32 = vperm.slane %v2869_v24, 4  ;;  %v74_v33 = vperm.slane %v2871_v25, 4  ;;  %1127 = vmatpush.bf16.msrb.mxu1 %v1825_v63  ;;  %v2342_v18 = vld [vmem:[%s3576_s1 + $0x364] sm:$0xf] }
  0x2a   :  { %1140 = vmatpush.bf16.msrb.mxu2 %v1953_v0  ;;  %v344_v63 = vunpack.c.l.b16 %v142_v42  ;;  %v1774_v0 = vld [vmem:[%s3576_s1 + $0x170] sm:$0xf0]  ;;  %v348_v17 = vunpack.c.l.b16 %v146_v43  ;;  %v387_v44 = vrot.slane %v328_v50, 6  ;;  %v389_v47 = vrot.slane %v332_v57, 5 }
  0x2b   :  { %v118_v36 = vpack.c.bf16 %v54_v28, %v54_v28  ;;  %v122_v37 = vpack.c.bf16 %v58_v29, %v58_v29  ;;  %v134_v40 = vpack.c.bf16 %v70_v32, %v70_v32  ;;  %v138_v41 = vpack.c.bf16 %v74_v33, %v74_v33  ;;  %1153 = vmatpush.bf16.msrb.mxu3 %v2081_v1  ;;  %v2310_v1 = vld [vmem:[%s3576_s1 + $0x264] sm:$0xf] }
  0x2c   :  { %1115 = vmatpush.bf16.msrb.mxu0 %v1681_v2  ;;  %v2030_v2 = vld [vmem:[%s3576_s1 + $0x370] sm:$0xf0]  ;;  %v395_v48 = vrot.slane %v344_v63, 2  ;;  %v397_v49 = vrot.slane %v348_v17, 1  ;;  %v1649_v53 = vor.u32 %v2246_v51, %v1646_v52  ;;  %v1777_v54 = vor.u32 %v2278_v56, %v1774_v0 }
  0x2d   :  { %v320_v45 = vunpack.c.l.b16 %v118_v36  ;;  %v324_v46 = vunpack.c.l.b16 %v122_v37  ;;  %v336_v58 = vunpack.c.l.b16 %v134_v40  ;;  %v340_v59 = vunpack.c.l.b16 %v138_v41  ;;  %1128 = vmatpush.bf16.msrb.mxu1 %v1809_v6 }
  0x2e   :  { %1141 = vmatpush.bf16.msrb.mxu2 %v1937_v7  ;;  %v1905_v7 = vor.u32 %v2310_v1, %v1902_v16  ;;  %v2033_v31 = vor.u32 %v2342_v18, %v2030_v2  ;;  %v52_v32 = vperm.slane %v2858_v19, 0  ;;  %v56_v55 = vperm.slane %v2860_v20, 0 }
  0x2f   :  { %v385_v23 = vrot.slane %v324_v46, 7  ;;  %1154 = vmatpush.bf16.msrb.mxu3 %v2065_v8  ;;  %v391_v28 = vrot.slane %v336_v58, 4  ;;  %v393_v29 = vrot.slane %v340_v59, 3  ;;  %v64_v62 = vperm.slane %v2864_v22, 0 }
  0x30   :  { %1116 = vmatpush.bf16.msrb.mxu0 %v1665_v9  ;;  %v68_v8 = vperm.slane %v2869_v24, 0  ;;  %v72_v3 = vperm.slane %v2871_v25, 0  ;;  %v76_v4 = vperm.slane %v2873_v26, 0  ;;  %v80_v5 = vperm.slane %v2875_v27, 0 }
  0x31   :  { %v386_v6 = vsel %vm351_vm0, %v385_v23, %v320_v45  ;;  %1129 = vmatpush.bf16.msrb.mxu1 %v1793_v13  ;;  %v116_v13 = vpack.c.bf16 %v52_v32, %v52_v32  ;;  %v124_v33 = vpack.c.bf16 %v60_v61, %v60_v61  ;;  %v128_v35 = vpack.c.bf16 %v64_v62, %v64_v62 }
  0x32   :  { %v388_v30 = vsel %vm354_vm1, %v387_v44, %v386_v6  ;;  %1142 = vmatpush.bf16.msrb.mxu2 %v1921_v14  ;;  %v120_v14 = vpack.c.bf16 %v56_v55, %v56_v55  ;;  %v132_v36 = vpack.c.bf16 %v68_v8, %v68_v8  ;;  %v136_v11 = vpack.c.bf16 %v72_v3, %v72_v3 }
  0x33   :  { %v390_v60 = vsel %vm357_vm2, %v389_v47, %v388_v30  ;;  %1155 = vmatpush.bf16.msrb.mxu3 %v2049_v15  ;;  %v140_v15 = vpack.c.bf16 %v76_v4, %v76_v4  ;;  %v144_v37 = vpack.c.bf16 %v80_v5, %v80_v5  ;;  %v318_v38 = vunpack.c.l.b16 %v116_v13 }
  0x34   :  { %v392_v9 = vsel %vm360_vm3, %v391_v28, %v390_v60  ;;  %1117 = vmatpush.bf16.msrb.mxu0 %v1649_v53  ;;  %v322_v40 = vunpack.c.l.b16 %v120_v14  ;;  %v326_v41 = vunpack.c.l.b16 %v124_v33  ;;  %v330_v42 = vunpack.c.l.b16 %v128_v35 }
  0x35   :  { %v394_v10 = vsel %vm363_vm4, %v393_v29, %v392_v9  ;;  %1130 = vmatpush.bf16.msrb.mxu1 %v1777_v54  ;;  %v334_v43 = vunpack.c.l.b16 %v132_v36  ;;  %v338_v45 = vunpack.c.l.b16 %v136_v11  ;;  %v342_v46 = vunpack.c.l.b16 %v140_v15 }
  0x36   :  { %v396_v34 = vsel %vm366_vm5, %v395_v48, %v394_v10  ;;  %1143 = vmatpush.bf16.msrb.mxu2 %v1905_v7  ;;  %v346_v50 = vunpack.c.l.b16 %v144_v37  ;;  %v350_v51 = vrot.slane %v322_v40, 7  ;;  %v353_v52 = vrot.slane %v326_v41, 6 }
  0x37   :  { %v398_v12 = vsel %vm369_vm6, %v397_v49, %v396_v34  ;;  %1156 = vmatpush.bf16.msrb.mxu3 %v2033_v31  ;;  %v356_v56 = vrot.slane %v330_v42, 5  ;;  %v55_v57 = vperm.slane %v2858_v19, 6  ;;  %v359_v58 = vrot.slane %v334_v43, 4 }
  0x38   :  { %v2948_v39 = vpack.c.b16 %v398_v12, %v398_v12  ;;  %v362_v59 = vrot.slane %v338_v45, 3  ;;  %v365_v63 = vrot.slane %v342_v46, 2  ;;  %v368_v0 = vrot.slane %v346_v50, 1 }
  0x39   :  { %v352_v1 = vsel %vm351_vm0, %v350_v51, %v318_v38  ;;  %v59_v16 = vperm.slane %v2860_v20, 6  ;;  %v63_v17 = vperm.slane %v2862_v21, 6  ;;  %v67_v18 = vperm.slane %v2864_v22, 6 }
  0x3a   :  { %1095 = vmatmul.bf16.vlgmr.msra.gmra.mxu2 %v2948_v39  ;;  %v355_v23 = vsel %vm354_vm1, %v353_v52, %v352_v1  ;;  %v71_v44 = vperm.slane %v2869_v24, 6  ;;  %v75_v47 = vperm.slane %v2871_v25, 6  ;;  %v79_v2 = vperm.slane %v2873_v26, 6  ;;  %v1758_v1 = vld [vmem:[%s3576_s1 + $0x150] sm:$0xf0] }
  0x3b   :  { %v358_v28 = vsel %vm357_vm2, %v356_v56, %v355_v23  ;;  %v83_v29 = vperm.slane %v2875_v27, 6  ;;  %v119_v48 = vpack.c.bf16 %v55_v57, %v55_v57  ;;  %v123_v49 = vpack.c.bf16 %v59_v16, %v59_v16 }
  0x3c   :  { %v361_v6 = vsel %vm360_vm3, %v359_v58, %v358_v28  ;;  %v127_v53 = vpack.c.bf16 %v63_v17, %v63_v17  ;;  %v131_v54 = vpack.c.bf16 %v67_v18, %v67_v18  ;;  %v135_v7 = vpack.c.bf16 %v71_v44, %v71_v44  ;;  %v2306_v44 = vld [vmem:[%s3576_s1 + $0x244] sm:$0xf] }
  0x3d   :  { %v364_v30 = vsel %vm363_vm4, %v362_v59, %v361_v6  ;;  %v139_v31 = vpack.c.bf16 %v75_v47, %v75_v47  ;;  %v143_v32 = vpack.c.bf16 %v79_v2, %v79_v2  ;;  %v147_v55 = vpack.c.bf16 %v83_v29, %v83_v29  ;;  %v1886_v47 = vld [vmem:[%s3576_s1 + $0x250] sm:$0xf0]  ;;  %v2338_v2 = vld [vmem:[%s3576_s1 + $0x344] sm:$0xf] }
  0x3e   :  { %v367_v60 = vsel %vm366_vm5, %v365_v63, %v364_v30  ;;  %v321_v61 = vunpack.c.l.b16 %v119_v48  ;;  %v325_v62 = vunpack.c.l.b16 %v123_v49  ;;  %v329_v8 = vunpack.c.l.b16 %v127_v53  ;;  %v2014_v6 = vld [vmem:[%s3576_s1 + $0x350] sm:$0xf0]  ;;  %v2238_v53 = vld [vmem:[%s3576_s1 + $0x24] sm:$0xf] }
  0x3f   :  { %v370_v9 = vsel %vm369_vm6, %v368_v0, %v367_v60  ;;  %v333_v3 = vunpack.c.l.b16 %v131_v54  ;;  %v337_v4 = vunpack.c.l.b16 %v135_v7  ;;  %v341_v5 = vunpack.c.l.b16 %v139_v31  ;;  %v2274_v0 = vld [vmem:[%s3576_s1 + $0x144] sm:$0xf]  ;;  %v1614_v54 = vld [vmem:[%s3576_s1 + $0x30] sm:$0xf0] }
  0x40   :  { %v2966_v10 = vpack.c.b16 %v370_v9, %v370_v9  ;;  %v345_v13 = vunpack.c.l.b16 %v143_v32  ;;  %v349_v14 = vunpack.c.l.b16 %v147_v55  ;;  %v399_v33 = vrot.slane %v325_v62, 7  ;;  %v2270_v55 = vld [vmem:[%s3576_s1 + $0x124] sm:$0xf]  ;;  %v1742_v60 = vld [vmem:[%s3576_s1 + $0x130] sm:$0xf0] }
  0x41   :  { %v401_v34 = vrot.slane %v329_v8, 6  ;;  %v403_v35 = vrot.slane %v333_v3, 5  ;;  %v405_v36 = vrot.slane %v337_v4, 4  ;;  %v407_v11 = vrot.slane %v341_v5, 3  ;;  %v2302_v9 = vld [vmem:[%s3576_s1 + $0x224] sm:$0xf] }
  0x42   :  { %1069 = vmatmul.bf16.vlgmr.msra.gmra.mxu0 %v2966_v10  ;;  %v400_v12 = vsel %vm351_vm0, %v399_v33, %v321_v61  ;;  %v409_v15 = vrot.slane %v345_v13, 2  ;;  %v411_v37 = vrot.slane %v349_v14, 1  ;;  %v53_v38 = vperm.slane %v2858_v19, 2  ;;  %v1870_v3 = vld [vmem:[%s3576_s1 + $0x230] sm:$0xf0] }
  0x43   :  { %v402_v40 = vsel %vm354_vm1, %v401_v34, %v400_v12  ;;  %v57_v41 = vperm.slane %v2860_v20, 2  ;;  %v61_v42 = vperm.slane %v2862_v21, 2  ;;  %v65_v43 = vperm.slane %v2864_v22, 2  ;;  %v2242_v22 = vld [vmem:[%s3576_s1 + $0x44] sm:$0xf] }
  0x44   :  { %v404_v45 = vsel %vm357_vm2, %v403_v35, %v402_v40  ;;  %v69_v46 = vperm.slane %v2869_v24, 2  ;;  %v73_v50 = vperm.slane %v2871_v25, 2  ;;  %v77_v51 = vperm.slane %v2873_v26, 2  ;;  %v2334_v33 = vld [vmem:[%s3576_s1 + $0x324] sm:$0xf] }
  0x45   :  { %v406_v52 = vsel %vm360_vm3, %v405_v36, %v404_v45  ;;  %v81_v19 = vperm.slane %v2875_v27, 2  ;;  %v117_v56 = vpack.c.bf16 %v53_v38, %v53_v38  ;;  %v121_v57 = vpack.c.bf16 %v57_v41, %v57_v41  ;;  %v1630_v27 = vld [vmem:[%s3576_s1 + $0x50] sm:$0xf0]  ;;  %v2266_v38 = vld [vmem:[%s3576_s1 + $0x104] sm:$0xf] }
  0x46   :  { %v408_v20 = vsel %vm363_vm4, %v407_v11, %v406_v52  ;;  %v125_v58 = vpack.c.bf16 %v61_v42, %v61_v42  ;;  %v129_v21 = vpack.c.bf16 %v65_v43, %v65_v43  ;;  %v133_v59 = vpack.c.bf16 %v69_v46, %v69_v46  ;;  %v1998_v34 = vld [vmem:[%s3576_s1 + $0x330] sm:$0xf0]  ;;  %v2298_v45 = vld [vmem:[%s3576_s1 + $0x204] sm:$0xf] }
  0x47   :  { %v410_v24 = vsel %vm366_vm5, %v409_v15, %v408_v20  ;;  %v137_v25 = vpack.c.bf16 %v73_v50, %v73_v50  ;;  %v141_v63 = vpack.c.bf16 %v77_v51, %v77_v51  ;;  %v145_v26 = vpack.c.bf16 %v81_v19, %v81_v19  ;;  %v2234_v15 = vld [vmem:[%s3576_s1 + $0x4] sm:$0xf]  ;;  %v1726_v43 = vld [vmem:[%s3576_s1 + $0x110] sm:$0xf0]  ;;  %v1716_v19 = vld [vmem:[%s3576_s1 + $0xe8] sm:$0xf] }
  0x48   :  { %v412_v16 = vsel %vm369_vm6, %v411_v37, %v410_v24  ;;  %v319_v17 = vunpack.c.l.b16 %v117_v56  ;;  %v323_v18 = vunpack.c.l.b16 %v121_v57  ;;  %v327_v23 = vunpack.c.l.b16 %v125_v58  ;;  %v1598_v37 = vld [vmem:[%s3576_s1 + $0x10] sm:$0xf0]  ;;  %v2265_v56 = vld [vmem:[%s3576_s1 + $0xf4] sm:$0xf0]  ;;  %v2330_v20 = vld [vmem:[%s3576_s1 + $0x304] sm:$0xf] }
  0x49   :  { %v3005_v28 = vpack.c.b16 %v412_v16, %v412_v16  ;;  %v331_v29 = vunpack.c.l.b16 %v129_v21  ;;  %v335_v48 = vunpack.c.l.b16 %v133_v59  ;;  %v339_v49 = vunpack.c.l.b16 %v137_v25  ;;  %v1854_v52 = vld [vmem:[%s3576_s1 + $0x210] sm:$0xf0]  ;;  %v1844_v21 = vld [vmem:[%s3576_s1 + $0x1e8] sm:$0xf]  ;;  %v2297_v24 = vld [vmem:[%s3576_s1 + $0x1f4] sm:$0xf0] }
  0x4a   :  { %v343_v7 = vunpack.c.l.b16 %v141_v63  ;;  %v347_v30 = vunpack.c.l.b16 %v145_v26  ;;  %v371_v31 = vrot.slane %v323_v18, 7  ;;  %v373_v32 = vrot.slane %v327_v23, 6  ;;  %v1982_v58 = vld [vmem:[%s3576_s1 + $0x310] sm:$0xf0]  ;;  %v1972_v25 = vld [vmem:[%s3576_s1 + $0x2e8] sm:$0xf] }
  0x4b   :  { %1108 = vmatmul.bf16.vlgmr.msra.gmra.mxu3 %v3005_v28  ;;  %v375_v61 = vrot.slane %v331_v29, 5  ;;  %v377_v62 = vrot.slane %v335_v48, 4  ;;  %v1633_v8 = vor.u32 %v2242_v22, %v1630_v27  ;;  %v379_v5 = vrot.slane %v339_v49, 3  ;;  %v2329_v63 = vld [vmem:[%s3576_s1 + $0x2f4] sm:$0xf0] }
  0x4c   :  { %v372_v4 = vsel %vm351_vm0, %v371_v31, %v319_v17  ;;  %v381_v13 = vrot.slane %v343_v7, 2  ;;  %v1761_v14 = vor.u32 %v2274_v0, %v1758_v1  ;;  %v1889_v36 = vor.u32 %v2306_v44, %v1886_v47  ;;  %v2100_v1 = vld [vmem:[%s3576_s1 + $0x3e8] sm:$0xf]  ;;  %v2361_v16 = vld [vmem:[%s3576_s1 + $0x3f4] sm:$0xf0] }
  0x4d   :  { %v374_v35 = vsel %vm354_vm1, %v373_v32, %v372_v4  ;;  %1118 = vmatpush.bf16.msrb.mxu0 %v1633_v8  ;;  %v2017_v11 = vor.u32 %v2338_v2, %v2014_v6  ;;  %v1617_v12 = vor.u32 %v2238_v53, %v1614_v54  ;;  %v383_v41 = vrot.slane %v347_v30, 1  ;;  %v1700_v44 = vld [vmem:[%s3576_s1 + $0xc8] sm:$0xf]  ;;  %v2261_v47 = vld [vmem:[%s3576_s1 + $0xd4] sm:$0xf0] }
  0x4e   :  { %v376_v40 = vsel %vm357_vm2, %v375_v61, %v374_v35  ;;  %1131 = vmatpush.bf16.msrb.mxu1 %v1761_v14  ;;  %v1745_v42 = vor.u32 %v2270_v55, %v1742_v60  ;;  %1144 = vmatpush.bf16.msrb.mxu2 %v1889_v36  ;;  %v1873_v50 = vor.u32 %v2302_v9, %v1870_v3  ;;  %v1828_v48 = vld [vmem:[%s3576_s1 + $0x1c8] sm:$0xf]  ;;  %v2293_v6 = vld [vmem:[%s3576_s1 + $0x1d4] sm:$0xf0] }
  0x4f   :  { %v378_v46 = vsel %vm360_vm3, %v377_v62, %v376_v40  ;;  %1157 = vmatpush.bf16.msrb.mxu3 %v2017_v11  ;;  %v2001_v51 = vor.u32 %v2334_v33, %v1998_v34  ;;  %v1601_v22 = vor.u32 %v2234_v15, %v1598_v37  ;;  %v1729_v27 = vor.u32 %v2266_v38, %v1726_v43  ;;  %v1956_v53 = vld [vmem:[%s3576_s1 + $0x2c8] sm:$0xf]  ;;  %v2325_v54 = vld [vmem:[%s3576_s1 + $0x2d4] sm:$0xf0] }
  0x50   :  { %v380_v57 = vsel %vm363_vm4, %v379_v5, %v378_v46  ;;  %v1717_v0 = vor.u32 %v2265_v56, %v1716_v19  ;;  %v1857_v18 = vor.u32 %v2298_v45, %v1854_v52  ;;  %v1985_v23 = vor.u32 %v2330_v20, %v1982_v58  ;;  %v2084_v30 = vld [vmem:[%s3576_s1 + $0x3c8] sm:$0xf]  ;;  %v2357_v31 = vld [vmem:[%s3576_s1 + $0x3d4] sm:$0xf0] }
  0x51   :  { %v382_v59 = vsel %vm366_vm5, %v381_v13, %v380_v57  ;;  %1119 = vmatpush.bf16.msrb.mxu0 %v1617_v12  ;;  %v1845_v2 = vor.u32 %v2297_v24, %v1844_v21  ;;  %v1973_v29 = vor.u32 %v2329_v63, %v1972_v25  ;;  %v2101_v49 = vor.u32 %v2361_v16, %v2100_v1  ;;  %v1684_v32 = vld [vmem:[%s3576_s1 + $0xa8] sm:$0xf]  ;;  %v2257_v55 = vld [vmem:[%s3576_s1 + $0xb4] sm:$0xf0] }
  0x52   :  { %v384_v26 = vsel %vm369_vm6, %v383_v41, %v382_v59  ;;  %1132 = vmatpush.bf16.msrb.mxu1 %v1745_v42  ;;  %1145 = vmatpush.bf16.msrb.mxu2 %v1873_v50  ;;  %v1701_v7 = vor.u32 %v2261_v47, %v1700_v44  ;;  %v1829_v60 = vor.u32 %v2293_v6, %v1828_v48  ;;  %v1812_v62 = vld [vmem:[%s3576_s1 + $0x1a8] sm:$0xf]  ;;  %v2289_v9 = vld [vmem:[%s3576_s1 + $0x1b4] sm:$0xf0] }
  0x53   :  { %v3090_v17 = vpack.c.b16 %v384_v26, %v384_v26  ;;  %1158 = vmatpush.bf16.msrb.mxu3 %v2001_v51  ;;  %v1957_v61 = vor.u32 %v2325_v54, %v1956_v53  ;;  %v2085_v8 = vor.u32 %v2357_v31, %v2084_v30  ;;  %v1940_v3 = vld [vmem:[%s3576_s1 + $0x2a8] sm:$0xf]  ;;  %v2321_v4 = vld [vmem:[%s3576_s1 + $0x2b4] sm:$0xf0]  ;;  %v1685_v5 = vor.u32 %v2257_v55, %v1684_v32 }
  0x54   :  { %v2068_v13 = vld [vmem:[%s3576_s1 + $0x3a8] sm:$0xf]  ;;  %v2353_v14 = vld [vmem:[%s3576_s1 + $0x3b4] sm:$0xf0]  ;;  %v1813_v35 = vor.u32 %v2289_v9, %v1812_v62  ;;  %v1941_v36 = vor.u32 %v2321_v4, %v1940_v3  ;;  %v2263_v3 = vld [vmem:[%s3576_s1 + $0xec] sm:$0xf] }
  0x55   :  { %1082 = vmatmul.bf16.vlgmr.msra.gmra.mxu1 %v3090_v17  ;;  %1120 = vmatpush.bf16.msrb.mxu0 %v1601_v22  ;;  %v1668_v33 = vld [vmem:[%s3576_s1 + $0x88] sm:$0xf]  ;;  %v2253_v34 = vld [vmem:[%s3576_s1 + $0x94] sm:$0xf0]  ;;  %v2069_v12 = vor.u32 %v2353_v14, %v2068_v13  ;;  %v1718_v4 = vld [vmem:[%s3576_s1 + $0xf8] sm:$0xf0] }
  0x56   :  { %1133 = vmatpush.bf16.msrb.mxu1 %v1729_v27  ;;  %1146 = vmatpush.bf16.msrb.mxu2 %v1857_v18  ;;  %v1796_v11 = vld [vmem:[%s3576_s1 + $0x188] sm:$0xf]  ;;  %v2285_v15 = vld [vmem:[%s3576_s1 + $0x194] sm:$0xf0]  ;;  %v1669_v40 = vor.u32 %v2253_v34, %v1668_v33 }
  0x57   :  { %1159 = vmatpush.bf16.msrb.mxu3 %v1985_v23  ;;  %v1924_v37 = vld [vmem:[%s3576_s1 + $0x288] sm:$0xf]  ;;  %v2317_v38 = vld [vmem:[%s3576_s1 + $0x294] sm:$0xf0]  ;;  %v1797_v46 = vor.u32 %v2285_v15, %v1796_v11  ;;  %v2327_v11 = vld [vmem:[%s3576_s1 + $0x2ec] sm:$0xf] }
  0x58   :  { %1121 = vmatmul.bf16.vlgmr.msrb.gmra.mxu0 %v2966_v10  ;;  %v2052_v41 = vld [vmem:[%s3576_s1 + $0x388] sm:$0xf]  ;;  %v2349_v42 = vld [vmem:[%s3576_s1 + $0x394] sm:$0xf0]  ;;  %v1925_v50 = vor.u32 %v2317_v38, %v1924_v37  ;;  %v1974_v15 = vld [vmem:[%s3576_s1 + $0x2f8] sm:$0xf0] }
  0x59   :  { %1165 = vmatpush.bf16.msra.mxu0 %v1717_v0  ;;  %1147 = vmatmul.bf16.vlgmr.msrb.gmra.mxu2 %v2948_v39  ;;  %v1652_v43 = vld [vmem:[%s3576_s1 + $0x68] sm:$0xf]  ;;  %v2249_v45 = vld [vmem:[%s3576_s1 + $0x74] sm:$0xf0]  ;;  %v2053_v52 = vor.u32 %v2349_v42, %v2052_v41  ;;  %v2359_v37 = vld [vmem:[%s3576_s1 + $0x3ec] sm:$0xf] }
  0x5a   :  { %1178 = vmatpush.bf16.msra.mxu1 %v1845_v2  ;;  %1191 = vmatpush.bf16.msra.mxu2 %v1973_v29  ;;  %v1780_v51 = vld [vmem:[%s3576_s1 + $0x168] sm:$0xf]  ;;  %v2281_v19 = vld [vmem:[%s3576_s1 + $0x174] sm:$0xf0]  ;;  %v1653_v20 = vor.u32 %v2249_v45, %v1652_v43  ;;  %v2102_v38 = vld [vmem:[%s3576_s1 + $0x3f8] sm:$0xf0] }
  0x5b   :  { %1204 = vmatpush.bf16.msra.mxu3 %v2101_v49  ;;  %v1908_v56 = vld [vmem:[%s3576_s1 + $0x268] sm:$0xf]  ;;  %v2313_v57 = vld [vmem:[%s3576_s1 + $0x274] sm:$0xf0]  ;;  %v1781_v24 = vor.u32 %v2281_v19, %v1780_v51  ;;  %v2259_v45 = vld [vmem:[%s3576_s1 + $0xcc] sm:$0xf]  ;;  %v2105_v51 = vor.u32 %v2359_v37, %v2102_v38 }
  0x5c   :  { %1160 = vmatmul.bf16.vlgmr.msrb.gmra.mxu3 %v3005_v28  ;;  %v2036_v58 = vld [vmem:[%s3576_s1 + $0x368] sm:$0xf]  ;;  %v2345_v21 = vld [vmem:[%s3576_s1 + $0x374] sm:$0xf0]  ;;  %v1909_v25 = vor.u32 %v2313_v57, %v1908_v56  ;;  %v1830_v19 = vld [vmem:[%s3576_s1 + $0x1d8] sm:$0xf0] }
  0x5d   :  { %1166 = vmatpush.bf16.msra.mxu0 %v1701_v7  ;;  %v1636_v59 = vld [vmem:[%s3576_s1 + $0x48] sm:$0xf]  ;;  %v2245_v22 = vld [vmem:[%s3576_s1 + $0x54] sm:$0xf0]  ;;  %v2037_v26 = vor.u32 %v2345_v21, %v2036_v58  ;;  %v2323_v56 = vld [vmem:[%s3576_s1 + $0x2cc] sm:$0xf] }
  0x5e   :  { %1179 = vmatpush.bf16.msra.mxu1 %v1829_v60  ;;  %1192 = vmatpush.bf16.msra.mxu2 %v1957_v61  ;;  %v1764_v63 = vld [vmem:[%s3576_s1 + $0x148] sm:$0xf]  ;;  %v2277_v27 = vld [vmem:[%s3576_s1 + $0x154] sm:$0xf0]  ;;  %v1637_v16 = vor.u32 %v2245_v22, %v1636_v59  ;;  %v1958_v57 = vld [vmem:[%s3576_s1 + $0x2d8] sm:$0xf0] }
  0x5f   :  { %1205 = vmatpush.bf16.msra.mxu3 %v2085_v8  ;;  %v1892_v0 = vld [vmem:[%s3576_s1 + $0x248] sm:$0xf]  ;;  %v2309_v1 = vld [vmem:[%s3576_s1 + $0x254] sm:$0xf0]  ;;  %v1765_v2 = vor.u32 %v2277_v27, %v1764_v63  ;;  %v2086_v58 = vld [vmem:[%s3576_s1 + $0x3d8] sm:$0xf0] }
  0x60   :  { %v2020_v18 = vld [vmem:[%s3576_s1 + $0x348] sm:$0xf]  ;;  %v2341_v23 = vld [vmem:[%s3576_s1 + $0x354] sm:$0xf0]  ;;  %v1893_v29 = vor.u32 %v2309_v1, %v1892_v0  ;;  %v2255_v22 = vld [vmem:[%s3576_s1 + $0xac] sm:$0xf] }
  0x61   :  { %1167 = vmatpush.bf16.msra.mxu0 %v1685_v5  ;;  %v1620_v44 = vld [vmem:[%s3576_s1 + $0x28] sm:$0xf]  ;;  %v2241_v47 = vld [vmem:[%s3576_s1 + $0x34] sm:$0xf0]  ;;  %v2021_v49 = vor.u32 %v2341_v23, %v2020_v18  ;;  %v1814_v27 = vld [vmem:[%s3576_s1 + $0x1b8] sm:$0xf0] }
  0x62   :  { %1180 = vmatpush.bf16.msra.mxu1 %v1813_v35  ;;  %1193 = vmatpush.bf16.msra.mxu2 %v1941_v36  ;;  %v1748_v48 = vld [vmem:[%s3576_s1 + $0x128] sm:$0xf]  ;;  %v2273_v6 = vld [vmem:[%s3576_s1 + $0x134] sm:$0xf0]  ;;  %v1621_v7 = vor.u32 %v2241_v47, %v1620_v44  ;;  %v2295_v35 = vld [vmem:[%s3576_s1 + $0x1ec] sm:$0xf] }
  0x63   :  { %1206 = vmatpush.bf16.msra.mxu3 %v2069_v12  ;;  %v1876_v53 = vld [vmem:[%s3576_s1 + $0x228] sm:$0xf]  ;;  %v2305_v54 = vld [vmem:[%s3576_s1 + $0x234] sm:$0xf0]  ;;  %v1749_v62 = vor.u32 %v2273_v6, %v1748_v48  ;;  %v1846_v36 = vld [vmem:[%s3576_s1 + $0x1f8] sm:$0xf0]  ;;  %v1721_v12 = vor.u32 %v2263_v3, %v1718_v4 }
  0x64   :  { %v2004_v30 = vld [vmem:[%s3576_s1 + $0x328] sm:$0xf]  ;;  %v2337_v31 = vld [vmem:[%s3576_s1 + $0x334] sm:$0xf0]  ;;  %v1877_v8 = vor.u32 %v2305_v54, %v1876_v53  ;;  %v1849_v43 = vor.u32 %v2295_v35, %v1846_v36  ;;  %v2319_v0 = vld [vmem:[%s3576_s1 + $0x2ac] sm:$0xf] }
  0x65   :  { %1168 = vmatpush.bf16.msra.mxu0 %v1669_v40  ;;  %1134 = vmatmul.bf16.vlgmr.msrb.gmra.mxu1 %v3090_v17  ;;  %v1604_v32 = vld [vmem:[%s3576_s1 + $0x8] sm:$0xf]  ;;  %v2237_v55 = vld [vmem:[%s3576_s1 + $0x14] sm:$0xf0]  ;;  %v2005_v5 = vor.u32 %v2337_v31, %v2004_v30  ;;  %v1942_v1 = vld [vmem:[%s3576_s1 + $0x2b8] sm:$0xf0] }
  0x66   :  { %1181 = vmatpush.bf16.msra.mxu1 %v1797_v46  ;;  %1194 = vmatpush.bf16.msra.mxu2 %v1925_v50  ;;  %v1732_v60 = vld [vmem:[%s3576_s1 + $0x108] sm:$0xf]  ;;  %v2269_v61 = vld [vmem:[%s3576_s1 + $0x114] sm:$0xf0]  ;;  %v1605_v34 = vor.u32 %v2237_v55, %v1604_v32  ;;  %v1702_v46 = vld [vmem:[%s3576_s1 + $0xd8] sm:$0xf0]  ;;  %v1977_v50 = vor.u32 %v2327_v11, %v1974_v15 }
  0x67   :  { %1207 = vmatpush.bf16.msra.mxu3 %v2053_v52  ;;  %v1860_v9 = vld [vmem:[%s3576_s1 + $0x208] sm:$0xf]  ;;  %v2301_v13 = vld [vmem:[%s3576_s1 + $0x214] sm:$0xf0]  ;;  %v1733_v40 = vor.u32 %v2269_v61, %v1732_v60  ;;  %v2291_v52 = vld [vmem:[%s3576_s1 + $0x1cc] sm:$0xf]  ;;  %v1705_v21 = vor.u32 %v2259_v45, %v1702_v46 }
  0x68   :  { %v1988_v14 = vld [vmem:[%s3576_s1 + $0x308] sm:$0xf]  ;;  %v2333_v33 = vld [vmem:[%s3576_s1 + $0x314] sm:$0xf0]  ;;  %v1861_v41 = vor.u32 %v2301_v13, %v1860_v9  ;;  %v1833_v59 = vor.u32 %v2291_v52, %v1830_v19  ;;  %v2070_v18 = vld [vmem:[%s3576_s1 + $0x3b8] sm:$0xf0] }
  0x69   :  { %1169 = vmatpush.bf16.msra.mxu0 %v1653_v20  ;;  %v1989_v42 = vor.u32 %v2333_v33, %v1988_v14  ;;  %v2355_v20 = vld [vmem:[%s3576_s1 + $0x3cc] sm:$0xf]  ;;  %v1798_v6 = vld [vmem:[%s3576_s1 + $0x198] sm:$0xf0] }
  0x6a   :  { %1182 = vmatpush.bf16.msra.mxu1 %v1781_v24  ;;  %1195 = vmatpush.bf16.msra.mxu2 %v1909_v25  ;;  %v1686_v24 = vld [vmem:[%s3576_s1 + $0xb8] sm:$0xf0]  ;;  %v1961_v25 = vor.u32 %v2323_v56, %v1958_v57  ;;  %v2089_v63 = vor.u32 %v2355_v20, %v2086_v58  ;;  %v2251_v47 = vld [vmem:[%s3576_s1 + $0x8c] sm:$0xf] }
  0x6b   :  { %1208 = vmatpush.bf16.msra.mxu3 %v2037_v26  ;;  %v2287_v26 = vld [vmem:[%s3576_s1 + $0x1ac] sm:$0xf]  ;;  %v1689_v23 = vor.u32 %v2255_v22, %v1686_v24  ;;  %v1926_v54 = vld [vmem:[%s3576_s1 + $0x298] sm:$0xf0] }
  0x6c   :  { %v1817_v44 = vor.u32 %v2287_v26, %v1814_v27  ;;  %v2315_v53 = vld [vmem:[%s3576_s1 + $0x28c] sm:$0xf]  ;;  %v2054_v30 = vld [vmem:[%s3576_s1 + $0x398] sm:$0xf0] }
  0x6d   :  { %1170 = vmatpush.bf16.msra.mxu0 %v1637_v16  ;;  %v2351_v16 = vld [vmem:[%s3576_s1 + $0x3ac] sm:$0xf]  ;;  %v1654_v60 = vld [vmem:[%s3576_s1 + $0x78] sm:$0xf0]  ;;  %v1929_v61 = vor.u32 %v2315_v53, %v1926_v54  ;;  %v2366_v53 = vld [vmem:[%s3578_s3 + $0x20] sm:$0xff] }
  0x6e   :  { %1183 = vmatpush.bf16.msra.mxu1 %v1765_v2  ;;  %1196 = vmatpush.bf16.msra.mxu2 %v1893_v29  ;;  %v1670_v2 = vld [vmem:[%s3576_s1 + $0x98] sm:$0xf0]  ;;  %v1945_v29 = vor.u32 %v2319_v0, %v1942_v1  ;;  %v2073_v48 = vor.u32 %v2351_v16, %v2070_v18  ;;  %v2247_v55 = vld [vmem:[%s3576_s1 + $0x6c] sm:$0xf]  ;;  %v2374_v54 = vld [vmem:[%s3578_s3 + $0x60] sm:$0xff] }
  0x6f   :  { %1209 = vmatpush.bf16.msra.mxu3 %v2021_v49  ;;  %v2283_v49 = vld [vmem:[%s3576_s1 + $0x18c] sm:$0xf]  ;;  %v1673_v31 = vor.u32 %v2251_v47, %v1670_v2  ;;  %v1782_v9 = vld [vmem:[%s3576_s1 + $0x178] sm:$0xf0]  ;;  %v1657_v14 = vor.u32 %v2247_v55, %v1654_v60  ;;  %v2372_v60 = vld [vmem:[%s3578_s3 + $0x50] sm:$0xff] }
  0x70   :  { %v1801_v32 = vor.u32 %v2283_v49, %v1798_v6  ;;  %v2311_v3 = vld [vmem:[%s3576_s1 + $0x26c] sm:$0xf]  ;;  %v1910_v4 = vld [vmem:[%s3576_s1 + $0x278] sm:$0xf0]  ;;  %v2368_v49 = vld [vmem:[%s3578_s3 + $0x30] sm:$0xff] }
  0x71   :  { %1171 = vmatpush.bf16.msra.mxu0 %v1621_v7  ;;  %v2347_v7 = vld [vmem:[%s3576_s1 + $0x38c] sm:$0xf]  ;;  %v2038_v13 = vld [vmem:[%s3576_s1 + $0x378] sm:$0xf0]  ;;  %v1913_v36 = vor.u32 %v2311_v3, %v1910_v4  ;;  %v2370_v3 = vld [vmem:[%s3578_s3 + $0x40] sm:$0xff] }
  0x72   :  { %1184 = vmatpush.bf16.msra.mxu1 %v1749_v62  ;;  %1197 = vmatpush.bf16.msra.mxu2 %v1877_v8  ;;  %v2057_v62 = vor.u32 %v2347_v7, %v2054_v30  ;;  %v2279_v8 = vld [vmem:[%s3576_s1 + $0x16c] sm:$0xf]  ;;  %v1638_v35 = vld [vmem:[%s3576_s1 + $0x58] sm:$0xf0] }
  0x73   :  { %1210 = vmatpush.bf16.msra.mxu3 %v2005_v5  ;;  %v2343_v5 = vld [vmem:[%s3576_s1 + $0x36c] sm:$0xf]  ;;  %v1785_v33 = vor.u32 %v2279_v8, %v1782_v9  ;;  %v1766_v15 = vld [vmem:[%s3576_s1 + $0x158] sm:$0xf0]  ;;  %v3513_v9 = vld [vmem:[%s3580_s2] sm:$0xf] }
  0x74   :  { %v2041_v11 = vor.u32 %v2343_v5, %v2038_v13  ;;  %v2307_v37 = vld [vmem:[%s3576_s1 + $0x24c] sm:$0xf]  ;;  %v1894_v38 = vld [vmem:[%s3576_s1 + $0x258] sm:$0xf0]  ;;  %v278_v5 = vperm.slane %v3513_v9, 0  ;;  %v2384_v13 = vld [vmem:[%s3578_s3 + $0xb0] sm:$0xff] }
  0x75   :  { %1172 = vmatpush.bf16.msra.mxu0 %v1605_v34  ;;  %v2243_v34 = vld [vmem:[%s3576_s1 + $0x4c] sm:$0xf]  ;;  %v1622_v46 = vld [vmem:[%s3576_s1 + $0x38] sm:$0xf0] }
  0x76   :  { %1185 = vmatpush.bf16.msra.mxu1 %v1733_v40  ;;  %1198 = vmatpush.bf16.msra.mxu2 %v1861_v41  ;;  %v2339_v40 = vld [vmem:[%s3576_s1 + $0x34c] sm:$0xf]  ;;  %v2022_v41 = vld [vmem:[%s3576_s1 + $0x358] sm:$0xf0] }
  0x77   :  { %1211 = vmatpush.bf16.msra.mxu3 %v1989_v42  ;;  %v1641_v42 = vor.u32 %v2243_v34, %v1638_v35  ;;  %v2239_v45 = vld [vmem:[%s3576_s1 + $0x2c] sm:$0xf]  ;;  %v1750_v19 = vld [vmem:[%s3576_s1 + $0x138] sm:$0xf0] }
  0x78   :  { %1173 = vmatmul.bf16.vlgmr.msra.gmra.mxu0 %v2966_v10  ;;  %v2271_v52 = vld [vmem:[%s3576_s1 + $0x12c] sm:$0xf]  ;;  %v1878_v57 = vld [vmem:[%s3576_s1 + $0x238] sm:$0xf0] }
  0x79   :  { %1217 = vmatpush.bf16.msrb.mxu0 %v1721_v12  ;;  %1199 = vmatmul.bf16.vlgmr.msra.gmra.mxu2 %v2948_v39  ;;  %v2275_v12 = vld [vmem:[%s3576_s1 + $0x14c] sm:$0xf]  ;;  %v2006_v58 = vld [vmem:[%s3576_s1 + $0x338] sm:$0xf0] }
  0x7a   :  { %1230 = vmatpush.bf16.msrb.mxu1 %v1849_v43  ;;  %1243 = vmatpush.bf16.msrb.mxu2 %v1977_v50  ;;  %v1769_v43 = vor.u32 %v2275_v12, %v1766_v15  ;;  %v1897_v50 = vor.u32 %v2307_v37, %v1894_v38  ;;  %v2303_v56 = vld [vmem:[%s3576_s1 + $0x22c] sm:$0xf]  ;;  %v1606_v24 = vld [vmem:[%s3576_s1 + $0x18] sm:$0xf0] }
  0x7b   :  { %1256 = vmatpush.bf16.msrb.mxu3 %v2105_v51  ;;  %1186 = vmatmul.bf16.vlgmr.msra.gmra.mxu1 %v3090_v17  ;;  %v2025_v51 = vor.u32 %v2339_v40, %v2022_v41  ;;  %v2335_v20 = vld [vmem:[%s3576_s1 + $0x32c] sm:$0xf]  ;;  %v1734_v27 = vld [vmem:[%s3576_s1 + $0x118] sm:$0xf0] }
  0x7c   :  { %1212 = vmatmul.bf16.vlgmr.msra.gmra.mxu3 %v3005_v28  ;;  %v2235_v22 = vld [vmem:[%s3576_s1 + $0xc] sm:$0xf]  ;;  %v1862_v1 = vld [vmem:[%s3576_s1 + $0x218] sm:$0xf0] }
  0x7d   :  { %1218 = vmatpush.bf16.msrb.mxu0 %v1705_v21  ;;  %v1625_v21 = vor.u32 %v2239_v45, %v1622_v46  ;;  %v2267_v26 = vld [vmem:[%s3576_s1 + $0x10c] sm:$0xf]  ;;  %v1990_v18 = vld [vmem:[%s3576_s1 + $0x318] sm:$0xf0]  ;;  %v279_v45 = vperm.slane %v3513_v9, 1  ;;  %v2380_v46 = vld [vmem:[%s3578_s3 + $0x90] sm:$0xff] }
  0x7e   :  { %1231 = vmatpush.bf16.msrb.mxu1 %v1833_v59  ;;  %1244 = vmatpush.bf16.msrb.mxu2 %v1961_v25  ;;  %v1753_v59 = vor.u32 %v2271_v52, %v1750_v19  ;;  %v1881_v25 = vor.u32 %v2303_v56, %v1878_v57  ;;  %v2299_v0 = vld [vmem:[%s3576_s1 + $0x20c] sm:$0xf]  ;;  %v2369_v47 = vld [vmem:[%s3578_s3 + $0x38] sm:$0xff] }
  0x7f   :  { %1257 = vmatpush.bf16.msrb.mxu3 %v2089_v63  ;;  %v2009_v63 = vor.u32 %v2335_v20, %v2006_v58  ;;  %v2331_v16 = vld [vmem:[%s3576_s1 + $0x30c] sm:$0xf]  ;;  %v1865_v2 = vor.u32 %v2299_v0, %v1862_v1  ;;  %v2385_v4 = vld [vmem:[%s3578_s3 + $0xb8] sm:$0xff] }
  0x80   :  { %v2367_v6 = vld [vmem:[%s3578_s3 + $0x28] sm:$0xff]  ;;  %v2381_v40 = vld [vmem:[%s3578_s3 + $0x98] sm:$0xff] }
  0x81   :  { %1219 = vmatpush.bf16.msrb.mxu0 %v1689_v23  ;;  %v1609_v23 = vor.u32 %v2235_v22, %v1606_v24  ;;  %v2363_v30 = vld [vmem:[%s3578_s3 + $0x8] sm:$0xff]  ;;  %v2393_v57 = vld [vmem:[%s3578_s3 + $0xf8] sm:$0xff] }
  0x82   :  { %1232 = vmatpush.bf16.msrb.mxu1 %v1817_v44  ;;  %1245 = vmatpush.bf16.msrb.mxu2 %v1945_v29  ;;  %v1737_v44 = vor.u32 %v2267_v26, %v1734_v27  ;;  %v1993_v29 = vor.u32 %v2331_v16, %v1990_v18  ;;  %v2383_v34 = vld [vmem:[%s3578_s3 + $0xa8] sm:$0xff]  ;;  %v2390_v16 = vld [vmem:[%s3578_s3 + $0xe0] sm:$0xff]  ;;  %v280_v18 = vperm.slane %v3513_v9, 2 }
  0x83   :  { %1258 = vmatpush.bf16.msrb.mxu3 %v2073_v48  ;;  %v2377_v48 = vld [vmem:[%s3578_s3 + $0x78] sm:$0xff]  ;;  %v2379_v56 = vld [vmem:[%s3578_s3 + $0x88] sm:$0xff] }
  0x84   :  { %v2391_v26 = vld [vmem:[%s3578_s3 + $0xe8] sm:$0xff] }
  0x85   :  { %1220 = vmatpush.bf16.msrb.mxu0 %v1673_v31  ;;  %v2373_v31 = vld [vmem:[%s3578_s3 + $0x58] sm:$0xff] }
  0x86   :  { %1233 = vmatpush.bf16.msrb.mxu1 %v1801_v32  ;;  %1246 = vmatpush.bf16.msrb.mxu2 %v1929_v61  ;;  %v2362_v32 = vld [vmem:[%s3578_s3] sm:$0xff] }
  0x87   :  { %1259 = vmatpush.bf16.msrb.mxu3 %v2057_v62  ;;  %v2371_v62 = vld [vmem:[%s3578_s3 + $0x48] sm:$0xff] }
  0x89   :  { %1221 = vmatpush.bf16.msrb.mxu0 %v1657_v14 }
  0x8a   :  { %1234 = vmatpush.bf16.msrb.mxu1 %v1785_v33  ;;  %1247 = vmatpush.bf16.msrb.mxu2 %v1913_v36 }
  0x8b   :  { %1260 = vmatpush.bf16.msrb.mxu3 %v2041_v11  ;;  %v2382_v11 = vld [vmem:[%s3578_s3 + $0xa0] sm:$0xff] }
  0x8d   :  { %1222 = vmatpush.bf16.msrb.mxu0 %v1641_v42 }
  0x8e   :  { %1235 = vmatpush.bf16.msrb.mxu1 %v1769_v43  ;;  %1248 = vmatpush.bf16.msrb.mxu2 %v1897_v50 }
  0x8f   :  { %1261 = vmatpush.bf16.msrb.mxu3 %v2025_v51 }
  0x91   :  { %1223 = vmatpush.bf16.msrb.mxu0 %v1625_v21  ;;  %v2378_v21 = vld [vmem:[%s3578_s3 + $0x80] sm:$0xff] }
  0x92   :  { %1236 = vmatpush.bf16.msrb.mxu1 %v1753_v59  ;;  %1249 = vmatpush.bf16.msrb.mxu2 %v1881_v25  ;;  %v2392_v59 = vld [vmem:[%s3578_s3 + $0xf0] sm:$0xff] }
  0x93   :  { %1262 = vmatpush.bf16.msrb.mxu3 %v2009_v63 }
  0x95   :  { %1224 = vmatpush.bf16.msrb.mxu0 %v1609_v23  ;;  %v2389_v23 = vld [vmem:[%s3578_s3 + $0xd8] sm:$0xff] }
  0x96   :  { %1237 = vmatpush.bf16.msrb.mxu1 %v1737_v44  ;;  %1250 = vmatpush.bf16.msrb.mxu2 %v1865_v2  ;;  %v2388_v2 = vld [vmem:[%s3578_s3 + $0xd0] sm:$0xff] }
  0x97   :  { %1263 = vmatpush.bf16.msrb.mxu3 %v1993_v29 }
  0x98   :  { %1225 = vmatmul.bf16.vlgmr.msrb.gmra.mxu0 %v2966_v10  ;;  %v2376_v10 = vld [vmem:[%s3578_s3 + $0x70] sm:$0xff] }
  0x99   :  { %1537 = vmatpush.bf16.msra.mxu0 %v2369_v47  ;;  %1238 = vmatmul.bf16.vlgmr.msrb.gmra.mxu1 %v3090_v17  ;;  %v2364_v17 = vld [vmem:[%s3578_s3 + $0x10] sm:$0xff] }
  0x9a   :  { %1550 = vmatpush.bf16.msra.mxu1 %v2377_v48  ;;  %1251 = vmatmul.bf16.vlgmr.msrb.gmra.mxu2 %v2948_v39  ;;  %v2365_v39 = vld [vmem:[%s3578_s3 + $0x18] sm:$0xff] }
  0x9b   :  { %1264 = vmatmul.bf16.vlgmr.msrb.gmra.mxu3 %v3005_v28  ;;  %v2375_v28 = vld [vmem:[%s3578_s3 + $0x68] sm:$0xff]  ;;  %1563 = vmatpush.bf16.msra.mxu2 %v2385_v4 }
  0x9c   :  { %1576 = vmatpush.bf16.msra.mxu3 %v2393_v57 }
  0x9d   :  { %1538 = vmatpush.bf16.msra.mxu0 %v2368_v49 }
  0x9e   :  { %1551 = vmatpush.bf16.msra.mxu1 %v2376_v10 }
  0x9f   :  { %1564 = vmatpush.bf16.msra.mxu2 %v2384_v13 }
  0xa0   :  { %1577 = vmatpush.bf16.msra.mxu3 %v2392_v59 }
  0xa1   :  { %1539 = vmatpush.bf16.msra.mxu0 %v2367_v6 }
  0xa2   :  { %1552 = vmatpush.bf16.msra.mxu1 %v2375_v28  ;;  %v2387_v28 = vld [vmem:[%s3578_s3 + $0xc8] sm:$0xff] }
  0xa3   :  { %1565 = vmatpush.bf16.msra.mxu2 %v2383_v34 }
  0xa4   :  { %1578 = vmatpush.bf16.msra.mxu3 %v2391_v26 }
  0xa5   :  { %1540 = vmatpush.bf16.msra.mxu0 %v2366_v53 }
  0xa6   :  { %1553 = vmatpush.bf16.msra.mxu1 %v2374_v54 }
  0xa7   :  { %1566 = vmatpush.bf16.msra.mxu2 %v2382_v11 }
  0xa8   :  { %1579 = vmatpush.bf16.msra.mxu3 %v2390_v16 }
  0xa9   :  { %1541 = vmatpush.bf16.msra.mxu0 %v2365_v39 }
  0xaa   :  { %1554 = vmatpush.bf16.msra.mxu1 %v2373_v31 }
  0xab   :  { %1567 = vmatpush.bf16.msra.mxu2 %v2381_v40 }
  0xac   :  { %1580 = vmatpush.bf16.msra.mxu3 %v2389_v23 }
  0xad   :  { %1542 = vmatpush.bf16.msra.mxu0 %v2364_v17 }
  0xae   :  { %1555 = vmatpush.bf16.msra.mxu1 %v2372_v60 }
  0xaf   :  { %1568 = vmatpush.bf16.msra.mxu2 %v2380_v46 }
  0xb0   :  { %1581 = vmatpush.bf16.msra.mxu3 %v2388_v2 }
  0xb1   :  { %1543 = vmatpush.bf16.msra.mxu0 %v2363_v30 }
  0xb2   :  { %1556 = vmatpush.bf16.msra.mxu1 %v2371_v62 }
  0xb3   :  { %1569 = vmatpush.bf16.msra.mxu2 %v2379_v56 }
  0xb4   :  { %1582 = vmatpush.bf16.msra.mxu3 %v2387_v28 }
  0xb5   :  { %1544 = vmatpush.bf16.msra.mxu0 %v2362_v32 }
  0xb6   :  { %1557 = vmatpush.bf16.msra.mxu1 %v2370_v3 }
  0xb7   :  { %1570 = vmatpush.bf16.msra.mxu2 %v2378_v21 }
  0xbd   :  { %v1096_v7 = vpop.f32.mrf.mxu2 }
  0xbf   :  { %v1070_v55 = vpop.f32.mrf.mxu0 }
  0xc0   :  { %v1071_v33 = vadd.f32 %v1070_v55, %v278_v5  ;;  %v281_v55 = vperm.slane %v3513_v9, 3 }
  0xc5   :  { %v1098_v61 = vpop.f32.mrf.mxu2 }
  0xc7   :  { %v1072_v8 = vpop.f32.mrf.mxu0 }
  0xce   :  { %v1109_v14 = vpop.f32.mrf.mxu3 }
  0xd2   :  { %v1083_v35 = vpop.f32.mrf.mxu1 }
  0xd3   :  { %v1084_v36 = vadd.f32 %v1083_v35, %v1071_v33 }
  0xd5   :  { %v1097_v12 = vadd.f32 %v1096_v7, %v1084_v36  ;;  %v1122_v37 = vpop.f32.mrf.mxu0  ;;  %v2386_v7 = vld [vmem:[%s3578_s3 + $0xc0] sm:$0xff] }
  0xd6   :  { %v1111_v15 = vpop.f32.mrf.mxu3  ;;  %v1123_v19 = vadd.f32 %v1122_v37, %v279_v45  ;;  %1583 = vmatpush.bf16.msra.mxu3 %v2386_v7 }
  0xd7   :  { %v1110_v38 = vadd.f32 %v1109_v14, %v1097_v12 }
  0xd9   :  { %v1269_v41 = vmax.f32 %v1110_v38, 0.0 }
  0xda   :  { %v1085_v42 = vpop.f32.mrf.mxu1 }
  0xdb   :  { %v1273_v43 = vpack.c.bf16 %v1269_v41, %v1269_v41  ;;  %v2413_v41 = vld [vmem:[%s3579_s4] ss:$0 sm:$0xff] }
  0xdc   :  { %v1148_v50 = vpop.f32.mrf.mxu2 }
  0xdd   :  { %1545 = vmatmul.bf16.vlgmr.msra.gmra.mxu0 %v1273_v43  ;;  %v1124_v52 = vpop.f32.mrf.mxu0 }
  0xdf   :  { %v1161_v51 = vpop.f32.mrf.mxu3 }
  0xe2   :  { %v1135_v20 = vpop.f32.mrf.mxu1 }
  0xe3   :  { %v1136_v58 = vadd.f32 %v1135_v20, %v1123_v19 }
  0xe4   :  { %v1150_v24 = vpop.f32.mrf.mxu2 }
  0xe5   :  { %v1149_v22 = vadd.f32 %v1148_v50, %v1136_v58 }
  0xe7   :  { %v1163_v25 = vpop.f32.mrf.mxu3  ;;  %v1162_v63 = vadd.f32 %v1161_v51, %v1149_v22 }
  0xe9   :  { %v1270_v27 = vmax.f32 %v1162_v63, 0.0 }
  0xea   :  { %v1137_v0 = vpop.f32.mrf.mxu1 }
  0xeb   :  { %v1274_v1 = vpack.c.bf16 %v1270_v27, %v1270_v27 }
  0xed   :  { %1558 = vmatmul.bf16.vlgmr.msra.gmra.mxu1 %v1274_v1 }
  0xf5   :  { %v1174_v44 = vpop.f32.mrf.mxu0 }
  0xf6   :  { %v1175_v47 = vadd.f32 %v1174_v44, %v280_v18 }
  0xf8   :  { %v1187_v29 = vpop.f32.mrf.mxu1 }
  0xf9   :  { %v1188_v48 = vadd.f32 %v1187_v29, %v1175_v47 }
  0xfc   :  { %v1200_v49 = vpop.f32.mrf.mxu2 }
  0xfd   :  { %v1201_v6 = vadd.f32 %v1200_v49, %v1188_v48  ;;  %v1176_v10 = vpop.f32.mrf.mxu0 }
  0xff   :  { %v1213_v53 = vpop.f32.mrf.mxu3 }
 0x100   :  { %v1214_v39 = vadd.f32 %v1213_v53, %v1201_v6  ;;  %v1189_v54 = vpop.f32.mrf.mxu1 }
 0x102   :  { %v1271_v17 = vmax.f32 %v1214_v39, 0.0 }
 0x104   :  { %v1275_v30 = vpack.c.bf16 %v1271_v17, %v1271_v17  ;;  %v1202_v31 = vpop.f32.mrf.mxu2 }
 0x106   :  { %1571 = vmatmul.bf16.vlgmr.msra.gmra.mxu2 %v1275_v30 }
 0x107   :  { %v1215_v32 = vpop.f32.mrf.mxu3 }
 0x115   :  { %v1226_v60 = vpop.f32.mrf.mxu0 }
 0x116   :  { %v1227_v61 = vadd.f32 %v1226_v60, %v281_v55  ;;  %v1239_v62 = vpop.f32.mrf.mxu1 }
 0x118   :  { %v1240_v8 = vadd.f32 %v1239_v62, %v1227_v61 }
 0x11d   :  { %v1252_v3 = vpop.f32.mrf.mxu2  ;;  %v1228_v13 = vpop.f32.mrf.mxu0 }
 0x11e   :  { %v1265_v4 = vpop.f32.mrf.mxu3  ;;  %v1253_v5 = vadd.f32 %v1252_v3, %v1240_v8  ;;  %v1241_v14 = vpop.f32.mrf.mxu1 }
 0x120   :  { %v1266_v33 = vadd.f32 %v1265_v4, %v1253_v5 }
 0x122   :  { %v1272_v34 = vmax.f32 %v1266_v33, 0.0 }
 0x124   :  { %v1276_v35 = vpack.c.bf16 %v1272_v34, %v1272_v34 }
 0x125   :  { %v1254_v36 = vpop.f32.mrf.mxu2 }
 0x126   :  { %v1267_v11 = vpop.f32.mrf.mxu3  ;;  %1584 = vmatmul.bf16.vlgmr.msra.gmra.mxu3 %v1276_v35 }
 0x15a   :  { %v1546_v12 = vpop.f32.mrf.mxu0 }
 0x15b   :  { %v1547_v42 = vadd.f32 %v2413_v41, %v1546_v12 }
 0x162   :  { %v1548_v15 = vpop.f32.mrf.mxu0 }
 0x16a   :  { %v1559_v37 = vpop.f32.mrf.mxu1 }
 0x16b   :  { %v1560_v43 = vadd.f32 %v1559_v37, %v1547_v42 }
 0x172   :  { %v1561_v38 = vpop.f32.mrf.mxu1 }
 0x189   :  { %v1572_v9 = vpop.f32.mrf.mxu2 }
 0x18a   :  { %v1573_v45 = vadd.f32 %v1572_v9, %v1560_v43 }
 0x191   :  { %v1574_v40 = vpop.f32.mrf.mxu2 }
 0x1a9   :  { %v1585_v46 = vpop.f32.mrf.mxu3 }
 0x1aa   :  { %v1586_v50 = vadd.f32 %v1585_v46, %v1573_v45 }
 0x1ac   :  { %1589 = vst [vmem:[%s3581_s5] sm:$0xff] %v1586_v50 }
 0x1b1   :  { %v1587_v51 = vpop.f32.mrf.mxu3 }

</bundles_post_ra>
